<compile_context>
chip_gen: v7x
topology: tpu7x:2x2x1
jax: 0.10.0
libtpu: 0.0.40
codegen_flags: <defaults>
</compile_context>

<pallas_src>
import functools
import math

import numpy as np

import jax
import jax.numpy as jnp
from jax.experimental import pallas as pl
from jax.experimental.pallas import tpu as pltpu


def _silu(t):
    # exact sigmoid: exp on the EUP, divide kept exact (two GroupNorms
    # downstream re-normalize, so we keep activation precision in f32)
    return t * (1.0 / (1.0 + jnp.exp(-t)))


def _resnet_block_kernel(x_ref, temb_ref, mask_ref,
                         m0_ref, m0t_ref, g0_ref, be0_ref, w0_ref, b0_ref,
                         wd_ref, bd_ref,
                         m1_ref, m1t_ref, g1_ref, be1_ref, w1_ref, b1_ref,
                         wsc_ref, bsc_ref,
                         out_ref, *,
                         eps, inv_n0, inv_n1, tap_shifts,
                         has_temb, has_shortcut, skip_rescale):
    f32 = jnp.float32
    x = x_ref[0]                                     # (HW, Cin) f32

    def group_norm_silu(h, m_ref, mt_ref, gamma_ref, beta_ref, inv_n):
        # two-pass (centered) statistics via one-hot group-membership matmuls
        s = jnp.sum(h, axis=0, keepdims=True)                        # (1, C)
        mean_c = jnp.dot(
            jnp.dot(s, m_ref[...], preferred_element_type=f32) * inv_n,
            mt_ref[...], preferred_element_type=f32)                 # (1, C)
        d = h - mean_c
        ss = jnp.sum(d * d, axis=0, keepdims=True)                   # (1, C)
        var_c = jnp.dot(
            jnp.dot(ss, m_ref[...], preferred_element_type=f32) * inv_n,
            mt_ref[...], preferred_element_type=f32)                 # (1, C)
        # folded affine: one FMA pass over the (HW, C) slab
        scale = gamma_ref[...] * jax.lax.rsqrt(var_c + eps)
        hn = d * scale + beta_ref[...]
        return _silu(hn)

    def conv3x3(h, w_ref, b_ref):
        # zero-padded 3x3 conv = sum over 9 spatially shifted 1x1 matmuls
        hw = h.shape[0]
        cout = b_ref.shape[-1]
        acc = jnp.zeros((hw, cout), f32)
        for t, s in enumerate(tap_shifts):
            if s == 0:
                shifted = h
            else:
                # shifted[p] = h[p + s] (circular); wrapped positions are
                # zeroed by the per-tap validity mask below
                shifted = pltpu.roll(h, shift=(-s) % hw, axis=0)
            tap = (shifted * mask_ref[t]).astype(jnp.bfloat16)        # (HW, Cin)
            acc = acc + jnp.dot(tap, w_ref[t],                        # bf16 MXU
                                preferred_element_type=f32)
        return acc + b_ref[...]

    # ---- GroupNorm_0 + act, Conv_0 ----
    h = group_norm_silu(x, m0_ref, m0t_ref, g0_ref, be0_ref, inv_n0)
    h = conv3x3(h, w0_ref, b0_ref)                                    # (HW, Cout)

    # ---- time-embedding projection ----
    if has_temb:
        te = _silu(temb_ref[0])                                       # (1, T)
        h = h + jnp.dot(te, wd_ref[...], preferred_element_type=f32) + bd_ref[...]

    # ---- GroupNorm_1 + act, Dropout (identity in eval), Conv_1 ----
    h = group_norm_silu(h, m1_ref, m1t_ref, g1_ref, be1_ref, inv_n1)
    # TODO(synk): training-mode Dropout_0 (p=0.1) would use pltpu.prng_seed /
    # pltpu.stateful_bernoulli; eval mode is the identity.
    h = conv3x3(h, w1_ref, b1_ref)

    # ---- shortcut ----
    if has_shortcut:
        xs = jnp.dot(x.astype(jnp.bfloat16), wsc_ref[...],
                     preferred_element_type=f32) + bsc_ref[...]
    else:
        xs = x

    out = xs + h
    if skip_rescale:
        out = out * 0.7071067811865476      # 1/sqrt(2)
    out_ref[0] = out


def resnet_block_biggan(x_nchw, params, temb=None, *, skip_rescale=True):
    """Forward of ResnetBlockBigGAN (up=False, down=False, act=SiLU, eval mode).

    x_nchw: (B, C_in, H, W) float32.  temb: (B, temb_dim) float32 or None.
    """
    # TODO(synk): FIR / naive up- and down-sampling branches (up/down=True) are
    # not implemented; this covers the default up=False, down=False path.
    B, Cin, H, W = x_nchw.shape
    Cout = params["w0"].shape[-1]
    HW = H * W
    G0 = min(Cin // 4, 32)
    G1 = min(Cout // 4, 32)
    assert G0 >= 1 and G1 >= 1, "need at least 4 channels per GroupNorm"
    assert Cin % G0 == 0 and Cout % G1 == 0, \
        "GroupNorm requires channels divisible by num_groups"
    has_temb = temb is not None
    has_shortcut = (Cin != Cout)

    # channels-last slab for the kernel (lane-dense for real C in [128, 512];
    # the tiny C of the smoke test is lane-sparse but functionally identical)
    x2 = jnp.transpose(x_nchw, (0, 2, 3, 1)).reshape(B, HW, Cin).astype(jnp.float32)

    # one-hot group-membership matrices (channel c -> group c // Cg)
    def membership(C, G):
        Cg = C // G
        M = (np.arange(C)[:, None] // Cg == np.arange(G)[None, :]).astype(np.float32)
        return jnp.asarray(M), jnp.asarray(M.T)
    M0, M0T = membership(Cin, G0)
    M1, M1T = membership(Cout, G1)

    # static per-tap validity masks (zero padding) on the flattened spatial grid
    rows = np.arange(HW) // W
    cols = np.arange(HW) % W
    mask_list, shifts = [], []
    for oy in (-1, 0, 1):
        for ox in (-1, 0, 1):
            valid = ((rows + oy >= 0) & (rows + oy < H) &
                     (cols + ox >= 0) & (cols + ox < W))
            mask_list.append(valid.astype(np.float32))
            shifts.append(oy * W + ox)
    taps_mask = jnp.asarray(np.stack(mask_list)[:, :, None])          # (9, HW, 1)

    # parameters (conv / nin weights in bf16 for the MXU; stats params in f32)
    w0 = params["w0"].reshape(9, Cin, Cout).astype(jnp.bfloat16)
    w1 = params["w1"].reshape(9, Cout, Cout).astype(jnp.bfloat16)
    b0 = params["b0"].astype(jnp.float32)
    b1 = params["b1"].astype(jnp.float32)
    gamma0 = params["gamma0"].astype(jnp.float32)
    beta0 = params["beta0"].astype(jnp.float32)
    gamma1 = params["gamma1"].astype(jnp.float32)
    beta1 = params["beta1"].astype(jnp.float32)

    if has_temb:
        temb3 = temb.astype(jnp.float32).reshape(B, 1, -1)            # (B, 1, T)
        wd = params["wd"].astype(jnp.float32)
        bd = params["bd"].astype(jnp.float32)
    else:
        temb3 = jnp.zeros((B, 1, 1), jnp.float32)
        wd = jnp.zeros((1, 1), jnp.float32)
        bd = jnp.zeros((1, 1), jnp.float32)
    if has_shortcut:
        wsc = params["wsc"].astype(jnp.bfloat16)
        bsc = params["bsc"].astype(jnp.float32)
    else:
        wsc = jnp.zeros((1, 1), jnp.bfloat16)
        bsc = jnp.zeros((1, 1), jnp.float32)

    kernel = functools.partial(
        _resnet_block_kernel,
        eps=1e-6,
        inv_n0=1.0 / float(HW * (Cin // G0)),
        inv_n1=1.0 / float(HW * (Cout // G1)),
        tap_shifts=tuple(shifts),
        has_temb=has_temb,
        has_shortcut=has_shortcut,
        skip_rescale=skip_rescale,
    )

    full2 = lambda r, c: pl.BlockSpec((r, c), lambda b: (0, 0))
    # NOTE(perf): for large C these constant-index parameter specs should be
    # single-buffered (pipeline_mode=pl.Buffered(1)) to reclaim the dead second
    # buffer; at these shapes the saving is negligible so default buffering is kept.
    in_specs = [
        pl.BlockSpec((1, HW, Cin), lambda b: (b, 0, 0)),               # x
        pl.BlockSpec((1, 1, temb3.shape[-1]), lambda b: (b, 0, 0)),    # temb
        pl.BlockSpec((9, HW, 1), lambda b: (0, 0, 0)),                 # tap masks
        full2(Cin, G0), full2(G0, Cin), full2(1, Cin), full2(1, Cin),  # GN_0
        pl.BlockSpec((9, Cin, Cout), lambda b: (0, 0, 0)),             # Conv_0 W
        full2(1, Cout),                                                # Conv_0 b
        full2(*wd.shape), full2(*bd.shape),                            # Dense_0
        full2(Cout, G1), full2(G1, Cout), full2(1, Cout), full2(1, Cout),  # GN_1
        pl.BlockSpec((9, Cout, Cout), lambda b: (0, 0, 0)),            # Conv_1 W
        full2(1, Cout),                                                # Conv_1 b
        full2(*wsc.shape), full2(*bsc.shape),                          # Conv_2
    ]

    # explicit scoped-VMEM limit, computed from the actual block/param sizes
    nbytes = lambda a: int(np.prod(a.shape)) * a.dtype.itemsize
    param_bytes = sum(nbytes(a) for a in
                      (taps_mask, M0, M0T, gamma0, beta0, w0, b0, wd, bd,
                       M1, M1T, gamma1, beta1, w1, b1, wsc, bsc))
    slab_bytes = HW * (Cin + Cout) * 4
    est = 4 * slab_bytes + 2 * param_bytes + 12 * HW * max(Cin, Cout) * 4
    vmem_limit = int(min(64 << 20, max(16 << 20, 4 * est)))

    out = pl.pallas_call(
        kernel,
        out_shape=jax.ShapeDtypeStruct((B, HW, Cout), jnp.float32),
        grid_spec=pltpu.PrefetchScalarGridSpec(
            num_scalar_prefetch=0,
            grid=(B,),
            in_specs=in_specs,
            out_specs=pl.BlockSpec((1, HW, Cout), lambda b: (b, 0, 0)),
        ),
        compiler_params=pltpu.CompilerParams(
            dimension_semantics=("parallel",),   # independent images -> 2 TCs on v7x
            vmem_limit_bytes=vmem_limit,
        ),
    )(x2, temb3, taps_mask, M0, M0T, gamma0, beta0, w0, b0, wd, bd,
      M1, M1T, gamma1, beta1, w1, b1, wsc, bsc)

    return jnp.transpose(out.reshape(B, H, W, Cout), (0, 3, 1, 2))


def init_params(key, in_ch, out_ch, temb_dim):
    """Synthetic parameters with the module's shapes (DDPM variance-scaling).

    The real module zero-inits biases/beta, one-inits gamma and uses
    init_scale=0.0 for Conv_1 (near-zero weights); here every parameter is
    mildly randomized so the correctness check exercises every term of the
    forward pass.  The kernel math is parameter-agnostic.
    """
    def ddpm_uniform(k, shape, fan_in, fan_out, scale=1.0):
        scale = 1e-10 if scale == 0.0 else scale
        limit = math.sqrt(3.0 * scale / ((fan_in + fan_out) / 2.0))
        return jax.random.uniform(k, shape, jnp.float32, -limit, limit)

    ks = jax.random.split(key, 12)
    p = {
        "gamma0": 1.0 + 0.1 * jax.random.normal(ks[0], (1, in_ch), jnp.float32),
        "beta0": 0.1 * jax.random.normal(ks[1], (1, in_ch), jnp.float32),
        "w0": ddpm_uniform(ks[2], (3, 3, in_ch, out_ch), 9 * in_ch, 9 * out_ch),
        "b0": 0.05 * jax.random.normal(ks[3], (1, out_ch), jnp.float32),
        "gamma1": 1.0 + 0.1 * jax.random.normal(ks[4], (1, out_ch), jnp.float32),
        "beta1": 0.1 * jax.random.normal(ks[5], (1, out_ch), jnp.float32),
        "w1": ddpm_uniform(ks[6], (3, 3, out_ch, out_ch), 9 * out_ch, 9 * out_ch),
        "b1": 0.05 * jax.random.normal(ks[7], (1, out_ch), jnp.float32),
    }
    if temb_dim is not None:
        p["wd"] = ddpm_uniform(ks[8], (temb_dim, out_ch), temb_dim, out_ch)
        p["bd"] = 0.05 * jax.random.normal(ks[9], (1, out_ch), jnp.float32)
    if in_ch != out_ch:
        p["wsc"] = ddpm_uniform(ks[10], (in_ch, out_ch), in_ch, out_ch)
        p["bsc"] = 0.05 * jax.random.normal(ks[11], (1, out_ch), jnp.float32)
    return p


def _reference(x, temb, params, *, skip_rescale=True):
    """Pure-JAX (f32) reference mirroring the PyTorch forward."""
    B, Cin, H, W = x.shape
    Cout = params["w0"].shape[-1]
    silu = lambda t: t * jax.nn.sigmoid(t)

    def gn(h, gamma, beta, eps=1e-6):
        Bh, C = h.shape[0], h.shape[1]
        G = min(C // 4, 32)
        hg = h.reshape(Bh, G, C // G, -1)
        mean = jnp.mean(hg, axis=(2, 3), keepdims=True)
        var = jnp.mean((hg - mean) ** 2, axis=(2, 3), keepdims=True)
        hn = ((hg - mean) * jax.lax.rsqrt(var + eps)).reshape(h.shape)
        return hn * gamma.reshape(1, C, 1, 1) + beta.reshape(1, C, 1, 1)

    def conv3x3(h, w, b):
        y = jax.lax.conv_general_dilated(
            h, w, (1, 1), ((1, 1), (1, 1)),
            dimension_numbers=("NCHW", "HWIO", "NCHW"))
        return y + b.reshape(1, -1, 1, 1)

    h = silu(gn(x, params["gamma0"], params["beta0"]))
    h = conv3x3(h, params["w0"], params["b0"])
    if temb is not None:
        h = h + (silu(temb) @ params["wd"] + params["bd"])[:, :, None, None]
    h = silu(gn(h, params["gamma1"], params["beta1"]))
    h = conv3x3(h, params["w1"], params["b1"])
    if Cin != Cout:
        x = (jnp.einsum("bchw,cd->bdhw", x, params["wsc"])
             + params["bsc"].reshape(1, -1, 1, 1))
    out = x + h
    return out / math.sqrt(2.0) if skip_rescale else out


if __name__ == "__main__":
    key = jax.random.PRNGKey(0)
    kx, kt, kp = jax.random.split(key, 3)

    B, Cin, Cout, H, W, T = 2, 4, 8, 16, 16, 32
    x = jax.random.normal(kx, (B, Cin, H, W), dtype=jnp.float32)
    temb = jax.random.normal(kt, (B, T), dtype=jnp.float32)
    params = init_params(kp, Cin, Cout, T)

    out = resnet_block_biggan(x, params, temb, skip_rescale=True)
    out = jax.block_until_ready(out)

    ref = _reference(x, temb, params, skip_rescale=True)
    assert out.shape == (B, Cout, H, W)
    # bf16 MXU operands with f32 accumulation -> small drift vs. the f32 reference
    max_err = float(jnp.max(jnp.abs(out - ref)))
    assert jnp.allclose(out, ref, atol=5e-2, rtol=5e-2), \
        f"mismatch vs reference (max abs err {max_err})"

    print("KERNEL_OK")
</pallas_src>

<mosaic_0001>
module attributes {stable_mosaic.version = 11 : i64} {
  func.func @_resnet_block_kernel(%arg0: i32, %arg1: memref<1x256x4xf32, #tpu.memory_space<vmem>>, %arg2: memref<1x1x32xf32, #tpu.memory_space<vmem>>, %arg3: memref<9x256x1xf32, #tpu.memory_space<vmem>>, %arg4: memref<4x1xf32, #tpu.memory_space<vmem>>, %arg5: memref<1x4xf32, #tpu.memory_space<vmem>>, %arg6: memref<1x4xf32, #tpu.memory_space<vmem>>, %arg7: memref<1x4xf32, #tpu.memory_space<vmem>>, %arg8: memref<9x4x8xbf16, #tpu.memory_space<vmem>>, %arg9: memref<1x8xf32, #tpu.memory_space<vmem>>, %arg10: memref<32x8xf32, #tpu.memory_space<vmem>>, %arg11: memref<1x8xf32, #tpu.memory_space<vmem>>, %arg12: memref<8x2xf32, #tpu.memory_space<vmem>>, %arg13: memref<2x8xf32, #tpu.memory_space<vmem>>, %arg14: memref<1x8xf32, #tpu.memory_space<vmem>>, %arg15: memref<1x8xf32, #tpu.memory_space<vmem>>, %arg16: memref<9x8x8xbf16, #tpu.memory_space<vmem>>, %arg17: memref<1x8xf32, #tpu.memory_space<vmem>>, %arg18: memref<4x8xbf16, #tpu.memory_space<vmem>>, %arg19: memref<1x8xf32, #tpu.memory_space<vmem>>, %arg20: memref<1x256x8xf32, #tpu.memory_space<vmem>>) attributes {dimension_semantics = [#tpu.dimension_semantics<parallel>], iteration_bounds = array<i64: 2>, scalar_prefetch = 0 : i64, scratch_operands = 0 : i64, tpu.core_type = #tpu.core_type<tc>, window_params = [{transform_indices = @transform_0, window_bounds = array<i64: 1, 256, 4>}, {transform_indices = @transform_1, window_bounds = array<i64: 1, 1, 32>}, {pipeline_mode = #tpu.pipeline_mode<synchronous>, transform_indices = @transform_2, window_bounds = array<i64: 9, 256, 1>}, {pipeline_mode = #tpu.pipeline_mode<synchronous>, transform_indices = @transform_3, window_bounds = array<i64: 4, 1>}, {pipeline_mode = #tpu.pipeline_mode<synchronous>, transform_indices = @transform_4, window_bounds = array<i64: 1, 4>}, {pipeline_mode = #tpu.pipeline_mode<synchronous>, transform_indices = @transform_5, window_bounds = array<i64: 1, 4>}, {pipeline_mode = #tpu.pipeline_mode<synchronous>, transform_indices = @transform_6, window_bounds = array<i64: 1, 4>}, {pipeline_mode = #tpu.pipeline_mode<synchronous>, transform_indices = @transform_7, window_bounds = array<i64: 9, 4, 8>}, {pipeline_mode = #tpu.pipeline_mode<synchronous>, transform_indices = @transform_8, window_bounds = array<i64: 1, 8>}, {pipeline_mode = #tpu.pipeline_mode<synchronous>, transform_indices = @transform_9, window_bounds = array<i64: 32, 8>}, {pipeline_mode = #tpu.pipeline_mode<synchronous>, transform_indices = @transform_10, window_bounds = array<i64: 1, 8>}, {pipeline_mode = #tpu.pipeline_mode<synchronous>, transform_indices = @transform_11, window_bounds = array<i64: 8, 2>}, {pipeline_mode = #tpu.pipeline_mode<synchronous>, transform_indices = @transform_12, window_bounds = array<i64: 2, 8>}, {pipeline_mode = #tpu.pipeline_mode<synchronous>, transform_indices = @transform_13, window_bounds = array<i64: 1, 8>}, {pipeline_mode = #tpu.pipeline_mode<synchronous>, transform_indices = @transform_14, window_bounds = array<i64: 1, 8>}, {pipeline_mode = #tpu.pipeline_mode<synchronous>, transform_indices = @transform_15, window_bounds = array<i64: 9, 8, 8>}, {pipeline_mode = #tpu.pipeline_mode<synchronous>, transform_indices = @transform_16, window_bounds = array<i64: 1, 8>}, {pipeline_mode = #tpu.pipeline_mode<synchronous>, transform_indices = @transform_17, window_bounds = array<i64: 4, 8>}, {pipeline_mode = #tpu.pipeline_mode<synchronous>, transform_indices = @transform_18, window_bounds = array<i64: 1, 8>}, {transform_indices = @transform_19, window_bounds = array<i64: 1, 256, 8>}]} {
    %c0 = arith.constant 0 : index
    %c0_0 = arith.constant 0 : index
    %c0_1 = arith.constant 0 : index
    %0 = vector.load %arg1[%c0, %c0_0, %c0_1] : memref<1x256x4xf32, #tpu.memory_space<vmem>>, vector<1x256x4xf32>
    %1 = vector.shape_cast %0 : vector<1x256x4xf32> to vector<256x4xf32>
    %cst = arith.constant dense<0.000000e+00> : vector<4xf32>
    %2 = vector.multi_reduction <add>, %1, %cst [0] : vector<256x4xf32> to vector<4xf32>
    %3 = vector.shape_cast %2 : vector<4xf32> to vector<1x4xf32>
    %c0_2 = arith.constant 0 : index
    %c0_3 = arith.constant 0 : index
    %4 = vector.load %arg4[%c0_2, %c0_3] : memref<4x1xf32, #tpu.memory_space<vmem>>, vector<4x1xf32>
    %cst_4 = arith.constant dense<0.000000e+00> : vector<1x1xf32>
    %5 = tpu.matmul %3, %4, %cst_4 {dimension_numbers = #tpu.dot_dimension_numbers<[1], [0], [0], [1], [0, 0, 1, 1], [], []>} : vector<1x4xf32>, vector<4x1xf32>, vector<1x1xf32> -> vector<1x1xf32>
    %cst_5 = arith.constant 9.765625E-4 : f32
    %6 = vector.broadcast %cst_5 : f32 to vector<1x1xf32>
    %7 = arith.mulf %5, %6 : vector<1x1xf32>
    %c0_6 = arith.constant 0 : index
    %c0_7 = arith.constant 0 : index
    %8 = vector.load %arg5[%c0_6, %c0_7] : memref<1x4xf32, #tpu.memory_space<vmem>>, vector<1x4xf32>
    %cst_8 = arith.constant dense<0.000000e+00> : vector<1x4xf32>
    %9 = tpu.matmul %7, %8, %cst_8 {dimension_numbers = #tpu.dot_dimension_numbers<[1], [0], [0], [1], [0, 0, 1, 1], [], []>} : vector<1x1xf32>, vector<1x4xf32>, vector<1x4xf32> -> vector<1x4xf32>
    %10 = vector.broadcast %9 : vector<1x4xf32> to vector<256x4xf32>
    %11 = arith.subf %1, %10 : vector<256x4xf32>
    %12 = arith.mulf %11, %11 : vector<256x4xf32>
    %cst_9 = arith.constant dense<0.000000e+00> : vector<4xf32>
    %13 = vector.multi_reduction <add>, %12, %cst_9 [0] : vector<256x4xf32> to vector<4xf32>
    %14 = vector.shape_cast %13 : vector<4xf32> to vector<1x4xf32>
    %c0_10 = arith.constant 0 : index
    %c0_11 = arith.constant 0 : index
    %15 = vector.load %arg4[%c0_10, %c0_11] : memref<4x1xf32, #tpu.memory_space<vmem>>, vector<4x1xf32>
    %cst_12 = arith.constant dense<0.000000e+00> : vector<1x1xf32>
    %16 = tpu.matmul %14, %15, %cst_12 {dimension_numbers = #tpu.dot_dimension_numbers<[1], [0], [0], [1], [0, 0, 1, 1], [], []>} : vector<1x4xf32>, vector<4x1xf32>, vector<1x1xf32> -> vector<1x1xf32>
    %cst_13 = arith.constant 9.765625E-4 : f32
    %17 = vector.broadcast %cst_13 : f32 to vector<1x1xf32>
    %18 = arith.mulf %16, %17 : vector<1x1xf32>
    %c0_14 = arith.constant 0 : index
    %c0_15 = arith.constant 0 : index
    %19 = vector.load %arg5[%c0_14, %c0_15] : memref<1x4xf32, #tpu.memory_space<vmem>>, vector<1x4xf32>
    %cst_16 = arith.constant dense<0.000000e+00> : vector<1x4xf32>
    %20 = tpu.matmul %18, %19, %cst_16 {dimension_numbers = #tpu.dot_dimension_numbers<[1], [0], [0], [1], [0, 0, 1, 1], [], []>} : vector<1x1xf32>, vector<1x4xf32>, vector<1x4xf32> -> vector<1x4xf32>
    %c0_17 = arith.constant 0 : index
    %c0_18 = arith.constant 0 : index
    %21 = vector.load %arg6[%c0_17, %c0_18] : memref<1x4xf32, #tpu.memory_space<vmem>>, vector<1x4xf32>
    %cst_19 = arith.constant 9.99999997E-7 : f32
    %22 = vector.broadcast %cst_19 : f32 to vector<1x4xf32>
    %23 = arith.addf %20, %22 : vector<1x4xf32>
    %24 = math.rsqrt %23 : vector<1x4xf32>
    %25 = arith.mulf %21, %24 : vector<1x4xf32>
    %26 = vector.broadcast %25 : vector<1x4xf32> to vector<256x4xf32>
    %27 = arith.mulf %11, %26 : vector<256x4xf32>
    %c0_20 = arith.constant 0 : index
    %c0_21 = arith.constant 0 : index
    %28 = vector.load %arg7[%c0_20, %c0_21] : memref<1x4xf32, #tpu.memory_space<vmem>>, vector<1x4xf32>
    %29 = vector.broadcast %28 : vector<1x4xf32> to vector<256x4xf32>
    %30 = arith.addf %27, %29 : vector<256x4xf32>
    %cst_22 = arith.constant 0.000000e+00 : f32
    %31 = vector.broadcast %cst_22 : f32 to vector<256x4xf32>
    %32 = arith.subf %31, %30 : vector<256x4xf32>
    %33 = math.exp %32 : vector<256x4xf32>
    %cst_23 = arith.constant 1.000000e+00 : f32
    %34 = vector.broadcast %cst_23 : f32 to vector<256x4xf32>
    %35 = arith.addf %34, %33 : vector<256x4xf32>
    %cst_24 = arith.constant 1.000000e+00 : f32
    %36 = vector.broadcast %cst_24 : f32 to vector<256x4xf32>
    %37 = arith.divf %36, %35 : vector<256x4xf32>
    %38 = arith.mulf %30, %37 : vector<256x4xf32>
    %cst_25 = arith.constant 0.000000e+00 : f32
    %39 = vector.broadcast %cst_25 : f32 to vector<256x8xf32>
    %c17_i32 = arith.constant 17 : i32
    %40 = tpu.dynamic_rotate %38 by %c17_i32 dim 0 : vector<256x4xf32>, i32 -> vector<256x4xf32>
    %c0_26 = arith.constant 0 : index
    %c0_27 = arith.constant 0 : index
    %c0_28 = arith.constant 0 : index
    %41 = vector.load %arg3[%c0_26, %c0_27, %c0_28] : memref<9x256x1xf32, #tpu.memory_space<vmem>>, vector<1x256x1xf32>
    %42 = vector.shape_cast %41 : vector<1x256x1xf32> to vector<256x1xf32>
    %43 = vector.broadcast %42 : vector<256x1xf32> to vector<256x4xf32>
    %44 = arith.mulf %40, %43 : vector<256x4xf32>
    %45 = arith.truncf %44 : vector<256x4xf32> to vector<256x4xbf16>
    %c0_29 = arith.constant 0 : index
    %c0_30 = arith.constant 0 : index
    %c0_31 = arith.constant 0 : index
    %46 = vector.load %arg8[%c0_29, %c0_30, %c0_31] : memref<9x4x8xbf16, #tpu.memory_space<vmem>>, vector<1x4x8xbf16>
    %47 = vector.shape_cast %46 : vector<1x4x8xbf16> to vector<4x8xbf16>
    %cst_32 = arith.constant dense<0.000000e+00> : vector<256x8xf32>
    %48 = tpu.matmul %45, %47, %cst_32 {dimension_numbers = #tpu.dot_dimension_numbers<[1], [0], [0], [1], [0, 0, 1, 1], [], []>} : vector<256x4xbf16>, vector<4x8xbf16>, vector<256x8xf32> -> vector<256x8xf32>
    %49 = arith.addf %39, %48 : vector<256x8xf32>
    %c16_i32 = arith.constant 16 : i32
    %50 = tpu.dynamic_rotate %38 by %c16_i32 dim 0 : vector<256x4xf32>, i32 -> vector<256x4xf32>
    %c1 = arith.constant 1 : index
    %c0_33 = arith.constant 0 : index
    %c0_34 = arith.constant 0 : index
    %51 = vector.load %arg3[%c1, %c0_33, %c0_34] : memref<9x256x1xf32, #tpu.memory_space<vmem>>, vector<1x256x1xf32>
    %52 = vector.shape_cast %51 : vector<1x256x1xf32> to vector<256x1xf32>
    %53 = vector.broadcast %52 : vector<256x1xf32> to vector<256x4xf32>
    %54 = arith.mulf %50, %53 : vector<256x4xf32>
    %55 = arith.truncf %54 : vector<256x4xf32> to vector<256x4xbf16>
    %c1_35 = arith.constant 1 : index
    %c0_36 = arith.constant 0 : index
    %c0_37 = arith.constant 0 : index
    %56 = vector.load %arg8[%c1_35, %c0_36, %c0_37] : memref<9x4x8xbf16, #tpu.memory_space<vmem>>, vector<1x4x8xbf16>
    %57 = vector.shape_cast %56 : vector<1x4x8xbf16> to vector<4x8xbf16>
    %cst_38 = arith.constant dense<0.000000e+00> : vector<256x8xf32>
    %58 = tpu.matmul %55, %57, %cst_38 {dimension_numbers = #tpu.dot_dimension_numbers<[1], [0], [0], [1], [0, 0, 1, 1], [], []>} : vector<256x4xbf16>, vector<4x8xbf16>, vector<256x8xf32> -> vector<256x8xf32>
    %59 = arith.addf %49, %58 : vector<256x8xf32>
    %c15_i32 = arith.constant 15 : i32
    %60 = tpu.dynamic_rotate %38 by %c15_i32 dim 0 : vector<256x4xf32>, i32 -> vector<256x4xf32>
    %c2 = arith.constant 2 : index
    %c0_39 = arith.constant 0 : index
    %c0_40 = arith.constant 0 : index
    %61 = vector.load %arg3[%c2, %c0_39, %c0_40] : memref<9x256x1xf32, #tpu.memory_space<vmem>>, vector<1x256x1xf32>
    %62 = vector.shape_cast %61 : vector<1x256x1xf32> to vector<256x1xf32>
    %63 = vector.broadcast %62 : vector<256x1xf32> to vector<256x4xf32>
    %64 = arith.mulf %60, %63 : vector<256x4xf32>
    %65 = arith.truncf %64 : vector<256x4xf32> to vector<256x4xbf16>
    %c2_41 = arith.constant 2 : index
    %c0_42 = arith.constant 0 : index
    %c0_43 = arith.constant 0 : index
    %66 = vector.load %arg8[%c2_41, %c0_42, %c0_43] : memref<9x4x8xbf16, #tpu.memory_space<vmem>>, vector<1x4x8xbf16>
    %67 = vector.shape_cast %66 : vector<1x4x8xbf16> to vector<4x8xbf16>
    %cst_44 = arith.constant dense<0.000000e+00> : vector<256x8xf32>
    %68 = tpu.matmul %65, %67, %cst_44 {dimension_numbers = #tpu.dot_dimension_numbers<[1], [0], [0], [1], [0, 0, 1, 1], [], []>} : vector<256x4xbf16>, vector<4x8xbf16>, vector<256x8xf32> -> vector<256x8xf32>
    %69 = arith.addf %59, %68 : vector<256x8xf32>
    %c1_i32 = arith.constant 1 : i32
    %70 = tpu.dynamic_rotate %38 by %c1_i32 dim 0 : vector<256x4xf32>, i32 -> vector<256x4xf32>
    %c3 = arith.constant 3 : index
    %c0_45 = arith.constant 0 : index
    %c0_46 = arith.constant 0 : index
    %71 = vector.load %arg3[%c3, %c0_45, %c0_46] : memref<9x256x1xf32, #tpu.memory_space<vmem>>, vector<1x256x1xf32>
    %72 = vector.shape_cast %71 : vector<1x256x1xf32> to vector<256x1xf32>
    %73 = vector.broadcast %72 : vector<256x1xf32> to vector<256x4xf32>
    %74 = arith.mulf %70, %73 : vector<256x4xf32>
    %75 = arith.truncf %74 : vector<256x4xf32> to vector<256x4xbf16>
    %c3_47 = arith.constant 3 : index
    %c0_48 = arith.constant 0 : index
    %c0_49 = arith.constant 0 : index
    %76 = vector.load %arg8[%c3_47, %c0_48, %c0_49] : memref<9x4x8xbf16, #tpu.memory_space<vmem>>, vector<1x4x8xbf16>
    %77 = vector.shape_cast %76 : vector<1x4x8xbf16> to vector<4x8xbf16>
    %cst_50 = arith.constant dense<0.000000e+00> : vector<256x8xf32>
    %78 = tpu.matmul %75, %77, %cst_50 {dimension_numbers = #tpu.dot_dimension_numbers<[1], [0], [0], [1], [0, 0, 1, 1], [], []>} : vector<256x4xbf16>, vector<4x8xbf16>, vector<256x8xf32> -> vector<256x8xf32>
    %79 = arith.addf %69, %78 : vector<256x8xf32>
    %c4 = arith.constant 4 : index
    %c0_51 = arith.constant 0 : index
    %c0_52 = arith.constant 0 : index
    %80 = vector.load %arg3[%c4, %c0_51, %c0_52] : memref<9x256x1xf32, #tpu.memory_space<vmem>>, vector<1x256x1xf32>
    %81 = vector.shape_cast %80 : vector<1x256x1xf32> to vector<256x1xf32>
    %82 = vector.broadcast %81 : vector<256x1xf32> to vector<256x4xf32>
    %83 = arith.mulf %38, %82 : vector<256x4xf32>
    %84 = arith.truncf %83 : vector<256x4xf32> to vector<256x4xbf16>
    %c4_53 = arith.constant 4 : index
    %c0_54 = arith.constant 0 : index
    %c0_55 = arith.constant 0 : index
    %85 = vector.load %arg8[%c4_53, %c0_54, %c0_55] : memref<9x4x8xbf16, #tpu.memory_space<vmem>>, vector<1x4x8xbf16>
    %86 = vector.shape_cast %85 : vector<1x4x8xbf16> to vector<4x8xbf16>
    %cst_56 = arith.constant dense<0.000000e+00> : vector<256x8xf32>
    %87 = tpu.matmul %84, %86, %cst_56 {dimension_numbers = #tpu.dot_dimension_numbers<[1], [0], [0], [1], [0, 0, 1, 1], [], []>} : vector<256x4xbf16>, vector<4x8xbf16>, vector<256x8xf32> -> vector<256x8xf32>
    %88 = arith.addf %79, %87 : vector<256x8xf32>
    %c255_i32 = arith.constant 255 : i32
    %89 = tpu.dynamic_rotate %38 by %c255_i32 dim 0 : vector<256x4xf32>, i32 -> vector<256x4xf32>
    %c5 = arith.constant 5 : index
    %c0_57 = arith.constant 0 : index
    %c0_58 = arith.constant 0 : index
    %90 = vector.load %arg3[%c5, %c0_57, %c0_58] : memref<9x256x1xf32, #tpu.memory_space<vmem>>, vector<1x256x1xf32>
    %91 = vector.shape_cast %90 : vector<1x256x1xf32> to vector<256x1xf32>
    %92 = vector.broadcast %91 : vector<256x1xf32> to vector<256x4xf32>
    %93 = arith.mulf %89, %92 : vector<256x4xf32>
    %94 = arith.truncf %93 : vector<256x4xf32> to vector<256x4xbf16>
    %c5_59 = arith.constant 5 : index
    %c0_60 = arith.constant 0 : index
    %c0_61 = arith.constant 0 : index
    %95 = vector.load %arg8[%c5_59, %c0_60, %c0_61] : memref<9x4x8xbf16, #tpu.memory_space<vmem>>, vector<1x4x8xbf16>
    %96 = vector.shape_cast %95 : vector<1x4x8xbf16> to vector<4x8xbf16>
    %cst_62 = arith.constant dense<0.000000e+00> : vector<256x8xf32>
    %97 = tpu.matmul %94, %96, %cst_62 {dimension_numbers = #tpu.dot_dimension_numbers<[1], [0], [0], [1], [0, 0, 1, 1], [], []>} : vector<256x4xbf16>, vector<4x8xbf16>, vector<256x8xf32> -> vector<256x8xf32>
    %98 = arith.addf %88, %97 : vector<256x8xf32>
    %c241_i32 = arith.constant 241 : i32
    %99 = tpu.dynamic_rotate %38 by %c241_i32 dim 0 : vector<256x4xf32>, i32 -> vector<256x4xf32>
    %c6 = arith.constant 6 : index
    %c0_63 = arith.constant 0 : index
    %c0_64 = arith.constant 0 : index
    %100 = vector.load %arg3[%c6, %c0_63, %c0_64] : memref<9x256x1xf32, #tpu.memory_space<vmem>>, vector<1x256x1xf32>
    %101 = vector.shape_cast %100 : vector<1x256x1xf32> to vector<256x1xf32>
    %102 = vector.broadcast %101 : vector<256x1xf32> to vector<256x4xf32>
    %103 = arith.mulf %99, %102 : vector<256x4xf32>
    %104 = arith.truncf %103 : vector<256x4xf32> to vector<256x4xbf16>
    %c6_65 = arith.constant 6 : index
    %c0_66 = arith.constant 0 : index
    %c0_67 = arith.constant 0 : index
    %105 = vector.load %arg8[%c6_65, %c0_66, %c0_67] : memref<9x4x8xbf16, #tpu.memory_space<vmem>>, vector<1x4x8xbf16>
    %106 = vector.shape_cast %105 : vector<1x4x8xbf16> to vector<4x8xbf16>
    %cst_68 = arith.constant dense<0.000000e+00> : vector<256x8xf32>
    %107 = tpu.matmul %104, %106, %cst_68 {dimension_numbers = #tpu.dot_dimension_numbers<[1], [0], [0], [1], [0, 0, 1, 1], [], []>} : vector<256x4xbf16>, vector<4x8xbf16>, vector<256x8xf32> -> vector<256x8xf32>
    %108 = arith.addf %98, %107 : vector<256x8xf32>
    %c240_i32 = arith.constant 240 : i32
    %109 = tpu.dynamic_rotate %38 by %c240_i32 dim 0 : vector<256x4xf32>, i32 -> vector<256x4xf32>
    %c7 = arith.constant 7 : index
    %c0_69 = arith.constant 0 : index
    %c0_70 = arith.constant 0 : index
    %110 = vector.load %arg3[%c7, %c0_69, %c0_70] : memref<9x256x1xf32, #tpu.memory_space<vmem>>, vector<1x256x1xf32>
    %111 = vector.shape_cast %110 : vector<1x256x1xf32> to vector<256x1xf32>
    %112 = vector.broadcast %111 : vector<256x1xf32> to vector<256x4xf32>
    %113 = arith.mulf %109, %112 : vector<256x4xf32>
    %114 = arith.truncf %113 : vector<256x4xf32> to vector<256x4xbf16>
    %c7_71 = arith.constant 7 : index
    %c0_72 = arith.constant 0 : index
    %c0_73 = arith.constant 0 : index
    %115 = vector.load %arg8[%c7_71, %c0_72, %c0_73] : memref<9x4x8xbf16, #tpu.memory_space<vmem>>, vector<1x4x8xbf16>
    %116 = vector.shape_cast %115 : vector<1x4x8xbf16> to vector<4x8xbf16>
    %cst_74 = arith.constant dense<0.000000e+00> : vector<256x8xf32>
    %117 = tpu.matmul %114, %116, %cst_74 {dimension_numbers = #tpu.dot_dimension_numbers<[1], [0], [0], [1], [0, 0, 1, 1], [], []>} : vector<256x4xbf16>, vector<4x8xbf16>, vector<256x8xf32> -> vector<256x8xf32>
    %118 = arith.addf %108, %117 : vector<256x8xf32>
    %c239_i32 = arith.constant 239 : i32
    %119 = tpu.dynamic_rotate %38 by %c239_i32 dim 0 : vector<256x4xf32>, i32 -> vector<256x4xf32>
    %c8 = arith.constant 8 : index
    %c0_75 = arith.constant 0 : index
    %c0_76 = arith.constant 0 : index
    %120 = vector.load %arg3[%c8, %c0_75, %c0_76] : memref<9x256x1xf32, #tpu.memory_space<vmem>>, vector<1x256x1xf32>
    %121 = vector.shape_cast %120 : vector<1x256x1xf32> to vector<256x1xf32>
    %122 = vector.broadcast %121 : vector<256x1xf32> to vector<256x4xf32>
    %123 = arith.mulf %119, %122 : vector<256x4xf32>
    %124 = arith.truncf %123 : vector<256x4xf32> to vector<256x4xbf16>
    %c8_77 = arith.constant 8 : index
    %c0_78 = arith.constant 0 : index
    %c0_79 = arith.constant 0 : index
    %125 = vector.load %arg8[%c8_77, %c0_78, %c0_79] : memref<9x4x8xbf16, #tpu.memory_space<vmem>>, vector<1x4x8xbf16>
    %126 = vector.shape_cast %125 : vector<1x4x8xbf16> to vector<4x8xbf16>
    %cst_80 = arith.constant dense<0.000000e+00> : vector<256x8xf32>
    %127 = tpu.matmul %124, %126, %cst_80 {dimension_numbers = #tpu.dot_dimension_numbers<[1], [0], [0], [1], [0, 0, 1, 1], [], []>} : vector<256x4xbf16>, vector<4x8xbf16>, vector<256x8xf32> -> vector<256x8xf32>
    %128 = arith.addf %118, %127 : vector<256x8xf32>
    %c0_81 = arith.constant 0 : index
    %c0_82 = arith.constant 0 : index
    %129 = vector.load %arg9[%c0_81, %c0_82] : memref<1x8xf32, #tpu.memory_space<vmem>>, vector<1x8xf32>
    %130 = vector.broadcast %129 : vector<1x8xf32> to vector<256x8xf32>
    %131 = arith.addf %128, %130 : vector<256x8xf32>
    %c0_83 = arith.constant 0 : index
    %c0_84 = arith.constant 0 : index
    %c0_85 = arith.constant 0 : index
    %132 = vector.load %arg2[%c0_83, %c0_84, %c0_85] : memref<1x1x32xf32, #tpu.memory_space<vmem>>, vector<1x1x32xf32>
    %133 = vector.shape_cast %132 : vector<1x1x32xf32> to vector<1x32xf32>
    %cst_86 = arith.constant 0.000000e+00 : f32
    %134 = vector.broadcast %cst_86 : f32 to vector<1x32xf32>
    %135 = arith.subf %134, %133 : vector<1x32xf32>
    %136 = math.exp %135 : vector<1x32xf32>
    %cst_87 = arith.constant 1.000000e+00 : f32
    %137 = vector.broadcast %cst_87 : f32 to vector<1x32xf32>
    %138 = arith.addf %137, %136 : vector<1x32xf32>
    %cst_88 = arith.constant 1.000000e+00 : f32
    %139 = vector.broadcast %cst_88 : f32 to vector<1x32xf32>
    %140 = arith.divf %139, %138 : vector<1x32xf32>
    %141 = arith.mulf %133, %140 : vector<1x32xf32>
    %c0_89 = arith.constant 0 : index
    %c0_90 = arith.constant 0 : index
    %142 = vector.load %arg10[%c0_89, %c0_90] : memref<32x8xf32, #tpu.memory_space<vmem>>, vector<32x8xf32>
    %cst_91 = arith.constant dense<0.000000e+00> : vector<1x8xf32>
    %143 = tpu.matmul %141, %142, %cst_91 {dimension_numbers = #tpu.dot_dimension_numbers<[1], [0], [0], [1], [0, 0, 1, 1], [], []>} : vector<1x32xf32>, vector<32x8xf32>, vector<1x8xf32> -> vector<1x8xf32>
    %144 = vector.broadcast %143 : vector<1x8xf32> to vector<256x8xf32>
    %145 = arith.addf %131, %144 : vector<256x8xf32>
    %c0_92 = arith.constant 0 : index
    %c0_93 = arith.constant 0 : index
    %146 = vector.load %arg11[%c0_92, %c0_93] : memref<1x8xf32, #tpu.memory_space<vmem>>, vector<1x8xf32>
    %147 = vector.broadcast %146 : vector<1x8xf32> to vector<256x8xf32>
    %148 = arith.addf %145, %147 : vector<256x8xf32>
    %cst_94 = arith.constant dense<0.000000e+00> : vector<8xf32>
    %149 = vector.multi_reduction <add>, %148, %cst_94 [0] : vector<256x8xf32> to vector<8xf32>
    %150 = vector.shape_cast %149 : vector<8xf32> to vector<1x8xf32>
    %c0_95 = arith.constant 0 : index
    %c0_96 = arith.constant 0 : index
    %151 = vector.load %arg12[%c0_95, %c0_96] : memref<8x2xf32, #tpu.memory_space<vmem>>, vector<8x2xf32>
    %cst_97 = arith.constant dense<0.000000e+00> : vector<1x2xf32>
    %152 = tpu.matmul %150, %151, %cst_97 {dimension_numbers = #tpu.dot_dimension_numbers<[1], [0], [0], [1], [0, 0, 1, 1], [], []>} : vector<1x8xf32>, vector<8x2xf32>, vector<1x2xf32> -> vector<1x2xf32>
    %cst_98 = arith.constant 9.765625E-4 : f32
    %153 = vector.broadcast %cst_98 : f32 to vector<1x2xf32>
    %154 = arith.mulf %152, %153 : vector<1x2xf32>
    %c0_99 = arith.constant 0 : index
    %c0_100 = arith.constant 0 : index
    %155 = vector.load %arg13[%c0_99, %c0_100] : memref<2x8xf32, #tpu.memory_space<vmem>>, vector<2x8xf32>
    %cst_101 = arith.constant dense<0.000000e+00> : vector<1x8xf32>
    %156 = tpu.matmul %154, %155, %cst_101 {dimension_numbers = #tpu.dot_dimension_numbers<[1], [0], [0], [1], [0, 0, 1, 1], [], []>} : vector<1x2xf32>, vector<2x8xf32>, vector<1x8xf32> -> vector<1x8xf32>
    %157 = vector.broadcast %156 : vector<1x8xf32> to vector<256x8xf32>
    %158 = arith.subf %148, %157 : vector<256x8xf32>
    %159 = arith.mulf %158, %158 : vector<256x8xf32>
    %cst_102 = arith.constant dense<0.000000e+00> : vector<8xf32>
    %160 = vector.multi_reduction <add>, %159, %cst_102 [0] : vector<256x8xf32> to vector<8xf32>
    %161 = vector.shape_cast %160 : vector<8xf32> to vector<1x8xf32>
    %c0_103 = arith.constant 0 : index
    %c0_104 = arith.constant 0 : index
    %162 = vector.load %arg12[%c0_103, %c0_104] : memref<8x2xf32, #tpu.memory_space<vmem>>, vector<8x2xf32>
    %cst_105 = arith.constant dense<0.000000e+00> : vector<1x2xf32>
    %163 = tpu.matmul %161, %162, %cst_105 {dimension_numbers = #tpu.dot_dimension_numbers<[1], [0], [0], [1], [0, 0, 1, 1], [], []>} : vector<1x8xf32>, vector<8x2xf32>, vector<1x2xf32> -> vector<1x2xf32>
    %cst_106 = arith.constant 9.765625E-4 : f32
    %164 = vector.broadcast %cst_106 : f32 to vector<1x2xf32>
    %165 = arith.mulf %163, %164 : vector<1x2xf32>
    %c0_107 = arith.constant 0 : index
    %c0_108 = arith.constant 0 : index
    %166 = vector.load %arg13[%c0_107, %c0_108] : memref<2x8xf32, #tpu.memory_space<vmem>>, vector<2x8xf32>
    %cst_109 = arith.constant dense<0.000000e+00> : vector<1x8xf32>
    %167 = tpu.matmul %165, %166, %cst_109 {dimension_numbers = #tpu.dot_dimension_numbers<[1], [0], [0], [1], [0, 0, 1, 1], [], []>} : vector<1x2xf32>, vector<2x8xf32>, vector<1x8xf32> -> vector<1x8xf32>
    %c0_110 = arith.constant 0 : index
    %c0_111 = arith.constant 0 : index
    %168 = vector.load %arg14[%c0_110, %c0_111] : memref<1x8xf32, #tpu.memory_space<vmem>>, vector<1x8xf32>
    %cst_112 = arith.constant 9.99999997E-7 : f32
    %169 = vector.broadcast %cst_112 : f32 to vector<1x8xf32>
    %170 = arith.addf %167, %169 : vector<1x8xf32>
    %171 = math.rsqrt %170 : vector<1x8xf32>
    %172 = arith.mulf %168, %171 : vector<1x8xf32>
    %173 = vector.broadcast %172 : vector<1x8xf32> to vector<256x8xf32>
    %174 = arith.mulf %158, %173 : vector<256x8xf32>
    %c0_113 = arith.constant 0 : index
    %c0_114 = arith.constant 0 : index
    %175 = vector.load %arg15[%c0_113, %c0_114] : memref<1x8xf32, #tpu.memory_space<vmem>>, vector<1x8xf32>
    %176 = vector.broadcast %175 : vector<1x8xf32> to vector<256x8xf32>
    %177 = arith.addf %174, %176 : vector<256x8xf32>
    %cst_115 = arith.constant 0.000000e+00 : f32
    %178 = vector.broadcast %cst_115 : f32 to vector<256x8xf32>
    %179 = arith.subf %178, %177 : vector<256x8xf32>
    %180 = math.exp %179 : vector<256x8xf32>
    %cst_116 = arith.constant 1.000000e+00 : f32
    %181 = vector.broadcast %cst_116 : f32 to vector<256x8xf32>
    %182 = arith.addf %181, %180 : vector<256x8xf32>
    %cst_117 = arith.constant 1.000000e+00 : f32
    %183 = vector.broadcast %cst_117 : f32 to vector<256x8xf32>
    %184 = arith.divf %183, %182 : vector<256x8xf32>
    %185 = arith.mulf %177, %184 : vector<256x8xf32>
    %cst_118 = arith.constant 0.000000e+00 : f32
    %186 = vector.broadcast %cst_118 : f32 to vector<256x8xf32>
    %c17_i32_119 = arith.constant 17 : i32
    %187 = tpu.dynamic_rotate %185 by %c17_i32_119 dim 0 : vector<256x8xf32>, i32 -> vector<256x8xf32>
    %c0_120 = arith.constant 0 : index
    %c0_121 = arith.constant 0 : index
    %c0_122 = arith.constant 0 : index
    %188 = vector.load %arg3[%c0_120, %c0_121, %c0_122] : memref<9x256x1xf32, #tpu.memory_space<vmem>>, vector<1x256x1xf32>
    %189 = vector.shape_cast %188 : vector<1x256x1xf32> to vector<256x1xf32>
    %190 = vector.broadcast %189 : vector<256x1xf32> to vector<256x8xf32>
    %191 = arith.mulf %187, %190 : vector<256x8xf32>
    %192 = arith.truncf %191 : vector<256x8xf32> to vector<256x8xbf16>
    %c0_123 = arith.constant 0 : index
    %c0_124 = arith.constant 0 : index
    %c0_125 = arith.constant 0 : index
    %193 = vector.load %arg16[%c0_123, %c0_124, %c0_125] : memref<9x8x8xbf16, #tpu.memory_space<vmem>>, vector<1x8x8xbf16>
    %194 = vector.shape_cast %193 : vector<1x8x8xbf16> to vector<8x8xbf16>
    %cst_126 = arith.constant dense<0.000000e+00> : vector<256x8xf32>
    %195 = tpu.matmul %192, %194, %cst_126 {dimension_numbers = #tpu.dot_dimension_numbers<[1], [0], [0], [1], [0, 0, 1, 1], [], []>} : vector<256x8xbf16>, vector<8x8xbf16>, vector<256x8xf32> -> vector<256x8xf32>
    %196 = arith.addf %186, %195 : vector<256x8xf32>
    %c16_i32_127 = arith.constant 16 : i32
    %197 = tpu.dynamic_rotate %185 by %c16_i32_127 dim 0 : vector<256x8xf32>, i32 -> vector<256x8xf32>
    %c1_128 = arith.constant 1 : index
    %c0_129 = arith.constant 0 : index
    %c0_130 = arith.constant 0 : index
    %198 = vector.load %arg3[%c1_128, %c0_129, %c0_130] : memref<9x256x1xf32, #tpu.memory_space<vmem>>, vector<1x256x1xf32>
    %199 = vector.shape_cast %198 : vector<1x256x1xf32> to vector<256x1xf32>
    %200 = vector.broadcast %199 : vector<256x1xf32> to vector<256x8xf32>
    %201 = arith.mulf %197, %200 : vector<256x8xf32>
    %202 = arith.truncf %201 : vector<256x8xf32> to vector<256x8xbf16>
    %c1_131 = arith.constant 1 : index
    %c0_132 = arith.constant 0 : index
    %c0_133 = arith.constant 0 : index
    %203 = vector.load %arg16[%c1_131, %c0_132, %c0_133] : memref<9x8x8xbf16, #tpu.memory_space<vmem>>, vector<1x8x8xbf16>
    %204 = vector.shape_cast %203 : vector<1x8x8xbf16> to vector<8x8xbf16>
    %cst_134 = arith.constant dense<0.000000e+00> : vector<256x8xf32>
    %205 = tpu.matmul %202, %204, %cst_134 {dimension_numbers = #tpu.dot_dimension_numbers<[1], [0], [0], [1], [0, 0, 1, 1], [], []>} : vector<256x8xbf16>, vector<8x8xbf16>, vector<256x8xf32> -> vector<256x8xf32>
    %206 = arith.addf %196, %205 : vector<256x8xf32>
    %c15_i32_135 = arith.constant 15 : i32
    %207 = tpu.dynamic_rotate %185 by %c15_i32_135 dim 0 : vector<256x8xf32>, i32 -> vector<256x8xf32>
    %c2_136 = arith.constant 2 : index
    %c0_137 = arith.constant 0 : index
    %c0_138 = arith.constant 0 : index
    %208 = vector.load %arg3[%c2_136, %c0_137, %c0_138] : memref<9x256x1xf32, #tpu.memory_space<vmem>>, vector<1x256x1xf32>
    %209 = vector.shape_cast %208 : vector<1x256x1xf32> to vector<256x1xf32>
    %210 = vector.broadcast %209 : vector<256x1xf32> to vector<256x8xf32>
    %211 = arith.mulf %207, %210 : vector<256x8xf32>
    %212 = arith.truncf %211 : vector<256x8xf32> to vector<256x8xbf16>
    %c2_139 = arith.constant 2 : index
    %c0_140 = arith.constant 0 : index
    %c0_141 = arith.constant 0 : index
    %213 = vector.load %arg16[%c2_139, %c0_140, %c0_141] : memref<9x8x8xbf16, #tpu.memory_space<vmem>>, vector<1x8x8xbf16>
    %214 = vector.shape_cast %213 : vector<1x8x8xbf16> to vector<8x8xbf16>
    %cst_142 = arith.constant dense<0.000000e+00> : vector<256x8xf32>
    %215 = tpu.matmul %212, %214, %cst_142 {dimension_numbers = #tpu.dot_dimension_numbers<[1], [0], [0], [1], [0, 0, 1, 1], [], []>} : vector<256x8xbf16>, vector<8x8xbf16>, vector<256x8xf32> -> vector<256x8xf32>
    %216 = arith.addf %206, %215 : vector<256x8xf32>
    %c1_i32_143 = arith.constant 1 : i32
    %217 = tpu.dynamic_rotate %185 by %c1_i32_143 dim 0 : vector<256x8xf32>, i32 -> vector<256x8xf32>
    %c3_144 = arith.constant 3 : index
    %c0_145 = arith.constant 0 : index
    %c0_146 = arith.constant 0 : index
    %218 = vector.load %arg3[%c3_144, %c0_145, %c0_146] : memref<9x256x1xf32, #tpu.memory_space<vmem>>, vector<1x256x1xf32>
    %219 = vector.shape_cast %218 : vector<1x256x1xf32> to vector<256x1xf32>
    %220 = vector.broadcast %219 : vector<256x1xf32> to vector<256x8xf32>
    %221 = arith.mulf %217, %220 : vector<256x8xf32>
    %222 = arith.truncf %221 : vector<256x8xf32> to vector<256x8xbf16>
    %c3_147 = arith.constant 3 : index
    %c0_148 = arith.constant 0 : index
    %c0_149 = arith.constant 0 : index
    %223 = vector.load %arg16[%c3_147, %c0_148, %c0_149] : memref<9x8x8xbf16, #tpu.memory_space<vmem>>, vector<1x8x8xbf16>
    %224 = vector.shape_cast %223 : vector<1x8x8xbf16> to vector<8x8xbf16>
    %cst_150 = arith.constant dense<0.000000e+00> : vector<256x8xf32>
    %225 = tpu.matmul %222, %224, %cst_150 {dimension_numbers = #tpu.dot_dimension_numbers<[1], [0], [0], [1], [0, 0, 1, 1], [], []>} : vector<256x8xbf16>, vector<8x8xbf16>, vector<256x8xf32> -> vector<256x8xf32>
    %226 = arith.addf %216, %225 : vector<256x8xf32>
    %c4_151 = arith.constant 4 : index
    %c0_152 = arith.constant 0 : index
    %c0_153 = arith.constant 0 : index
    %227 = vector.load %arg3[%c4_151, %c0_152, %c0_153] : memref<9x256x1xf32, #tpu.memory_space<vmem>>, vector<1x256x1xf32>
    %228 = vector.shape_cast %227 : vector<1x256x1xf32> to vector<256x1xf32>
    %229 = vector.broadcast %228 : vector<256x1xf32> to vector<256x8xf32>
    %230 = arith.mulf %185, %229 : vector<256x8xf32>
    %231 = arith.truncf %230 : vector<256x8xf32> to vector<256x8xbf16>
    %c4_154 = arith.constant 4 : index
    %c0_155 = arith.constant 0 : index
    %c0_156 = arith.constant 0 : index
    %232 = vector.load %arg16[%c4_154, %c0_155, %c0_156] : memref<9x8x8xbf16, #tpu.memory_space<vmem>>, vector<1x8x8xbf16>
    %233 = vector.shape_cast %232 : vector<1x8x8xbf16> to vector<8x8xbf16>
    %cst_157 = arith.constant dense<0.000000e+00> : vector<256x8xf32>
    %234 = tpu.matmul %231, %233, %cst_157 {dimension_numbers = #tpu.dot_dimension_numbers<[1], [0], [0], [1], [0, 0, 1, 1], [], []>} : vector<256x8xbf16>, vector<8x8xbf16>, vector<256x8xf32> -> vector<256x8xf32>
    %235 = arith.addf %226, %234 : vector<256x8xf32>
    %c255_i32_158 = arith.constant 255 : i32
    %236 = tpu.dynamic_rotate %185 by %c255_i32_158 dim 0 : vector<256x8xf32>, i32 -> vector<256x8xf32>
    %c5_159 = arith.constant 5 : index
    %c0_160 = arith.constant 0 : index
    %c0_161 = arith.constant 0 : index
    %237 = vector.load %arg3[%c5_159, %c0_160, %c0_161] : memref<9x256x1xf32, #tpu.memory_space<vmem>>, vector<1x256x1xf32>
    %238 = vector.shape_cast %237 : vector<1x256x1xf32> to vector<256x1xf32>
    %239 = vector.broadcast %238 : vector<256x1xf32> to vector<256x8xf32>
    %240 = arith.mulf %236, %239 : vector<256x8xf32>
    %241 = arith.truncf %240 : vector<256x8xf32> to vector<256x8xbf16>
    %c5_162 = arith.constant 5 : index
    %c0_163 = arith.constant 0 : index
    %c0_164 = arith.constant 0 : index
    %242 = vector.load %arg16[%c5_162, %c0_163, %c0_164] : memref<9x8x8xbf16, #tpu.memory_space<vmem>>, vector<1x8x8xbf16>
    %243 = vector.shape_cast %242 : vector<1x8x8xbf16> to vector<8x8xbf16>
    %cst_165 = arith.constant dense<0.000000e+00> : vector<256x8xf32>
    %244 = tpu.matmul %241, %243, %cst_165 {dimension_numbers = #tpu.dot_dimension_numbers<[1], [0], [0], [1], [0, 0, 1, 1], [], []>} : vector<256x8xbf16>, vector<8x8xbf16>, vector<256x8xf32> -> vector<256x8xf32>
    %245 = arith.addf %235, %244 : vector<256x8xf32>
    %c241_i32_166 = arith.constant 241 : i32
    %246 = tpu.dynamic_rotate %185 by %c241_i32_166 dim 0 : vector<256x8xf32>, i32 -> vector<256x8xf32>
    %c6_167 = arith.constant 6 : index
    %c0_168 = arith.constant 0 : index
    %c0_169 = arith.constant 0 : index
    %247 = vector.load %arg3[%c6_167, %c0_168, %c0_169] : memref<9x256x1xf32, #tpu.memory_space<vmem>>, vector<1x256x1xf32>
    %248 = vector.shape_cast %247 : vector<1x256x1xf32> to vector<256x1xf32>
    %249 = vector.broadcast %248 : vector<256x1xf32> to vector<256x8xf32>
    %250 = arith.mulf %246, %249 : vector<256x8xf32>
    %251 = arith.truncf %250 : vector<256x8xf32> to vector<256x8xbf16>
    %c6_170 = arith.constant 6 : index
    %c0_171 = arith.constant 0 : index
    %c0_172 = arith.constant 0 : index
    %252 = vector.load %arg16[%c6_170, %c0_171, %c0_172] : memref<9x8x8xbf16, #tpu.memory_space<vmem>>, vector<1x8x8xbf16>
    %253 = vector.shape_cast %252 : vector<1x8x8xbf16> to vector<8x8xbf16>
    %cst_173 = arith.constant dense<0.000000e+00> : vector<256x8xf32>
    %254 = tpu.matmul %251, %253, %cst_173 {dimension_numbers = #tpu.dot_dimension_numbers<[1], [0], [0], [1], [0, 0, 1, 1], [], []>} : vector<256x8xbf16>, vector<8x8xbf16>, vector<256x8xf32> -> vector<256x8xf32>
    %255 = arith.addf %245, %254 : vector<256x8xf32>
    %c240_i32_174 = arith.constant 240 : i32
    %256 = tpu.dynamic_rotate %185 by %c240_i32_174 dim 0 : vector<256x8xf32>, i32 -> vector<256x8xf32>
    %c7_175 = arith.constant 7 : index
    %c0_176 = arith.constant 0 : index
    %c0_177 = arith.constant 0 : index
    %257 = vector.load %arg3[%c7_175, %c0_176, %c0_177] : memref<9x256x1xf32, #tpu.memory_space<vmem>>, vector<1x256x1xf32>
    %258 = vector.shape_cast %257 : vector<1x256x1xf32> to vector<256x1xf32>
    %259 = vector.broadcast %258 : vector<256x1xf32> to vector<256x8xf32>
    %260 = arith.mulf %256, %259 : vector<256x8xf32>
    %261 = arith.truncf %260 : vector<256x8xf32> to vector<256x8xbf16>
    %c7_178 = arith.constant 7 : index
    %c0_179 = arith.constant 0 : index
    %c0_180 = arith.constant 0 : index
    %262 = vector.load %arg16[%c7_178, %c0_179, %c0_180] : memref<9x8x8xbf16, #tpu.memory_space<vmem>>, vector<1x8x8xbf16>
    %263 = vector.shape_cast %262 : vector<1x8x8xbf16> to vector<8x8xbf16>
    %cst_181 = arith.constant dense<0.000000e+00> : vector<256x8xf32>
    %264 = tpu.matmul %261, %263, %cst_181 {dimension_numbers = #tpu.dot_dimension_numbers<[1], [0], [0], [1], [0, 0, 1, 1], [], []>} : vector<256x8xbf16>, vector<8x8xbf16>, vector<256x8xf32> -> vector<256x8xf32>
    %265 = arith.addf %255, %264 : vector<256x8xf32>
    %c239_i32_182 = arith.constant 239 : i32
    %266 = tpu.dynamic_rotate %185 by %c239_i32_182 dim 0 : vector<256x8xf32>, i32 -> vector<256x8xf32>
    %c8_183 = arith.constant 8 : index
    %c0_184 = arith.constant 0 : index
    %c0_185 = arith.constant 0 : index
    %267 = vector.load %arg3[%c8_183, %c0_184, %c0_185] : memref<9x256x1xf32, #tpu.memory_space<vmem>>, vector<1x256x1xf32>
    %268 = vector.shape_cast %267 : vector<1x256x1xf32> to vector<256x1xf32>
    %269 = vector.broadcast %268 : vector<256x1xf32> to vector<256x8xf32>
    %270 = arith.mulf %266, %269 : vector<256x8xf32>
    %271 = arith.truncf %270 : vector<256x8xf32> to vector<256x8xbf16>
    %c8_186 = arith.constant 8 : index
    %c0_187 = arith.constant 0 : index
    %c0_188 = arith.constant 0 : index
    %272 = vector.load %arg16[%c8_186, %c0_187, %c0_188] : memref<9x8x8xbf16, #tpu.memory_space<vmem>>, vector<1x8x8xbf16>
    %273 = vector.shape_cast %272 : vector<1x8x8xbf16> to vector<8x8xbf16>
    %cst_189 = arith.constant dense<0.000000e+00> : vector<256x8xf32>
    %274 = tpu.matmul %271, %273, %cst_189 {dimension_numbers = #tpu.dot_dimension_numbers<[1], [0], [0], [1], [0, 0, 1, 1], [], []>} : vector<256x8xbf16>, vector<8x8xbf16>, vector<256x8xf32> -> vector<256x8xf32>
    %275 = arith.addf %265, %274 : vector<256x8xf32>
    %c0_190 = arith.constant 0 : index
    %c0_191 = arith.constant 0 : index
    %276 = vector.load %arg17[%c0_190, %c0_191] : memref<1x8xf32, #tpu.memory_space<vmem>>, vector<1x8xf32>
    %277 = vector.broadcast %276 : vector<1x8xf32> to vector<256x8xf32>
    %278 = arith.addf %275, %277 : vector<256x8xf32>
    %279 = arith.truncf %1 : vector<256x4xf32> to vector<256x4xbf16>
    %c0_192 = arith.constant 0 : index
    %c0_193 = arith.constant 0 : index
    %280 = vector.load %arg18[%c0_192, %c0_193] : memref<4x8xbf16, #tpu.memory_space<vmem>>, vector<4x8xbf16>
    %cst_194 = arith.constant dense<0.000000e+00> : vector<256x8xf32>
    %281 = tpu.matmul %279, %280, %cst_194 {dimension_numbers = #tpu.dot_dimension_numbers<[1], [0], [0], [1], [0, 0, 1, 1], [], []>} : vector<256x4xbf16>, vector<4x8xbf16>, vector<256x8xf32> -> vector<256x8xf32>
    %c0_195 = arith.constant 0 : index
    %c0_196 = arith.constant 0 : index
    %282 = vector.load %arg19[%c0_195, %c0_196] : memref<1x8xf32, #tpu.memory_space<vmem>>, vector<1x8xf32>
    %283 = vector.broadcast %282 : vector<1x8xf32> to vector<256x8xf32>
    %284 = arith.addf %281, %283 : vector<256x8xf32>
    %285 = arith.addf %284, %278 : vector<256x8xf32>
    %cst_197 = arith.constant 0.707106769 : f32
    %286 = vector.broadcast %cst_197 : f32 to vector<256x8xf32>
    %287 = arith.mulf %285, %286 : vector<256x8xf32>
    %c0_198 = arith.constant 0 : index
    %c0_199 = arith.constant 0 : index
    %c0_200 = arith.constant 0 : index
    %288 = vector.load %arg20[%c0_198, %c0_199, %c0_200] : memref<1x256x8xf32, #tpu.memory_space<vmem>>, vector<1x256x8xf32>
    %289 = vector.shape_cast %288 : vector<1x256x8xf32> to vector<256x8xf32>
    %290 = vector.shape_cast %287 : vector<256x8xf32> to vector<1x256x8xf32>
    tpu.vector_store %arg20[%c0_198, %c0_199, %c0_200], %290 {strides = array<i32>} : memref<1x256x8xf32, #tpu.memory_space<vmem>>, vector<1x256x8xf32>,
    return
  }
  func.func @transform_0(%arg0: i32) -> (i32, i32, i32) {
    %c0_i32 = arith.constant 0 : i32
    %c0_i32_0 = arith.constant 0 : i32
    %c0_i32_1 = arith.constant 0 : i32
    return %arg0, %c0_i32, %c0_i32_0 : i32, i32, i32
  }
  func.func @transform_1(%arg0: i32) -> (i32, i32, i32) {
    %c0_i32 = arith.constant 0 : i32
    %c0_i32_0 = arith.constant 0 : i32
    %c0_i32_1 = arith.constant 0 : i32
    return %arg0, %c0_i32, %c0_i32_0 : i32, i32, i32
  }
  func.func @transform_2(%arg0: i32) -> (i32, i32, i32) {
    %c0_i32 = arith.constant 0 : i32
    %c0_i32_0 = arith.constant 0 : i32
    %c0_i32_1 = arith.constant 0 : i32
    %c0_i32_2 = arith.constant 0 : i32
    return %c0_i32, %c0_i32_0, %c0_i32_1 : i32, i32, i32
  }
  func.func @transform_3(%arg0: i32) -> (i32, i32) {
    %c0_i32 = arith.constant 0 : i32
    %c0_i32_0 = arith.constant 0 : i32
    %c0_i32_1 = arith.constant 0 : i32
    return %c0_i32, %c0_i32_0 : i32, i32
  }
  func.func @transform_4(%arg0: i32) -> (i32, i32) {
    %c0_i32 = arith.constant 0 : i32
    %c0_i32_0 = arith.constant 0 : i32
    %c0_i32_1 = arith.constant 0 : i32
    return %c0_i32, %c0_i32_0 : i32, i32
  }
  func.func @transform_5(%arg0: i32) -> (i32, i32) {
    %c0_i32 = arith.constant 0 : i32
    %c0_i32_0 = arith.constant 0 : i32
    %c0_i32_1 = arith.constant 0 : i32
    return %c0_i32, %c0_i32_0 : i32, i32
  }
  func.func @transform_6(%arg0: i32) -> (i32, i32) {
    %c0_i32 = arith.constant 0 : i32
    %c0_i32_0 = arith.constant 0 : i32
    %c0_i32_1 = arith.constant 0 : i32
    return %c0_i32, %c0_i32_0 : i32, i32
  }
  func.func @transform_7(%arg0: i32) -> (i32, i32, i32) {
    %c0_i32 = arith.constant 0 : i32
    %c0_i32_0 = arith.constant 0 : i32
    %c0_i32_1 = arith.constant 0 : i32
    %c0_i32_2 = arith.constant 0 : i32
    return %c0_i32, %c0_i32_0, %c0_i32_1 : i32, i32, i32
  }
  func.func @transform_8(%arg0: i32) -> (i32, i32) {
    %c0_i32 = arith.constant 0 : i32
    %c0_i32_0 = arith.constant 0 : i32
    %c0_i32_1 = arith.constant 0 : i32
    return %c0_i32, %c0_i32_0 : i32, i32
  }
  func.func @transform_9(%arg0: i32) -> (i32, i32) {
    %c0_i32 = arith.constant 0 : i32
    %c0_i32_0 = arith.constant 0 : i32
    %c0_i32_1 = arith.constant 0 : i32
    return %c0_i32, %c0_i32_0 : i32, i32
  }
  func.func @transform_10(%arg0: i32) -> (i32, i32) {
    %c0_i32 = arith.constant 0 : i32
    %c0_i32_0 = arith.constant 0 : i32
    %c0_i32_1 = arith.constant 0 : i32
    return %c0_i32, %c0_i32_0 : i32, i32
  }
  func.func @transform_11(%arg0: i32) -> (i32, i32) {
    %c0_i32 = arith.constant 0 : i32
    %c0_i32_0 = arith.constant 0 : i32
    %c0_i32_1 = arith.constant 0 : i32
    return %c0_i32, %c0_i32_0 : i32, i32
  }
  func.func @transform_12(%arg0: i32) -> (i32, i32) {
    %c0_i32 = arith.constant 0 : i32
    %c0_i32_0 = arith.constant 0 : i32
    %c0_i32_1 = arith.constant 0 : i32
    return %c0_i32, %c0_i32_0 : i32, i32
  }
  func.func @transform_13(%arg0: i32) -> (i32, i32) {
    %c0_i32 = arith.constant 0 : i32
    %c0_i32_0 = arith.constant 0 : i32
    %c0_i32_1 = arith.constant 0 : i32
    return %c0_i32, %c0_i32_0 : i32, i32
  }
  func.func @transform_14(%arg0: i32) -> (i32, i32) {
    %c0_i32 = arith.constant 0 : i32
    %c0_i32_0 = arith.constant 0 : i32
    %c0_i32_1 = arith.constant 0 : i32
    return %c0_i32, %c0_i32_0 : i32, i32
  }
  func.func @transform_15(%arg0: i32) -> (i32, i32, i32) {
    %c0_i32 = arith.constant 0 : i32
    %c0_i32_0 = arith.constant 0 : i32
    %c0_i32_1 = arith.constant 0 : i32
    %c0_i32_2 = arith.constant 0 : i32
    return %c0_i32, %c0_i32_0, %c0_i32_1 : i32, i32, i32
  }
  func.func @transform_16(%arg0: i32) -> (i32, i32) {
    %c0_i32 = arith.constant 0 : i32
    %c0_i32_0 = arith.constant 0 : i32
    %c0_i32_1 = arith.constant 0 : i32
    return %c0_i32, %c0_i32_0 : i32, i32
  }
  func.func @transform_17(%arg0: i32) -> (i32, i32) {
    %c0_i32 = arith.constant 0 : i32
    %c0_i32_0 = arith.constant 0 : i32
    %c0_i32_1 = arith.constant 0 : i32
    return %c0_i32, %c0_i32_0 : i32, i32
  }
  func.func @transform_18(%arg0: i32) -> (i32, i32) {
    %c0_i32 = arith.constant 0 : i32
    %c0_i32_0 = arith.constant 0 : i32
    %c0_i32_1 = arith.constant 0 : i32
    return %c0_i32, %c0_i32_0 : i32, i32
  }
  func.func @transform_19(%arg0: i32) -> (i32, i32, i32) {
    %c0_i32 = arith.constant 0 : i32
    %c0_i32_0 = arith.constant 0 : i32
    %c0_i32_1 = arith.constant 0 : i32
    return %arg0, %c0_i32, %c0_i32_0 : i32, i32, i32
  }
}

</mosaic_0001>

<bundles_post_ra>
// kernel: tpu_custom_call.1
= control target key start
LH: loop header
LB: loop body
LE: loop exit
PB: predicated region body
PF: predicated region fallthrough
CT: control target
= control target key end

     0   :  { %s19802_s0 = inlined_call_operand.vmem [shape: f32[2,256,4], index: 0, kind: input, shape index: {}]   ;;  %s19803_s1 = inlined_call_operand.vmem [shape: f32[2,1,32], index: 1, kind: input, shape index: {}]   ;;  %s19804_s2 = inlined_call_operand.vmem [shape: f32[9,256,1], index: 2, kind: input, shape index: {}]   ;;  %s19805_s3 = inlined_call_operand.vmem [shape: f32[4,1], index: 3, kind: input, shape index: {}]   ;;  %s19806_s4 = inlined_call_operand.vmem [shape: f32[1,4], index: 4, kind: input, shape index: {}]   ;;  %s19807_s5 = inlined_call_operand.vmem [shape: f32[1,4], index: 5, kind: input, shape index: {}]   ;;  %s19808_s6 = inlined_call_operand.vmem [shape: f32[1,4], index: 6, kind: input, shape index: {}]   ;;  %s19809_s7 = inlined_call_operand.vmem [shape: bf16[9,4,8], index: 7, kind: input, shape index: {}]   ;;  %s19810_s8 = inlined_call_operand.vmem [shape: f32[1,8], index: 8, kind: input, shape index: {}]   ;;  %s19811_s9 = inlined_call_operand.vmem [shape: f32[32,8], index: 9, kind: input, shape index: {}]   ;;  %s19812_s10 = inlined_call_operand.vmem [shape: f32[1,8], index: 10, kind: input, shape index: {}]   ;;  %s19813_s11 = inlined_call_operand.vmem [shape: f32[8,2], index: 11, kind: input, shape index: {}]   ;;  %s19814_s12 = inlined_call_operand.vmem [shape: f32[2,8], index: 12, kind: input, shape index: {}]   ;;  %s19815_s13 = inlined_call_operand.vmem [shape: f32[1,8], index: 13, kind: input, shape index: {}]   ;;  %s19816_s14 = inlined_call_operand.vmem [shape: f32[1,8], index: 14, kind: input, shape index: {}]   ;;  %s19817_s15 = inlined_call_operand.vmem [shape: bf16[9,8,8], index: 15, kind: input, shape index: {}]   ;;  %s19818_s16 = inlined_call_operand.vmem [shape: f32[1,8], index: 16, kind: input, shape index: {}]   ;;  %s19819_s17 = inlined_call_operand.vmem [shape: bf16[4,8], index: 17, kind: input, shape index: {}]   ;;  %s19820_s18 = inlined_call_operand.vmem [shape: f32[1,8], index: 18, kind: input, shape index: {}]   ;;  %s19821_s19 = inlined_call_operand.vmem [shape: f32[2,256,8], index: 19, kind: output, shape index: {}]  }
   0x1   :  { %20543 = sst [smem:[#allocation539_spill]] %s19802_s0  ;;  %s12792_s0 = smov 0  }
   0x2   :  { %20544 = sst [smem:[#allocation540_spill]] %s19803_s1 }
   0x3   :  { %20545 = sst [smem:[#allocation541_spill]] %s19804_s2 }
   0x4   :  { %20546 = sst [smem:[#allocation542_spill]] %s19805_s3 }
   0x5 LB: > { %s10071_s30 = sadd.s32 4294967295, %s12686_s0   ;;  %p10075_p0 = scmp.ge.s32.totalorder %s12686_s0, 1  ;;  %s12686_s0 = sphi %s12792_s0, %s29_s0  }
   0x6   : > { %p545_p1 = scmp.lt.s32.totalorder %s12686_s0, 3 }
   0x8   : > { %p546_p2 = pnand %p10075_p0, %p545_p1 }
   0xa   : > { %549 = sbr.rel (%p546_p2) target bundleno = 3955 (0xf73), region = 96 }
  0x11   : > { %s20547_s1 = sld [smem:[#allocation542_spill]]  ;;  %vm724_vm0 = vcmask 1043456   ;;  %p604_p3 = scmp.lt.s32.totalorder %s10071_s30, 1  ;;  %v19823_v1 = vmov 0.0   ;;  %vm12689_vm1 = vmmov 0   ;;  %vm804_vm2 = vcmask 1040384  }
  0x12   : > { %11025 = vmatprep.subr.mxu0 %v19823_v1  ;;  %11027 = vmatprep.mubr.msk.f32.mxu0 %vm12689_vm1, %v19823_v1  ;;  %v12815_v2 = vld [vmem:[%s19806_s4] sm:$0x1]  ;;  %vm650_vm3 = vcmask 31744   ;;  %s20548_s3 = sld [smem:[#allocation539_spill]]  ;;  %s20549_s29 = sld [smem:[#allocation541_spill]]  ;;  %vm800_vm4 = vcmask 7168  }
  0x13   : > { %s22602_s30 = smov (!%p604_p3, %s10071_s30), 1  ;;  %11040 = vmatprep.subr.mxu1 %v19823_v1  ;;  %11042 = vmatprep.mubr.msk.f32.mxu1 %vm12689_vm1, %v19823_v1  ;;  %vm2065_vm7 = vcmask 1041408   ;;  %s21954_s25 = sld [smem:[#allocation540_spill]]  ;;  %vm5967_vm8 = vcmask 261120   ;;  %vm6116_vm9 = vcmask 64512   ;;  %vm6262_vm10 = vcmask 15360  }
  0x14   : > { %11041 = vmatpush3.msk.msra.mxu1 %vm804_vm2, %v12815_v2  ;;  %s10679_s23 = sshll.u32 %s22602_s30, 8 }
  0x15   : > { %s19686_s24 = scalar_lea.vmem %s19821_s19, %s10679_s23 }
  0x17   : > { %v12803_v0 = vld [vmem:[%s20547_s1] sm:$0xf] }
  0x18   : > { %11026 = vmatpush3.msk.msra.mxu0 %vm724_vm0, %v12803_v0  ;;  %s12829_s26 = scalar_lea.vmem %s20548_s3, %s10679_s23 }
  0x19   : > { %11030 = vmatprep.subr.mxu0 %v19823_v1  ;;  %v12832_v3 = vld [vmem:[%s12829_s26] sm:$0xff]  ;;  %v12835_v4 = vld [vmem:[%s12829_s26 + $0x8] sm:$0xff]  ;;  %v12838_v5 = vld [vmem:[%s12829_s26 + $0x10] sm:$0xff]  ;;  %s611_s3 = scalar_lea.vmem %s21954_s25, %s22602_s30 }
  0x1a   : > { %v12841_v6 = vld [vmem:[%s12829_s26 + $0x18] sm:$0xff]  ;;  %v651_v7 = vsel %vm650_vm3, %v12832_v3, 0.0  ;;  %v652_v8 = vsel %vm650_vm3, %v12835_v4, 0.0  ;;  %v654_v9 = vsel %vm650_vm3, %v12838_v5, 0.0  ;;  %v12850_v10 = vld [vmem:[%s12829_s26 + $0x20] sm:$0xff]  ;;  %v12855_v13 = vld [vmem:[%s12829_s26 + $0x28] sm:$0xff] }
  0x1b   : > { %v653_v11 = vadd.f32 %v652_v8, %v651_v7  ;;  %v656_v12 = vsel %vm650_vm3, %v12841_v6, 0.0  ;;  %v658_v15 = vsel %vm650_vm3, %v12850_v10, 0.0  ;;  %v12860_v16 = vld [vmem:[%s12829_s26 + $0x30] sm:$0xff]  ;;  %v660_v18 = vsel %vm650_vm3, %v12855_v13, 0.0  ;;  %v12865_v19 = vld [vmem:[%s12829_s26 + $0x38] sm:$0xff]  ;;  %v12870_v22 = vld [vmem:[%s12829_s26 + $0x40] sm:$0xff] }
  0x1c   : > { %v662_v21 = vsel %vm650_vm3, %v12860_v16, 0.0  ;;  %v664_v24 = vsel %vm650_vm3, %v12865_v19, 0.0  ;;  %v12875_v25 = vld [vmem:[%s12829_s26 + $0x48] sm:$0xff]  ;;  %v666_v27 = vsel %vm650_vm3, %v12870_v22, 0.0  ;;  %v12880_v28 = vld [vmem:[%s12829_s26 + $0x50] sm:$0xff]  ;;  %v12885_v31 = vld [vmem:[%s12829_s26 + $0x58] sm:$0xff] }
  0x1d   : > { %v655_v14 = vadd.f32 %v654_v9, %v653_v11  ;;  %v668_v30 = vsel %vm650_vm3, %v12875_v25, 0.0  ;;  %v670_v33 = vsel %vm650_vm3, %v12880_v28, 0.0  ;;  %v12890_v34 = vld [vmem:[%s12829_s26 + $0x60] sm:$0xff]  ;;  %v672_v36 = vsel %vm650_vm3, %v12885_v31, 0.0  ;;  %v12895_v37 = vld [vmem:[%s12829_s26 + $0x68] sm:$0xff]  ;;  %v12900_v40 = vld [vmem:[%s12829_s26 + $0x70] sm:$0xff] }
  0x1e   : > { %v674_v39 = vsel %vm650_vm3, %v12890_v34, 0.0  ;;  %v676_v42 = vsel %vm650_vm3, %v12895_v37, 0.0  ;;  %v12905_v43 = vld [vmem:[%s12829_s26 + $0x78] sm:$0xff]  ;;  %v678_v45 = vsel %vm650_vm3, %v12900_v40, 0.0  ;;  %v12910_v46 = vld [vmem:[%s12829_s26 + $0x80] sm:$0xff]  ;;  %v12915_v49 = vld [vmem:[%s12829_s26 + $0x88] sm:$0xff] }
  0x1f   : > { %v657_v17 = vadd.f32 %v656_v12, %v655_v14  ;;  %v680_v48 = vsel %vm650_vm3, %v12905_v43, 0.0  ;;  %v682_v51 = vsel %vm650_vm3, %v12910_v46, 0.0  ;;  %v12920_v52 = vld [vmem:[%s12829_s26 + $0x90] sm:$0xff]  ;;  %v684_v54 = vsel %vm650_vm3, %v12915_v49, 0.0  ;;  %v12925_v55 = vld [vmem:[%s12829_s26 + $0x98] sm:$0xff]  ;;  %v638_v58 = vld [vmem:[%s12829_s26 + $0xa0] sm:$0xff] }
  0x20   : > { %v686_v57 = vsel %vm650_vm3, %v12920_v52, 0.0  ;;  %v688_v60 = vsel %vm650_vm3, %v12925_v55, 0.0  ;;  %v639_v61 = vld [vmem:[%s12829_s26 + $0xa8] sm:$0xff]  ;;  %v690_v63 = vsel %vm650_vm3, %v638_v58, 0.0  ;;  %v640_v7 = vld [vmem:[%s12829_s26 + $0xb0] sm:$0xff]  ;;  %v641_v11 = vld [vmem:[%s12829_s26 + $0xb8] sm:$0xff] }
  0x21   : > { %v659_v20 = vadd.f32 %v658_v15, %v657_v17  ;;  %v692_v9 = vsel %vm650_vm3, %v639_v61, 0.0  ;;  %v694_v14 = vsel %vm650_vm3, %v640_v7, 0.0  ;;  %v642_v15 = vld [vmem:[%s12829_s26 + $0xc0] sm:$0xff]  ;;  %v10091_v7 = vld [vmem:[%s20549_s29 + $0x110] sm:$0xff] }
  0x23   : > { %v661_v23 = vadd.f32 %v660_v18, %v659_v20  ;;  %v696_v18 = vsel %vm650_vm3, %v641_v11, 0.0  ;;  %v643_v20 = vld [vmem:[%s12829_s26 + $0xc8] sm:$0xff]  ;;  %v10093_v11 = vld [vmem:[%s20549_s29 + $0x120] sm:$0xff] }
  0x25   : > { %v663_v26 = vadd.f32 %v662_v21, %v661_v23  ;;  %v698_v23 = vsel %vm650_vm3, %v642_v15, 0.0  ;;  %v10096_v15 = vld [vmem:[%s20549_s29 + $0x138] sm:$0xff] }
  0x27   : > { %v665_v29 = vadd.f32 %v664_v24, %v663_v26  ;;  %v644_v24 = vld [vmem:[%s12829_s26 + $0xd0] sm:$0xff] }
  0x29   : > { %v667_v32 = vadd.f32 %v666_v27, %v665_v29  ;;  %v700_v27 = vsel %vm650_vm3, %v643_v20, 0.0  ;;  %v645_v29 = vld [vmem:[%s12829_s26 + $0xd8] sm:$0xff]  ;;  %v10099_v20 = vld [vmem:[%s20549_s29 + $0x150] sm:$0xff] }
  0x2b   : > { %v669_v35 = vadd.f32 %v668_v30, %v667_v32  ;;  %v702_v32 = vsel %vm650_vm3, %v644_v24, 0.0  ;;  %v10102_v24 = vld [vmem:[%s20549_s29 + $0x168] sm:$0xff] }
  0x2d   : > { %v671_v38 = vadd.f32 %v670_v33, %v669_v35  ;;  %v646_v33 = vld [vmem:[%s12829_s26 + $0xe0] sm:$0xff] }
  0x2f   : > { %v673_v41 = vadd.f32 %v672_v36, %v671_v38  ;;  %v704_v36 = vsel %vm650_vm3, %v645_v29, 0.0  ;;  %v647_v38 = vld [vmem:[%s12829_s26 + $0xe8] sm:$0xff]  ;;  %v10105_v29 = vld [vmem:[%s20549_s29 + $0x180] sm:$0xff] }
  0x31   : > { %v675_v44 = vadd.f32 %v674_v39, %v673_v41  ;;  %v706_v41 = vsel %vm650_vm3, %v646_v33, 0.0  ;;  %v10108_v33 = vld [vmem:[%s20549_s29 + $0x198] sm:$0xff] }
  0x33   : > { %v677_v47 = vadd.f32 %v676_v42, %v675_v44  ;;  %v648_v42 = vld [vmem:[%s12829_s26 + $0xf0] sm:$0xff] }
  0x35   : > { %v679_v50 = vadd.f32 %v678_v45, %v677_v47  ;;  %v708_v45 = vsel %vm650_vm3, %v647_v38, 0.0  ;;  %v649_v47 = vld [vmem:[%s12829_s26 + $0xf8] sm:$0xff]  ;;  %v10111_v38 = vld [vmem:[%s20549_s29 + $0x1b0] sm:$0xff] }
  0x37   : > { %v681_v53 = vadd.f32 %v680_v48, %v679_v50  ;;  %v710_v50 = vsel %vm650_vm3, %v648_v42, 0.0  ;;  %v10114_v42 = vld [vmem:[%s20549_s29 + $0x1c8] sm:$0xff] }
  0x39   : > { %v683_v56 = vadd.f32 %v682_v51, %v681_v53  ;;  %v712_v53 = vsel %vm650_vm3, %v649_v47, 0.0  ;;  %v10117_v47 = vld [vmem:[%s20549_s29 + $0x1e0] sm:$0xff] }
  0x3b   : > { %v685_v59 = vadd.f32 %v684_v54, %v683_v56 }
  0x3d   : > { %v687_v62 = vadd.f32 %v686_v57, %v685_v59 }
  0x3f   : > { %v689_v8 = vadd.f32 %v688_v60, %v687_v62 }
  0x41   : > { %v691_v12 = vadd.f32 %v690_v63, %v689_v8  ;;  %v10089_v63 = vld [vmem:[%s20549_s29 + $0x100] sm:$0xff]  ;;  %v12690_v8 = vmov 0  }
  0x42   : > { %12370 = vset.pattern.permute.xlu0 %v12690_v8  ;;  %12371 = vset.pattern.permute.xlu1 %v12690_v8  ;;  %v1544_v8 = vld [vmem:[%s20549_s29 + $0x58] sm:$0xff] }
  0x43   : > { %v693_v17 = vadd.f32 %v692_v9, %v691_v12  ;;  %1809 = vperm.xlu0 %12370, %v10089_v63   ;;  %1819 = vperm.xlu1 %12371, %v10091_v7   ;;  %v10092_v9 = vld [vmem:[%s20549_s29 + $0x118] sm:$0xff]  ;;  %v10094_v12 = vld [vmem:[%s20549_s29 + $0x128] sm:$0xff]  ;;  %v1543_v7 = vld [vmem:[%s20549_s29 + $0x50] sm:$0xff] }
  0x44   : > { %v1542_v63 = vld [vmem:[%s20549_s29 + $0x48] sm:$0xff] }
  0x45   : > { %v695_v21 = vadd.f32 %v694_v14, %v693_v17  ;;  %v10095_v14 = vld [vmem:[%s20549_s29 + $0x130] sm:$0xff]  ;;  %v10097_v17 = vld [vmem:[%s20549_s29 + $0x140] sm:$0xff] }
  0x47   : > { %v697_v26 = vadd.f32 %v696_v18, %v695_v21  ;;  %1824 = vperm.xlu1 %12371, %v10092_v9   ;;  %v10098_v18 = vld [vmem:[%s20549_s29 + $0x148] sm:$0xff]  ;;  %v10100_v21 = vld [vmem:[%s20549_s29 + $0x158] sm:$0xff] }
  0x48   : > { %v1546_v9 = vld [vmem:[%s20549_s29 + $0x68] sm:$0xff] }
  0x49   : > { %v699_v30 = vadd.f32 %v698_v23, %v697_v26  ;;  %v10101_v23 = vld [vmem:[%s20549_s29 + $0x160] sm:$0xff]  ;;  %v10103_v26 = vld [vmem:[%s20549_s29 + $0x170] sm:$0xff] }
  0x4b   : > { %v701_v35 = vadd.f32 %v700_v27, %v699_v30  ;;  %1834 = vperm.xlu1 %12371, %v10094_v12   ;;  %v10104_v27 = vld [vmem:[%s20549_s29 + $0x178] sm:$0xff]  ;;  %v10106_v30 = vld [vmem:[%s20549_s29 + $0x188] sm:$0xff] }
  0x4c   : > { %v1548_v12 = vld [vmem:[%s20549_s29 + $0x78] sm:$0xff] }
  0x4d   : > { %v703_v39 = vadd.f32 %v702_v32, %v701_v35  ;;  %v10107_v32 = vld [vmem:[%s20549_s29 + $0x190] sm:$0xff]  ;;  %v10109_v35 = vld [vmem:[%s20549_s29 + $0x1a0] sm:$0xff] }
  0x4f   : > { %v705_v44 = vadd.f32 %v704_v36, %v703_v39  ;;  %1844 = vperm.xlu1 %12371, %v10096_v15   ;;  %v10110_v36 = vld [vmem:[%s20549_s29 + $0x1a8] sm:$0xff]  ;;  %v10112_v39 = vld [vmem:[%s20549_s29 + $0x1b8] sm:$0xff] }
  0x50   : > { %v1550_v15 = vld [vmem:[%s20549_s29 + $0x88] sm:$0xff] }
  0x51   : > { %v707_v48 = vadd.f32 %v706_v41, %v705_v44  ;;  %v10113_v41 = vld [vmem:[%s20549_s29 + $0x1c0] sm:$0xff]  ;;  %v10115_v44 = vld [vmem:[%s20549_s29 + $0x1d0] sm:$0xff] }
  0x53   : > { %v709_v51 = vadd.f32 %v708_v45, %v707_v48  ;;  %1854 = vperm.xlu1 %12371, %v10098_v18   ;;  %v10116_v45 = vld [vmem:[%s20549_s29 + $0x1d8] sm:$0xff]  ;;  %v10118_v48 = vld [vmem:[%s20549_s29 + $0x1e8] sm:$0xff] }
  0x54   : > { %v1552_v18 = vld [vmem:[%s20549_s29 + $0x98] sm:$0xff] }
  0x55   : > { %v711_v54 = vadd.f32 %v710_v50, %v709_v51  ;;  %v10119_v50 = vld [vmem:[%s20549_s29 + $0x1f0] sm:$0xff]  ;;  %v10120_v51 = vld [vmem:[%s20549_s29 + $0x1f8] sm:$0xff] }
  0x57   : > { %v713_v56 = vadd.f32 %v712_v53, %v711_v54  ;;  %1864 = vperm.xlu1 %12371, %v10100_v21   ;;  %v1533_v53 = vld [vmem:[%s20549_s29] sm:$0xff]  ;;  %v1534_v54 = vld [vmem:[%s20549_s29 + $0x8] sm:$0xff] }
  0x58   : > { %v1554_v21 = vld [vmem:[%s20549_s29 + $0xa8] sm:$0xff] }
  0x59   : > { %v714_v57 = vrot.slane %v713_v56, 4 }
  0x5b   : > { %v715_v58 = vadd.f32 %v714_v57, %v713_v56  ;;  %1874 = vperm.xlu1 %12371, %v10102_v24   ;;  %v1535_v56 = vld [vmem:[%s20549_s29 + $0x10] sm:$0xff]  ;;  %v1536_v57 = vld [vmem:[%s20549_s29 + $0x18] sm:$0xff] }
  0x5c   : > { %v1556_v24 = vld [vmem:[%s20549_s29 + $0xb8] sm:$0xff] }
  0x5d   : > { %v716_v59 = vrot.slane %v715_v58, 2 }
  0x5f   : > { %v717_v60 = vadd.f32 %v716_v59, %v715_v58  ;;  %1884 = vperm.xlu1 %12371, %v10104_v27   ;;  %v1537_v58 = vld [vmem:[%s20549_s29 + $0x20] sm:$0xff]  ;;  %v1538_v59 = vld [vmem:[%s20549_s29 + $0x28] sm:$0xff] }
  0x60   : > { %v1558_v27 = vld [vmem:[%s20549_s29 + $0xc8] sm:$0xff] }
  0x61   : > { %v718_v61 = vrot.slane %v717_v60, 1 }
  0x63   : > { %v719_v62 = vadd.f32 %v718_v61, %v717_v60  ;;  %1894 = vperm.xlu1 %12371, %v10106_v30   ;;  %v1539_v60 = vld [vmem:[%s20549_s29 + $0x30] sm:$0xff]  ;;  %v1540_v61 = vld [vmem:[%s20549_s29 + $0x38] sm:$0xff] }
  0x64   : > { %v1560_v30 = vld [vmem:[%s20549_s29 + $0xd8] sm:$0xff] }
  0x65   : > { %11028 = vmatmul.mubr.msk.f32.vlgmr.msra.gmra.mrb[0].mxu0 %vm650_vm3, %v719_v62  ;;  %v1541_v62 = vld [vmem:[%s20549_s29 + $0x40] sm:$0xff] }
  0x66   : > { %11031 = vmatpush3.msk.msra.mxu0 %vm804_vm2, %v12815_v2  ;;  %11032 = vmatprep.mubr.msk.f32.mxu0 %vm12689_vm1, %v19823_v1  ;;  %v10090_v2 = vld [vmem:[%s20549_s29 + $0x108] sm:$0xff] }
  0x67   : > { %11035 = vmatprep.subr.mxu0 %v19823_v1  ;;  %1814 = vperm.xlu0 %12370, %v10090_v2   ;;  %v1545_v2 = vld [vmem:[%s20549_s29 + $0x60] sm:$0xff] }
  0x68   : > { %1904 = vperm.xlu1 %12371, %v10108_v33   ;;  %v1562_v33 = vld [vmem:[%s20549_s29 + $0xe8] sm:$0xff] }
  0x6b   : > { %1829 = vperm.xlu0 %12370, %v10093_v11   ;;  %v1547_v11 = vld [vmem:[%s20549_s29 + $0x70] sm:$0xff] }
  0x6c   : > { %1914 = vperm.xlu1 %12371, %v10110_v36   ;;  %v1564_v36 = vld [vmem:[%s20549_s29 + $0xf8] sm:$0xff] }
  0x6f   : > { %1839 = vperm.xlu0 %12370, %v10095_v14   ;;  %v1549_v14 = vld [vmem:[%s20549_s29 + $0x80] sm:$0xff] }
  0x70   : > { %1924 = vperm.xlu1 %12371, %v10112_v39  }
  0x73   : > { %1849 = vperm.xlu0 %12370, %v10097_v17   ;;  %v1551_v17 = vld [vmem:[%s20549_s29 + $0x90] sm:$0xff] }
  0x74   : > { %1934 = vperm.xlu1 %12371, %v10114_v42   ;;  %v10154_v42 = vld [vmem:[%s20549_s29 + $0x200] sm:$0xff] }
  0x77   : > { %1859 = vperm.xlu0 %12370, %v10099_v20   ;;  %v1553_v20 = vld [vmem:[%s20549_s29 + $0xa0] sm:$0xff] }
  0x78   : > { %1944 = vperm.xlu1 %12371, %v10116_v45   ;;  %v10156_v45 = vld [vmem:[%s20549_s29 + $0x210] sm:$0xff] }
  0x7b   : > { %1869 = vperm.xlu0 %12370, %v10101_v23   ;;  %v1555_v23 = vld [vmem:[%s20549_s29 + $0xb0] sm:$0xff] }
  0x7c   : > { %1954 = vperm.xlu1 %12371, %v10118_v48   ;;  %v10158_v48 = vld [vmem:[%s20549_s29 + $0x220] sm:$0xff] }
  0x7f   : > { %1879 = vperm.xlu0 %12370, %v10103_v26   ;;  %v1557_v26 = vld [vmem:[%s20549_s29 + $0xc0] sm:$0xff] }
  0x80   : > { %1964 = vperm.xlu1 %12371, %v10120_v51   ;;  %v10161_v51 = vld [vmem:[%s20549_s29 + $0x238] sm:$0xff] }
  0x83   : > { %1889 = vperm.xlu0 %12370, %v10105_v29   ;;  %v1559_v29 = vld [vmem:[%s20549_s29 + $0xd0] sm:$0xff] }
  0x84   : > { %1572 = vperm.xlu1 %12371, %v1534_v54   ;;  %v10163_v54 = vld [vmem:[%s20549_s29 + $0x248] sm:$0xff] }
  0x87   : > { %1899 = vperm.xlu0 %12370, %v10107_v32   ;;  %v1561_v32 = vld [vmem:[%s20549_s29 + $0xe0] sm:$0xff] }
  0x88   : > { %1582 = vperm.xlu1 %12371, %v1536_v57  }
  0x8b   : > { %1909 = vperm.xlu0 %12370, %v10109_v35   ;;  %v1563_v35 = vld [vmem:[%s20549_s29 + $0xf0] sm:$0xff] }
  0x8c   : > { %1592 = vperm.xlu1 %12371, %v1538_v59  }
  0x8f   : > { %1919 = vperm.xlu0 %12370, %v10111_v38  }
  0x90   : > { %1602 = vperm.xlu1 %12371, %v1540_v61  }
  0x93   : > { %1929 = vperm.xlu0 %12370, %v10113_v41  }
  0x94   : > { %1612 = vperm.xlu1 %12371, %v1542_v63  }
  0x97   : > { %1939 = vperm.xlu0 %12370, %v10115_v44   ;;  %v10155_v44 = vld [vmem:[%s20549_s29 + $0x208] sm:$0xff] }
  0x98   : > { %1622 = vperm.xlu1 %12371, %v1544_v8  }
  0x9b   : > { %1949 = vperm.xlu0 %12370, %v10117_v47   ;;  %v10157_v47 = vld [vmem:[%s20549_s29 + $0x218] sm:$0xff] }
  0x9c   : > { %1632 = vperm.xlu1 %12371, %v1546_v9  }
  0x9f   : > { %1959 = vperm.xlu0 %12370, %v10119_v50   ;;  %v10160_v50 = vld [vmem:[%s20549_s29 + $0x230] sm:$0xff] }
  0xa0   : > { %1642 = vperm.xlu1 %12371, %v1548_v12   ;;  %v10165_v12 = vld [vmem:[%s20549_s29 + $0x258] sm:$0xff] }
  0xa3   : > { %1567 = vperm.xlu0 %12370, %v1533_v53   ;;  %v10162_v53 = vld [vmem:[%s20549_s29 + $0x240] sm:$0xff] }
  0xa4   : > { %1652 = vperm.xlu1 %12371, %v1550_v15   ;;  %v10166_v15 = vld [vmem:[%s20549_s29 + $0x260] sm:$0xff] }
  0xa7   : > { %1577 = vperm.xlu0 %12370, %v1535_v56  }
  0xa8   : > { %1662 = vperm.xlu1 %12371, %v1552_v18   ;;  %v10167_v18 = vld [vmem:[%s20549_s29 + $0x268] sm:$0xff] }
  0xab   : > { %1587 = vperm.xlu0 %12370, %v1537_v58  }
  0xac   : > { %1672 = vperm.xlu1 %12371, %v1554_v21   ;;  %v10168_v21 = vld [vmem:[%s20549_s29 + $0x270] sm:$0xff] }
  0xaf   : > { %1597 = vperm.xlu0 %12370, %v1539_v60  }
  0xb0   : > { %1682 = vperm.xlu1 %12371, %v1556_v24  }
  0xb3   : > { %1607 = vperm.xlu0 %12370, %v1541_v62  }
  0xb4   : > { %1692 = vperm.xlu1 %12371, %v1558_v27   ;;  %v10170_v27 = vld [vmem:[%s20549_s29 + $0x280] sm:$0xff] }
  0xb7   : > { %1617 = vperm.xlu0 %12370, %v1543_v7  }
  0xb8   : > { %1702 = vperm.xlu1 %12371, %v1560_v30  }
  0xbb   : > { %1627 = vperm.xlu0 %12370, %v1545_v2  }
  0xbc   : > { %1712 = vperm.xlu1 %12371, %v1562_v33   ;;  %v10172_v33 = vld [vmem:[%s20549_s29 + $0x290] sm:$0xff] }
  0xbf   : > { %1637 = vperm.xlu0 %12370, %v1547_v11   ;;  %v10164_v11 = vld [vmem:[%s20549_s29 + $0x250] sm:$0xff] }
  0xc0   : > { %1722 = vperm.xlu1 %12371, %v1564_v36   ;;  %v10173_v36 = vld [vmem:[%s20549_s29 + $0x298] sm:$0xff] }
  0xc2   : > { %v13188_v56 = vpop.permute.xlu0 %1809  ;;  %v13190_v57 = vpop.permute.xlu1 %1819 }
  0xc3   : > { %1647 = vperm.xlu0 %12370, %v1549_v14   ;;  %20550 = vst [vmem:[#allocation2_spill] sm:$0xff] %v13188_v56  ;;  %20551 = vst [vmem:[#allocation3_spill] sm:$0xff] %v13190_v57 }
  0xc4   : > { %2547 = vperm.xlu1 %12371, %v10155_v44  }
  0xc6   : > { %v13194_v59 = vpop.permute.xlu1 %1824 }
  0xc7   : > { %1657 = vperm.xlu0 %12370, %v1551_v17   ;;  %20553 = vst [vmem:[#allocation5_spill] sm:$0xff] %v13194_v59 }
  0xc8   : > { %2557 = vperm.xlu1 %12371, %v10157_v47  }
  0xca   : > { %v13198_v61 = vpop.permute.xlu1 %1834 }
  0xcb   : > { %1667 = vperm.xlu0 %12370, %v1553_v20   ;;  %20555 = vst [vmem:[#allocation7_spill] sm:$0xff] %v13198_v61 }
  0xce   : > { %v13202_v63 = vpop.permute.xlu1 %1844 }
  0xcf   : > { %1677 = vperm.xlu0 %12370, %v1555_v23   ;;  %20557 = vst [vmem:[#allocation9_spill] sm:$0xff] %v13202_v63  ;;  %v10169_v23 = vld [vmem:[%s20549_s29 + $0x278] sm:$0xff] }
  0xd2   : > { %v13206_v8 = vpop.permute.xlu1 %1854 }
  0xd3   : > { %1687 = vperm.xlu0 %12370, %v1557_v26   ;;  %20559 = vst [vmem:[#allocation11_spill] sm:$0xff] %v13206_v8 }
  0xd6   : > { %v13210_v9 = vpop.permute.xlu1 %1864 }
  0xd7   : > { %1697 = vperm.xlu0 %12370, %v1559_v29   ;;  %20561 = vst [vmem:[#allocation13_spill] sm:$0xff] %v13210_v9  ;;  %v10171_v29 = vld [vmem:[%s20549_s29 + $0x288] sm:$0xff] }
  0xda   : > { %v13223_v17 = vpop.permute.xlu1 %1874 }
  0xdb   : > { %1707 = vperm.xlu0 %12370, %v1561_v32   ;;  %20563 = vst [vmem:[#allocation15_spill] sm:$0xff] %v13223_v17 }
  0xde   : > { %v13236_v24 = vpop.permute.xlu1 %1884 }
  0xdf   : > { %1717 = vperm.xlu0 %12370, %v1563_v35   ;;  %20565 = vst [vmem:[#allocation17_spill] sm:$0xff] %v13236_v24 }
  0xe2   : > { %v13246_v30 = vpop.permute.xlu1 %1894 }
  0xe3   : > { %2542 = vperm.xlu0 %12370, %v10154_v42   ;;  %20567 = vst [vmem:[#allocation19_spill] sm:$0xff] %v13246_v30  ;;  %v10175_v42 = vld [vmem:[%s20549_s29 + $0x2a8] sm:$0xff] }
  0xe6   : > { %v13192_v58 = vpop.permute.xlu0 %1814 }
  0xe7   : > { %2552 = vperm.xlu0 %12370, %v10156_v45   ;;  %20552 = vst [vmem:[#allocation4_spill] sm:$0xff] %v13192_v58  ;;  %v13253_v35 = vpop.permute.xlu1 %1904  ;;  %v10176_v45 = vld [vmem:[%s20549_s29 + $0x2b0] sm:$0xff] }
  0xe8   : > { %20569 = vst [vmem:[#allocation21_spill] sm:$0xff] %v13253_v35 }
  0xea   : > { %v13196_v60 = vpop.permute.xlu0 %1829 }
  0xeb   : > { %2562 = vperm.xlu0 %12370, %v10158_v48   ;;  %20554 = vst [vmem:[#allocation6_spill] sm:$0xff] %v13196_v60  ;;  %v10177_v48 = vld [vmem:[%s20549_s29 + $0x2b8] sm:$0xff] }
  0xee   : > { %v13200_v62 = vpop.permute.xlu0 %1839 }
  0xef   : > { %2572 = vperm.xlu0 %12370, %v10160_v50   ;;  %20556 = vst [vmem:[#allocation8_spill] sm:$0xff] %v13200_v62 }
  0xf2   : > { %v13204_v7 = vpop.permute.xlu0 %1849 }
  0xf3   : > { %2582 = vperm.xlu0 %12370, %v10162_v53   ;;  %20558 = vst [vmem:[#allocation10_spill] sm:$0xff] %v13204_v7  ;;  %v10179_v53 = vld [vmem:[%s20549_s29 + $0x2c8] sm:$0xff] }
  0xf6   : > { %v13208_v2 = vpop.permute.xlu0 %1859 }
  0xf7   : > { %20560 = vst [vmem:[#allocation12_spill] sm:$0xff] %v13208_v2  ;;  %2592 = vperm.xlu0 %12370, %v10164_v11   ;;  %v10180_v11 = vld [vmem:[%s20549_s29 + $0x2d0] sm:$0xff]  ;;  %v12636_v2 = vld [vmem:[%s12829_s26 + $0xa0] sm:$0xff] }
  0xfa   : > { %v13218_v14 = vpop.permute.xlu0 %1869 }
  0xfb   : > { %20562 = vst [vmem:[#allocation14_spill] sm:$0xff] %v13218_v14  ;;  %2602 = vperm.xlu0 %12370, %v10166_v15   ;;  %v10181_v15 = vld [vmem:[%s20549_s29 + $0x2d8] sm:$0xff] }
  0xfe   : > { %v13228_v20 = vpop.permute.xlu0 %1879 }
  0xff   : > { %20564 = vst [vmem:[#allocation16_spill] sm:$0xff] %v13228_v20  ;;  %2612 = vperm.xlu0 %12370, %v10168_v21   ;;  %v10182_v21 = vld [vmem:[%s20549_s29 + $0x2e0] sm:$0xff] }
 0x102   : > { %v13238_v26 = vpop.permute.xlu0 %1889 }
 0x103   : > { %20566 = vst [vmem:[#allocation18_spill] sm:$0xff] %v13238_v26  ;;  %2622 = vperm.xlu0 %12370, %v10170_v27   ;;  %v10183_v27 = vld [vmem:[%s20549_s29 + $0x2e8] sm:$0xff] }
 0x106   : > { %v13248_v32 = vpop.permute.xlu0 %1899 }
 0x107   : > { %20568 = vst [vmem:[#allocation20_spill] sm:$0xff] %v13248_v32  ;;  %2632 = vperm.xlu0 %12370, %v10172_v33  }
 0x138   : > { %v794_v38 = vpop.f32.mrb[0].mxu0 }
 0x139   : > { %v798_v39 = vmul.f32 0.0009765625, %v794_v38  ;;  %v11029_v41 = vpop.f32.mrb[1].mxu0  ;;  %v13258_v38 = vpop.permute.xlu0 %1909 }
 0x13a   : > { %20570 = vst [vmem:[#allocation22_spill] sm:$0xff] %v13258_v38  ;;  %v10174_v41 = vld [vmem:[%s20549_s29 + $0x2a0] sm:$0xff] }
 0x13b   : > { %11033 = vmatmul.mubr.msk.f32.vlgmr.msra.gmra.mrb[2].mxu0 %vm800_vm4, %v798_v39  ;;  %v13260_v39 = vpop.permute.xlu1 %1914  ;;  %2642 = vperm.xlu0 %12370, %v10174_v41  }
 0x13c   : > { %11036 = vmatpush3.msk.msra.mxu0 %vm724_vm0, %v12803_v0  ;;  %11037 = vmatprep.mubr.msk.f32.mxu0 %vm12689_vm1, %v19823_v1  ;;  %v10159_v0 = vld [vmem:[%s20549_s29 + $0x228] sm:$0xff]  ;;  %20571 = vst [vmem:[#allocation23_spill] sm:$0xff] %v13260_v39 }
 0x13d   : > { %2567 = vperm.xlu1 %12371, %v10159_v0   ;;  %v13268_v44 = vpop.permute.xlu0 %1919 }
 0x13e   : > { %20572 = vst [vmem:[#allocation24_spill] sm:$0xff] %v13268_v44 }
 0x13f   : > { %v13273_v47 = vpop.permute.xlu1 %1924  ;;  %2652 = vperm.xlu0 %12370, %v10176_v45  }
 0x140   : > { %20573 = vst [vmem:[#allocation25_spill] sm:$0xff] %v13273_v47 }
 0x141   : > { %2577 = vperm.xlu1 %12371, %v10161_v51   ;;  %v13278_v0 = vpop.permute.xlu0 %1929  ;;  %v10178_v51 = vld [vmem:[%s20549_s29 + $0x2c0] sm:$0xff] }
 0x142   : > { %20574 = vst [vmem:[#allocation26_spill] sm:$0xff] %v13278_v0 }
 0x143   : > { %v13280_v50 = vpop.permute.xlu1 %1934  ;;  %2662 = vperm.xlu0 %12370, %v10178_v51  }
 0x144   : > { %20575 = vst [vmem:[#allocation27_spill] sm:$0xff] %v13280_v50 }
 0x145   : > { %2587 = vperm.xlu1 %12371, %v10163_v54   ;;  %v13288_v54 = vpop.permute.xlu0 %1939 }
 0x146   : > { %20576 = vst [vmem:[#allocation28_spill] sm:$0xff] %v13288_v54 }
 0x147   : > { %2672 = vperm.xlu0 %12370, %v10180_v11  }
 0x149   : > { %2597 = vperm.xlu1 %12371, %v10165_v12   ;;  %v13293_v12 = vpop.permute.xlu1 %1944 }
 0x14a   : > { %20577 = vst [vmem:[#allocation29_spill] sm:$0xff] %v13293_v12 }
 0x14b   : > { %2682 = vperm.xlu0 %12370, %v10182_v21  }
 0x14d   : > { %2607 = vperm.xlu1 %12371, %v10167_v18   ;;  %v13298_v18 = vpop.permute.xlu0 %1949 }
 0x14e   : > { %20578 = vst [vmem:[#allocation30_spill] sm:$0xff] %v13298_v18 }
 0x151   : > { %2617 = vperm.xlu1 %12371, %v10169_v23   ;;  %v13303_v23 = vpop.permute.xlu1 %1954  ;;  %v13311_v33 = vpop.permute.xlu0 %1959 }
 0x152   : > { %20579 = vst [vmem:[#allocation31_spill] sm:$0xff] %v13303_v23  ;;  %20580 = vst [vmem:[#allocation32_spill] sm:$0xff] %v13311_v33 }
 0x155   : > { %2627 = vperm.xlu1 %12371, %v10171_v29   ;;  %v10184_v29 = vld [vmem:[%s20549_s29 + $0x2f0] sm:$0xff]  ;;  %v13316_v41 = vpop.permute.xlu1 %1964  ;;  %v13321_v45 = vpop.permute.xlu0 %1567 }
 0x156   : > { %20581 = vst [vmem:[#allocation33_spill] sm:$0xff] %v13316_v41  ;;  %2692 = vperm.xlu0 %12370, %v10184_v29   ;;  %20582 = vst [vmem:[#allocation34_spill] sm:$0xff] %v13321_v45  ;;  %v10223_v45 = vld [vmem:[%s20549_s29 + $0x3a0] sm:$0xff] }
 0x159   : > { %2637 = vperm.xlu1 %12371, %v10173_v36   ;;  %v10185_v36 = vld [vmem:[%s20549_s29 + $0x2f8] sm:$0xff]  ;;  %v13326_v51 = vpop.permute.xlu1 %1572  ;;  %v13331_v11 = vpop.permute.xlu0 %1577 }
 0x15a   : > { %20583 = vst [vmem:[#allocation35_spill] sm:$0xff] %v13326_v51  ;;  %20584 = vst [vmem:[#allocation36_spill] sm:$0xff] %v13331_v11  ;;  %v10221_v11 = vld [vmem:[%s20549_s29 + $0x390] sm:$0xff] }
 0x15d   : > { %2647 = vperm.xlu1 %12371, %v10175_v42   ;;  %v10203_v42 = vld [vmem:[%s20549_s29 + $0x300] sm:$0xff]  ;;  %v13336_v21 = vpop.permute.xlu1 %1582  ;;  %v13341_v29 = vpop.permute.xlu0 %1587 }
 0x15e   : > { %3029 = vperm.xlu0 %12370, %v10203_v42   ;;  %20585 = vst [vmem:[#allocation37_spill] sm:$0xff] %v13336_v21  ;;  %20586 = vst [vmem:[#allocation38_spill] sm:$0xff] %v13341_v29 }
 0x161   : > { %2657 = vperm.xlu1 %12371, %v10177_v48   ;;  %v10204_v48 = vld [vmem:[%s20549_s29 + $0x308] sm:$0xff]  ;;  %v13346_v42 = vpop.permute.xlu1 %1592 }
 0x162   : > { %20587 = vst [vmem:[#allocation39_spill] sm:$0xff] %v13346_v42  ;;  %v10211_v42 = vld [vmem:[%s20549_s29 + $0x340] sm:$0xff] }
 0x165   : > { %2667 = vperm.xlu1 %12371, %v10179_v53   ;;  %v10205_v53 = vld [vmem:[%s20549_s29 + $0x310] sm:$0xff]  ;;  %v13356_v1 = vpop.permute.xlu1 %1602 }
 0x166   : > { %3039 = vperm.xlu0 %12370, %v10205_v53   ;;  %v13351_v53 = vpop.permute.xlu0 %1597  ;;  %20589 = vst [vmem:[#allocation41_spill] sm:$0xff] %v13356_v1  ;;  %v10213_v1 = vld [vmem:[%s20549_s29 + $0x350] sm:$0xff] }
 0x167   : > { %20588 = vst [vmem:[#allocation40_spill] sm:$0xff] %v13351_v53 }
 0x169   : > { %2677 = vperm.xlu1 %12371, %v10181_v15   ;;  %v10206_v15 = vld [vmem:[%s20549_s29 + $0x318] sm:$0xff]  ;;  %v13366_v29 = vpop.permute.xlu1 %1612 }
 0x16a   : > { %20591 = vst [vmem:[#allocation43_spill] sm:$0xff] %v13366_v29  ;;  %v10215_v29 = vld [vmem:[%s20549_s29 + $0x360] sm:$0xff] }
 0x16d   : > { %2687 = vperm.xlu1 %12371, %v10183_v27   ;;  %v10207_v27 = vld [vmem:[%s20549_s29 + $0x320] sm:$0xff]  ;;  %v13376_v53 = vpop.permute.xlu1 %1622 }
 0x16e   : > { %3049 = vperm.xlu0 %12370, %v10207_v27   ;;  %v13361_v27 = vpop.permute.xlu0 %1607  ;;  %20593 = vst [vmem:[#allocation45_spill] sm:$0xff] %v13376_v53  ;;  %v10217_v53 = vld [vmem:[%s20549_s29 + $0x370] sm:$0xff] }
 0x16f   : > { %20590 = vst [vmem:[#allocation42_spill] sm:$0xff] %v13361_v27 }
 0x171   : > { %2697 = vperm.xlu1 %12371, %v10185_v36   ;;  %v10208_v36 = vld [vmem:[%s20549_s29 + $0x328] sm:$0xff]  ;;  %v13386_v27 = vpop.permute.xlu1 %1632 }
 0x172   : > { %20595 = vst [vmem:[#allocation47_spill] sm:$0xff] %v13386_v27 }
 0x175   : > { %3034 = vperm.xlu1 %12371, %v10204_v48   ;;  %v10209_v48 = vld [vmem:[%s20549_s29 + $0x330] sm:$0xff] }
 0x176   : > { %3059 = vperm.xlu0 %12370, %v10209_v48   ;;  %v13371_v48 = vpop.permute.xlu0 %1617 }
 0x177   : > { %20592 = vst [vmem:[#allocation44_spill] sm:$0xff] %v13371_v48  ;;  %v13396_v48 = vpop.permute.xlu1 %1642 }
 0x178   : > { %20597 = vst [vmem:[#allocation49_spill] sm:$0xff] %v13396_v48 }
 0x179   : > { %3044 = vperm.xlu1 %12371, %v10206_v15   ;;  %v10210_v15 = vld [vmem:[%s20549_s29 + $0x338] sm:$0xff] }
 0x17a   : > { %3069 = vperm.xlu0 %12370, %v10211_v42   ;;  %v13381_v42 = vpop.permute.xlu0 %1627 }
 0x17b   : > { %20594 = vst [vmem:[#allocation46_spill] sm:$0xff] %v13381_v42  ;;  %v10219_v42 = vld [vmem:[%s20549_s29 + $0x380] sm:$0xff]  ;;  %v13406_v21 = vpop.permute.xlu1 %1652 }
 0x17c   : > { %20599 = vst [vmem:[#allocation51_spill] sm:$0xff] %v13406_v21 }
 0x17d   : > { %3054 = vperm.xlu1 %12371, %v10208_v36   ;;  %v10212_v36 = vld [vmem:[%s20549_s29 + $0x348] sm:$0xff] }
 0x17e   : > { %3079 = vperm.xlu0 %12370, %v10213_v1   ;;  %v13391_v1 = vpop.permute.xlu0 %1637 }
 0x17f   : > { %20596 = vst [vmem:[#allocation48_spill] sm:$0xff] %v13391_v1  ;;  %v13416_v51 = vpop.permute.xlu1 %1662 }
 0x180   : > { %20601 = vst [vmem:[#allocation53_spill] sm:$0xff] %v13416_v51  ;;  %v10225_v51 = vld [vmem:[%s20549_s29 + $0x3b0] sm:$0xff] }
 0x181   : > { %3064 = vperm.xlu1 %12371, %v10210_v15   ;;  %v10214_v15 = vld [vmem:[%s20549_s29 + $0x358] sm:$0xff] }
 0x182   : > { %3089 = vperm.xlu0 %12370, %v10215_v29   ;;  %v13401_v29 = vpop.permute.xlu0 %1647 }
 0x183   : > { %20598 = vst [vmem:[#allocation50_spill] sm:$0xff] %v13401_v29  ;;  %v13426_v41 = vpop.permute.xlu1 %1672  ;;  %v10380_v29 = vld [vmem:[%s20549_s29 + $0x6f0] sm:$0xff] }
 0x184   : > { %20603 = vst [vmem:[#allocation55_spill] sm:$0xff] %v13426_v41  ;;  %v10227_v41 = vld [vmem:[%s20549_s29 + $0x3c0] sm:$0xff] }
 0x185   : > { %3074 = vperm.xlu1 %12371, %v10212_v36   ;;  %v10216_v36 = vld [vmem:[%s20549_s29 + $0x368] sm:$0xff] }
 0x186   : > { %3099 = vperm.xlu0 %12370, %v10217_v53   ;;  %v13411_v53 = vpop.permute.xlu0 %1657 }
 0x187   : > { %20600 = vst [vmem:[#allocation52_spill] sm:$0xff] %v13411_v53  ;;  %v13436_v53 = vpop.permute.xlu1 %1682 }
 0x188   : > { %20605 = vst [vmem:[#allocation57_spill] sm:$0xff] %v13436_v53  ;;  %v10229_v53 = vld [vmem:[%s20549_s29 + $0x3d0] sm:$0xff] }
 0x189   : > { %3084 = vperm.xlu1 %12371, %v10214_v15   ;;  %v10218_v15 = vld [vmem:[%s20549_s29 + $0x378] sm:$0xff] }
 0x18a   : > { %3109 = vperm.xlu0 %12370, %v10219_v42   ;;  %v13421_v42 = vpop.permute.xlu0 %1667 }
 0x18b   : > { %20602 = vst [vmem:[#allocation54_spill] sm:$0xff] %v13421_v42  ;;  %v13446_v42 = vpop.permute.xlu1 %1692 }
 0x18c   : > { %20607 = vst [vmem:[#allocation59_spill] sm:$0xff] %v13446_v42 }
 0x18d   : > { %3094 = vperm.xlu1 %12371, %v10216_v36   ;;  %v10220_v36 = vld [vmem:[%s20549_s29 + $0x388] sm:$0xff] }
 0x18e   : > { %3119 = vperm.xlu0 %12370, %v10221_v11   ;;  %v13431_v11 = vpop.permute.xlu0 %1677 }
 0x18f   : > { %20604 = vst [vmem:[#allocation56_spill] sm:$0xff] %v13431_v11  ;;  %v10230_v11 = vld [vmem:[%s20549_s29 + $0x3d8] sm:$0xff] }
 0x191   : > { %3104 = vperm.xlu1 %12371, %v10218_v15   ;;  %v10222_v15 = vld [vmem:[%s20549_s29 + $0x398] sm:$0xff] }
 0x192   : > { %3129 = vperm.xlu0 %12370, %v10223_v45   ;;  %v13441_v45 = vpop.permute.xlu0 %1687 }
 0x193   : > { %20606 = vst [vmem:[#allocation58_spill] sm:$0xff] %v13441_v45  ;;  %v13456_v45 = vpop.permute.xlu1 %1702 }
 0x194   : > { %20609 = vst [vmem:[#allocation61_spill] sm:$0xff] %v13456_v45 }
 0x195   : > { %3114 = vperm.xlu1 %12371, %v10220_v36   ;;  %v10224_v36 = vld [vmem:[%s20549_s29 + $0x3a8] sm:$0xff] }
 0x196   : > { %3139 = vperm.xlu0 %12370, %v10225_v51   ;;  %v878_v51 = vlaneseq }
 0x197   : > { %v13468_v33 = vpop.permute.xlu1 %1712 }
 0x198   : > { %20612 = vst [vmem:[#allocation64_spill] sm:$0xff] %v13468_v33 }
 0x199   : > { %3124 = vperm.xlu1 %12371, %v10222_v15   ;;  %v10226_v15 = vld [vmem:[%s20549_s29 + $0x3b8] sm:$0xff] }
 0x19a   : > { %3149 = vperm.xlu0 %12370, %v10227_v41   ;;  %v10231_v41 = vld [vmem:[%s20549_s29 + $0x3e0] sm:$0xff] }
 0x19d   : > { %3134 = vperm.xlu1 %12371, %v10224_v36   ;;  %v10228_v36 = vld [vmem:[%s20549_s29 + $0x3c8] sm:$0xff] }
 0x19e   : > { %3159 = vperm.xlu0 %12370, %v10229_v53   ;;  %v10233_v53 = vld [vmem:[%s20549_s29 + $0x3f0] sm:$0xff] }
 0x1a1   : > { %3144 = vperm.xlu1 %12371, %v10226_v15   ;;  %v13451_v15 = vpop.permute.xlu0 %1697 }
 0x1a2   : > { %20608 = vst [vmem:[#allocation60_spill] sm:$0xff] %v13451_v15  ;;  %v10232_v15 = vld [vmem:[%s20549_s29 + $0x3e8] sm:$0xff]  ;;  %3169 = vperm.xlu0 %12370, %v10231_v41  }
 0x1a5   : > { %3154 = vperm.xlu1 %12371, %v10228_v36   ;;  %v13461_v36 = vshrl.u32 %v878_v51, 7  ;;  %v13463_v42 = vpop.permute.xlu0 %1707  ;;  %v10234_v51 = vld [vmem:[%s20549_s29 + $0x3f8] sm:$0xff] }
 0x1a6   : > { %20611 = vst [vmem:[#allocation63_spill] sm:$0xff] %v13463_v42  ;;  %v13481_v42 = vpop.permute.xlu1 %1722  ;;  %3179 = vperm.xlu0 %12370, %v10233_v53  }
 0x1a7   : > { %20610 = vst [vmem:[#allocation62_spill] sm:$0xff] %v13461_v36  ;;  %20615 = vst [vmem:[#allocation67_spill] sm:$0xff] %v13481_v42  ;;  %vm1500_vm5 = vcmp.lt.s32.totalorder %v13461_v36, 1  ;;  %vm2474_vm6 = vcmp.lt.s32.totalorder %v13461_v36, 7 }
 0x1a9   : > { %3164 = vperm.xlu1 %12371, %v10230_v11   ;;  %v13474_v11 = vsub.s32 0, %v13461_v36  ;;  %v13476_v45 = vpop.permute.xlu0 %1717 }
 0x1aa   : > { %20614 = vst [vmem:[#allocation66_spill] sm:$0xff] %v13476_v45  ;;  %v10253_v45 = vld [vmem:[%s20549_s29 + $0x408] sm:$0xff] }
 0x1ab   : > { %20613 = vst [vmem:[#allocation65_spill] sm:$0xff] %v13474_v11 }
 0x1ad   : > { %3174 = vperm.xlu1 %12371, %v10232_v15   ;;  %v10252_v15 = vld [vmem:[%s20549_s29 + $0x400] sm:$0xff]  ;;  %v13489_v18 = vpop.permute.xlu0 %2542 }
 0x1ae   : > { %20616 = vst [vmem:[#allocation68_spill] sm:$0xff] %v13489_v18  ;;  %3516 = vperm.xlu0 %12370, %v10252_v15   ;;  %v10255_v15 = vld [vmem:[%s20549_s29 + $0x418] sm:$0xff] }
 0x1b1   : > { %3184 = vperm.xlu1 %12371, %v10234_v51  }
 0x1b5   : > { %3521 = vperm.xlu1 %12371, %v10253_v45  }
 0x1b9   : > { %3531 = vperm.xlu1 %12371, %v10255_v15  }
 0x20e   : > { %v874_v23 = vpop.f32.mrb[2].mxu0 }
 0x20f   : > { %v13487_v41 = vrot.slane %v874_v23, %v13474_v11  ;;  %v11034_v33 = vpop.f32.mrb[3].mxu0  ;;  %v13506_v23 = vpop.permute.xlu1 %2547 }
 0x210   : > { %20617 = vst [vmem:[#allocation69_spill] sm:$0xff] %v13506_v23 }
 0x211   : > { %v13496_v42 = vsub.f32 %v12832_v3, %v13487_v41  ;;  %v13500_v53 = vsub.f32 %v12835_v4, %v13487_v41  ;;  %v13504_v51 = vsub.f32 %v12838_v5, %v13487_v41  ;;  %v13510_v33 = vsub.f32 %v12841_v6, %v13487_v41  ;;  %v10254_v3 = vld [vmem:[%s20549_s29 + $0x410] sm:$0xff]  ;;  %v13519_v5 = vpop.permute.xlu0 %2552 }
 0x212   : > { %20618 = vst [vmem:[#allocation70_spill] sm:$0xff] %v13519_v5  ;;  %v13526_v6 = vsub.f32 %v12850_v10, %v13487_v41  ;;  %3526 = vperm.xlu0 %12370, %v10254_v3   ;;  %v13535_v54 = vsub.f32 %v12855_v13, %v13487_v41  ;;  %v10256_v10 = vld [vmem:[%s20549_s29 + $0x420] sm:$0xff]  ;;  %v10257_v3 = vld [vmem:[%s20549_s29 + $0x428] sm:$0xff]  ;;  %v13550_v13 = vsub.f32 %v12860_v16, %v13487_v41  ;;  %v10258_v16 = vld [vmem:[%s20549_s29 + $0x430] sm:$0xff] }
 0x213   : > { %v914_v4 = vmul.f32 %v13496_v42, %v13496_v42  ;;  %v915_v18 = vmul.f32 %v13500_v53, %v13500_v53  ;;  %v916_v45 = vmul.f32 %v13504_v51, %v13504_v51  ;;  %v13531_v12 = vpop.permute.xlu1 %2557  ;;  %v917_v5 = vmul.f32 %v13510_v33, %v13510_v33  ;;  %3541 = vperm.xlu1 %12371, %v10257_v3  }
 0x214   : > { %20619 = vst [vmem:[#allocation71_spill] sm:$0xff] %v13531_v12  ;;  %v13682_v38 = vsub.f32 %v12915_v49, %v13487_v41  ;;  %v13697_v49 = vsub.f32 %v12920_v52, %v13487_v41  ;;  %v10270_v52 = vld [vmem:[%s20549_s29 + $0x490] sm:$0xff] }
 0x215   : > { %v946_v23 = vsel %vm650_vm3, %v914_v4, 0.0  ;;  %v947_v50 = vsel %vm650_vm3, %v915_v18, 0.0  ;;  %v13543_v47 = vpop.permute.xlu0 %2562  ;;  %v918_v4 = vmul.f32 %v13526_v6, %v13526_v6  ;;  %v949_v18 = vsel %vm650_vm3, %v916_v45, 0.0 }
 0x216   : > { %v948_v0 = vadd.f32 %v947_v50, %v946_v23  ;;  %20620 = vst [vmem:[#allocation72_spill] sm:$0xff] %v13543_v47  ;;  %3536 = vperm.xlu0 %12370, %v10256_v10   ;;  %v13559_v50 = vsub.f32 %v12865_v19, %v13487_v41  ;;  %v919_v23 = vmul.f32 %v13535_v54, %v13535_v54  ;;  %v951_v47 = vsel %vm650_vm3, %v917_v5, 0.0 }
 0x217   : > { %v13555_v12 = vpop.permute.xlu1 %2567  ;;  %v920_v19 = vmul.f32 %v13550_v13, %v13550_v13  ;;  %v13576_v10 = vsub.f32 %v12870_v22, %v13487_v41  ;;  %v953_v5 = vsel %vm650_vm3, %v918_v4, 0.0  ;;  %v10260_v22 = vld [vmem:[%s20549_s29 + $0x440] sm:$0xff] }
 0x218   : > { %v950_v15 = vadd.f32 %v949_v18, %v948_v0  ;;  %20621 = vst [vmem:[#allocation73_spill] sm:$0xff] %v13555_v12  ;;  %v10259_v0 = vld [vmem:[%s20549_s29 + $0x438] sm:$0xff] }
 0x219   : > { %v13567_v45 = vpop.permute.xlu0 %2572  ;;  %3551 = vperm.xlu1 %12371, %v10259_v0  }
 0x21a   : > { %v952_v44 = vadd.f32 %v951_v47, %v950_v15  ;;  %20622 = vst [vmem:[#allocation74_spill] sm:$0xff] %v13567_v45  ;;  %3546 = vperm.xlu0 %12370, %v10258_v16   ;;  %v921_v47 = vmul.f32 %v13559_v50, %v13559_v50  ;;  %v955_v15 = vsel %vm650_vm3, %v919_v23, 0.0  ;;  %v13586_v45 = vsub.f32 %v12875_v25, %v13487_v41 }
 0x21b   : > { %v13579_v18 = vpop.permute.xlu1 %2577  ;;  %v922_v16 = vmul.f32 %v13576_v10, %v13576_v10  ;;  %v957_v23 = vsel %vm650_vm3, %v920_v19, 0.0  ;;  %v13601_v25 = vsub.f32 %v12880_v28, %v13487_v41  ;;  %v10262_v19 = vld [vmem:[%s20549_s29 + $0x450] sm:$0xff] }
 0x21c   : > { %v954_v3 = vadd.f32 %v953_v5, %v952_v44  ;;  %20623 = vst [vmem:[#allocation75_spill] sm:$0xff] %v13579_v18  ;;  %v10261_v44 = vld [vmem:[%s20549_s29 + $0x448] sm:$0xff] }
 0x21d   : > { %v13591_v4 = vpop.permute.xlu0 %2582  ;;  %3561 = vperm.xlu1 %12371, %v10261_v44  }
 0x21e   : > { %v956_v12 = vadd.f32 %v955_v15, %v954_v3  ;;  %20624 = vst [vmem:[#allocation76_spill] sm:$0xff] %v13591_v4  ;;  %3556 = vperm.xlu0 %12370, %v10260_v22   ;;  %v959_v3 = vsel %vm650_vm3, %v921_v47, 0.0  ;;  %v923_v15 = vmul.f32 %v13586_v45, %v13586_v45  ;;  %v13610_v4 = vsub.f32 %v12885_v31, %v13487_v41 }
 0x21f   : > { %v13603_v5 = vpop.permute.xlu1 %2587  ;;  %v961_v47 = vsel %vm650_vm3, %v922_v16, 0.0  ;;  %v924_v22 = vmul.f32 %v13601_v25, %v13601_v25  ;;  %v13625_v31 = vsub.f32 %v12890_v34, %v13487_v41  ;;  %v10264_v16 = vld [vmem:[%s20549_s29 + $0x460] sm:$0xff] }
 0x220   : > { %v958_v0 = vadd.f32 %v957_v23, %v956_v12  ;;  %20625 = vst [vmem:[#allocation77_spill] sm:$0xff] %v13603_v5  ;;  %v10263_v12 = vld [vmem:[%s20549_s29 + $0x458] sm:$0xff] }
 0x221   : > { %v13615_v18 = vpop.permute.xlu0 %2592  ;;  %3571 = vperm.xlu1 %12371, %v10263_v12  }
 0x222   : > { %v960_v28 = vadd.f32 %v959_v3, %v958_v0  ;;  %20626 = vst [vmem:[#allocation78_spill] sm:$0xff] %v13615_v18  ;;  %3566 = vperm.xlu0 %12370, %v10262_v19   ;;  %v963_v0 = vsel %vm650_vm3, %v923_v15, 0.0  ;;  %v925_v3 = vmul.f32 %v13610_v4, %v13610_v4  ;;  %v13634_v18 = vsub.f32 %v12895_v37, %v13487_v41  ;;  %v10265_v19 = vld [vmem:[%s20549_s29 + $0x468] sm:$0xff] }
 0x223   : > { %v13627_v23 = vpop.permute.xlu1 %2597  ;;  %v965_v15 = vsel %vm650_vm3, %v924_v22, 0.0  ;;  %v13649_v37 = vsub.f32 %v12900_v40, %v13487_v41  ;;  %v10266_v22 = vld [vmem:[%s20549_s29 + $0x470] sm:$0xff] }
 0x224   : > { %v962_v44 = vadd.f32 %v961_v47, %v960_v28  ;;  %20627 = vst [vmem:[#allocation79_spill] sm:$0xff] %v13627_v23  ;;  %v926_v28 = vmul.f32 %v13625_v31, %v13625_v31  ;;  %v13658_v23 = vsub.f32 %v12905_v43, %v13487_v41  ;;  %v13673_v43 = vsub.f32 %v12910_v46, %v13487_v41 }
 0x225   : > { %v13639_v5 = vpop.permute.xlu0 %2602  ;;  %3581 = vperm.xlu1 %12371, %v10265_v19  }
 0x226   : > { %v964_v34 = vadd.f32 %v963_v0, %v962_v44  ;;  %20628 = vst [vmem:[#allocation80_spill] sm:$0xff] %v13639_v5  ;;  %3576 = vperm.xlu0 %12370, %v10264_v16   ;;  %v967_v44 = vsel %vm650_vm3, %v925_v3, 0.0  ;;  %v927_v0 = vmul.f32 %v13634_v18, %v13634_v18  ;;  %v10267_v16 = vld [vmem:[%s20549_s29 + $0x478] sm:$0xff]  ;;  %v969_v3 = vsel %vm650_vm3, %v926_v28, 0.0  ;;  %v10268_v28 = vld [vmem:[%s20549_s29 + $0x480] sm:$0xff] }
 0x227   : > { %v13651_v47 = vpop.permute.xlu1 %2607 }
 0x228   : > { %v966_v12 = vadd.f32 %v965_v15, %v964_v34  ;;  %20629 = vst [vmem:[#allocation81_spill] sm:$0xff] %v13651_v47  ;;  %v928_v34 = vmul.f32 %v13649_v37, %v13649_v37 }
 0x229   : > { %v13663_v39 = vpop.permute.xlu0 %2612  ;;  %3591 = vperm.xlu1 %12371, %v10267_v16  }
 0x22a   : > { %v968_v40 = vadd.f32 %v967_v44, %v966_v12  ;;  %20630 = vst [vmem:[#allocation82_spill] sm:$0xff] %v13663_v39  ;;  %3586 = vperm.xlu0 %12370, %v10266_v22   ;;  %v971_v12 = vsel %vm650_vm3, %v927_v0, 0.0  ;;  %v929_v44 = vmul.f32 %v13658_v23, %v13658_v23  ;;  %v10269_v22 = vld [vmem:[%s20549_s29 + $0x488] sm:$0xff]  ;;  %v973_v0 = vsel %vm650_vm3, %v928_v34, 0.0 }
 0x22b   : > { %v13675_v15 = vpop.permute.xlu1 %2617  ;;  %v13706_v34 = vsub.f32 %v12925_v55, %v13487_v41  ;;  %v13721_v55 = vsub.f32 %v12636_v2, %v13487_v41  ;;  %v10272_v2 = vld [vmem:[%s20549_s29 + $0x4a0] sm:$0xff] }
 0x22c   : > { %v970_v19 = vadd.f32 %v969_v3, %v968_v40  ;;  %20631 = vst [vmem:[#allocation83_spill] sm:$0xff] %v13675_v15  ;;  %v930_v40 = vmul.f32 %v13673_v43, %v13673_v43 }
 0x22d   : > { %v13687_v35 = vpop.permute.xlu0 %2622  ;;  %3601 = vperm.xlu1 %12371, %v10269_v22  }
 0x22e   : > { %v972_v46 = vadd.f32 %v971_v12, %v970_v19  ;;  %20632 = vst [vmem:[#allocation84_spill] sm:$0xff] %v13687_v35  ;;  %3596 = vperm.xlu0 %12370, %v10268_v28   ;;  %v975_v19 = vsel %vm650_vm3, %v929_v44, 0.0  ;;  %v931_v12 = vmul.f32 %v13682_v38, %v13682_v38  ;;  %v10271_v44 = vld [vmem:[%s20549_s29 + $0x498] sm:$0xff]  ;;  %v977_v28 = vsel %vm650_vm3, %v930_v40, 0.0 }
 0x22f   : > { %v13699_v3 = vpop.permute.xlu1 %2627 }
 0x230   : > { %v974_v16 = vadd.f32 %v973_v0, %v972_v46  ;;  %20633 = vst [vmem:[#allocation85_spill] sm:$0xff] %v13699_v3  ;;  %v932_v0 = vmul.f32 %v13697_v49, %v13697_v49 }
 0x231   : > { %v13711_v46 = vpop.permute.xlu0 %2632  ;;  %3611 = vperm.xlu1 %12371, %v10271_v44  }
 0x232   : > { %v976_v9 = vadd.f32 %v975_v19, %v974_v16  ;;  %20634 = vst [vmem:[#allocation86_spill] sm:$0xff] %v13711_v46  ;;  %3606 = vperm.xlu0 %12370, %v10270_v52   ;;  %v979_v16 = vsel %vm650_vm3, %v931_v12, 0.0  ;;  %v933_v19 = vmul.f32 %v13706_v34, %v13706_v34  ;;  %v12637_v46 = vld [vmem:[%s12829_s26 + $0xa8] sm:$0xff]  ;;  %v981_v52 = vsel %vm650_vm3, %v932_v0, 0.0 }
 0x233   : > { %v13723_v8 = vpop.permute.xlu1 %2637  ;;  %v13730_v40 = vsub.f32 %v12637_v46, %v13487_v41  ;;  %v10273_v12 = vld [vmem:[%s20549_s29 + $0x4a8] sm:$0xff] }
 0x234   : > { %v978_v22 = vadd.f32 %v977_v28, %v976_v9  ;;  %20635 = vst [vmem:[#allocation87_spill] sm:$0xff] %v13723_v8  ;;  %v934_v28 = vmul.f32 %v13721_v55, %v13721_v55  ;;  %v12638_v8 = vld [vmem:[%s12829_s26 + $0xb0] sm:$0xff] }
 0x235   : > { %v13735_v9 = vpop.permute.xlu0 %2642  ;;  %v13745_v46 = vsub.f32 %v12638_v8, %v13487_v41  ;;  %3621 = vperm.xlu1 %12371, %v10273_v12   ;;  %v10274_v8 = vld [vmem:[%s20549_s29 + $0x4b0] sm:$0xff] }
 0x236   : > { %v980_v7 = vadd.f32 %v979_v16, %v978_v22  ;;  %20636 = vst [vmem:[#allocation88_spill] sm:$0xff] %v13735_v9  ;;  %3616 = vperm.xlu0 %12370, %v10272_v2   ;;  %v983_v22 = vsel %vm650_vm3, %v933_v19, 0.0  ;;  %v935_v16 = vmul.f32 %v13730_v40, %v13730_v40  ;;  %v12639_v9 = vld [vmem:[%s12829_s26 + $0xb8] sm:$0xff]  ;;  %v985_v2 = vsel %vm650_vm3, %v934_v28, 0.0 }
 0x237   : > { %v13747_v58 = vpop.permute.xlu1 %2647  ;;  %v13754_v0 = vsub.f32 %v12639_v9, %v13487_v41  ;;  %v10275_v19 = vld [vmem:[%s20549_s29 + $0x4b8] sm:$0xff] }
 0x238   : > { %v982_v44 = vadd.f32 %v981_v52, %v980_v7  ;;  %20637 = vst [vmem:[#allocation89_spill] sm:$0xff] %v13747_v58  ;;  %v936_v52 = vmul.f32 %v13745_v46, %v13745_v46  ;;  %v12640_v58 = vld [vmem:[%s12829_s26 + $0xc0] sm:$0xff] }
 0x239   : > { %v13759_v7 = vpop.permute.xlu0 %2652  ;;  %v13769_v9 = vsub.f32 %v12640_v58, %v13487_v41  ;;  %3631 = vperm.xlu1 %12371, %v10275_v19   ;;  %v10276_v58 = vld [vmem:[%s20549_s29 + $0x4c0] sm:$0xff] }
 0x23a   : > { %v984_v63 = vadd.f32 %v983_v22, %v982_v44  ;;  %20638 = vst [vmem:[#allocation90_spill] sm:$0xff] %v13759_v7  ;;  %3626 = vperm.xlu0 %12370, %v10274_v8   ;;  %v987_v44 = vsel %vm650_vm3, %v935_v16, 0.0  ;;  %v937_v22 = vmul.f32 %v13754_v0, %v13754_v0  ;;  %v12641_v7 = vld [vmem:[%s12829_s26 + $0xc8] sm:$0xff]  ;;  %v989_v8 = vsel %vm650_vm3, %v936_v52, 0.0 }
 0x23b   : > { %v13771_v62 = vpop.permute.xlu1 %2657  ;;  %v13778_v28 = vsub.f32 %v12641_v7, %v13487_v41  ;;  %v10277_v16 = vld [vmem:[%s20549_s29 + $0x4c8] sm:$0xff] }
 0x23c   : > { %v986_v12 = vadd.f32 %v985_v2, %v984_v63  ;;  %20639 = vst [vmem:[#allocation91_spill] sm:$0xff] %v13771_v62  ;;  %v938_v2 = vmul.f32 %v13769_v9, %v13769_v9  ;;  %v12642_v62 = vld [vmem:[%s12829_s26 + $0xd0] sm:$0xff] }
 0x23d   : > { %v13783_v63 = vpop.permute.xlu0 %2662  ;;  %v13793_v7 = vsub.f32 %v12642_v62, %v13487_v41  ;;  %3641 = vperm.xlu1 %12371, %v10277_v16   ;;  %v10278_v62 = vld [vmem:[%s20549_s29 + $0x4d0] sm:$0xff] }
 0x23e   : > { %v988_v56 = vadd.f32 %v987_v44, %v986_v12  ;;  %20640 = vst [vmem:[#allocation92_spill] sm:$0xff] %v13783_v63  ;;  %3636 = vperm.xlu0 %12370, %v10276_v58   ;;  %v991_v12 = vsel %vm650_vm3, %v937_v22, 0.0  ;;  %v939_v44 = vmul.f32 %v13778_v28, %v13778_v28  ;;  %v12643_v63 = vld [vmem:[%s12829_s26 + $0xd8] sm:$0xff]  ;;  %v993_v58 = vsel %vm650_vm3, %v938_v2, 0.0 }
 0x23f   : > { %v13795_v61 = vpop.permute.xlu1 %2667  ;;  %v13802_v52 = vsub.f32 %v12643_v63, %v13487_v41  ;;  %v10279_v22 = vld [vmem:[%s20549_s29 + $0x4d8] sm:$0xff]  ;;  %v12644_v63 = vld [vmem:[%s12829_s26 + $0xe0] sm:$0xff] }
 0x240   : > { %v990_v19 = vadd.f32 %v989_v8, %v988_v56  ;;  %20641 = vst [vmem:[#allocation93_spill] sm:$0xff] %v13795_v61  ;;  %v940_v8 = vmul.f32 %v13793_v7, %v13793_v7  ;;  %v13817_v16 = vsub.f32 %v12644_v63, %v13487_v41  ;;  %v10280_v63 = vld [vmem:[%s20549_s29 + $0x4e0] sm:$0xff] }
 0x241   : > { %v13807_v56 = vpop.permute.xlu0 %2672  ;;  %3651 = vperm.xlu1 %12371, %v10279_v22  }
 0x242   : > { %v992_v60 = vadd.f32 %v991_v12, %v990_v19  ;;  %20642 = vst [vmem:[#allocation94_spill] sm:$0xff] %v13807_v56  ;;  %3646 = vperm.xlu0 %12370, %v10278_v62   ;;  %v995_v19 = vsel %vm650_vm3, %v939_v44, 0.0  ;;  %v941_v12 = vmul.f32 %v13802_v52, %v13802_v52  ;;  %v12645_v56 = vld [vmem:[%s12829_s26 + $0xe8] sm:$0xff]  ;;  %v12646_v62 = vld [vmem:[%s12829_s26 + $0xf0] sm:$0xff] }
 0x243   : > { %v13819_v59 = vpop.permute.xlu1 %2677  ;;  %v13826_v2 = vsub.f32 %v12645_v56, %v13487_v41  ;;  %v13836_v44 = vsub.f32 %v12646_v62, %v13487_v41  ;;  %v942_v56 = vmul.f32 %v13817_v16, %v13817_v16 }
 0x244   : > { %v994_v61 = vadd.f32 %v993_v58, %v992_v60  ;;  %20643 = vst [vmem:[#allocation95_spill] sm:$0xff] %v13819_v59  ;;  %v10281_v60 = vld [vmem:[%s20549_s29 + $0x4e8] sm:$0xff]  ;;  %v997_v58 = vsel %vm650_vm3, %v940_v8, 0.0  ;;  %v999_v3 = vsel %vm650_vm3, %v941_v12, 0.0  ;;  %v10282_v8 = vld [vmem:[%s20549_s29 + $0x4f0] sm:$0xff] }
 0x245   : > { %v13841_v59 = vpop.permute.xlu0 %2682  ;;  %v943_v62 = vmul.f32 %v13826_v2, %v13826_v2  ;;  %3661 = vperm.xlu1 %12371, %v10281_v60  }
 0x246   : > { %v996_v57 = vadd.f32 %v995_v19, %v994_v61  ;;  %20644 = vst [vmem:[#allocation96_spill] sm:$0xff] %v13841_v59  ;;  %3656 = vperm.xlu0 %12370, %v10280_v63   ;;  %v12647_v61 = vld [vmem:[%s12829_s26 + $0xf8] sm:$0xff]  ;;  %v944_v63 = vmul.f32 %v13836_v44, %v13836_v44  ;;  %v10362_v59 = vld [vmem:[%s20549_s29 + $0x660] sm:$0xff] }
 0x247   : > { %v13843_v21 = vpop.permute.xlu1 %2687  ;;  %v13847_v19 = vsub.f32 %v12647_v61, %v13487_v41  ;;  %v1001_v41 = vsel %vm650_vm3, %v942_v56, 0.0  ;;  %v10302_v56 = vld [vmem:[%s20549_s29 + $0x508] sm:$0xff] }
 0x248   : > { %v998_v22 = vadd.f32 %v997_v58, %v996_v57  ;;  %20645 = vst [vmem:[#allocation97_spill] sm:$0xff] %v13843_v21  ;;  %v10283_v57 = vld [vmem:[%s20549_s29 + $0x4f8] sm:$0xff] }
 0x249   : > { %v13861_v58 = vpop.permute.xlu0 %2692  ;;  %v945_v60 = vmul.f32 %v13847_v19, %v13847_v19  ;;  %3671 = vperm.xlu1 %12371, %v10283_v57   ;;  %v10303_v57 = vld [vmem:[%s20549_s29 + $0x510] sm:$0xff] }
 0x24a   : > { %v1000_v32 = vadd.f32 %v999_v3, %v998_v22  ;;  %20646 = vst [vmem:[#allocation98_spill] sm:$0xff] %v13861_v58  ;;  %3666 = vperm.xlu0 %12370, %v10282_v8   ;;  %v1003_v3 = vsel %vm650_vm3, %v943_v62, 0.0  ;;  %v10301_v22 = vld [vmem:[%s20549_s29 + $0x500] sm:$0xff] }
 0x24b   : > { %v13863_v61 = vpop.permute.xlu1 %2697  ;;  %v1007_v62 = vsel %vm650_vm3, %v945_v60, 0.0 }
 0x24c   : > { %v1002_v12 = vadd.f32 %v1001_v41, %v1000_v32  ;;  %20647 = vst [vmem:[#allocation99_spill] sm:$0xff] %v13863_v61  ;;  %v1005_v32 = vsel %vm650_vm3, %v944_v63, 0.0 }
 0x24d   : > { %v13875_v41 = vpop.permute.xlu0 %3029  ;;  %4008 = vperm.xlu1 %12371, %v10302_v56  }
 0x24e   : > { %v1004_v21 = vadd.f32 %v1003_v3, %v1002_v12  ;;  %20648 = vst [vmem:[#allocation100_spill] sm:$0xff] %v13875_v41  ;;  %4003 = vperm.xlu0 %12370, %v10301_v22   ;;  %v10304_v3 = vld [vmem:[%s20549_s29 + $0x518] sm:$0xff]  ;;  %v10306_v22 = vld [vmem:[%s20549_s29 + $0x528] sm:$0xff] }
 0x24f   : > { %v13877_v61 = vpop.permute.xlu1 %3034 }
 0x250   : > { %v1006_v8 = vadd.f32 %v1005_v32, %v1004_v21  ;;  %20649 = vst [vmem:[#allocation101_spill] sm:$0xff] %v13877_v61  ;;  %v10305_v21 = vld [vmem:[%s20549_s29 + $0x520] sm:$0xff] }
 0x251   : > { %v13886_v58 = vpop.permute.xlu0 %3039  ;;  %4018 = vperm.xlu1 %12371, %v10304_v3  }
 0x252   : > { %v1008_v12 = vadd.f32 %v1007_v62, %v1006_v8  ;;  %20650 = vst [vmem:[#allocation102_spill] sm:$0xff] %v13886_v58  ;;  %4013 = vperm.xlu0 %12370, %v10303_v57   ;;  %v10307_v62 = vld [vmem:[%s20549_s29 + $0x530] sm:$0xff] }
 0x253   : > { %v13888_v41 = vpop.permute.xlu1 %3044 }
 0x254   : > { %v1009_v63 = vrot.slane %v1008_v12, 4  ;;  %20651 = vst [vmem:[#allocation103_spill] sm:$0xff] %v13888_v41 }
 0x255   : > { %v13896_v56 = vpop.permute.xlu0 %3049  ;;  %4028 = vperm.xlu1 %12371, %v10306_v22  }
 0x256   : > { %v1010_v60 = vadd.f32 %v1009_v63, %v1008_v12  ;;  %20652 = vst [vmem:[#allocation104_spill] sm:$0xff] %v13896_v56  ;;  %4023 = vperm.xlu0 %12370, %v10305_v21   ;;  %v10308_v12 = vld [vmem:[%s20549_s29 + $0x538] sm:$0xff]  ;;  %v10309_v21 = vld [vmem:[%s20549_s29 + $0x540] sm:$0xff]  ;;  %v10319_v56 = vld [vmem:[%s20549_s29 + $0x590] sm:$0xff] }
 0x257   : > { %v13898_v8 = vpop.permute.xlu1 %3054 }
 0x258   : > { %v1011_v32 = vrot.slane %v1010_v60, 2  ;;  %20653 = vst [vmem:[#allocation105_spill] sm:$0xff] %v13898_v8 }
 0x259   : > { %v13906_v3 = vpop.permute.xlu0 %3059  ;;  %4038 = vperm.xlu1 %12371, %v10308_v12  }
 0x25a   : > { %v1012_v57 = vadd.f32 %v1011_v32, %v1010_v60  ;;  %20654 = vst [vmem:[#allocation106_spill] sm:$0xff] %v13906_v3  ;;  %4033 = vperm.xlu0 %12370, %v10307_v62   ;;  %v10310_v60 = vld [vmem:[%s20549_s29 + $0x548] sm:$0xff]  ;;  %v10311_v62 = vld [vmem:[%s20549_s29 + $0x550] sm:$0xff] }
 0x25b   : > { %v13908_v41 = vpop.permute.xlu1 %3064 }
 0x25c   : > { %v1013_v63 = vrot.slane %v1012_v57, 1  ;;  %20655 = vst [vmem:[#allocation107_spill] sm:$0xff] %v13908_v41  ;;  %v10317_v41 = vld [vmem:[%s20549_s29 + $0x580] sm:$0xff] }
 0x25d   : > { %v13916_v32 = vpop.permute.xlu0 %3069  ;;  %4048 = vperm.xlu1 %12371, %v10310_v60  }
 0x25e   : > { %v1014_v22 = vadd.f32 %v1013_v63, %v1012_v57  ;;  %20656 = vst [vmem:[#allocation108_spill] sm:$0xff] %v13916_v32  ;;  %4043 = vperm.xlu0 %12370, %v10309_v21   ;;  %v10312_v57 = vld [vmem:[%s20549_s29 + $0x558] sm:$0xff]  ;;  %v10314_v21 = vld [vmem:[%s20549_s29 + $0x568] sm:$0xff] }
 0x25f   : > { %v13919_v8 = vpop.permute.xlu1 %3074 }
 0x260   : > { %11038 = vmatmul.mubr.msk.f32.vlgmr.msra.gmra.mrb[4].mxu0 %vm650_vm3, %v1014_v22  ;;  %20657 = vst [vmem:[#allocation109_spill] sm:$0xff] %v13919_v8  ;;  %v10313_v22 = vld [vmem:[%s20549_s29 + $0x560] sm:$0xff] }
 0x261   : > { %v13927_v12 = vpop.permute.xlu0 %3079  ;;  %4058 = vperm.xlu1 %12371, %v10312_v57  }
 0x262   : > { %20658 = vst [vmem:[#allocation110_spill] sm:$0xff] %v13927_v12  ;;  %4053 = vperm.xlu0 %12370, %v10311_v62   ;;  %v10315_v12 = vld [vmem:[%s20549_s29 + $0x570] sm:$0xff]  ;;  %v10316_v62 = vld [vmem:[%s20549_s29 + $0x578] sm:$0xff] }
 0x263   : > { %v13929_v63 = vpop.permute.xlu1 %3084 }
 0x264   : > { %20659 = vst [vmem:[#allocation111_spill] sm:$0xff] %v13929_v63 }
 0x265   : > { %v13937_v60 = vpop.permute.xlu0 %3089  ;;  %4068 = vperm.xlu1 %12371, %v10314_v21  }
 0x266   : > { %20660 = vst [vmem:[#allocation112_spill] sm:$0xff] %v13937_v60  ;;  %4063 = vperm.xlu0 %12370, %v10313_v22   ;;  %v10318_v22 = vld [vmem:[%s20549_s29 + $0x588] sm:$0xff] }
 0x267   : > { %v13939_v8 = vpop.permute.xlu1 %3094 }
 0x268   : > { %20661 = vst [vmem:[#allocation113_spill] sm:$0xff] %v13939_v8 }
 0x269   : > { %v13947_v57 = vpop.permute.xlu0 %3099  ;;  %4078 = vperm.xlu1 %12371, %v10316_v62  }
 0x26a   : > { %20662 = vst [vmem:[#allocation114_spill] sm:$0xff] %v13947_v57  ;;  %4073 = vperm.xlu0 %12370, %v10315_v12   ;;  %v10320_v12 = vld [vmem:[%s20549_s29 + $0x598] sm:$0xff] }
 0x26b   : > { %v13949_v32 = vpop.permute.xlu1 %3104 }
 0x26c   : > { %20663 = vst [vmem:[#allocation115_spill] sm:$0xff] %v13949_v32  ;;  %v10378_v32 = vld [vmem:[%s20549_s29 + $0x6e0] sm:$0xff] }
 0x26d   : > { %v13957_v21 = vpop.permute.xlu0 %3109  ;;  %4088 = vperm.xlu1 %12371, %v10318_v22  }
 0x26e   : > { %20664 = vst [vmem:[#allocation116_spill] sm:$0xff] %v13957_v21  ;;  %4083 = vperm.xlu0 %12370, %v10317_v41   ;;  %v10322_v41 = vld [vmem:[%s20549_s29 + $0x5a8] sm:$0xff] }
 0x26f   : > { %v13959_v3 = vpop.permute.xlu1 %3114 }
 0x270   : > { %20665 = vst [vmem:[#allocation117_spill] sm:$0xff] %v13959_v3  ;;  %v10321_v3 = vld [vmem:[%s20549_s29 + $0x5a0] sm:$0xff] }
 0x271   : > { %v13967_v62 = vpop.permute.xlu0 %3119  ;;  %4098 = vperm.xlu1 %12371, %v10320_v12  }
 0x272   : > { %20666 = vst [vmem:[#allocation118_spill] sm:$0xff] %v13967_v62  ;;  %4093 = vperm.xlu0 %12370, %v10319_v56   ;;  %v10324_v56 = vld [vmem:[%s20549_s29 + $0x5b8] sm:$0xff] }
 0x273   : > { %v13969_v58 = vpop.permute.xlu1 %3124 }
 0x274   : > { %20667 = vst [vmem:[#allocation119_spill] sm:$0xff] %v13969_v58  ;;  %v10323_v58 = vld [vmem:[%s20549_s29 + $0x5b0] sm:$0xff] }
 0x275   : > { %v13977_v22 = vpop.permute.xlu0 %3129  ;;  %4108 = vperm.xlu1 %12371, %v10322_v41  }
 0x276   : > { %20668 = vst [vmem:[#allocation120_spill] sm:$0xff] %v13977_v22  ;;  %4103 = vperm.xlu0 %12370, %v10321_v3   ;;  %v10326_v3 = vld [vmem:[%s20549_s29 + $0x5c8] sm:$0xff] }
 0x277   : > { %v13979_v61 = vpop.permute.xlu1 %3134 }
 0x278   : > { %20669 = vst [vmem:[#allocation121_spill] sm:$0xff] %v13979_v61  ;;  %v10325_v61 = vld [vmem:[%s20549_s29 + $0x5c0] sm:$0xff] }
 0x279   : > { %v13987_v12 = vpop.permute.xlu0 %3139  ;;  %4118 = vperm.xlu1 %12371, %v10324_v56   ;;  %v10329_v56 = vld [vmem:[%s20549_s29 + $0x5e0] sm:$0xff] }
 0x27a   : > { %20670 = vst [vmem:[#allocation122_spill] sm:$0xff] %v13987_v12  ;;  %4113 = vperm.xlu0 %12370, %v10323_v58   ;;  %v10328_v58 = vld [vmem:[%s20549_s29 + $0x5d8] sm:$0xff] }
 0x27b   : > { %v13989_v62 = vpop.permute.xlu1 %3144 }
 0x27c   : > { %20671 = vst [vmem:[#allocation123_spill] sm:$0xff] %v13989_v62  ;;  %v10327_v62 = vld [vmem:[%s20549_s29 + $0x5d0] sm:$0xff] }
 0x27d   : > { %v13997_v41 = vpop.permute.xlu0 %3149  ;;  %4128 = vperm.xlu1 %12371, %v10326_v3  }
 0x27e   : > { %20672 = vst [vmem:[#allocation124_spill] sm:$0xff] %v13997_v41  ;;  %4123 = vperm.xlu0 %12370, %v10325_v61   ;;  %v10330_v61 = vld [vmem:[%s20549_s29 + $0x5e8] sm:$0xff] }
 0x27f   : > { %v13999_v22 = vpop.permute.xlu1 %3154 }
 0x280   : > { %20673 = vst [vmem:[#allocation125_spill] sm:$0xff] %v13999_v22  ;;  %v10331_v22 = vld [vmem:[%s20549_s29 + $0x5f0] sm:$0xff] }
 0x281   : > { %4138 = vperm.xlu1 %12371, %v10328_v58   ;;  %v14010_v12 = vpop.permute.xlu0 %3159 }
 0x282   : > { %4133 = vperm.xlu0 %12370, %v10327_v62   ;;  %20674 = vst [vmem:[#allocation126_spill] sm:$0xff] %v14010_v12  ;;  %v10332_v62 = vld [vmem:[%s20549_s29 + $0x5f8] sm:$0xff] }
 0x283   : > { %v14015_v3 = vpop.permute.xlu1 %3164 }
 0x284   : > { %20675 = vst [vmem:[#allocation127_spill] sm:$0xff] %v14015_v3  ;;  %v10350_v3 = vld [vmem:[%s20549_s29 + $0x600] sm:$0xff] }
 0x285   : > { %4148 = vperm.xlu1 %12371, %v10330_v61   ;;  %v14023_v58 = vpop.permute.xlu0 %3169  ;;  %v10352_v61 = vld [vmem:[%s20549_s29 + $0x610] sm:$0xff] }
 0x286   : > { %4143 = vperm.xlu0 %12370, %v10329_v56   ;;  %20676 = vst [vmem:[#allocation128_spill] sm:$0xff] %v14023_v58  ;;  %v10351_v56 = vld [vmem:[%s20549_s29 + $0x608] sm:$0xff] }
 0x287   : > { %v14025_v12 = vpop.permute.xlu1 %3174 }
 0x288   : > { %20677 = vst [vmem:[#allocation129_spill] sm:$0xff] %v14025_v12  ;;  %v10354_v12 = vld [vmem:[%s20549_s29 + $0x620] sm:$0xff] }
 0x289   : > { %4158 = vperm.xlu1 %12371, %v10332_v62   ;;  %v14036_v41 = vpop.permute.xlu0 %3179 }
 0x28a   : > { %4153 = vperm.xlu0 %12370, %v10331_v22   ;;  %20678 = vst [vmem:[#allocation130_spill] sm:$0xff] %v14036_v41  ;;  %v10353_v22 = vld [vmem:[%s20549_s29 + $0x618] sm:$0xff] }
 0x28b   : > { %v14041_v62 = vpop.permute.xlu1 %3184 }
 0x28c   : > { %20679 = vst [vmem:[#allocation131_spill] sm:$0xff] %v14041_v62  ;;  %v10356_v62 = vld [vmem:[%s20549_s29 + $0x630] sm:$0xff] }
 0x28d   : > { %4495 = vperm.xlu1 %12371, %v10351_v56   ;;  %v14049_v56 = vpop.permute.xlu0 %3516 }
 0x28e   : > { %4490 = vperm.xlu0 %12370, %v10350_v3   ;;  %v10355_v3 = vld [vmem:[%s20549_s29 + $0x628] sm:$0xff]  ;;  %20680 = vst [vmem:[#allocation132_spill] sm:$0xff] %v14049_v56 }
 0x28f   : > { %v14051_v41 = vpop.permute.xlu1 %3521 }
 0x290   : > { %20681 = vst [vmem:[#allocation133_spill] sm:$0xff] %v14051_v41  ;;  %v10360_v41 = vld [vmem:[%s20549_s29 + $0x650] sm:$0xff] }
 0x291   : > { %4505 = vperm.xlu1 %12371, %v10353_v22   ;;  %v10358_v22 = vld [vmem:[%s20549_s29 + $0x640] sm:$0xff]  ;;  %v14062_v58 = vpop.permute.xlu0 %3526 }
 0x292   : > { %4500 = vperm.xlu0 %12370, %v10352_v61   ;;  %v10357_v61 = vld [vmem:[%s20549_s29 + $0x638] sm:$0xff]  ;;  %20682 = vst [vmem:[#allocation134_spill] sm:$0xff] %v14062_v58 }
 0x295   : > { %4515 = vperm.xlu1 %12371, %v10355_v3   ;;  %v14067_v3 = vpop.permute.xlu1 %3531 }
 0x296   : > { %4510 = vperm.xlu0 %12370, %v10354_v12   ;;  %v10359_v12 = vld [vmem:[%s20549_s29 + $0x648] sm:$0xff]  ;;  %20683 = vst [vmem:[#allocation135_spill] sm:$0xff] %v14067_v3  ;;  %v10374_v3 = vld [vmem:[%s20549_s29 + $0x6c0] sm:$0xff] }
 0x299   : > { %4525 = vperm.xlu1 %12371, %v10357_v61   ;;  %v14075_v61 = vpop.permute.xlu0 %3536  ;;  %v14077_v56 = vpop.permute.xlu1 %3541 }
 0x29a   : > { %4520 = vperm.xlu0 %12370, %v10356_v62   ;;  %v10361_v62 = vld [vmem:[%s20549_s29 + $0x658] sm:$0xff]  ;;  %20684 = vst [vmem:[#allocation136_spill] sm:$0xff] %v14075_v61  ;;  %20685 = vst [vmem:[#allocation137_spill] sm:$0xff] %v14077_v56  ;;  %v10366_v56 = vld [vmem:[%s20549_s29 + $0x680] sm:$0xff] }
 0x29d   : > { %4535 = vperm.xlu1 %12371, %v10359_v12   ;;  %v10364_v12 = vld [vmem:[%s20549_s29 + $0x670] sm:$0xff]  ;;  %v14088_v21 = vpop.permute.xlu0 %3546 }
 0x29e   : > { %4530 = vperm.xlu0 %12370, %v10358_v22   ;;  %v10363_v22 = vld [vmem:[%s20549_s29 + $0x668] sm:$0xff]  ;;  %20686 = vst [vmem:[#allocation138_spill] sm:$0xff] %v14088_v21 }
 0x2a1   : > { %4545 = vperm.xlu1 %12371, %v10361_v62   ;;  %v14093_v62 = vpop.permute.xlu1 %3551 }
 0x2a2   : > { %4540 = vperm.xlu0 %12370, %v10360_v41   ;;  %v10365_v41 = vld [vmem:[%s20549_s29 + $0x678] sm:$0xff]  ;;  %20687 = vst [vmem:[#allocation139_spill] sm:$0xff] %v14093_v62  ;;  %v10368_v62 = vld [vmem:[%s20549_s29 + $0x690] sm:$0xff] }
 0x2a5   : > { %4555 = vperm.xlu1 %12371, %v10363_v22   ;;  %v14101_v22 = vpop.permute.xlu0 %3556  ;;  %v14103_v21 = vpop.permute.xlu1 %3561 }
 0x2a6   : > { %4550 = vperm.xlu0 %12370, %v10362_v59   ;;  %v10367_v59 = vld [vmem:[%s20549_s29 + $0x688] sm:$0xff]  ;;  %20688 = vst [vmem:[#allocation140_spill] sm:$0xff] %v14101_v22  ;;  %20689 = vst [vmem:[#allocation141_spill] sm:$0xff] %v14103_v21  ;;  %v10372_v21 = vld [vmem:[%s20549_s29 + $0x6b0] sm:$0xff] }
 0x2a9   : > { %4565 = vperm.xlu1 %12371, %v10365_v41   ;;  %v10370_v41 = vld [vmem:[%s20549_s29 + $0x6a0] sm:$0xff]  ;;  %v14114_v61 = vpop.permute.xlu0 %3566 }
 0x2aa   : > { %4560 = vperm.xlu0 %12370, %v10364_v12   ;;  %v10369_v12 = vld [vmem:[%s20549_s29 + $0x698] sm:$0xff]  ;;  %20690 = vst [vmem:[#allocation142_spill] sm:$0xff] %v14114_v61 }
 0x2ad   : > { %4575 = vperm.xlu1 %12371, %v10367_v59   ;;  %v14119_v59 = vpop.permute.xlu1 %3571 }
 0x2ae   : > { %4570 = vperm.xlu0 %12370, %v10366_v56   ;;  %v10371_v56 = vld [vmem:[%s20549_s29 + $0x6a8] sm:$0xff]  ;;  %20691 = vst [vmem:[#allocation143_spill] sm:$0xff] %v14119_v59 }
 0x2b1   : > { %4585 = vperm.xlu1 %12371, %v10369_v12   ;;  %v14127_v12 = vpop.permute.xlu0 %3576  ;;  %v14129_v22 = vpop.permute.xlu1 %3581 }
 0x2b2   : > { %4580 = vperm.xlu0 %12370, %v10368_v62   ;;  %v10373_v62 = vld [vmem:[%s20549_s29 + $0x6b8] sm:$0xff]  ;;  %20692 = vst [vmem:[#allocation144_spill] sm:$0xff] %v14127_v12  ;;  %20693 = vst [vmem:[#allocation145_spill] sm:$0xff] %v14129_v22 }
 0x2b5   : > { %4595 = vperm.xlu1 %12371, %v10371_v56   ;;  %v10376_v56 = vld [vmem:[%s20549_s29 + $0x6d0] sm:$0xff]  ;;  %v14140_v58 = vpop.permute.xlu0 %3586 }
 0x2b6   : > { %4590 = vperm.xlu0 %12370, %v10370_v41   ;;  %v10375_v41 = vld [vmem:[%s20549_s29 + $0x6c8] sm:$0xff]  ;;  %20694 = vst [vmem:[#allocation146_spill] sm:$0xff] %v14140_v58  ;;  %v10460_v58 = vld [vmem:[%s20549_s29 + $0x860] sm:$0xff] }
 0x2b9   : > { %4605 = vperm.xlu1 %12371, %v10373_v62   ;;  %v14145_v62 = vpop.permute.xlu1 %3591 }
 0x2ba   : > { %4600 = vperm.xlu0 %12370, %v10372_v21   ;;  %v10377_v21 = vld [vmem:[%s20549_s29 + $0x6d8] sm:$0xff]  ;;  %20695 = vst [vmem:[#allocation147_spill] sm:$0xff] %v14145_v62  ;;  %v10456_v62 = vld [vmem:[%s20549_s29 + $0x840] sm:$0xff] }
 0x2bd   : > { %4615 = vperm.xlu1 %12371, %v10375_v41   ;;  %v14153_v41 = vpop.permute.xlu0 %3596  ;;  %v14155_v57 = vpop.permute.xlu1 %3601 }
 0x2be   : > { %4610 = vperm.xlu0 %12370, %v10374_v3   ;;  %v10379_v3 = vld [vmem:[%s20549_s29 + $0x6e8] sm:$0xff]  ;;  %20696 = vst [vmem:[#allocation148_spill] sm:$0xff] %v14153_v41  ;;  %20697 = vst [vmem:[#allocation149_spill] sm:$0xff] %v14155_v57  ;;  %v10401_v57 = vld [vmem:[%s20549_s29 + $0x710] sm:$0xff] }
 0x2c1   : > { %4625 = vperm.xlu1 %12371, %v10377_v21   ;;  %v10399_v21 = vld [vmem:[%s20549_s29 + $0x700] sm:$0xff]  ;;  %v14166_v35 = vpop.permute.xlu0 %3606 }
 0x2c2   : > { %4620 = vperm.xlu0 %12370, %v10376_v56   ;;  %v10381_v56 = vld [vmem:[%s20549_s29 + $0x6f8] sm:$0xff]  ;;  %20698 = vst [vmem:[#allocation150_spill] sm:$0xff] %v14166_v35 }
 0x2c5   : > { %4635 = vperm.xlu1 %12371, %v10379_v3   ;;  %v14171_v3 = vpop.permute.xlu1 %3611 }
 0x2c6   : > { %4630 = vperm.xlu0 %12370, %v10378_v32   ;;  %v10400_v32 = vld [vmem:[%s20549_s29 + $0x708] sm:$0xff]  ;;  %20699 = vst [vmem:[#allocation151_spill] sm:$0xff] %v14171_v3  ;;  %v10403_v3 = vld [vmem:[%s20549_s29 + $0x720] sm:$0xff] }
 0x2c9   : > { %4645 = vperm.xlu1 %12371, %v10381_v56   ;;  %v14179_v56 = vpop.permute.xlu0 %3616  ;;  %v14181_v35 = vpop.permute.xlu1 %3621 }
 0x2ca   : > { %4640 = vperm.xlu0 %12370, %v10380_v29   ;;  %v10402_v29 = vld [vmem:[%s20549_s29 + $0x718] sm:$0xff]  ;;  %20700 = vst [vmem:[#allocation152_spill] sm:$0xff] %v14179_v56  ;;  %20701 = vst [vmem:[#allocation153_spill] sm:$0xff] %v14181_v35  ;;  %v10407_v35 = vld [vmem:[%s20549_s29 + $0x740] sm:$0xff] }
 0x2cd   : > { %4982 = vperm.xlu1 %12371, %v10400_v32   ;;  %v10405_v32 = vld [vmem:[%s20549_s29 + $0x730] sm:$0xff]  ;;  %v14192_v41 = vpop.permute.xlu0 %3626 }
 0x2ce   : > { %4977 = vperm.xlu0 %12370, %v10399_v21   ;;  %v10404_v21 = vld [vmem:[%s20549_s29 + $0x728] sm:$0xff]  ;;  %20702 = vst [vmem:[#allocation154_spill] sm:$0xff] %v14192_v41 }
 0x2d1   : > { %4992 = vperm.xlu1 %12371, %v10402_v29   ;;  %v14197_v29 = vpop.permute.xlu1 %3631 }
 0x2d2   : > { %4987 = vperm.xlu0 %12370, %v10401_v57   ;;  %v10406_v57 = vld [vmem:[%s20549_s29 + $0x738] sm:$0xff]  ;;  %20703 = vst [vmem:[#allocation155_spill] sm:$0xff] %v14197_v29  ;;  %v10409_v29 = vld [vmem:[%s20549_s29 + $0x750] sm:$0xff] }
 0x2d5   : > { %5002 = vperm.xlu1 %12371, %v10404_v21   ;;  %v14205_v21 = vpop.permute.xlu0 %3636  ;;  %v14207_v41 = vpop.permute.xlu1 %3641 }
 0x2d6   : > { %4997 = vperm.xlu0 %12370, %v10403_v3   ;;  %v10408_v3 = vld [vmem:[%s20549_s29 + $0x748] sm:$0xff]  ;;  %20704 = vst [vmem:[#allocation156_spill] sm:$0xff] %v14205_v21  ;;  %20705 = vst [vmem:[#allocation157_spill] sm:$0xff] %v14207_v41  ;;  %v10413_v41 = vld [vmem:[%s20549_s29 + $0x770] sm:$0xff] }
 0x2d9   : > { %5012 = vperm.xlu1 %12371, %v10406_v57   ;;  %v10411_v57 = vld [vmem:[%s20549_s29 + $0x760] sm:$0xff]  ;;  %v14218_v56 = vpop.permute.xlu0 %3646 }
 0x2da   : > { %5007 = vperm.xlu0 %12370, %v10405_v32   ;;  %v10410_v32 = vld [vmem:[%s20549_s29 + $0x758] sm:$0xff]  ;;  %20706 = vst [vmem:[#allocation158_spill] sm:$0xff] %v14218_v56 }
 0x2dd   : > { %5022 = vperm.xlu1 %12371, %v10408_v3   ;;  %v14223_v3 = vpop.permute.xlu1 %3651 }
 0x2de   : > { %5017 = vperm.xlu0 %12370, %v10407_v35   ;;  %v10412_v35 = vld [vmem:[%s20549_s29 + $0x768] sm:$0xff]  ;;  %20707 = vst [vmem:[#allocation159_spill] sm:$0xff] %v14223_v3  ;;  %v10415_v3 = vld [vmem:[%s20549_s29 + $0x780] sm:$0xff] }
 0x2e1   : > { %5032 = vperm.xlu1 %12371, %v10410_v32   ;;  %v14231_v32 = vpop.permute.xlu0 %3656  ;;  %v14233_v56 = vpop.permute.xlu1 %3661 }
 0x2e2   : > { %5027 = vperm.xlu0 %12370, %v10409_v29   ;;  %v10414_v29 = vld [vmem:[%s20549_s29 + $0x778] sm:$0xff]  ;;  %20708 = vst [vmem:[#allocation160_spill] sm:$0xff] %v14231_v32  ;;  %20709 = vst [vmem:[#allocation161_spill] sm:$0xff] %v14233_v56  ;;  %v10419_v56 = vld [vmem:[%s20549_s29 + $0x7a0] sm:$0xff] }
 0x2e5   : > { %5042 = vperm.xlu1 %12371, %v10412_v35   ;;  %v10417_v35 = vld [vmem:[%s20549_s29 + $0x790] sm:$0xff]  ;;  %v14244_v21 = vpop.permute.xlu0 %3666 }
 0x2e6   : > { %5037 = vperm.xlu0 %12370, %v10411_v57   ;;  %v10416_v57 = vld [vmem:[%s20549_s29 + $0x788] sm:$0xff]  ;;  %20710 = vst [vmem:[#allocation162_spill] sm:$0xff] %v14244_v21 }
 0x2e9   : > { %5052 = vperm.xlu1 %12371, %v10414_v29   ;;  %v14249_v29 = vpop.permute.xlu1 %3671 }
 0x2ea   : > { %5047 = vperm.xlu0 %12370, %v10413_v41   ;;  %v10418_v41 = vld [vmem:[%s20549_s29 + $0x798] sm:$0xff]  ;;  %20711 = vst [vmem:[#allocation163_spill] sm:$0xff] %v14249_v29  ;;  %v10421_v29 = vld [vmem:[%s20549_s29 + $0x7b0] sm:$0xff] }
 0x2ed   : > { %5062 = vperm.xlu1 %12371, %v10416_v57   ;;  %v14257_v57 = vpop.permute.xlu0 %4003  ;;  %v14259_v21 = vpop.permute.xlu1 %4008 }
 0x2ee   : > { %5057 = vperm.xlu0 %12370, %v10415_v3   ;;  %v10420_v3 = vld [vmem:[%s20549_s29 + $0x7a8] sm:$0xff]  ;;  %20712 = vst [vmem:[#allocation164_spill] sm:$0xff] %v14257_v57  ;;  %20713 = vst [vmem:[#allocation165_spill] sm:$0xff] %v14259_v21  ;;  %v10425_v21 = vld [vmem:[%s20549_s29 + $0x7d0] sm:$0xff] }
 0x2f1   : > { %5072 = vperm.xlu1 %12371, %v10418_v41   ;;  %v10423_v41 = vld [vmem:[%s20549_s29 + $0x7c0] sm:$0xff]  ;;  %v14270_v32 = vpop.permute.xlu0 %4013 }
 0x2f2   : > { %5067 = vperm.xlu0 %12370, %v10417_v35   ;;  %v10422_v35 = vld [vmem:[%s20549_s29 + $0x7b8] sm:$0xff]  ;;  %20714 = vst [vmem:[#allocation166_spill] sm:$0xff] %v14270_v32 }
 0x2f5   : > { %5082 = vperm.xlu1 %12371, %v10420_v3   ;;  %v14275_v3 = vpop.permute.xlu1 %4018 }
 0x2f6   : > { %5077 = vperm.xlu0 %12370, %v10419_v56   ;;  %v10424_v56 = vld [vmem:[%s20549_s29 + $0x7c8] sm:$0xff]  ;;  %20715 = vst [vmem:[#allocation167_spill] sm:$0xff] %v14275_v3  ;;  %v10427_v3 = vld [vmem:[%s20549_s29 + $0x7e0] sm:$0xff] }
 0x2f9   : > { %5092 = vperm.xlu1 %12371, %v10422_v35   ;;  %v14283_v35 = vpop.permute.xlu0 %4023  ;;  %v14285_v57 = vpop.permute.xlu1 %4028 }
 0x2fa   : > { %5087 = vperm.xlu0 %12370, %v10421_v29   ;;  %v10426_v29 = vld [vmem:[%s20549_s29 + $0x7d8] sm:$0xff]  ;;  %20716 = vst [vmem:[#allocation168_spill] sm:$0xff] %v14283_v35  ;;  %20717 = vst [vmem:[#allocation169_spill] sm:$0xff] %v14285_v57  ;;  %v10448_v57 = vld [vmem:[%s20549_s29 + $0x800] sm:$0xff] }
 0x2fd   : > { %5102 = vperm.xlu1 %12371, %v10424_v56   ;;  %v10429_v56 = vld [vmem:[%s20549_s29 + $0x7f0] sm:$0xff]  ;;  %v14296_v32 = vpop.permute.xlu0 %4033 }
 0x2fe   : > { %5097 = vperm.xlu0 %12370, %v10423_v41   ;;  %v10428_v41 = vld [vmem:[%s20549_s29 + $0x7e8] sm:$0xff]  ;;  %20718 = vst [vmem:[#allocation170_spill] sm:$0xff] %v14296_v32 }
 0x301   : > { %5112 = vperm.xlu1 %12371, %v10426_v29   ;;  %v14301_v29 = vpop.permute.xlu1 %4038 }
 0x302   : > { %5107 = vperm.xlu0 %12370, %v10425_v21   ;;  %v10430_v21 = vld [vmem:[%s20549_s29 + $0x7f8] sm:$0xff]  ;;  %20719 = vst [vmem:[#allocation171_spill] sm:$0xff] %v14301_v29  ;;  %v10450_v29 = vld [vmem:[%s20549_s29 + $0x810] sm:$0xff] }
 0x305   : > { %5122 = vperm.xlu1 %12371, %v10428_v41   ;;  %v14309_v41 = vpop.permute.xlu0 %4043  ;;  %v14311_v32 = vpop.permute.xlu1 %4048 }
 0x306   : > { %5117 = vperm.xlu0 %12370, %v10427_v3   ;;  %v10449_v3 = vld [vmem:[%s20549_s29 + $0x808] sm:$0xff]  ;;  %20720 = vst [vmem:[#allocation172_spill] sm:$0xff] %v14309_v41  ;;  %20721 = vst [vmem:[#allocation173_spill] sm:$0xff] %v14311_v32  ;;  %v10454_v32 = vld [vmem:[%s20549_s29 + $0x830] sm:$0xff] }
 0x309   : > { %5132 = vperm.xlu1 %12371, %v10430_v21   ;;  %v10452_v21 = vld [vmem:[%s20549_s29 + $0x820] sm:$0xff]  ;;  %v14322_v35 = vpop.permute.xlu0 %4053 }
 0x30a   : > { %5127 = vperm.xlu0 %12370, %v10429_v56   ;;  %v10451_v56 = vld [vmem:[%s20549_s29 + $0x818] sm:$0xff]  ;;  %20722 = vst [vmem:[#allocation174_spill] sm:$0xff] %v14322_v35 }
 0x30d   : > { %5469 = vperm.xlu1 %12371, %v10449_v3   ;;  %v14327_v3 = vpop.permute.xlu1 %4058 }
 0x30e   : > { %5464 = vperm.xlu0 %12370, %v10448_v57   ;;  %v10453_v57 = vld [vmem:[%s20549_s29 + $0x828] sm:$0xff]  ;;  %20723 = vst [vmem:[#allocation175_spill] sm:$0xff] %v14327_v3 }
 0x311   : > { %5479 = vperm.xlu1 %12371, %v10451_v56   ;;  %v14335_v56 = vpop.permute.xlu0 %4063  ;;  %v14337_v41 = vpop.permute.xlu1 %4068 }
 0x312   : > { %5474 = vperm.xlu0 %12370, %v10450_v29   ;;  %v10455_v29 = vld [vmem:[%s20549_s29 + $0x838] sm:$0xff]  ;;  %20724 = vst [vmem:[#allocation176_spill] sm:$0xff] %v14335_v56  ;;  %20725 = vst [vmem:[#allocation177_spill] sm:$0xff] %v14337_v41 }
 0x315   : > { %5489 = vperm.xlu1 %12371, %v10453_v57   ;;  %v10458_v57 = vld [vmem:[%s20549_s29 + $0x850] sm:$0xff]  ;;  %v14348_v30 = vpop.permute.xlu0 %4073 }
 0x316   : > { %5484 = vperm.xlu0 %12370, %v10452_v21   ;;  %v10457_v21 = vld [vmem:[%s20549_s29 + $0x848] sm:$0xff]  ;;  %20726 = vst [vmem:[#allocation178_spill] sm:$0xff] %v14348_v30 }
 0x319   : > { %5499 = vperm.xlu1 %12371, %v10455_v29   ;;  %v14353_v29 = vpop.permute.xlu1 %4078 }
 0x31a   : > { %5494 = vperm.xlu0 %12370, %v10454_v32   ;;  %v10459_v32 = vld [vmem:[%s20549_s29 + $0x858] sm:$0xff]  ;;  %20727 = vst [vmem:[#allocation179_spill] sm:$0xff] %v14353_v29  ;;  %v10462_v29 = vld [vmem:[%s20549_s29 + $0x870] sm:$0xff] }
 0x31d   : > { %5509 = vperm.xlu1 %12371, %v10457_v21   ;;  %v14361_v21 = vpop.permute.xlu0 %4083  ;;  %v14363_v30 = vpop.permute.xlu1 %4088 }
 0x31e   : > { %5504 = vperm.xlu0 %12370, %v10456_v62   ;;  %v10461_v62 = vld [vmem:[%s20549_s29 + $0x868] sm:$0xff]  ;;  %20728 = vst [vmem:[#allocation180_spill] sm:$0xff] %v14361_v21  ;;  %20729 = vst [vmem:[#allocation181_spill] sm:$0xff] %v14363_v30  ;;  %v10466_v30 = vld [vmem:[%s20549_s29 + $0x890] sm:$0xff] }
 0x321   : > { %5519 = vperm.xlu1 %12371, %v10459_v32   ;;  %v10464_v32 = vld [vmem:[%s20549_s29 + $0x880] sm:$0xff]  ;;  %v14374_v26 = vpop.permute.xlu0 %4093 }
 0x322   : > { %5514 = vperm.xlu0 %12370, %v10458_v57   ;;  %v10463_v57 = vld [vmem:[%s20549_s29 + $0x878] sm:$0xff]  ;;  %20730 = vst [vmem:[#allocation182_spill] sm:$0xff] %v14374_v26 }
 0x325   : > { %5529 = vperm.xlu1 %12371, %v10461_v62   ;;  %v14379_v62 = vpop.permute.xlu1 %4098  ;;  %v14387_v26 = vpop.permute.xlu0 %4103 }
 0x326   : > { %5524 = vperm.xlu0 %12370, %v10460_v58   ;;  %v10465_v58 = vld [vmem:[%s20549_s29 + $0x888] sm:$0xff]  ;;  %20731 = vst [vmem:[#allocation183_spill] sm:$0xff] %v14379_v62  ;;  %20732 = vst [vmem:[#allocation184_spill] sm:$0xff] %v14387_v26  ;;  %v20734_v62 = vmov 0.0  }
 0x329   : > { %5539 = vperm.xlu1 %12371, %v10463_v57   ;;  %v14389_v15 = vpop.permute.xlu1 %4108 }
 0x32a   : > { %5534 = vperm.xlu0 %12370, %v10462_v29   ;;  %v10467_v29 = vld [vmem:[%s20549_s29 + $0x898] sm:$0xff]  ;;  %20733 = vst [vmem:[#allocation185_spill] sm:$0xff] %v14389_v15 }
 0x32d   : > { %5549 = vperm.xlu1 %12371, %v10465_v58   ;;  %v10469_v58 = vld [vmem:[%s20549_s29 + $0x8a8] sm:$0xff] }
 0x32e   : > { %5544 = vperm.xlu0 %12370, %v10464_v32   ;;  %v10468_v32 = vld [vmem:[%s20549_s29 + $0x8a0] sm:$0xff] }
 0x331   : > { %5559 = vperm.xlu1 %12371, %v10467_v29   ;;  %v10471_v29 = vld [vmem:[%s20549_s29 + $0x8b8] sm:$0xff] }
 0x332   : > { %5554 = vperm.xlu0 %12370, %v10466_v30   ;;  %v10470_v30 = vld [vmem:[%s20549_s29 + $0x8b0] sm:$0xff] }
 0x333   : > { %v1084_v57 = vpop.f32.mrb[4].mxu0 }
 0x334   : > { %v1088_v21 = vmul.f32 0.0009765625, %v1084_v57  ;;  %v11039_v41 = vpop.f32.mrb[5].mxu0  ;;  %v10472_v57 = vld [vmem:[%s20549_s29 + $0x8c0] sm:$0xff] }
 0x335   : > { %5569 = vperm.xlu1 %12371, %v10469_v58   ;;  %v14403_v41 = vpop.permute.xlu0 %4113 }
 0x336   : > { %11043 = vmatmul.mubr.msk.f32.vlgmr.msra.gmra.mrb[0].mxu1 %vm800_vm4, %v1088_v21  ;;  %5564 = vperm.xlu0 %12370, %v10468_v32   ;;  %20735 = vst [vmem:[#allocation186_spill] sm:$0xff] %v14403_v41  ;;  %v14408_v21 = vpop.permute.xlu1 %4118  ;;  %v10473_v32 = vld [vmem:[%s20549_s29 + $0x8c8] sm:$0xff] }
 0x337   : > { %11359 = vmatprep.mubr.msk.f32.mxu1 %vm12689_vm1, %v20734_v62  ;;  %20736 = vst [vmem:[#allocation187_spill] sm:$0xff] %v14408_v21  ;;  %v10474_v21 = vld [vmem:[%s20549_s29 + $0x8d0] sm:$0xff] }
 0x339   : > { %5579 = vperm.xlu1 %12371, %v10471_v29   ;;  %v14416_v58 = vpop.permute.xlu0 %4123  ;;  %v10476_v29 = vld [vmem:[%s20549_s29 + $0x8e0] sm:$0xff] }
 0x33a   : > { %5574 = vperm.xlu0 %12370, %v10470_v30   ;;  %20737 = vst [vmem:[#allocation188_spill] sm:$0xff] %v14416_v58  ;;  %v14418_v62 = vpop.permute.xlu1 %4128  ;;  %v10475_v30 = vld [vmem:[%s20549_s29 + $0x8d8] sm:$0xff] }
 0x33b   : > { %20738 = vst [vmem:[#allocation189_spill] sm:$0xff] %v14418_v62  ;;  %v10478_v62 = vld [vmem:[%s20549_s29 + $0x8f0] sm:$0xff] }
 0x33d   : > { %5589 = vperm.xlu1 %12371, %v10473_v32   ;;  %v14429_v41 = vpop.permute.xlu0 %4133 }
 0x33e   : > { %5584 = vperm.xlu0 %12370, %v10472_v57   ;;  %20739 = vst [vmem:[#allocation190_spill] sm:$0xff] %v14429_v41  ;;  %v10477_v57 = vld [vmem:[%s20549_s29 + $0x8e8] sm:$0xff]  ;;  %v14434_v32 = vpop.permute.xlu1 %4138 }
 0x33f   : > { %20740 = vst [vmem:[#allocation191_spill] sm:$0xff] %v14434_v32 }
 0x341   : > { %5599 = vperm.xlu1 %12371, %v10475_v30   ;;  %v14442_v30 = vpop.permute.xlu0 %4143 }
 0x342   : > { %5594 = vperm.xlu0 %12370, %v10474_v21   ;;  %v10479_v21 = vld [vmem:[%s20549_s29 + $0x8f8] sm:$0xff]  ;;  %20741 = vst [vmem:[#allocation192_spill] sm:$0xff] %v14442_v30  ;;  %v14444_v41 = vpop.permute.xlu1 %4148 }
 0x343   : > { %20742 = vst [vmem:[#allocation193_spill] sm:$0xff] %v14444_v41 }
 0x345   : > { %5609 = vperm.xlu1 %12371, %v10477_v57   ;;  %v14446_v58 = vpop.permute.xlu0 %4153 }
 0x346   : > { %5604 = vperm.xlu0 %12370, %v10476_v29   ;;  %20743 = vst [vmem:[#allocation194_spill] sm:$0xff] %v14446_v58  ;;  %v14448_v15 = vpop.permute.xlu1 %4158 }
 0x347   : > { %20744 = vst [vmem:[#allocation195_spill] sm:$0xff] %v14448_v15 }
 0x349   : > { %5619 = vperm.xlu1 %12371, %v10479_v21   ;;  %v14450_v29 = vpop.permute.xlu0 %4490 }
 0x34a   : > { %5614 = vperm.xlu0 %12370, %v10478_v62   ;;  %20745 = vst [vmem:[#allocation196_spill] sm:$0xff] %v14450_v29  ;;  %v14452_v57 = vpop.permute.xlu1 %4495 }
 0x34b   : > { %20746 = vst [vmem:[#allocation197_spill] sm:$0xff] %v14452_v57 }
 0x34d   : > { %v14454_v32 = vpop.permute.xlu0 %4500 }
 0x34e   : > { %20747 = vst [vmem:[#allocation198_spill] sm:$0xff] %v14454_v32  ;;  %v14456_v26 = vpop.permute.xlu1 %4505 }
 0x34f   : > { %20748 = vst [vmem:[#allocation199_spill] sm:$0xff] %v14456_v26 }
 0x351   : > { %v14458_v56 = vpop.permute.xlu0 %4510 }
 0x352   : > { %20749 = vst [vmem:[#allocation200_spill] sm:$0xff] %v14458_v56  ;;  %v14460_v39 = vpop.permute.xlu1 %4515 }
 0x353   : > { %20750 = vst [vmem:[#allocation201_spill] sm:$0xff] %v14460_v39 }
 0x355   : > { %v14462_v62 = vpop.permute.xlu0 %4520 }
 0x356   : > { %20751 = vst [vmem:[#allocation202_spill] sm:$0xff] %v14462_v62  ;;  %v14464_v41 = vpop.permute.xlu1 %4525 }
 0x357   : > { %20752 = vst [vmem:[#allocation203_spill] sm:$0xff] %v14464_v41 }
 0x359   : > { %v14466_v21 = vpop.permute.xlu0 %4530 }
 0x35a   : > { %20753 = vst [vmem:[#allocation204_spill] sm:$0xff] %v14466_v21  ;;  %v14468_v58 = vpop.permute.xlu1 %4535 }
 0x35b   : > { %20754 = vst [vmem:[#allocation205_spill] sm:$0xff] %v14468_v58 }
 0x35d   : > { %v14470_v15 = vpop.permute.xlu0 %4540 }
 0x35e   : > { %20755 = vst [vmem:[#allocation206_spill] sm:$0xff] %v14470_v15  ;;  %v14472_v29 = vpop.permute.xlu1 %4545 }
 0x35f   : > { %20756 = vst [vmem:[#allocation207_spill] sm:$0xff] %v14472_v29 }
 0x361   : > { %v14474_v57 = vpop.permute.xlu0 %4550 }
 0x362   : > { %20757 = vst [vmem:[#allocation208_spill] sm:$0xff] %v14474_v57  ;;  %v14476_v32 = vpop.permute.xlu1 %4555 }
 0x363   : > { %20758 = vst [vmem:[#allocation209_spill] sm:$0xff] %v14476_v32 }
 0x365   : > { %v14478_v26 = vpop.permute.xlu0 %4560 }
 0x366   : > { %20759 = vst [vmem:[#allocation210_spill] sm:$0xff] %v14478_v26  ;;  %v14480_v56 = vpop.permute.xlu1 %4565 }
 0x367   : > { %20760 = vst [vmem:[#allocation211_spill] sm:$0xff] %v14480_v56 }
 0x369   : > { %v14482_v39 = vpop.permute.xlu0 %4570 }
 0x36a   : > { %20761 = vst [vmem:[#allocation212_spill] sm:$0xff] %v14482_v39  ;;  %v14484_v62 = vpop.permute.xlu1 %4575 }
 0x36b   : > { %20762 = vst [vmem:[#allocation213_spill] sm:$0xff] %v14484_v62 }
 0x36d   : > { %v14486_v41 = vpop.permute.xlu0 %4580 }
 0x36e   : > { %20763 = vst [vmem:[#allocation214_spill] sm:$0xff] %v14486_v41  ;;  %v14488_v21 = vpop.permute.xlu1 %4585 }
 0x36f   : > { %20764 = vst [vmem:[#allocation215_spill] sm:$0xff] %v14488_v21 }
 0x371   : > { %v14490_v30 = vpop.permute.xlu0 %4590 }
 0x372   : > { %20765 = vst [vmem:[#allocation216_spill] sm:$0xff] %v14490_v30  ;;  %v14492_v58 = vpop.permute.xlu1 %4595 }
 0x373   : > { %20766 = vst [vmem:[#allocation217_spill] sm:$0xff] %v14492_v58 }
 0x375   : > { %v14494_v63 = vpop.permute.xlu0 %4600 }
 0x376   : > { %20767 = vst [vmem:[#allocation218_spill] sm:$0xff] %v14494_v63  ;;  %v14496_v57 = vpop.permute.xlu1 %4605 }
 0x377   : > { %20768 = vst [vmem:[#allocation219_spill] sm:$0xff] %v14496_v57 }
 0x379   : > { %v14498_v32 = vpop.permute.xlu0 %4610 }
 0x37a   : > { %20769 = vst [vmem:[#allocation220_spill] sm:$0xff] %v14498_v32  ;;  %v14500_v26 = vpop.permute.xlu1 %4615 }
 0x37b   : > { %20770 = vst [vmem:[#allocation221_spill] sm:$0xff] %v14500_v26 }
 0x37d   : > { %v14502_v56 = vpop.permute.xlu0 %4620 }
 0x37e   : > { %20771 = vst [vmem:[#allocation222_spill] sm:$0xff] %v14502_v56  ;;  %v14504_v39 = vpop.permute.xlu1 %4625 }
 0x37f   : > { %20772 = vst [vmem:[#allocation223_spill] sm:$0xff] %v14504_v39 }
 0x381   : > { %v14506_v62 = vpop.permute.xlu0 %4630 }
 0x382   : > { %20773 = vst [vmem:[#allocation224_spill] sm:$0xff] %v14506_v62  ;;  %v14508_v41 = vpop.permute.xlu1 %4635 }
 0x383   : > { %20774 = vst [vmem:[#allocation225_spill] sm:$0xff] %v14508_v41 }
 0x385   : > { %v14510_v21 = vpop.permute.xlu0 %4640 }
 0x386   : > { %20775 = vst [vmem:[#allocation226_spill] sm:$0xff] %v14510_v21  ;;  %v14512_v30 = vpop.permute.xlu1 %4645 }
 0x387   : > { %20776 = vst [vmem:[#allocation227_spill] sm:$0xff] %v14512_v30 }
 0x389   : > { %v14514_v58 = vpop.permute.xlu0 %4977 }
 0x38a   : > { %20777 = vst [vmem:[#allocation228_spill] sm:$0xff] %v14514_v58  ;;  %v14516_v63 = vpop.permute.xlu1 %4982 }
 0x38b   : > { %20778 = vst [vmem:[#allocation229_spill] sm:$0xff] %v14516_v63 }
 0x38d   : > { %v14518_v57 = vpop.permute.xlu0 %4987 }
 0x38e   : > { %20779 = vst [vmem:[#allocation230_spill] sm:$0xff] %v14518_v57  ;;  %v14520_v32 = vpop.permute.xlu1 %4992 }
 0x38f   : > { %20780 = vst [vmem:[#allocation231_spill] sm:$0xff] %v14520_v32 }
 0x391   : > { %v14522_v26 = vpop.permute.xlu0 %4997 }
 0x392   : > { %20781 = vst [vmem:[#allocation232_spill] sm:$0xff] %v14522_v26  ;;  %v14524_v56 = vpop.permute.xlu1 %5002 }
 0x393   : > { %20782 = vst [vmem:[#allocation233_spill] sm:$0xff] %v14524_v56 }
 0x395   : > { %v14526_v39 = vpop.permute.xlu0 %5007 }
 0x396   : > { %20783 = vst [vmem:[#allocation234_spill] sm:$0xff] %v14526_v39  ;;  %v14528_v62 = vpop.permute.xlu1 %5012 }
 0x397   : > { %20784 = vst [vmem:[#allocation235_spill] sm:$0xff] %v14528_v62 }
 0x399   : > { %v14530_v41 = vpop.permute.xlu0 %5017 }
 0x39a   : > { %20785 = vst [vmem:[#allocation236_spill] sm:$0xff] %v14530_v41  ;;  %v14532_v21 = vpop.permute.xlu1 %5022 }
 0x39b   : > { %20786 = vst [vmem:[#allocation237_spill] sm:$0xff] %v14532_v21 }
 0x39d   : > { %v14534_v30 = vpop.permute.xlu0 %5027 }
 0x39e   : > { %20787 = vst [vmem:[#allocation238_spill] sm:$0xff] %v14534_v30  ;;  %v14536_v58 = vpop.permute.xlu1 %5032 }
 0x39f   : > { %20788 = vst [vmem:[#allocation239_spill] sm:$0xff] %v14536_v58 }
 0x3a1   : > { %v14538_v63 = vpop.permute.xlu0 %5037 }
 0x3a2   : > { %20789 = vst [vmem:[#allocation240_spill] sm:$0xff] %v14538_v63  ;;  %v14540_v57 = vpop.permute.xlu1 %5042 }
 0x3a3   : > { %20790 = vst [vmem:[#allocation241_spill] sm:$0xff] %v14540_v57 }
 0x3a5   : > { %v14542_v32 = vpop.permute.xlu0 %5047 }
 0x3a6   : > { %20791 = vst [vmem:[#allocation242_spill] sm:$0xff] %v14542_v32  ;;  %v14544_v26 = vpop.permute.xlu1 %5052  ;;  %v1089_v32 = vld [vmem:[%s19807_s5] sm:$0x1] }
 0x3a7   : > { %20792 = vst [vmem:[#allocation243_spill] sm:$0xff] %v14544_v26 }
 0x3a9   : > { %v14546_v56 = vpop.permute.xlu0 %5057 }
 0x3aa   : > { %20793 = vst [vmem:[#allocation244_spill] sm:$0xff] %v14546_v56  ;;  %v14548_v62 = vpop.permute.xlu1 %5062 }
 0x3ab   : > { %20794 = vst [vmem:[#allocation245_spill] sm:$0xff] %v14548_v62 }
 0x3ad   : > { %v14550_v8 = vpop.permute.xlu0 %5067 }
 0x3ae   : > { %20795 = vst [vmem:[#allocation246_spill] sm:$0xff] %v14550_v8  ;;  %v14552_v48 = vpop.permute.xlu1 %5072 }
 0x3af   : > { %20796 = vst [vmem:[#allocation247_spill] sm:$0xff] %v14552_v48 }
 0x3b1   : > { %v14554_v15 = vpop.permute.xlu0 %5077 }
 0x3b2   : > { %20797 = vst [vmem:[#allocation248_spill] sm:$0xff] %v14554_v15  ;;  %v14559_v26 = vpop.permute.xlu1 %5082 }
 0x3b3   : > { %20798 = vst [vmem:[#allocation249_spill] sm:$0xff] %v14559_v26 }
 0x3b6   : > { %v14570_v15 = vpop.permute.xlu1 %5092 }
 0x3b7   : > { %20800 = vst [vmem:[#allocation251_spill] sm:$0xff] %v14570_v15 }
 0x3ba   : > { %v14627_v15 = vpop.permute.xlu1 %5102 }
 0x3bb   : > { %20802 = vst [vmem:[#allocation253_spill] sm:$0xff] %v14627_v15 }
 0x409   : > { %v1159_v39 = vpop.f32.mrb[0].mxu1 }
 0x40a   : > { %v1160_v27 = vadd.f32 1e-06, %v1159_v39  ;;  %v11044_v29 = vpop.f32.mrb[1].mxu1  ;;  %v14564_v39 = vpop.permute.xlu0 %5087 }
 0x40b   : > { %20799 = vst [vmem:[#allocation250_spill] sm:$0xff] %v14564_v39 }
 0x40c   : > { %12372 = vrsqrt.f32 %v1160_v27 }
 0x416   : > { %v12373_v57 = vpop.eup %12372 }
 0x417   : > { %v1164_v56 = vmul.f32 %v12373_v57, %v1089_v32 }
 0x419   : > { %v14562_v63 = vrot.slane %v1164_v56, %v13474_v11 }
 0x41b   : > { %v1171_v27 = vmul.f32 %v14562_v63, %v13496_v42  ;;  %v1172_v29 = vmul.f32 %v14562_v63, %v13500_v53  ;;  %v1173_v48 = vmul.f32 %v14562_v63, %v13504_v51  ;;  %v1174_v26 = vmul.f32 %v14562_v63, %v13510_v33 }
 0x41c   : > { %v1175_v56 = vmul.f32 %v14562_v63, %v13526_v6  ;;  %v1176_v32 = vmul.f32 %v14562_v63, %v13535_v54  ;;  %v1177_v42 = vmul.f32 %v14562_v63, %v13550_v13  ;;  %v1178_v53 = vmul.f32 %v14562_v63, %v13559_v50 }
 0x41d   : > { %v1179_v57 = vmul.f32 %v14562_v63, %v13576_v10  ;;  %v1180_v51 = vmul.f32 %v14562_v63, %v13586_v45  ;;  %v1181_v33 = vmul.f32 %v14562_v63, %v13601_v25  ;;  %v1182_v6 = vmul.f32 %v14562_v63, %v13610_v4  ;;  %v14607_v4 = vld [vmem:[%s19808_s6] ss:$0 sm:$0xff] }
 0x41e   : > { %v1183_v54 = vmul.f32 %v14562_v63, %v13625_v31  ;;  %v1184_v13 = vmul.f32 %v14562_v63, %v13634_v18  ;;  %v1185_v50 = vmul.f32 %v14562_v63, %v13649_v37  ;;  %v1186_v10 = vmul.f32 %v14562_v63, %v13658_v23  ;;  %v14609_v31 = vpop.permute.xlu0 %5097 }
 0x41f   : > { %v1187_v45 = vmul.f32 %v14562_v63, %v13673_v43  ;;  %v1188_v25 = vmul.f32 %v14562_v63, %v13682_v38  ;;  %20801 = vst [vmem:[#allocation252_spill] sm:$0xff] %v14609_v31  ;;  %v1189_v18 = vmul.f32 %v14562_v63, %v13697_v49  ;;  %v1190_v37 = vmul.f32 %v14562_v63, %v13706_v34 }
 0x420   : > { %v1191_v23 = vmul.f32 %v14562_v63, %v13721_v55  ;;  %v1192_v43 = vmul.f32 %v14562_v63, %v13730_v40  ;;  %v1193_v38 = vmul.f32 %v14562_v63, %v13745_v46  ;;  %v1194_v11 = vmul.f32 %v14562_v63, %v13754_v0 }
 0x421   : > { %v1195_v31 = vmul.f32 %v14562_v63, %v13769_v9  ;;  %v1196_v49 = vmul.f32 %v14562_v63, %v13778_v28  ;;  %v1197_v34 = vmul.f32 %v14562_v63, %v13793_v7  ;;  %v1198_v55 = vmul.f32 %v14562_v63, %v13802_v52 }
 0x422   : > { %v1199_v40 = vmul.f32 %v14562_v63, %v13817_v16  ;;  %v1200_v46 = vmul.f32 %v14562_v63, %v13826_v2  ;;  %v14638_v0 = vadd.f32 %v14607_v4, %v1171_v27  ;;  %v14641_v9 = vadd.f32 %v14607_v4, %v1172_v29 }
 0x423   : > { %v14644_v28 = vadd.f32 %v14607_v4, %v1173_v48  ;;  %v14647_v7 = vadd.f32 %v14607_v4, %v1174_v26  ;;  %v14650_v52 = vadd.f32 %v14607_v4, %v1175_v56  ;;  %v14653_v16 = vadd.f32 %v14607_v4, %v1176_v32  ;;  %v14673_v32 = vpop.permute.xlu0 %5107 }
 0x424   : > { %20803 = vst [vmem:[#allocation254_spill] sm:$0xff] %v14638_v0  ;;  %20804 = vst [vmem:[#allocation255_spill] sm:$0xff] %v14641_v9  ;;  %v14656_v2 = vadd.f32 %v14607_v4, %v1177_v42  ;;  %v14659_v27 = vadd.f32 %v14607_v4, %v1178_v53  ;;  %v14662_v29 = vadd.f32 %v14607_v4, %v1179_v57 }
 0x425   : > { %20805 = vst [vmem:[#allocation256_spill] sm:$0xff] %v14647_v7  ;;  %20806 = vst [vmem:[#allocation257_spill] sm:$0xff] %v14650_v52  ;;  %v14665_v48 = vadd.f32 %v14607_v4, %v1180_v51  ;;  %v14668_v26 = vadd.f32 %v14607_v4, %v1181_v33  ;;  %v14671_v56 = vadd.f32 %v14607_v4, %v1182_v6  ;;  %v1247_v58 = vsub.f32 0.0, %v14653_v16 }
 0x426   : > { %20807 = vst [vmem:[#allocation258_spill] sm:$0xff] %v14653_v16  ;;  %20808 = vst [vmem:[#allocation259_spill] sm:$0xff] %v14673_v32  ;;  %v14676_v42 = vadd.f32 %v14607_v4, %v1183_v54  ;;  %v14679_v53 = vadd.f32 %v14607_v4, %v1184_v13  ;;  %v14682_v57 = vadd.f32 %v14607_v4, %v1185_v50  ;;  %v14699_v13 = vpop.permute.xlu1 %5112 }
 0x427   : > { %v14685_v51 = vadd.f32 %v14607_v4, %v1186_v10  ;;  %v14688_v33 = vadd.f32 %v14607_v4, %v1187_v45  ;;  %v14691_v6 = vadd.f32 %v14607_v4, %v1188_v25  ;;  %v14694_v32 = vadd.f32 %v14607_v4, %v1189_v18  ;;  %20811 = vst [vmem:[#allocation262_spill] sm:$0xff] %v14699_v13  ;;  %v14733_v15 = vpop.permute.xlu0 %5117 }
 0x428   : > { %v14697_v54 = vadd.f32 %v14607_v4, %v1190_v37  ;;  %v14702_v50 = vadd.f32 %v14607_v4, %v1191_v23  ;;  %v14705_v10 = vadd.f32 %v14607_v4, %v1192_v43  ;;  %v14708_v45 = vadd.f32 %v14607_v4, %v1193_v38  ;;  %20817 = vst [vmem:[#allocation268_spill] sm:$0xff] %v14733_v15 }
 0x429   : > { %20809 = vst [vmem:[#allocation260_spill] sm:$0xff] %v14694_v32  ;;  %v14711_v25 = vadd.f32 %v14607_v4, %v1194_v11  ;;  %v14714_v18 = vadd.f32 %v14607_v4, %v1195_v31  ;;  %v14717_v37 = vadd.f32 %v14607_v4, %v1196_v49  ;;  %v14720_v13 = vadd.f32 %v14607_v4, %v1197_v34 }
 0x42a   : > { %20810 = vst [vmem:[#allocation261_spill] sm:$0xff] %v14697_v54  ;;  %20812 = vst [vmem:[#allocation263_spill] sm:$0xff] %v14702_v50  ;;  %v14723_v23 = vadd.f32 %v14607_v4, %v1198_v55  ;;  %v14726_v43 = vadd.f32 %v14607_v4, %v1199_v40  ;;  %v14729_v38 = vadd.f32 %v14607_v4, %v1200_v46  ;;  %v1252_v11 = vsub.f32 0.0, %v14668_v26  ;;  %v14735_v8 = vpop.permute.xlu1 %5122 }
 0x42b   : > { %20813 = vst [vmem:[#allocation264_spill] sm:$0xff] %v14705_v10  ;;  %20814 = vst [vmem:[#allocation265_spill] sm:$0xff] %v14708_v45  ;;  %v1253_v31 = vsub.f32 0.0, %v14671_v56  ;;  %v1254_v34 = vsub.f32 0.0, %v14676_v42  ;;  %v14738_v55 = vpop.permute.xlu0 %5127  ;;  %v1242_v40 = vsub.f32 0.0, %v14638_v0  ;;  %v1243_v46 = vsub.f32 0.0, %v14641_v9 }
 0x42c   : > { %20815 = vst [vmem:[#allocation266_spill] sm:$0xff] %v14711_v25  ;;  %20816 = vst [vmem:[#allocation267_spill] sm:$0xff] %v14714_v18  ;;  %v1294_v49 = vmul.f32 1.442695, %v1252_v11  ;;  %v1255_v62 = vsub.f32 0.0, %v14679_v53  ;;  %v1244_v11 = vsub.f32 0.0, %v14644_v28  ;;  %v1201_v9 = vmul.f32 %v14562_v63, %v13836_v44 }
 0x42d   : > { %v1296_v39 = vmul.f32 1.442695, %v1253_v31  ;;  %20818 = vst [vmem:[#allocation269_spill] sm:$0xff] %v14735_v8  ;;  %20819 = vst [vmem:[#allocation270_spill] sm:$0xff] %v14738_v55  ;;  %v1298_v1 = vmul.f32 1.442695, %v1254_v34 }
 0x42e   : > { %12374 = vpow2.f32 %v1294_v49  ;;  %v14743_v60 = vpop.permute.xlu1 %5132  ;;  %v1274_v31 = vmul.f32 1.442695, %v1242_v40  ;;  %v1245_v49 = vsub.f32 0.0, %v14647_v7  ;;  %v1300_v8 = vmul.f32 1.442695, %v1255_v62 }
 0x42f   : > { %12376 = vpow2.f32 %v1296_v39  ;;  %20820 = vst [vmem:[#allocation271_spill] sm:$0xff] %v14743_v60  ;;  %v1276_v39 = vmul.f32 1.442695, %v1243_v46  ;;  %v14747_v15 = vpop.permute.xlu0 %5464  ;;  %v1246_v55 = vsub.f32 0.0, %v14650_v52  ;;  %v1248_v40 = vsub.f32 0.0, %v14656_v2 }
 0x430   : > { %12378 = vpow2.f32 %v1298_v1  ;;  %20821 = vst [vmem:[#allocation272_spill] sm:$0xff] %v14747_v15  ;;  %v1278_v7 = vmul.f32 1.442695, %v1244_v11  ;;  %v1202_v62 = vmul.f32 %v14562_v63, %v13847_v19  ;;  %v1280_v15 = vmul.f32 1.442695, %v1245_v49 }
 0x431   : > { %12380 = vpow2.f32 %v1300_v8  ;;  %v1249_v44 = vsub.f32 0.0, %v14659_v27  ;;  %v1282_v52 = vmul.f32 1.442695, %v1246_v55  ;;  %v1250_v8 = vsub.f32 0.0, %v14662_v29 }
 0x432   : > { %v14753_v60 = vpop.permute.xlu1 %5469  ;;  %12382 = vpow2.f32 %v1274_v31  ;;  %v1284_v16 = vmul.f32 1.442695, %v1247_v58  ;;  %v14763_v11 = vadd.f32 %v14607_v4, %v1201_v9  ;;  %v14766_v19 = vadd.f32 %v14607_v4, %v1202_v62 }
 0x433   : > { %20822 = vst [vmem:[#allocation273_spill] sm:$0xff] %v14753_v60  ;;  %12384 = vpow2.f32 %v1276_v39  ;;  %v14760_v60 = vpop.permute.xlu0 %5474  ;;  %v1251_v63 = vsub.f32 0.0, %v14665_v48  ;;  %v1256_v55 = vsub.f32 0.0, %v14682_v57  ;;  %v1257_v58 = vsub.f32 0.0, %v14685_v51 }
 0x434   : > { %20823 = vst [vmem:[#allocation274_spill] sm:$0xff] %v14760_v60  ;;  %v1288_v39 = vmul.f32 1.442695, %v1249_v44  ;;  %v1258_v9 = vsub.f32 0.0, %v14688_v33  ;;  %v1262_v62 = vsub.f32 0.0, %v14702_v50 }
 0x436   : > { %v14769_v49 = vpop.permute.xlu1 %5479 }
 0x437   : > { %20824 = vst [vmem:[#allocation275_spill] sm:$0xff] %v14769_v49  ;;  %v14783_v49 = vpop.permute.xlu0 %5484 }
 0x438   : > { %v12375_v0 = vpop.eup %12374  ;;  %20825 = vst [vmem:[#allocation276_spill] sm:$0xff] %v14783_v49 }
 0x439   : > { %v12377_v34 = vpop.eup %12376  ;;  %v1348_v1 = vadd.f32 1.0, %v12375_v0  ;;  %v1286_v0 = vmul.f32 1.442695, %v1248_v40 }
 0x43a   : > { %v1349_v46 = vadd.f32 1.0, %v12377_v34  ;;  %v12379_v31 = vpop.eup %12378  ;;  %v1260_v34 = vsub.f32 0.0, %v14694_v32 }
 0x43b   : > { %12386 = vrcp.f32 %v1348_v1  ;;  %v1350_v4 = vadd.f32 1.0, %v12379_v31  ;;  %v1261_v1 = vsub.f32 0.0, %v14697_v54  ;;  %v12381_v40 = vpop.eup %12380  ;;  %v1266_v54 = vsub.f32 0.0, %v14714_v18 }
 0x43c   : > { %12388 = vrcp.f32 %v1349_v46  ;;  %v1292_v46 = vmul.f32 1.442695, %v1251_v63  ;;  %v14781_v44 = vpop.eup %12382  ;;  %v1351_v31 = vadd.f32 1.0, %v12381_v40  ;;  %v14791_v63 = vpop.permute.xlu1 %5489 }
 0x43d   : > { %12390 = vpow2.f32 %v1278_v7  ;;  %v1290_v7 = vmul.f32 1.442695, %v1250_v8  ;;  %v1302_v8 = vmul.f32 1.442695, %v1256_v55  ;;  %v14786_v60 = vpop.eup %12384  ;;  %20826 = vst [vmem:[#allocation277_spill] sm:$0xff] %v14791_v63 }
 0x43e   : > { %12392 = vpow2.f32 %v1280_v15  ;;  %v1259_v15 = vsub.f32 0.0, %v14691_v6  ;;  %v1310_v63 = vmul.f32 1.442695, %v1260_v34 }
 0x43f   : > { %12394 = vpow2.f32 %v1282_v52  ;;  %v1263_v52 = vsub.f32 0.0, %v14705_v10 }
 0x440   : > { %12396 = vpow2.f32 %v1284_v16  ;;  %v1264_v16 = vsub.f32 0.0, %v14708_v45  ;;  %v1306_v45 = vmul.f32 1.442695, %v1258_v9  ;;  %v1308_v50 = vmul.f32 1.442695, %v1259_v15 }
 0x441   : > { %12398 = vpow2.f32 %v1286_v0  ;;  %v1265_v0 = vsub.f32 0.0, %v14711_v25  ;;  %v1304_v25 = vmul.f32 1.442695, %v1257_v58  ;;  %v1316_v32 = vmul.f32 1.442695, %v1263_v52 }
 0x442   : > { %12400 = vrcp.f32 %v1350_v4 }
 0x443   : > { %12402 = vpow2.f32 %v1288_v39 }
 0x444   : > { %12404 = vpow2.f32 %v1290_v7 }
 0x445   : > { %v12387_v4 = vpop.eup %12386  ;;  %12406 = vrcp.f32 %v1351_v31  ;;  %v1312_v31 = vmul.f32 1.442695, %v1261_v1 }
 0x446   : > { %v12389_v39 = vpop.eup %12388  ;;  %v14797_v40 = vmul.f32 %v12387_v4, %v14668_v26  ;;  %12408 = vpow2.f32 %v1292_v46 }
 0x447   : > { %v14799_v18 = vpop.eup %12390  ;;  %v1445_v7 = vmul.f32 %v12389_v39, %v14671_v56  ;;  %12410 = vpow2.f32 %v1302_v8  ;;  %v14816_v56 = vpop.permute.xlu0 %5494 }
 0x448   : > { %20827 = vst [vmem:[#allocation278_spill] sm:$0xff] %v14797_v40  ;;  %v14802_v10 = vpop.eup %12392  ;;  %v14808_v26 = vmul.f32 %v13218_v14, %v14797_v40  ;;  %v14812_v58 = vmul.f32 %v14114_v61, %v14797_v40  ;;  %20830 = vst [vmem:[#allocation281_spill] sm:$0xff] %v14816_v56  ;;  %v14828_v39 = vmul.f32 %v14530_v41, %v14797_v40  ;;  %12412 = vpow2.f32 %v1304_v25  ;;  %v14835_v61 = vpop.permute.xlu1 %5499 }
 0x449   : > { %v14814_v9 = vpop.eup %12394  ;;  %v2453_v15 = vrot.slane %v1445_v7, 1  ;;  %v1477_v34 = vrot.slane %v1445_v7, 7  ;;  %v14819_v46 = vmul.f32 %v13223_v17, %v1445_v7  ;;  %v14822_v8 = vmul.f32 %v14119_v59, %v1445_v7  ;;  %20835 = vst [vmem:[#allocation286_spill] sm:$0xff] %v14835_v61 }
 0x44a   : > { %20828 = vst [vmem:[#allocation279_spill] sm:$0xff] %v14808_v26  ;;  %20829 = vst [vmem:[#allocation280_spill] sm:$0xff] %v14812_v58  ;;  %v14824_v4 = vpop.eup %12396  ;;  %v14831_v55 = vmul.f32 %v14532_v21, %v1445_v7  ;;  %v20836_v17 = vrot.slane %v14797_v40, 1  ;;  %v20837_v14 = vrot.slane %v14797_v40, 7  ;;  %v1271_v21 = vsub.f32 0.0, %v14729_v38 }
 0x44b   : > { %20831 = vst [vmem:[#allocation282_spill] sm:$0xff] %v14819_v46  ;;  %20832 = vst [vmem:[#allocation283_spill] sm:$0xff] %v14822_v8  ;;  %v14833_v49 = vpop.eup %12398  ;;  %v1314_v61 = vmul.f32 1.442695, %v1262_v62  ;;  %12414 = vpow2.f32 %v1306_v45  ;;  %v1272_v40 = vsub.f32 0.0, %v14763_v11  ;;  %v14861_v26 = vpop.permute.xlu0 %5504  ;;  %v20976_v46 = vld [vmem:[#allocation22_spill] sm:$0xff] }
 0x44c   : > { %20833 = vst [vmem:[#allocation284_spill] sm:$0xff] %v14828_v39  ;;  %20834 = vst [vmem:[#allocation285_spill] sm:$0xff] %v14831_v55  ;;  %v2495_v59 = vsel %vm2474_vm6, %v20836_v17, %v2453_v15  ;;  %v14845_v41 = vsel %vm1500_vm5, %v20837_v14, %v1477_v34  ;;  %v12401_v1 = vpop.eup %12400  ;;  %12416 = vpow2.f32 %v1308_v50  ;;  %v1318_v58 = vmul.f32 1.442695, %v1264_v16 }
 0x44d   : > { %v14854_v17 = vpop.eup %12402  ;;  %v1446_v14 = vmul.f32 %v12401_v1, %v14676_v42  ;;  %v1320_v8 = vmul.f32 1.442695, %v1265_v0  ;;  %12418 = vpow2.f32 %v1310_v63  ;;  %20838 = vst [vmem:[#allocation287_spill] sm:$0xff] %v14861_v26  ;;  %v1322_v45 = vmul.f32 1.442695, %v1266_v54  ;;  %v14877_v63 = vpop.permute.xlu1 %5509 }
 0x44e   : > { %v14858_v7 = vpop.eup %12404  ;;  %12420 = vpow2.f32 %v1312_v31  ;;  %v14866_v42 = vmul.f32 %v14861_v26, %v2495_v59  ;;  %v14869_v50 = vmul.f32 %v13639_v5, %v2495_v59  ;;  %v14875_v0 = vmul.f32 %v14322_v35, %v2495_v59  ;;  %20842 = vst [vmem:[#allocation291_spill] sm:$0xff] %v14877_v63  ;;  %v20855_v5 = vld [vmem:[#allocation239_spill] sm:$0xff] }
 0x44f   : > { %v12407_v62 = vpop.eup %12406  ;;  %v2454_v56 = vrot.slane %v1446_v14, 1  ;;  %v1478_v39 = vrot.slane %v1446_v14, 7  ;;  %12422 = vpow2.f32 %v1314_v61  ;;  %v20848_v26 = vsub.f32 0.0, %v14723_v23 }
 0x450   : > { %v14863_v55 = vpop.eup %12408  ;;  %20839 = vst [vmem:[#allocation288_spill] sm:$0xff] %v14866_v42  ;;  %20840 = vst [vmem:[#allocation289_spill] sm:$0xff] %v14869_v50  ;;  %v14872_v52 = vmul.f32 %v12407_v62, %v14679_v53  ;;  %12424 = vpow2.f32 %v1316_v32  ;;  %v20846_v62 = vsub.f32 0.0, %v14717_v37 }
 0x451   : > { %v12411_v16 = vpop.eup %12410  ;;  %20841 = vst [vmem:[#allocation290_spill] sm:$0xff] %v14875_v0  ;;  %v2494_v54 = vsel %vm2474_vm6, %v2453_v15, %v2454_v56  ;;  %v1520_v31 = vsel %vm1500_vm5, %v1477_v34, %v1478_v39  ;;  %v20847_v15 = vsub.f32 0.0, %v14720_v13  ;;  %v1328_v34 = vmul.f32 1.442695, %v20848_v26 }
 0x452   : > { %v14884_v1 = vmul.f32 %v14877_v63, %v2494_v54  ;;  %v14887_v53 = vmul.f32 %v13651_v47, %v2494_v54  ;;  %v14890_v61 = vmul.f32 %v14327_v3, %v2494_v54  ;;  %v20106_v59 = vrot.slane %v14872_v52, 1  ;;  %v12413_v63 = vpop.eup %12412 }
 0x453   : > { %v1324_v25 = vmul.f32 1.442695, %v20846_v62  ;;  %v1326_v32 = vmul.f32 1.442695, %v20847_v15  ;;  %12426 = vpow2.f32 %v1318_v58  ;;  %v20849_v15 = vsub.f32 0.0, %v14726_v43 }
 0x454   : > { %20843 = vst [vmem:[#allocation292_spill] sm:$0xff] %v14884_v1  ;;  %20844 = vst [vmem:[#allocation293_spill] sm:$0xff] %v14887_v53  ;;  %v14905_v54 = vsel %vm2474_vm6, %v2454_v56, %v20106_v59  ;;  %v14913_v26 = vmul.f32 %v13228_v20, %v1446_v14  ;;  %12428 = vpow2.f32 %v1320_v8  ;;  %v14917_v58 = vmul.f32 %v13236_v24, %v14872_v52  ;;  %v20858_v1 = vld [vmem:[#allocation48_spill] sm:$0xff] }
 0x455   : > { %20845 = vst [vmem:[#allocation294_spill] sm:$0xff] %v14890_v61  ;;  %v1330_v47 = vmul.f32 1.442695, %v20849_v15  ;;  %v14919_v35 = vpop.eup %12414  ;;  %v14922_v56 = vmul.f32 %v14127_v12, %v1446_v14  ;;  %12430 = vpow2.f32 %v1322_v45  ;;  %v14926_v62 = vmul.f32 %v14129_v22, %v14872_v52 }
 0x456   : > { %20850 = vst [vmem:[#allocation295_spill] sm:$0xff] %v14913_v26  ;;  %20851 = vst [vmem:[#allocation296_spill] sm:$0xff] %v14917_v58  ;;  %v14930_v59 = vpop.eup %12416  ;;  %v1332_v8 = vmul.f32 1.442695, %v1271_v21  ;;  %v14933_v3 = vmul.f32 %v14534_v30, %v1446_v14  ;;  %12432 = vpow2.f32 %v1324_v25  ;;  %v14937_v24 = vmul.f32 %v20855_v5, %v14872_v52  ;;  %v20860_v30 = vld [vmem:[#allocation112_spill] sm:$0xff]  ;;  %v20865_v25 = vld [vmem:[#allocation49_spill] sm:$0xff] }
 0x457   : > { %20852 = vst [vmem:[#allocation297_spill] sm:$0xff] %v14922_v56  ;;  %20853 = vst [vmem:[#allocation298_spill] sm:$0xff] %v14926_v62  ;;  %v12419_v12 = vpop.eup %12418  ;;  %v1334_v45 = vmul.f32 1.442695, %v1272_v40  ;;  %12434 = vpow2.f32 %v1326_v32  ;;  %v1352_v20 = vadd.f32 1.0, %v12411_v16  ;;  %v20857_v22 = vrot.slane %v14872_v52, 7 }
 0x458   : > { %20854 = vst [vmem:[#allocation299_spill] sm:$0xff] %v14933_v3  ;;  %20856 = vst [vmem:[#allocation300_spill] sm:$0xff] %v14937_v24  ;;  %v12421_v42 = vpop.eup %12420  ;;  %12436 = vpow2.f32 %v1328_v34  ;;  %v1353_v21 = vadd.f32 1.0, %v12413_v63  ;;  %v14944_v14 = vmul.f32 %v20858_v1, %v1520_v31  ;;  %v14949_v40 = vmul.f32 %v20860_v30, %v1520_v31  ;;  %v20862_v32 = vld [vmem:[#allocation206_spill] sm:$0xff]  ;;  %v20867_v30 = vld [vmem:[#allocation113_spill] sm:$0xff] }
 0x459   : > { %v1519_v15 = vsel %vm1500_vm5, %v1478_v39, %v20857_v22  ;;  %v12423_v5 = vpop.eup %12422  ;;  %12438 = vpow2.f32 %v1330_v47  ;;  %v14954_v0 = vmul.f32 %v20862_v32, %v1520_v31  ;;  %v20864_v39 = vsub.f32 0.0, %v14766_v19  ;;  %v20869_v16 = vld [vmem:[#allocation207_spill] sm:$0xff]  ;;  %v20879_v24 = vld [vmem:[#allocation82_spill] sm:$0xff]  ;;  %v20972_v26 = vld [vmem:[#allocation13_spill] sm:$0xff] }
 0x45a   : > { %20859 = vst [vmem:[#allocation301_spill] sm:$0xff] %v14944_v14  ;;  %20861 = vst [vmem:[#allocation302_spill] sm:$0xff] %v14949_v40  ;;  %v12425_v22 = vpop.eup %12424  ;;  %12440 = vpow2.f32 %v1332_v8  ;;  %v14961_v1 = vmul.f32 %v20865_v25, %v1519_v15  ;;  %v1338_v47 = vadd.f32 1.0, %v14781_v44  ;;  %v14965_v61 = vmul.f32 %v20867_v30, %v1519_v15  ;;  %v14982_v25 = vpop.permute.xlu0 %5514  ;;  %v20872_v44 = vld [vmem:[#allocation47_spill] sm:$0xff]  ;;  %v20974_v58 = vld [vmem:[#allocation21_spill] sm:$0xff] }
 0x45b   : > { %20863 = vst [vmem:[#allocation303_spill] sm:$0xff] %v14954_v0  ;;  %v1336_v63 = vmul.f32 1.442695, %v20864_v39  ;;  %12442 = vpow2.f32 %v1334_v45  ;;  %v14968_v31 = vmul.f32 %v20869_v16, %v1519_v15  ;;  %v1339_v39 = vadd.f32 1.0, %v14786_v60  ;;  %20871 = vst [vmem:[#allocation307_spill] sm:$0xff] %v14982_v25 }
 0x45c   : > { %20866 = vst [vmem:[#allocation304_spill] sm:$0xff] %v14961_v1  ;;  %20868 = vst [vmem:[#allocation305_spill] sm:$0xff] %v14965_v61  ;;  %12444 = vrcp.f32 %v1352_v20  ;;  %v1340_v34 = vadd.f32 1.0, %v14799_v18  ;;  %v1341_v15 = vadd.f32 1.0, %v14802_v10  ;;  %v1342_v20 = vadd.f32 1.0, %v14814_v9  ;;  %v20874_v10 = vld [vmem:[#allocation111_spill] sm:$0xff] }
 0x45d   : > { %20870 = vst [vmem:[#allocation306_spill] sm:$0xff] %v14968_v31  ;;  %v12427_v32 = vpop.eup %12426  ;;  %12446 = vrcp.f32 %v1353_v21  ;;  %v1343_v8 = vadd.f32 1.0, %v14824_v4  ;;  %v1344_v21 = vadd.f32 1.0, %v14833_v49  ;;  %v14990_v3 = vmul.f32 %v20874_v10, %v14845_v41  ;;  %v20877_v49 = vld [vmem:[#allocation205_spill] sm:$0xff] }
 0x45e   : > { %v12429_v30 = vpop.eup %12428  ;;  %12448 = vpow2.f32 %v1336_v63  ;;  %v14986_v63 = vmul.f32 %v20872_v44, %v14845_v41  ;;  %v1345_v9 = vadd.f32 1.0, %v14854_v17  ;;  %v15004_v10 = vmul.f32 %v20879_v24, %v14905_v54  ;;  %v20881_v17 = vld [vmem:[#allocation176_spill] sm:$0xff] }
 0x45f   : > { %v12431_v16 = vpop.eup %12430  ;;  %12450 = vrcp.f32 %v1338_v47  ;;  %20875 = vst [vmem:[#allocation309_spill] sm:$0xff] %v14990_v3  ;;  %v14995_v47 = vmul.f32 %v14982_v25, %v14905_v54  ;;  %v1354_v0 = vadd.f32 1.0, %v14919_v35  ;;  %v1347_v31 = vadd.f32 1.0, %v14863_v55  ;;  %v20984_v3 = vld [vmem:[#allocation26_spill] sm:$0xff] }
 0x460   : > { %v12433_v60 = vpop.eup %12432  ;;  %12452 = vrcp.f32 %v1339_v39  ;;  %20873 = vst [vmem:[#allocation308_spill] sm:$0xff] %v14986_v63  ;;  %v1346_v39 = vadd.f32 1.0, %v14858_v7  ;;  %20880 = vst [vmem:[#allocation312_spill] sm:$0xff] %v15004_v10  ;;  %v1358_v56 = vadd.f32 1.0, %v12423_v5  ;;  %v1359_v62 = vadd.f32 1.0, %v12425_v22  ;;  %v20905_v10 = vld [vmem:[#allocation178_spill] sm:$0xff] }
 0x461   : > { %v12435_v18 = vpop.eup %12434  ;;  %12454 = vrcp.f32 %v1340_v34  ;;  %20876 = vst [vmem:[#allocation310_spill] sm:$0xff] %v14995_v47  ;;  %v14999_v34 = vmul.f32 %v20877_v49, %v14845_v41  ;;  %v1355_v41 = vadd.f32 1.0, %v14930_v59  ;;  %v1356_v49 = vadd.f32 1.0, %v12419_v12  ;;  %v20986_v63 = vld [vmem:[#allocation27_spill] sm:$0xff] }
 0x462   : > { %v12437_v45 = vpop.eup %12436  ;;  %12456 = vrcp.f32 %v1341_v15  ;;  %v15008_v15 = vmul.f32 %v20881_v17, %v14905_v54  ;;  %v1360_v54 = vadd.f32 1.0, %v12427_v32  ;;  %v1361_v17 = vadd.f32 1.0, %v12429_v30 }
 0x463   : > { %v12439_v4 = vpop.eup %12438  ;;  %20878 = vst [vmem:[#allocation311_spill] sm:$0xff] %v14999_v34  ;;  %12458 = vrcp.f32 %v1342_v20  ;;  %v1357_v20 = vadd.f32 1.0, %v12421_v42  ;;  %v1363_v61 = vadd.f32 1.0, %v12433_v60  ;;  %v1364_v5 = vadd.f32 1.0, %v12435_v18  ;;  %v20982_v34 = vld [vmem:[#allocation25_spill] sm:$0xff] }
 0x464   : > { %v12441_v44 = vpop.eup %12440  ;;  %20882 = vst [vmem:[#allocation313_spill] sm:$0xff] %v15008_v15  ;;  %12460 = vrcp.f32 %v1343_v8  ;;  %v1362_v8 = vadd.f32 1.0, %v12431_v16  ;;  %v15022_v16 = vpop.permute.xlu1 %5519  ;;  %v20885_v60 = vrot.slane %v14872_v52, 7 }
 0x465   : > { %v12443_v25 = vpop.eup %12442  ;;  %12462 = vrcp.f32 %v1344_v21  ;;  %v1366_v21 = vadd.f32 1.0, %v12439_v4  ;;  %20883 = vst [vmem:[#allocation314_spill] sm:$0xff] %v15022_v16 }
 0x466   : > { %v12445_v7 = vpop.eup %12444  ;;  %12464 = vrcp.f32 %v1345_v9  ;;  %v20887_v9 = vld [vmem:[#allocation83_spill] sm:$0xff] }
 0x467   : > { %v12447_v24 = vpop.eup %12446  ;;  %v15014_v40 = vmul.f32 %v12445_v7, %v14682_v57  ;;  %12466 = vrcp.f32 %v1346_v39  ;;  %v1365_v57 = vadd.f32 1.0, %v12437_v45  ;;  %v20889_v39 = vld [vmem:[#allocation177_spill] sm:$0xff] }
 0x468   : > { %v12449_v35 = vpop.eup %12448  ;;  %v15017_v55 = vmul.f32 %v12447_v24, %v14685_v51  ;;  %12468 = vrcp.f32 %v1354_v0  ;;  %v20884_v24 = vrot.slane %v14872_v52, 1  ;;  %v1367_v0 = vadd.f32 1.0, %v12441_v44 }
 0x469   : > { %v12451_v12 = vpop.eup %12450  ;;  %v2456_v42 = vrot.slane %v15014_v40, 1  ;;  %v1480_v59 = vrot.slane %v15014_v40, 7  ;;  %12470 = vrcp.f32 %v1347_v31  ;;  %v1369_v7 = vadd.f32 1.0, %v12449_v35 }
 0x46a   : > { %v12453_v22 = vpop.eup %12452  ;;  %v20127_v30 = vrot.slane %v15017_v55, 1  ;;  %12472 = vrcp.f32 %v1355_v41 }
 0x46b   : > { %v12455_v32 = vpop.eup %12454  ;;  %v2492_v51 = vsel %vm2474_vm6, %v20884_v24, %v2456_v42  ;;  %12474 = vrcp.f32 %v1356_v49  ;;  %v15032_v31 = vsel %vm1500_vm5, %v20885_v60, %v1480_v59  ;;  %v1368_v49 = vadd.f32 1.0, %v12443_v25  ;;  %v20891_v24 = vld [vmem:[#allocation18_spill] sm:$0xff]  ;;  %v20895_v25 = vld [vmem:[#allocation240_spill] sm:$0xff] }
 0x46c   : > { %v12457_v45 = vpop.eup %12456  ;;  %v15035_v18 = vmul.f32 %v15022_v16, %v2492_v51  ;;  %v15038_v4 = vmul.f32 %v20887_v9, %v2492_v51  ;;  %v15041_v41 = vmul.f32 %v20889_v39, %v2492_v51  ;;  %v2491_v44 = vsel %vm2474_vm6, %v2456_v42, %v20127_v30  ;;  %v20893_v51 = vld [vmem:[#allocation146_spill] sm:$0xff] }
 0x46d   : > { %v12459_v52 = vpop.eup %12458  ;;  %v15049_v60 = vmul.f32 %v20891_v24, %v15014_v40  ;;  %12476 = vrcp.f32 %v1357_v20  ;;  %v15055_v39 = vmul.f32 %v20893_v51, %v15014_v40  ;;  %v15061_v35 = vmul.f32 %v20895_v25, %v15014_v40  ;;  %v15063_v24 = vpop.permute.xlu0 %5524  ;;  %v20901_v40 = vld [vmem:[#allocation147_spill] sm:$0xff] }
 0x46e   : > { %20886 = vst [vmem:[#allocation315_spill] sm:$0xff] %v15035_v18  ;;  %20888 = vst [vmem:[#allocation316_spill] sm:$0xff] %v15038_v4  ;;  %v12461_v16 = vpop.eup %12460  ;;  %12478 = vrcp.f32 %v1358_v56  ;;  %v15069_v51 = vmul.f32 %v15063_v24, %v2491_v44  ;;  %v20899_v56 = vld [vmem:[#allocation19_spill] sm:$0xff]  ;;  %v15077_v25 = vmul.f32 %v20901_v40, %v15017_v55  ;;  %v15083_v9 = vmul.f32 %v20905_v10, %v2491_v44  ;;  %v20914_v10 = vld [vmem:[#allocation256_spill] sm:$0xff] }
 0x46f   : > { %20890 = vst [vmem:[#allocation317_spill] sm:$0xff] %v15041_v41  ;;  %20892 = vst [vmem:[#allocation318_spill] sm:$0xff] %v15049_v60  ;;  %v12463_v30 = vpop.eup %12462  ;;  %12480 = vrcp.f32 %v1359_v62  ;;  %v15073_v42 = vmul.f32 %v20899_v56, %v15017_v55  ;;  %v20903_v62 = vld [vmem:[#allocation84_spill] sm:$0xff]  ;;  %v20909_v56 = vld [vmem:[#allocation254_spill] sm:$0xff]  ;;  %v15102_v50 = vmul.f32 %v12457_v45, %v20914_v10 }
 0x470   : > { %20894 = vst [vmem:[#allocation319_spill] sm:$0xff] %v15055_v39  ;;  %20896 = vst [vmem:[#allocation320_spill] sm:$0xff] %v15061_v35  ;;  %v12465_v47 = vpop.eup %12464  ;;  %12482 = vrcp.f32 %v1360_v54  ;;  %v15080_v20 = vmul.f32 %v20903_v62, %v2491_v44  ;;  %v15090_v41 = vmul.f32 %v12451_v12, %v20909_v56  ;;  %v20911_v4 = vld [vmem:[#allocation255_spill] sm:$0xff] }
 0x471   : > { %20897 = vst [vmem:[#allocation321_spill] sm:$0xff] %v15063_v24  ;;  %20898 = vst [vmem:[#allocation322_spill] sm:$0xff] %v15069_v51  ;;  %v12467_v18 = vpop.eup %12466  ;;  %12484 = vrcp.f32 %v1361_v17  ;;  %v20907_v24 = vld [vmem:[#allocation241_spill] sm:$0xff]  ;;  %v15093_v40 = vmul.f32 %v12453_v22, %v20911_v4  ;;  %v15096_v17 = vmul.f32 %v12455_v32, %v14644_v28  ;;  %v20917_v32 = vld [vmem:[#allocation258_spill] sm:$0xff] }
 0x472   : > { %20900 = vst [vmem:[#allocation323_spill] sm:$0xff] %v15073_v42  ;;  %20902 = vst [vmem:[#allocation324_spill] sm:$0xff] %v15077_v25  ;;  %v15087_v15 = vmul.f32 %v20907_v24, %v15017_v55  ;;  %v12469_v54 = vpop.eup %12468  ;;  %12486 = vrcp.f32 %v1362_v8  ;;  %v20915_v24 = vrot.slane %v15017_v55, 7  ;;  %v20916_v22 = vld [vmem:[#allocation257_spill] sm:$0xff]  ;;  %v15119_v45 = vmul.f32 %v12461_v16, %v20917_v32  ;;  %v20944_v25 = vld [vmem:[#allocation267_spill] sm:$0xff] }
 0x473   : > { %20904 = vst [vmem:[#allocation325_spill] sm:$0xff] %v15080_v20  ;;  %20906 = vst [vmem:[#allocation326_spill] sm:$0xff] %v15083_v9  ;;  %v12471_v62 = vpop.eup %12470  ;;  %12488 = vrcp.f32 %v1363_v61  ;;  %v15099_v44 = vmul.f32 %v12469_v54, %v14688_v33  ;;  %v15111_v4 = vmul.f32 %v12459_v52, %v20916_v22  ;;  %v15128_v52 = vmul.f32 %v12467_v18, %v14662_v29  ;;  %v20928_v33 = vld [vmem:[#allocation148_spill] sm:$0xff]  ;;  %v21012_v20 = vld [vmem:[#allocation138_spill] sm:$0xff] }
 0x474   : > { %20908 = vst [vmem:[#allocation327_spill] sm:$0xff] %v15087_v15  ;;  %20910 = vst [vmem:[#allocation254_spill] sm:$0xff] %v15090_v41  ;;  %v15108_v8 = vsel %vm1500_vm5, %v1480_v59, %v20915_v24  ;;  %v12473_v12 = vpop.eup %12472  ;;  %12490 = vrcp.f32 %v1364_v5  ;;  %v15122_v59 = vmul.f32 %v12463_v30, %v14656_v2  ;;  %v15125_v5 = vmul.f32 %v12465_v47, %v14659_v27  ;;  %v20920_v27 = vld [vmem:[#allocation50_spill] sm:$0xff]  ;;  %v20970_v42 = vld [vmem:[#allocation12_spill] sm:$0xff] }
 0x475   : > { %20912 = vst [vmem:[#allocation255_spill] sm:$0xff] %v15093_v40  ;;  %20913 = vst [vmem:[#allocation328_spill] sm:$0xff] %v15096_v17  ;;  %v12475_v61 = vpop.eup %12474  ;;  %12492 = vrcp.f32 %v1365_v57  ;;  %v2458_v10 = vrot.slane %v15099_v44, 1  ;;  %v15131_v24 = vmul.f32 %v12473_v12, %v14691_v6  ;;  %v15133_v57 = vpop.permute.xlu1 %5529  ;;  %v20919_v16 = vrot.slane %v15017_v55, 1  ;;  %v20925_v12 = vld [vmem:[#allocation260_spill] sm:$0xff] }
 0x476   : > { %12494 = vrcp.f32 %v1366_v21  ;;  %20918 = vst [vmem:[#allocation256_spill] sm:$0xff] %v15133_v57  ;;  %v15140_v21 = vmul.f32 %v12471_v62, %v14665_v48  ;;  %v15144_v47 = vmul.f32 %v20920_v27, %v15032_v31  ;;  %v15155_v48 = vmul.f32 %v12475_v61, %v20925_v12  ;;  %v20926_v62 = vld [vmem:[#allocation20_spill] sm:$0xff]  ;;  %v20933_v27 = vld [vmem:[#allocation263_spill] sm:$0xff] }
 0x477   : > { %v12477_v56 = vpop.eup %12476  ;;  %12496 = vrcp.f32 %v1367_v0  ;;  %v2490_v2 = vsel %vm2474_vm6, %v20919_v16, %v2458_v10  ;;  %v20923_v0 = vld [vmem:[#allocation114_spill] sm:$0xff]  ;;  %v15159_v22 = vmul.f32 %v20926_v62, %v15099_v44  ;;  %v15167_v28 = vmul.f32 %v20928_v33, %v15099_v44  ;;  %v20934_v62 = vld [vmem:[#allocation85_spill] sm:$0xff]  ;;  %v21054_v9 = vld [vmem:[#allocation228_spill] sm:$0xff] }
 0x478   : > { %20921 = vst [vmem:[#allocation257_spill] sm:$0xff] %v15144_v47  ;;  %v12479_v29 = vpop.eup %12478  ;;  %12498 = vrcp.f32 %v1368_v49  ;;  %v15147_v6 = vmul.f32 %v15133_v57, %v2490_v2  ;;  %v15152_v18 = vmul.f32 %v20923_v0, %v15032_v31  ;;  %v20932_v57 = vld [vmem:[#allocation261_spill] sm:$0xff]  ;;  %v15181_v35 = vmul.f32 %v20934_v62, %v2490_v2  ;;  %v20936_v16 = vld [vmem:[#allocation242_spill] sm:$0xff] }
 0x479   : > { %v12481_v54 = vpop.eup %12480  ;;  %12500 = vrcp.f32 %v1369_v7  ;;  %20927 = vst [vmem:[#allocation260_spill] sm:$0xff] %v15159_v22  ;;  %20929 = vst [vmem:[#allocation330_spill] sm:$0xff] %v15167_v28  ;;  %v20930_v7 = vld [vmem:[#allocation208_spill] sm:$0xff]  ;;  %v15175_v0 = vmul.f32 %v12477_v56, %v20932_v57  ;;  %v15178_v49 = vmul.f32 %v12479_v29, %v20933_v27  ;;  %v15185_v33 = vmul.f32 %v20936_v16, %v15099_v44  ;;  %v20942_v62 = vld [vmem:[#allocation265_spill] sm:$0xff] }
 0x47a   : > { %20922 = vst [vmem:[#allocation258_spill] sm:$0xff] %v15147_v6  ;;  %20924 = vst [vmem:[#allocation329_spill] sm:$0xff] %v15152_v18  ;;  %v12483_v32 = vpop.eup %12482  ;;  %v15171_v30 = vmul.f32 %v20930_v7, %v15032_v31  ;;  %v20938_v6 = vld [vmem:[#allocation264_spill] sm:$0xff]  ;;  %v20939_v7 = vld [vmem:[#allocation179_spill] sm:$0xff]  ;;  %v20941_v56 = vrot.slane %v15131_v24, 1 }
 0x47b   : > { %v12485_v12 = vpop.eup %12484  ;;  %20935 = vst [vmem:[#allocation261_spill] sm:$0xff] %v15181_v35  ;;  %20937 = vst [vmem:[#allocation263_spill] sm:$0xff] %v15185_v33  ;;  %v15188_v31 = vmul.f32 %v12481_v54, %v20938_v6  ;;  %v15191_v61 = vmul.f32 %v20939_v7, %v2490_v2  ;;  %v15201_v15 = vmul.f32 %v12483_v32, %v20942_v62  ;;  %v20943_v7 = vld [vmem:[#allocation266_spill] sm:$0xff]  ;;  %v20948_v54 = vrot.slane %v15017_v55, 7  ;;  %v20954_v62 = vld [vmem:[#allocation5_spill] sm:$0xff] }
 0x47c   : > { %20931 = vst [vmem:[#allocation331_spill] sm:$0xff] %v15171_v30  ;;  %v12487_v51 = vpop.eup %12486  ;;  %v15197_v57 = vsel %vm2474_vm6, %v2458_v10, %v20941_v56  ;;  %v15207_v39 = vmul.f32 %v12485_v12, %v20943_v7  ;;  %v15212_v10 = vpop.permute.xlu0 %5534  ;;  %v20958_v55 = vld [vmem:[#allocation7_spill] sm:$0xff]  ;;  %v20988_v33 = vld [vmem:[#allocation28_spill] sm:$0xff]  ;;  %v20990_v30 = vld [vmem:[#allocation29_spill] sm:$0xff] }
 0x47d   : > { %20940 = vst [vmem:[#allocation264_spill] sm:$0xff] %v15191_v61  ;;  %v12489_v29 = vpop.eup %12488  ;;  %v15210_v53 = vmul.f32 %v12487_v51, %v20944_v25  ;;  %20945 = vst [vmem:[#allocation265_spill] sm:$0xff] %v15212_v10  ;;  %v15221_v27 = vmul.f32 %v15212_v10, %v15197_v57  ;;  %v20992_v28 = vld [vmem:[#allocation30_spill] sm:$0xff]  ;;  %v20994_v18 = vld [vmem:[#allocation31_spill] sm:$0xff] }
 0x47e   : > { %v12491_v2 = vpop.eup %12490  ;;  %v15217_v16 = vmul.f32 %v12489_v29, %v14717_v37  ;;  %v21014_v35 = vld [vmem:[#allocation139_spill] sm:$0xff]  ;;  %v21056_v61 = vld [vmem:[#allocation229_spill] sm:$0xff] }
 0x47f   : > { %v12493_v32 = vpop.eup %12492  ;;  %20946 = vst [vmem:[#allocation266_spill] sm:$0xff] %v15221_v27  ;;  %v15226_v25 = vmul.f32 %v12491_v2, %v14720_v13 }
 0x480   : > { %v12495_v51 = vpop.eup %12494  ;;  %v15229_v6 = vmul.f32 %v12493_v32, %v14723_v23  ;;  %v20947_v32 = vrot.slane %v15099_v44, 7  ;;  %v20952_v23 = vld [vmem:[#allocation3_spill] sm:$0xff] }
 0x481   : > { %v12497_v29 = vpop.eup %12496  ;;  %v15234_v56 = vmul.f32 %v12495_v51, %v14726_v43  ;;  %v15271_v2 = vmul.f32 %v20952_v23, %v15090_v41 }
 0x482   : > { %v12499_v10 = vpop.eup %12498  ;;  %v15240_v13 = vmul.f32 %v12497_v29, %v14729_v38  ;;  %v15250_v43 = vsel %vm1500_vm5, %v20948_v54, %v20947_v32  ;;  %v20956_v29 = vld [vmem:[#allocation6_spill] sm:$0xff]  ;;  %v15285_v54 = vmul.f32 %v20958_v55, %v15102_v50  ;;  %v20968_v32 = vld [vmem:[#allocation11_spill] sm:$0xff] }
 0x483   : > { %20949 = vst [vmem:[#allocation267_spill] sm:$0xff] %v15250_v43  ;;  %v12501_v51 = vpop.eup %12500  ;;  %v15253_v37 = vmul.f32 %v12499_v10, %v14763_v11  ;;  %v20950_v11 = vld [vmem:[#allocation51_spill] sm:$0xff]  ;;  %20953 = vst [vmem:[#allocation333_spill] sm:$0xff] %v15271_v2  ;;  %v15281_v12 = vmul.f32 %v20956_v29, %v15096_v17  ;;  %v20965_v29 = vld [vmem:[#allocation4_spill] sm:$0xff] }
 0x484   : > { %v15259_v7 = vmul.f32 %v12501_v51, %v14766_v19  ;;  %v15267_v10 = vmul.f32 %v20950_v11, %v15108_v8  ;;  %v15275_v19 = vmul.f32 %v20954_v62, %v15093_v40  ;;  %20959 = vst [vmem:[#allocation336_spill] sm:$0xff] %v15285_v54  ;;  %v20960_v11 = vld [vmem:[#allocation2_spill] sm:$0xff]  ;;  %v20961_v62 = vld [vmem:[#allocation8_spill] sm:$0xff]  ;;  %v20963_v51 = vld [vmem:[#allocation9_spill] sm:$0xff]  ;;  %v21188_v47 = vrot.slane %v15240_v13, 1 }
 0x485   : > { %20957 = vst [vmem:[#allocation335_spill] sm:$0xff] %v15281_v12  ;;  %v15290_v23 = vmul.f32 %v20960_v11, %v15253_v37  ;;  %v15294_v14 = vmul.f32 %v20961_v62, %v15111_v4  ;;  %v15298_v38 = vmul.f32 %v20963_v51, %v15119_v45  ;;  %v20966_v55 = vld [vmem:[#allocation10_spill] sm:$0xff]  ;;  %v15310_v11 = vmul.f32 %v20968_v32, %v15125_v5  ;;  %v20980_v2 = vld [vmem:[#allocation24_spill] sm:$0xff] }
 0x486   : > { %20951 = vst [vmem:[#allocation332_spill] sm:$0xff] %v15267_v10  ;;  %20955 = vst [vmem:[#allocation334_spill] sm:$0xff] %v15275_v19  ;;  %v15302_v1 = vmul.f32 %v20965_v29, %v15259_v7  ;;  %v15306_v60 = vmul.f32 %v20966_v55, %v15122_v59  ;;  %v15314_v62 = vmul.f32 %v20970_v42, %v15128_v52  ;;  %v20978_v19 = vld [vmem:[#allocation23_spill] sm:$0xff]  ;;  %v20996_v43 = vld [vmem:[#allocation32_spill] sm:$0xff]  ;;  %v21184_v22 = vrot.slane %v15259_v7, 1 }
 0x487   : > { %20962 = vst [vmem:[#allocation337_spill] sm:$0xff] %v15294_v14  ;;  %20964 = vst [vmem:[#allocation338_spill] sm:$0xff] %v15298_v38  ;;  %v15318_v51 = vmul.f32 %v20972_v26, %v15140_v21  ;;  %v15322_v29 = vmul.f32 %v20974_v58, %v15131_v24  ;;  %v15326_v55 = vmul.f32 %v20976_v46, %v15155_v48  ;;  %v21324_v10 = vld [vmem:[#allocation43_spill] sm:$0xff]  ;;  %v21333_v12 = vld [vmem:[#allocation46_spill] sm:$0xff] }
 0x488   : > { %20967 = vst [vmem:[#allocation339_spill] sm:$0xff] %v15306_v60  ;;  %20969 = vst [vmem:[#allocation340_spill] sm:$0xff] %v15310_v11  ;;  %v15330_v32 = vmul.f32 %v20978_v19, %v15175_v0  ;;  %v15334_v42 = vmul.f32 %v20980_v2, %v15178_v49  ;;  %v15338_v26 = vmul.f32 %v20982_v34, %v15188_v31  ;;  %v21269_v11 = vld [vmem:[#allocation116_spill] sm:$0xff]  ;;  %v21307_v60 = vld [vmem:[#allocation37_spill] sm:$0xff] }
 0x489   : > { %20971 = vst [vmem:[#allocation341_spill] sm:$0xff] %v15314_v62  ;;  %20973 = vst [vmem:[#allocation342_spill] sm:$0xff] %v15318_v51  ;;  %v15342_v58 = vmul.f32 %v20984_v3, %v15201_v15  ;;  %v15346_v46 = vmul.f32 %v20986_v63, %v15207_v39  ;;  %v15350_v19 = vmul.f32 %v20988_v33, %v15210_v53 }
 0x48a   : > { %20975 = vst [vmem:[#allocation343_spill] sm:$0xff] %v15322_v29  ;;  %20977 = vst [vmem:[#allocation344_spill] sm:$0xff] %v15326_v55  ;;  %v15354_v2 = vmul.f32 %v20990_v30, %v15217_v16  ;;  %v15358_v34 = vmul.f32 %v20992_v28, %v15226_v25  ;;  %v15362_v3 = vmul.f32 %v20994_v18, %v15229_v6  ;;  %v21008_v30 = vld [vmem:[#allocation136_spill] sm:$0xff]  ;;  %v21010_v28 = vld [vmem:[#allocation137_spill] sm:$0xff] }
 0x48b   : > { %20979 = vst [vmem:[#allocation345_spill] sm:$0xff] %v15330_v32  ;;  %20981 = vst [vmem:[#allocation346_spill] sm:$0xff] %v15334_v42  ;;  %v15366_v63 = vmul.f32 %v20996_v43, %v15234_v56  ;;  %v21004_v43 = vld [vmem:[#allocation134_spill] sm:$0xff]  ;;  %v21305_v29 = vld [vmem:[#allocation36_spill] sm:$0xff] }
 0x48c   : > { %20983 = vst [vmem:[#allocation347_spill] sm:$0xff] %v15338_v26  ;;  %20985 = vst [vmem:[#allocation348_spill] sm:$0xff] %v15342_v58  ;;  %v21292_v55 = vld [vmem:[#allocation210_spill] sm:$0xff]  ;;  %v21315_v42 = vld [vmem:[#allocation40_spill] sm:$0xff] }
 0x48d   : > { %20987 = vst [vmem:[#allocation349_spill] sm:$0xff] %v15346_v46  ;;  %20989 = vst [vmem:[#allocation350_spill] sm:$0xff] %v15350_v19  ;;  %v20998_v46 = vld [vmem:[#allocation33_spill] sm:$0xff]  ;;  %v21300_v58 = vld [vmem:[#allocation34_spill] sm:$0xff] }
 0x48e   : > { %20991 = vst [vmem:[#allocation351_spill] sm:$0xff] %v15354_v2  ;;  %20993 = vst [vmem:[#allocation352_spill] sm:$0xff] %v15358_v34  ;;  %v15370_v33 = vmul.f32 %v20998_v46, %v15240_v13  ;;  %v21000_v34 = vld [vmem:[#allocation86_spill] sm:$0xff]  ;;  %v21006_v46 = vld [vmem:[#allocation135_spill] sm:$0xff]  ;;  %v15415_v2 = vmul.f32 %v21008_v30, %v15111_v4 }
 0x48f   : > { %20995 = vst [vmem:[#allocation353_spill] sm:$0xff] %v15362_v3  ;;  %20997 = vst [vmem:[#allocation354_spill] sm:$0xff] %v15366_v63  ;;  %v15399_v18 = vmul.f32 %v21000_v34, %v15197_v57  ;;  %v21002_v3 = vld [vmem:[#allocation115_spill] sm:$0xff]  ;;  %v15407_v63 = vmul.f32 %v21004_v43, %v15096_v17  ;;  %v15411_v19 = vmul.f32 %v21006_v46, %v15102_v50  ;;  %v21318_v32 = vld [vmem:[#allocation41_spill] sm:$0xff] }
 0x490   : > { %20999 = vst [vmem:[#allocation355_spill] sm:$0xff] %v15370_v33  ;;  %v15403_v33 = vmul.f32 %v21002_v3, %v15108_v8  ;;  %21009 = vst [vmem:[#allocation360_spill] sm:$0xff] %v15415_v2  ;;  %v15419_v34 = vmul.f32 %v21010_v28, %v15119_v45  ;;  %v15423_v3 = vmul.f32 %v21012_v20, %v15122_v59  ;;  %v21020_v2 = vld [vmem:[#allocation149_spill] sm:$0xff] }
 0x491   : > { %21001 = vst [vmem:[#allocation356_spill] sm:$0xff] %v15399_v18  ;;  %21005 = vst [vmem:[#allocation358_spill] sm:$0xff] %v15407_v63  ;;  %v15427_v43 = vmul.f32 %v21014_v35, %v15125_v5  ;;  %v21016_v18 = vld [vmem:[#allocation140_spill] sm:$0xff]  ;;  %v15439_v28 = vmul.f32 %v21020_v2, %v15131_v24  ;;  %v16098_v63 = vpop.permute.xlu0 %5544 }
 0x492   : > { %21003 = vst [vmem:[#allocation357_spill] sm:$0xff] %v15403_v33  ;;  %21007 = vst [vmem:[#allocation359_spill] sm:$0xff] %v15411_v19  ;;  %v15431_v46 = vmul.f32 %v21016_v18, %v15128_v52  ;;  %v21018_v19 = vld [vmem:[#allocation141_spill] sm:$0xff] }
 0x493   : > { %21011 = vst [vmem:[#allocation361_spill] sm:$0xff] %v15419_v34  ;;  %21013 = vst [vmem:[#allocation362_spill] sm:$0xff] %v15423_v3  ;;  %v15435_v30 = vmul.f32 %v21018_v19, %v15140_v21  ;;  %v21022_v34 = vld [vmem:[#allocation150_spill] sm:$0xff]  ;;  %v21024_v3 = vld [vmem:[#allocation151_spill] sm:$0xff] }
 0x494   : > { %21015 = vst [vmem:[#allocation363_spill] sm:$0xff] %v15427_v43  ;;  %21017 = vst [vmem:[#allocation364_spill] sm:$0xff] %v15431_v46  ;;  %v15443_v20 = vmul.f32 %v21022_v34, %v15155_v48  ;;  %v15447_v35 = vmul.f32 %v21024_v3, %v15175_v0  ;;  %v21026_v43 = vld [vmem:[#allocation152_spill] sm:$0xff]  ;;  %v21028_v46 = vld [vmem:[#allocation153_spill] sm:$0xff] }
 0x495   : > { %21019 = vst [vmem:[#allocation365_spill] sm:$0xff] %v15435_v30  ;;  %21021 = vst [vmem:[#allocation366_spill] sm:$0xff] %v15439_v28  ;;  %v15451_v18 = vmul.f32 %v21026_v43, %v15178_v49  ;;  %v15455_v19 = vmul.f32 %v21028_v46, %v15188_v31  ;;  %v21030_v30 = vld [vmem:[#allocation154_spill] sm:$0xff]  ;;  %v21032_v28 = vld [vmem:[#allocation155_spill] sm:$0xff] }
 0x496   : > { %21023 = vst [vmem:[#allocation367_spill] sm:$0xff] %v15443_v20  ;;  %21025 = vst [vmem:[#allocation368_spill] sm:$0xff] %v15447_v35  ;;  %v15459_v2 = vmul.f32 %v21030_v30, %v15201_v15  ;;  %v15463_v34 = vmul.f32 %v21032_v28, %v15207_v39  ;;  %v21034_v20 = vld [vmem:[#allocation156_spill] sm:$0xff]  ;;  %v21036_v35 = vld [vmem:[#allocation157_spill] sm:$0xff] }
 0x497   : > { %21027 = vst [vmem:[#allocation369_spill] sm:$0xff] %v15451_v18  ;;  %21029 = vst [vmem:[#allocation370_spill] sm:$0xff] %v15455_v19  ;;  %v15467_v3 = vmul.f32 %v21034_v20, %v15210_v53  ;;  %v15471_v43 = vmul.f32 %v21036_v35, %v15217_v16  ;;  %v21038_v18 = vld [vmem:[#allocation158_spill] sm:$0xff]  ;;  %v21040_v19 = vld [vmem:[#allocation159_spill] sm:$0xff] }
 0x498   : > { %21031 = vst [vmem:[#allocation371_spill] sm:$0xff] %v15459_v2  ;;  %21033 = vst [vmem:[#allocation372_spill] sm:$0xff] %v15463_v34  ;;  %v15475_v46 = vmul.f32 %v21038_v18, %v15226_v25  ;;  %v15479_v30 = vmul.f32 %v21040_v19, %v15229_v6  ;;  %v21042_v34 = vld [vmem:[#allocation160_spill] sm:$0xff]  ;;  %v21044_v20 = vld [vmem:[#allocation161_spill] sm:$0xff] }
 0x499   : > { %21035 = vst [vmem:[#allocation373_spill] sm:$0xff] %v15467_v3  ;;  %21037 = vst [vmem:[#allocation374_spill] sm:$0xff] %v15471_v43  ;;  %v15485_v2 = vmul.f32 %v21042_v34, %v15234_v56  ;;  %v15489_v3 = vmul.f32 %v21044_v20, %v15240_v13  ;;  %v21046_v35 = vld [vmem:[#allocation162_spill] sm:$0xff]  ;;  %v21048_v18 = vld [vmem:[#allocation163_spill] sm:$0xff]  ;;  %v15509_v20 = vmul.f32 %v21054_v9, %v15096_v17 }
 0x49a   : > { %21039 = vst [vmem:[#allocation375_spill] sm:$0xff] %v15475_v46  ;;  %21041 = vst [vmem:[#allocation376_spill] sm:$0xff] %v15479_v30  ;;  %v15493_v43 = vmul.f32 %v21046_v35, %v15253_v37  ;;  %v15497_v46 = vmul.f32 %v21048_v18, %v15259_v7  ;;  %v21050_v19 = vld [vmem:[#allocation180_spill] sm:$0xff]  ;;  %v21052_v28 = vld [vmem:[#allocation209_spill] sm:$0xff]  ;;  %v15513_v35 = vmul.f32 %v21056_v61, %v15102_v50 }
 0x49b   : > { %21043 = vst [vmem:[#allocation377_spill] sm:$0xff] %v15485_v2  ;;  %21045 = vst [vmem:[#allocation378_spill] sm:$0xff] %v15489_v3  ;;  %v15501_v30 = vmul.f32 %v21050_v19, %v15197_v57  ;;  %v15505_v34 = vmul.f32 %v21052_v28, %v15108_v8  ;;  %v21062_v19 = vld [vmem:[#allocation232_spill] sm:$0xff]  ;;  %v21064_v28 = vld [vmem:[#allocation233_spill] sm:$0xff] }
 0x49c   : > { %21047 = vst [vmem:[#allocation379_spill] sm:$0xff] %v15493_v43  ;;  %21049 = vst [vmem:[#allocation380_spill] sm:$0xff] %v15497_v46  ;;  %v21058_v43 = vld [vmem:[#allocation230_spill] sm:$0xff]  ;;  %v21060_v46 = vld [vmem:[#allocation231_spill] sm:$0xff]  ;;  %v15525_v8 = vmul.f32 %v21062_v19, %v15122_v59  ;;  %v15529_v9 = vmul.f32 %v21064_v28, %v15125_v5 }
 0x49d   : > { %21051 = vst [vmem:[#allocation381_spill] sm:$0xff] %v15501_v30  ;;  %21053 = vst [vmem:[#allocation382_spill] sm:$0xff] %v15505_v34  ;;  %v15517_v18 = vmul.f32 %v21058_v43, %v15111_v4  ;;  %v15521_v57 = vmul.f32 %v21060_v46, %v15119_v45  ;;  %v21066_v30 = vld [vmem:[#allocation234_spill] sm:$0xff] }
 0x49e   : > { %21055 = vst [vmem:[#allocation383_spill] sm:$0xff] %v15509_v20  ;;  %21057 = vst [vmem:[#allocation384_spill] sm:$0xff] %v15513_v35  ;;  %v15533_v61 = vmul.f32 %v21066_v30, %v15128_v52  ;;  %v21068_v35 = vld [vmem:[#allocation235_spill] sm:$0xff] }
 0x49f   : > { %21059 = vst [vmem:[#allocation385_spill] sm:$0xff] %v15517_v18  ;;  %21061 = vst [vmem:[#allocation386_spill] sm:$0xff] %v15521_v57  ;;  %v15537_v43 = vmul.f32 %v21068_v35, %v15140_v21  ;;  %v21070_v18 = vld [vmem:[#allocation243_spill] sm:$0xff]  ;;  %v21072_v57 = vld [vmem:[#allocation244_spill] sm:$0xff] }
 0x4a0   : > { %21063 = vst [vmem:[#allocation387_spill] sm:$0xff] %v15525_v8  ;;  %21065 = vst [vmem:[#allocation388_spill] sm:$0xff] %v15529_v9  ;;  %v15541_v46 = vmul.f32 %v21070_v18, %v15131_v24  ;;  %v15545_v19 = vmul.f32 %v21072_v57, %v15155_v48  ;;  %v21074_v8 = vld [vmem:[#allocation245_spill] sm:$0xff]  ;;  %v21076_v9 = vld [vmem:[#allocation246_spill] sm:$0xff] }
 0x4a1   : > { %21067 = vst [vmem:[#allocation389_spill] sm:$0xff] %v15533_v61  ;;  %21069 = vst [vmem:[#allocation390_spill] sm:$0xff] %v15537_v43  ;;  %v15549_v28 = vmul.f32 %v21074_v8, %v15175_v0  ;;  %v15553_v30 = vmul.f32 %v21076_v9, %v15178_v49  ;;  %v21078_v61 = vld [vmem:[#allocation247_spill] sm:$0xff]  ;;  %v21080_v43 = vld [vmem:[#allocation248_spill] sm:$0xff] }
 0x4a2   : > { %21071 = vst [vmem:[#allocation391_spill] sm:$0xff] %v15541_v46  ;;  %21073 = vst [vmem:[#allocation392_spill] sm:$0xff] %v15545_v19  ;;  %v15557_v35 = vmul.f32 %v21078_v61, %v15188_v31  ;;  %v15561_v18 = vmul.f32 %v21080_v43, %v15201_v15  ;;  %v21082_v46 = vld [vmem:[#allocation249_spill] sm:$0xff]  ;;  %v21084_v19 = vld [vmem:[#allocation250_spill] sm:$0xff] }
 0x4a3   : > { %21075 = vst [vmem:[#allocation393_spill] sm:$0xff] %v15549_v28  ;;  %21077 = vst [vmem:[#allocation394_spill] sm:$0xff] %v15553_v30  ;;  %v15565_v57 = vmul.f32 %v21082_v46, %v15207_v39  ;;  %v15569_v8 = vmul.f32 %v21084_v19, %v15210_v53  ;;  %v21086_v28 = vld [vmem:[#allocation251_spill] sm:$0xff]  ;;  %v21088_v30 = vld [vmem:[#allocation252_spill] sm:$0xff]  ;;  %v21095_v19 = vrot.slane %v15155_v48, 1 }
 0x4a4   : > { %21079 = vst [vmem:[#allocation395_spill] sm:$0xff] %v15557_v35  ;;  %21081 = vst [vmem:[#allocation396_spill] sm:$0xff] %v15561_v18  ;;  %v15573_v9 = vmul.f32 %v21086_v28, %v15217_v16  ;;  %v15577_v61 = vmul.f32 %v21088_v30, %v15226_v25  ;;  %v21090_v35 = vld [vmem:[#allocation253_spill] sm:$0xff]  ;;  %v21092_v18 = vld [vmem:[#allocation259_spill] sm:$0xff]  ;;  %v21097_v30 = vrot.slane %v15259_v7, 7 }
 0x4a5   : > { %21083 = vst [vmem:[#allocation397_spill] sm:$0xff] %v15565_v57  ;;  %21085 = vst [vmem:[#allocation398_spill] sm:$0xff] %v15569_v8  ;;  %v15581_v43 = vmul.f32 %v21090_v35, %v15229_v6  ;;  %v15585_v46 = vmul.f32 %v21092_v18, %v15234_v56  ;;  %v15587_v57 = vpop.permute.xlu1 %5539  ;;  %v21096_v8 = vrot.slane %v15131_v24, 1 }
 0x4a6   : > { %21087 = vst [vmem:[#allocation399_spill] sm:$0xff] %v15573_v9  ;;  %21089 = vst [vmem:[#allocation400_spill] sm:$0xff] %v15577_v61  ;;  %v21098_v61 = vrot.slane %v15253_v37, 7  ;;  %v21105_v9 = vrot.slane %v15234_v56, 7 }
 0x4a7   : > { %21091 = vst [vmem:[#allocation401_spill] sm:$0xff] %v15581_v43  ;;  %21093 = vst [vmem:[#allocation402_spill] sm:$0xff] %v15585_v46  ;;  %v15595_v28 = vsel %vm2474_vm6, %v21096_v8, %v21095_v19  ;;  %v21102_v43 = vrot.slane %v15240_v13, 7 }
 0x4a8   : > { %21094 = vst [vmem:[#allocation403_spill] sm:$0xff] %v15587_v57  ;;  %v15603_v35 = vsel %vm1500_vm5, %v21098_v61, %v21097_v30  ;;  %v15607_v18 = vmul.f32 %v15587_v57, %v15595_v28  ;;  %v21101_v46 = vmov %v21098_v61  ;;  %v21107_v61 = vmov %v21105_v9  ;;  %21297 = vst [vmem:[#allocation446_spill] sm:$0xff] %v16098_v63 }
 0x4a9   : > { %21099 = vst [vmem:[#allocation404_spill] sm:$0xff] %v15603_v35  ;;  %v15615_v19 = vsel %vm1500_vm5, %v21102_v43, %v21101_v46  ;;  %v21104_v8 = vmov %v21102_v43  ;;  %v21108_v57 = vrot.slane %v15229_v6, 7  ;;  %v21111_v46 = vrot.slane %v15226_v25, 7 }
 0x4aa   : > { %21100 = vst [vmem:[#allocation405_spill] sm:$0xff] %v15607_v18  ;;  %21103 = vst [vmem:[#allocation406_spill] sm:$0xff] %v15615_v19  ;;  %v15623_v30 = vsel %vm1500_vm5, %v21105_v9, %v21104_v8  ;;  %v21114_v9 = vrot.slane %v15217_v16, 7 }
 0x4ab   : > { %21106 = vst [vmem:[#allocation407_spill] sm:$0xff] %v15623_v30  ;;  %v15631_v35 = vsel %vm1500_vm5, %v21108_v57, %v21107_v61  ;;  %v21110_v20 = vmov %v21108_v57  ;;  %v21113_v19 = vmov %v21111_v46  ;;  %v21117_v57 = vrot.slane %v15210_v53, 7 }
 0x4ac   : > { %21109 = vst [vmem:[#allocation408_spill] sm:$0xff] %v15631_v35  ;;  %v15639_v43 = vsel %vm1500_vm5, %v21111_v46, %v21110_v20  ;;  %v15647_v8 = vsel %vm1500_vm5, %v21114_v9, %v21113_v19  ;;  %v21116_v30 = vmov %v21114_v9  ;;  %v21120_v20 = vrot.slane %v15207_v39, 7 }
 0x4ad   : > { %21112 = vst [vmem:[#allocation409_spill] sm:$0xff] %v15639_v43  ;;  %21115 = vst [vmem:[#allocation410_spill] sm:$0xff] %v15647_v8  ;;  %v15655_v61 = vsel %vm1500_vm5, %v21117_v57, %v21116_v30  ;;  %v21119_v35 = vmov %v21117_v57  ;;  %v21123_v43 = vrot.slane %v15201_v15, 7  ;;  %v21126_v57 = vrot.slane %v15188_v31, 7 }
 0x4ae   : > { %21118 = vst [vmem:[#allocation411_spill] sm:$0xff] %v15655_v61  ;;  %v15663_v46 = vsel %vm1500_vm5, %v21120_v20, %v21119_v35  ;;  %v21122_v9 = vmov %v21120_v20  ;;  %v21129_v20 = vrot.slane %v15178_v49, 7 }
 0x4af   : > { %21121 = vst [vmem:[#allocation412_spill] sm:$0xff] %v15663_v46  ;;  %v15673_v8 = vsel %vm1500_vm5, %v21123_v43, %v21122_v9  ;;  %v21125_v30 = vmov %v21123_v43  ;;  %v21128_v35 = vmov %v21126_v57  ;;  %v21132_v43 = vrot.slane %v15175_v0, 7 }
 0x4b0   : > { %21124 = vst [vmem:[#allocation413_spill] sm:$0xff] %v15673_v8  ;;  %v15681_v61 = vsel %vm1500_vm5, %v21126_v57, %v21125_v30  ;;  %v15689_v19 = vsel %vm1500_vm5, %v21129_v20, %v21128_v35  ;;  %v21131_v27 = vmov %v21129_v20  ;;  %v21135_v30 = vrot.slane %v15155_v48, 7 }
 0x4b1   : > { %21127 = vst [vmem:[#allocation414_spill] sm:$0xff] %v15681_v61  ;;  %21130 = vst [vmem:[#allocation415_spill] sm:$0xff] %v15689_v19  ;;  %v15697_v9 = vsel %vm1500_vm5, %v21132_v43, %v21131_v27  ;;  %v21134_v18 = vmov %v21132_v43  ;;  %v21138_v35 = vrot.slane %v15131_v24, 7  ;;  %v21141_v27 = vrot.slane %v15099_v44, 7  ;;  %v21143_v61 = vld [vmem:[#allocation278_spill] sm:$0xff] }
 0x4b2   : > { %21133 = vst [vmem:[#allocation416_spill] sm:$0xff] %v15697_v9  ;;  %v15705_v57 = vsel %vm1500_vm5, %v21135_v30, %v21134_v18  ;;  %v21137_v46 = vmov %v21135_v30  ;;  %v21144_v19 = vrot.slane %v21143_v61, 7  ;;  %v21145_v18 = vrot.slane %v15140_v21, 7 }
 0x4b3   : > { %21136 = vst [vmem:[#allocation417_spill] sm:$0xff] %v15705_v57  ;;  %v15713_v20 = vsel %vm1500_vm5, %v21138_v35, %v21137_v46  ;;  %v21140_v8 = vmov %v21138_v35  ;;  %v21148_v46 = vrot.slane %v15128_v52, 7 }
 0x4b4   : > { %21139 = vst [vmem:[#allocation418_spill] sm:$0xff] %v15713_v20  ;;  %v15721_v43 = vsel %vm1500_vm5, %v21141_v27, %v21140_v8  ;;  %v15729_v30 = vsel %vm1500_vm5, %v21145_v18, %v21144_v19  ;;  %v21147_v9 = vmov %v21145_v18  ;;  %v21151_v8 = vrot.slane %v15125_v5, 7 }
 0x4b5   : > { %21142 = vst [vmem:[#allocation419_spill] sm:$0xff] %v15721_v43  ;;  %21146 = vst [vmem:[#allocation278_spill] sm:$0xff] %v15729_v30  ;;  %v15737_v24 = vsel %vm1500_vm5, %v21148_v46, %v21147_v9  ;;  %v21150_v44 = vmov %v21148_v46  ;;  %v21154_v19 = vrot.slane %v15122_v59, 7  ;;  %v21157_v9 = vrot.slane %v15119_v45, 7 }
 0x4b6   : > { %21149 = vst [vmem:[#allocation420_spill] sm:$0xff] %v15737_v24  ;;  %v15745_v35 = vsel %vm1500_vm5, %v21151_v8, %v21150_v44  ;;  %v21153_v27 = vmov %v21151_v8  ;;  %v21160_v44 = vrot.slane %v15111_v4, 7  ;;  %v21168_v24 = vld [vmem:[#allocation262_spill] sm:$0xff] }
 0x4b7   : > { %21152 = vst [vmem:[#allocation421_spill] sm:$0xff] %v15745_v35  ;;  %v15753_v18 = vsel %vm1500_vm5, %v21154_v19, %v21153_v27  ;;  %v21156_v57 = vmov %v21154_v19  ;;  %v21159_v20 = vmov %v21157_v9  ;;  %v21163_v27 = vrot.slane %v15102_v50, 7 }
 0x4b8   : > { %21155 = vst [vmem:[#allocation422_spill] sm:$0xff] %v15753_v18  ;;  %v15761_v46 = vsel %vm1500_vm5, %v21157_v9, %v21156_v57  ;;  %v15769_v8 = vsel %vm1500_vm5, %v21160_v44, %v21159_v20  ;;  %v21162_v43 = vmov %v21160_v44  ;;  %v21166_v57 = vrot.slane %v15096_v17, 7  ;;  %v21170_v44 = vld [vmem:[#allocation268_spill] sm:$0xff]  ;;  %v21172_v18 = vld [vmem:[#allocation269_spill] sm:$0xff] }
 0x4b9   : > { %21158 = vst [vmem:[#allocation423_spill] sm:$0xff] %v15761_v46  ;;  %21161 = vst [vmem:[#allocation424_spill] sm:$0xff] %v15769_v8  ;;  %v15777_v19 = vsel %vm1500_vm5, %v21163_v27, %v21162_v43  ;;  %v21165_v30 = vmov %v21163_v27  ;;  %v15789_v20 = vmul.f32 %v21168_v24, %v15240_v13  ;;  %v15793_v35 = vmul.f32 %v21170_v44, %v15253_v37 }
 0x4ba   : > { %21164 = vst [vmem:[#allocation425_spill] sm:$0xff] %v15777_v19  ;;  %v15785_v9 = vsel %vm1500_vm5, %v21166_v57, %v21165_v30  ;;  %v15797_v43 = vmul.f32 %v21172_v18, %v15259_v7  ;;  %v21174_v27 = vrot.slane %v15090_v41, 7  ;;  %v21175_v46 = vrot.slane %v15259_v7, 7 }
 0x4bb   : > { %21167 = vst [vmem:[#allocation426_spill] sm:$0xff] %v15785_v9  ;;  %21169 = vst [vmem:[#allocation427_spill] sm:$0xff] %v15789_v20  ;;  %v21176_v24 = vrot.slane %v15093_v40, 7  ;;  %v1999_v8 = vpack.c.bf16 %v15302_v1, %v15290_v23  ;;  %v21190_v9 = vmov %v21188_v47  ;;  %v21312_v20 = vld [vmem:[#allocation39_spill] sm:$0xff]  ;;  %v21338_v36 = vld [vmem:[#allocation418_spill] sm:$0xff] }
 0x4bc   : > { %21171 = vst [vmem:[#allocation428_spill] sm:$0xff] %v15793_v35  ;;  %21173 = vst [vmem:[#allocation429_spill] sm:$0xff] %v15797_v43  ;;  %v15805_v30 = vsel %vm1500_vm5, %v21175_v46, %v21174_v27  ;;  %v21299_v46 = vld [vmem:[#allocation406_spill] sm:$0xff]  ;;  %v21335_v54 = vld [vmem:[#allocation419_spill] sm:$0xff] }
 0x4bd   : > { %v15813_v44 = vsel %vm1500_vm5, %v21176_v24, %v21166_v57  ;;  %11047 = vmatprep.mubr.msk.bf16.mxu0 %vm650_vm3, %v1999_v8  ;;  %v21185_v57 = vrot.slane %v15253_v37, 1  ;;  %v21191_v24 = vrot.slane %v15234_v56, 1  ;;  %v16114_v33 = vmul.f32 %v21305_v29, %v15805_v30  ;;  %v21309_v43 = vld [vmem:[#allocation38_spill] sm:$0xff]  ;;  %v21329_v26 = vld [vmem:[#allocation420_spill] sm:$0xff] }
 0x4be   : > { %v21326_v3 = vld [vmem:[#allocation421_spill] sm:$0xff]  ;;  %v21332_v38 = vld [vmem:[#allocation278_spill] sm:$0xff] }
 0x4bf   : > { %v15848_v1 = vsel %vm2474_vm6, %v21185_v57, %v21184_v22  ;;  %v21187_v18 = vmov %v21185_v57  ;;  %v15864_v62 = vsel %vm2474_vm6, %v21191_v24, %v21190_v9  ;;  %v21193_v51 = vmov %v21191_v24  ;;  %21306 = vst [vmem:[#allocation448_spill] sm:$0xff] %v16114_v33 }
 0x4c0   : > { %21186 = vst [vmem:[#allocation430_spill] sm:$0xff] %v15848_v1  ;;  %v15856_v8 = vsel %vm2474_vm6, %v21188_v47, %v21187_v18  ;;  %21192 = vst [vmem:[#allocation432_spill] sm:$0xff] %v15864_v62  ;;  %v21194_v22 = vrot.slane %v15229_v6, 1  ;;  %v21197_v47 = vrot.slane %v15226_v25, 1  ;;  %v21200_v9 = vrot.slane %v15217_v16, 1  ;;  %v21317_v23 = vld [vmem:[#allocation424_spill] sm:$0xff] }
 0x4c1   : > { %21189 = vst [vmem:[#allocation431_spill] sm:$0xff] %v15856_v8  ;;  %v16134_v29 = vmul.f32 %v21318_v32, %v21317_v23  ;;  %v21320_v19 = vld [vmem:[#allocation423_spill] sm:$0xff]  ;;  %v16154_v32 = vmul.f32 %v21333_v12, %v21332_v38 }
 0x4c2   : > { %v15872_v37 = vsel %vm2474_vm6, %v21194_v22, %v21193_v51  ;;  %v21196_v57 = vmov %v21194_v22  ;;  %v21199_v18 = vmov %v21197_v47  ;;  %v21202_v24 = vmov %v21200_v9 }
 0x4c3   : > { %21195 = vst [vmem:[#allocation433_spill] sm:$0xff] %v15872_v37  ;;  %v15880_v13 = vsel %vm2474_vm6, %v21197_v47, %v21196_v57  ;;  %v15888_v56 = vsel %vm2474_vm6, %v21200_v9, %v21199_v18  ;;  %v21203_v51 = vrot.slane %v15210_v53, 1  ;;  %v21206_v57 = vrot.slane %v15207_v39, 1  ;;  %21319 = vst [vmem:[#allocation424_spill] sm:$0xff] %v16134_v29  ;;  %v21360_v29 = vld [vmem:[#allocation61_spill] sm:$0xff] }
 0x4c4   : > { %21198 = vst [vmem:[#allocation434_spill] sm:$0xff] %v15880_v13  ;;  %21201 = vst [vmem:[#allocation435_spill] sm:$0xff] %v15888_v56  ;;  %v21209_v18 = vrot.slane %v15201_v15, 1 }
 0x4c5   : > { %v15896_v6 = vsel %vm2474_vm6, %v21203_v51, %v21202_v24  ;;  %v21205_v22 = vmov %v21203_v51  ;;  %v21208_v47 = vmov %v21206_v57  ;;  %v21212_v24 = vrot.slane %v15188_v31, 1  ;;  %21334 = vst [vmem:[#allocation278_spill] sm:$0xff] %v16154_v32  ;;  %v21350_v32 = vld [vmem:[#allocation414_spill] sm:$0xff] }
 0x4c6   : > { %21204 = vst [vmem:[#allocation436_spill] sm:$0xff] %v15896_v6  ;;  %v15904_v25 = vsel %vm2474_vm6, %v21206_v57, %v21205_v22  ;;  %v15912_v16 = vsel %vm2474_vm6, %v21209_v18, %v21208_v47  ;;  %v21211_v9 = vmov %v21209_v18  ;;  %v21215_v22 = vrot.slane %v15178_v49, 1 }
 0x4c7   : > { %21207 = vst [vmem:[#allocation437_spill] sm:$0xff] %v15904_v25  ;;  %21210 = vst [vmem:[#allocation438_spill] sm:$0xff] %v15912_v16  ;;  %v15920_v53 = vsel %vm2474_vm6, %v21212_v24, %v21211_v9  ;;  %v21214_v51 = vmov %v21212_v24  ;;  %v21218_v47 = vrot.slane %v15175_v0, 1  ;;  %v21220_v9 = vrot.slane %v15155_v48, 1 }
 0x4c8   : > { %21213 = vst [vmem:[#allocation439_spill] sm:$0xff] %v15920_v53  ;;  %v15928_v39 = vsel %vm2474_vm6, %v21215_v22, %v21214_v51  ;;  %v21217_v57 = vmov %v21215_v22  ;;  %v21221_v24 = vrot.slane %v21143_v61, 1  ;;  %v21222_v51 = vrot.slane %v15140_v21, 1 }
 0x4c9   : > { %21216 = vst [vmem:[#allocation440_spill] sm:$0xff] %v15928_v39  ;;  %v15936_v15 = vsel %vm2474_vm6, %v21218_v47, %v21217_v57  ;;  %v21219_v18 = vmov %v21218_v47  ;;  %v21224_v57 = vrot.slane %v15128_v52, 1  ;;  %v21226_v47 = vrot.slane %v15125_v5, 1 }
 0x4ca   : > { %v15944_v31 = vsel %vm2474_vm6, %v21220_v9, %v21219_v18  ;;  %v15952_v49 = vsel %vm2474_vm6, %v21222_v51, %v21221_v24  ;;  %v21223_v22 = vmov %v21222_v51  ;;  %v21228_v9 = vrot.slane %v15122_v59, 1 }
 0x4cb   : > { %v15960_v0 = vsel %vm2474_vm6, %v21224_v57, %v21223_v22  ;;  %v21225_v48 = vmov %v21224_v57  ;;  %v21227_v18 = vmov %v21226_v47  ;;  %v21230_v51 = vrot.slane %v15119_v45, 1 }
 0x4cc   : > { %v15968_v61 = vsel %vm2474_vm6, %v21226_v47, %v21225_v48  ;;  %v15976_v21 = vsel %vm2474_vm6, %v21228_v9, %v21227_v18  ;;  %v21229_v24 = vmov %v21228_v9  ;;  %v21232_v57 = vrot.slane %v15111_v4, 1 }
 0x4cd   : > { %v15984_v52 = vsel %vm2474_vm6, %v21230_v51, %v21229_v24  ;;  %v21231_v22 = vmov %v21230_v51  ;;  %v21234_v47 = vrot.slane %v15102_v50, 1  ;;  %v21236_v9 = vrot.slane %v15096_v17, 1  ;;  %v21336_v17 = vld [vmem:[#allocation53_spill] sm:$0xff] }
 0x4ce   : > { %v15992_v5 = vsel %vm2474_vm6, %v21232_v57, %v21231_v22  ;;  %v21233_v48 = vmov %v21232_v57  ;;  %v21237_v24 = vrot.slane %v15090_v41, 1  ;;  %v21238_v51 = vrot.slane %v15259_v7, 1  ;;  %v21271_v7 = vld [vmem:[#allocation181_spill] sm:$0xff] }
 0x4cf   : > { %v16000_v59 = vsel %vm2474_vm6, %v21234_v47, %v21233_v48  ;;  %v21235_v18 = vmov %v21234_v47  ;;  %v21240_v22 = vrot.slane %v15093_v40, 7  ;;  %v21241_v57 = vrot.slane %v15090_v41, 7  ;;  %v21242_v48 = vld [vmem:[#allocation267_spill] sm:$0xff]  ;;  %v21243_v47 = vld [vmem:[#allocation52_spill] sm:$0xff]  ;;  %v21339_v41 = vld [vmem:[#allocation54_spill] sm:$0xff] }
 0x4d0   : > { %v16008_v45 = vsel %vm2474_vm6, %v21236_v9, %v21235_v18  ;;  %v16016_v4 = vsel %vm2474_vm6, %v21238_v51, %v21237_v24  ;;  %v16028_v18 = vmul.f32 %v21243_v47, %v21242_v48  ;;  %v21245_v9 = vld [vmem:[#allocation87_spill] sm:$0xff]  ;;  %v16066_v14 = vmul.f32 %v21271_v7, %v15595_v28  ;;  %v21311_v24 = vld [vmem:[#allocation426_spill] sm:$0xff]  ;;  %v21341_v40 = vld [vmem:[#allocation417_spill] sm:$0xff] }
 0x4d1   : > { %21239 = vst [vmem:[#allocation441_spill] sm:$0xff] %v16016_v4  ;;  %v16024_v50 = vsel %vm1500_vm5, %v21241_v57, %v21240_v22  ;;  %v16032_v27 = vmul.f32 %v21245_v9, %v15595_v28  ;;  %v16062_v9 = vmul.f32 %v21269_v11, %v21242_v48  ;;  %v16090_v2 = vmul.f32 %v21292_v55, %v21242_v48  ;;  %v21302_v48 = vld [vmem:[#allocation404_spill] sm:$0xff]  ;;  %v21303_v55 = vld [vmem:[#allocation35_spill] sm:$0xff]  ;;  %v21314_v11 = vld [vmem:[#allocation425_spill] sm:$0xff] }
 0x4d2   : > { %21244 = vst [vmem:[#allocation267_spill] sm:$0xff] %v16028_v18  ;;  %21272 = vst [vmem:[#allocation444_spill] sm:$0xff] %v16066_v14  ;;  %v16102_v51 = vmul.f32 %v16098_v63, %v15944_v31  ;;  %v16106_v47 = vmul.f32 %v21300_v58, %v21299_v46  ;;  %v16110_v34 = vmul.f32 %v21303_v55, %v21302_v48  ;;  %v21321_v28 = vld [vmem:[#allocation42_spill] sm:$0xff]  ;;  %v21327_v57 = vld [vmem:[#allocation44_spill] sm:$0xff] }
 0x4d3   : > { %21246 = vst [vmem:[#allocation442_spill] sm:$0xff] %v16032_v27  ;;  %21270 = vst [vmem:[#allocation443_spill] sm:$0xff] %v16062_v9  ;;  %v16118_v35 = vmul.f32 %v21307_v60, %v16024_v50  ;;  %v16122_v63 = vmul.f32 %v21309_v43, %v15813_v44  ;;  %v16126_v58 = vmul.f32 %v21312_v20, %v21311_v24  ;;  %v21323_v7 = vld [vmem:[#allocation422_spill] sm:$0xff]  ;;  %v21330_v22 = vld [vmem:[#allocation45_spill] sm:$0xff] }
 0x4d4   : > { %21293 = vst [vmem:[#allocation445_spill] sm:$0xff] %v16090_v2  ;;  %21298 = vst [vmem:[#allocation447_spill] sm:$0xff] %v16102_v51  ;;  %v16130_v55 = vmul.f32 %v21315_v42, %v21314_v11  ;;  %v16138_v60 = vmul.f32 %v21321_v28, %v21320_v19  ;;  %v16142_v43 = vmul.f32 %v21324_v10, %v21323_v7  ;;  %v21342_v2 = vld [vmem:[#allocation55_spill] sm:$0xff]  ;;  %v21344_v9 = vld [vmem:[#allocation416_spill] sm:$0xff] }
 0x4d5   : > { %21301 = vst [vmem:[#allocation406_spill] sm:$0xff] %v16106_v47  ;;  %21304 = vst [vmem:[#allocation404_spill] sm:$0xff] %v16110_v34  ;;  %v16146_v20 = vmul.f32 %v21327_v57, %v21326_v3  ;;  %v16150_v42 = vmul.f32 %v21330_v22, %v21329_v26  ;;  %v16158_v28 = vmul.f32 %v21336_v17, %v21335_v54  ;;  %v21345_v18 = vld [vmem:[#allocation56_spill] sm:$0xff]  ;;  %v21347_v51 = vld [vmem:[#allocation415_spill] sm:$0xff] }
 0x4d6   : > { %21308 = vst [vmem:[#allocation449_spill] sm:$0xff] %v16118_v35  ;;  %21310 = vst [vmem:[#allocation450_spill] sm:$0xff] %v16122_v63  ;;  %v16162_v10 = vmul.f32 %v21339_v41, %v21338_v36  ;;  %v16166_v57 = vmul.f32 %v21342_v2, %v21341_v40  ;;  %v16170_v22 = vmul.f32 %v21345_v18, %v21344_v9  ;;  %v21369_v63 = vld [vmem:[#allocation66_spill] sm:$0xff]  ;;  %v21372_v35 = vld [vmem:[#allocation67_spill] sm:$0xff] }
 0x4d7   : > { %21313 = vst [vmem:[#allocation426_spill] sm:$0xff] %v16126_v58  ;;  %21316 = vst [vmem:[#allocation425_spill] sm:$0xff] %v16130_v55  ;;  %v21363_v55 = vld [vmem:[#allocation63_spill] sm:$0xff]  ;;  %v21366_v58 = vld [vmem:[#allocation64_spill] sm:$0xff] }
 0x4d8   : > { %21322 = vst [vmem:[#allocation423_spill] sm:$0xff] %v16138_v60  ;;  %21325 = vst [vmem:[#allocation422_spill] sm:$0xff] %v16142_v43  ;;  %v21354_v43 = vld [vmem:[#allocation59_spill] sm:$0xff]  ;;  %v21357_v60 = vld [vmem:[#allocation60_spill] sm:$0xff] }
 0x4d9   : > { %21328 = vst [vmem:[#allocation421_spill] sm:$0xff] %v16146_v20  ;;  %21331 = vst [vmem:[#allocation420_spill] sm:$0xff] %v16150_v42  ;;  %v21348_v42 = vld [vmem:[#allocation57_spill] sm:$0xff]  ;;  %v21351_v20 = vld [vmem:[#allocation58_spill] sm:$0xff] }
 0x4da   : > { %21337 = vst [vmem:[#allocation419_spill] sm:$0xff] %v16158_v28  ;;  %21340 = vst [vmem:[#allocation418_spill] sm:$0xff] %v16162_v10  ;;  %v16174_v12 = vmul.f32 %v21348_v42, %v21347_v51  ;;  %v16178_v17 = vmul.f32 %v21351_v20, %v21350_v32  ;;  %v21353_v28 = vld [vmem:[#allocation413_spill] sm:$0xff]  ;;  %v21356_v10 = vld [vmem:[#allocation412_spill] sm:$0xff] }
 0x4db   : > { %21343 = vst [vmem:[#allocation417_spill] sm:$0xff] %v16166_v57  ;;  %21346 = vst [vmem:[#allocation416_spill] sm:$0xff] %v16170_v22  ;;  %v16182_v41 = vmul.f32 %v21354_v43, %v21353_v28  ;;  %v16186_v2 = vmul.f32 %v21357_v60, %v21356_v10  ;;  %v21359_v57 = vld [vmem:[#allocation411_spill] sm:$0xff]  ;;  %v21362_v22 = vld [vmem:[#allocation410_spill] sm:$0xff] }
 0x4dc   : > { %21349 = vst [vmem:[#allocation415_spill] sm:$0xff] %v16174_v12  ;;  %21352 = vst [vmem:[#allocation414_spill] sm:$0xff] %v16178_v17  ;;  %v16190_v18 = vmul.f32 %v21360_v29, %v21359_v57  ;;  %v16194_v42 = vmul.f32 %v21363_v55, %v21362_v22  ;;  %v21365_v12 = vld [vmem:[#allocation409_spill] sm:$0xff]  ;;  %v21368_v17 = vld [vmem:[#allocation408_spill] sm:$0xff] }
 0x4dd   : > { %21355 = vst [vmem:[#allocation413_spill] sm:$0xff] %v16182_v41  ;;  %21358 = vst [vmem:[#allocation412_spill] sm:$0xff] %v16186_v2  ;;  %v16198_v20 = vmul.f32 %v21366_v58, %v21365_v12  ;;  %v16202_v43 = vmul.f32 %v21369_v63, %v21368_v17  ;;  %v21371_v41 = vld [vmem:[#allocation407_spill] sm:$0xff]  ;;  %v21374_v2 = vld [vmem:[#allocation68_spill] sm:$0xff] }
 0x4de   : > { %21361 = vst [vmem:[#allocation411_spill] sm:$0xff] %v16190_v18  ;;  %21364 = vst [vmem:[#allocation410_spill] sm:$0xff] %v16194_v42  ;;  %v16206_v60 = vmul.f32 %v21372_v35, %v21371_v41  ;;  %v16210_v29 = vmul.f32 %v21374_v2, %v15848_v1  ;;  %v21376_v18 = vld [vmem:[#allocation69_spill] sm:$0xff]  ;;  %v21378_v42 = vld [vmem:[#allocation72_spill] sm:$0xff] }
 0x4df   : > { %21367 = vst [vmem:[#allocation409_spill] sm:$0xff] %v16198_v20  ;;  %21370 = vst [vmem:[#allocation408_spill] sm:$0xff] %v16202_v43  ;;  %v16214_v55 = vmul.f32 %v21376_v18, %v16016_v4  ;;  %v16218_v58 = vmul.f32 %v21378_v42, %v16008_v45  ;;  %v21380_v20 = vld [vmem:[#allocation73_spill] sm:$0xff]  ;;  %v21382_v43 = vld [vmem:[#allocation74_spill] sm:$0xff] }
 0x4e0   : > { %21373 = vst [vmem:[#allocation407_spill] sm:$0xff] %v16206_v60  ;;  %21375 = vst [vmem:[#allocation451_spill] sm:$0xff] %v16210_v29  ;;  %v16222_v63 = vmul.f32 %v21380_v20, %v16000_v59  ;;  %v16226_v35 = vmul.f32 %v21382_v43, %v15992_v5  ;;  %v21384_v60 = vld [vmem:[#allocation75_spill] sm:$0xff]  ;;  %v21386_v29 = vld [vmem:[#allocation76_spill] sm:$0xff] }
 0x4e1   : > { %21377 = vst [vmem:[#allocation452_spill] sm:$0xff] %v16214_v55  ;;  %21379 = vst [vmem:[#allocation453_spill] sm:$0xff] %v16218_v58  ;;  %v16230_v2 = vmul.f32 %v21384_v60, %v15984_v52  ;;  %v16234_v18 = vmul.f32 %v21386_v29, %v15976_v21  ;;  %v21388_v55 = vld [vmem:[#allocation77_spill] sm:$0xff]  ;;  %v21390_v58 = vld [vmem:[#allocation78_spill] sm:$0xff] }
 0x4e2   : > { %21381 = vst [vmem:[#allocation454_spill] sm:$0xff] %v16222_v63  ;;  %21383 = vst [vmem:[#allocation455_spill] sm:$0xff] %v16226_v35  ;;  %v16238_v42 = vmul.f32 %v21388_v55, %v15968_v61  ;;  %v16242_v20 = vmul.f32 %v21390_v58, %v15960_v0  ;;  %v21392_v63 = vld [vmem:[#allocation79_spill] sm:$0xff]  ;;  %v21394_v35 = vld [vmem:[#allocation88_spill] sm:$0xff] }
 0x4e3   : > { %21385 = vst [vmem:[#allocation456_spill] sm:$0xff] %v16230_v2  ;;  %21387 = vst [vmem:[#allocation457_spill] sm:$0xff] %v16234_v18  ;;  %v16246_v43 = vmul.f32 %v21392_v63, %v15952_v49  ;;  %v16250_v60 = vmul.f32 %v21394_v35, %v15944_v31  ;;  %v21396_v2 = vld [vmem:[#allocation89_spill] sm:$0xff]  ;;  %v21398_v18 = vld [vmem:[#allocation90_spill] sm:$0xff] }
 0x4e4   : > { %21389 = vst [vmem:[#allocation458_spill] sm:$0xff] %v16238_v42  ;;  %21391 = vst [vmem:[#allocation459_spill] sm:$0xff] %v16242_v20  ;;  %v16254_v29 = vmul.f32 %v21396_v2, %v15936_v15  ;;  %v16258_v55 = vmul.f32 %v21398_v18, %v15928_v39  ;;  %v21400_v42 = vld [vmem:[#allocation91_spill] sm:$0xff]  ;;  %v21402_v20 = vld [vmem:[#allocation92_spill] sm:$0xff] }
 0x4e5   : > { %21393 = vst [vmem:[#allocation460_spill] sm:$0xff] %v16246_v43  ;;  %21395 = vst [vmem:[#allocation461_spill] sm:$0xff] %v16250_v60  ;;  %v16262_v58 = vmul.f32 %v21400_v42, %v15920_v53  ;;  %v16266_v63 = vmul.f32 %v21402_v20, %v15912_v16  ;;  %v21404_v43 = vld [vmem:[#allocation93_spill] sm:$0xff]  ;;  %v21406_v60 = vld [vmem:[#allocation94_spill] sm:$0xff] }
 0x4e6   : > { %21397 = vst [vmem:[#allocation462_spill] sm:$0xff] %v16254_v29  ;;  %21399 = vst [vmem:[#allocation463_spill] sm:$0xff] %v16258_v55  ;;  %v16270_v35 = vmul.f32 %v21404_v43, %v15904_v25  ;;  %v16274_v2 = vmul.f32 %v21406_v60, %v15896_v6  ;;  %v21408_v29 = vld [vmem:[#allocation95_spill] sm:$0xff]  ;;  %v21410_v55 = vld [vmem:[#allocation96_spill] sm:$0xff] }
 0x4e7   : > { %21401 = vst [vmem:[#allocation464_spill] sm:$0xff] %v16262_v58  ;;  %21403 = vst [vmem:[#allocation465_spill] sm:$0xff] %v16266_v63  ;;  %v16278_v18 = vmul.f32 %v21408_v29, %v15888_v56  ;;  %v16282_v42 = vmul.f32 %v21410_v55, %v15880_v13  ;;  %v21412_v58 = vld [vmem:[#allocation97_spill] sm:$0xff]  ;;  %v21414_v63 = vld [vmem:[#allocation98_spill] sm:$0xff] }
 0x4e8   : > { %21405 = vst [vmem:[#allocation466_spill] sm:$0xff] %v16270_v35  ;;  %21407 = vst [vmem:[#allocation467_spill] sm:$0xff] %v16274_v2  ;;  %v16286_v20 = vmul.f32 %v21412_v58, %v15872_v37  ;;  %v16290_v43 = vmul.f32 %v21414_v63, %v15864_v62  ;;  %v21416_v35 = vld [vmem:[#allocation99_spill] sm:$0xff]  ;;  %v21421_v55 = vld [vmem:[#allocation101_spill] sm:$0xff] }
 0x4e9   : > { %21409 = vst [vmem:[#allocation468_spill] sm:$0xff] %v16278_v18  ;;  %21411 = vst [vmem:[#allocation469_spill] sm:$0xff] %v16282_v42  ;;  %v16294_v60 = vmul.f32 %v21416_v35, %v15856_v8  ;;  %v21419_v18 = vld [vmem:[#allocation100_spill] sm:$0xff]  ;;  %v16304_v42 = vmul.f32 %v21421_v55, %v16024_v50  ;;  %v21423_v58 = vld [vmem:[#allocation102_spill] sm:$0xff] }
 0x4ea   : > { %21413 = vst [vmem:[#allocation470_spill] sm:$0xff] %v16286_v20  ;;  %21415 = vst [vmem:[#allocation471_spill] sm:$0xff] %v16290_v43  ;;  %v16300_v33 = vmul.f32 %v21419_v18, %v15805_v30  ;;  %v16308_v20 = vmul.f32 %v21423_v58, %v15813_v44  ;;  %v21425_v63 = vld [vmem:[#allocation103_spill] sm:$0xff]  ;;  %v21427_v35 = vld [vmem:[#allocation104_spill] sm:$0xff] }
 0x4eb   : > { %21417 = vst [vmem:[#allocation472_spill] sm:$0xff] %v16294_v60  ;;  %21422 = vst [vmem:[#allocation474_spill] sm:$0xff] %v16304_v42  ;;  %v16312_v43 = vmul.f32 %v21425_v63, %v21311_v24  ;;  %v16316_v60 = vmul.f32 %v21427_v35, %v21314_v11  ;;  %v21429_v29 = vld [vmem:[#allocation105_spill] sm:$0xff]  ;;  %v21431_v2 = vld [vmem:[#allocation106_spill] sm:$0xff] }
 0x4ec   : > { %21420 = vst [vmem:[#allocation473_spill] sm:$0xff] %v16300_v33  ;;  %21424 = vst [vmem:[#allocation475_spill] sm:$0xff] %v16308_v20  ;;  %v16320_v18 = vmul.f32 %v21429_v29, %v21317_v23  ;;  %v16324_v55 = vmul.f32 %v21431_v2, %v21320_v19  ;;  %v21433_v27 = vld [vmem:[#allocation107_spill] sm:$0xff]  ;;  %v21435_v20 = vld [vmem:[#allocation108_spill] sm:$0xff] }
 0x4ed   : > { %21426 = vst [vmem:[#allocation476_spill] sm:$0xff] %v16312_v43  ;;  %21428 = vst [vmem:[#allocation477_spill] sm:$0xff] %v16316_v60  ;;  %v16328_v58 = vmul.f32 %v21433_v27, %v21323_v7  ;;  %v16332_v63 = vmul.f32 %v21435_v20, %v21326_v3  ;;  %v21437_v43 = vld [vmem:[#allocation109_spill] sm:$0xff]  ;;  %v21439_v60 = vld [vmem:[#allocation110_spill] sm:$0xff] }
 0x4ee   : > { %21430 = vst [vmem:[#allocation478_spill] sm:$0xff] %v16320_v18  ;;  %21432 = vst [vmem:[#allocation479_spill] sm:$0xff] %v16324_v55  ;;  %v16336_v35 = vmul.f32 %v21437_v43, %v21329_v26  ;;  %v16340_v29 = vmul.f32 %v21439_v60, %v21332_v38  ;;  %v21441_v18 = vld [vmem:[#allocation117_spill] sm:$0xff]  ;;  %v21443_v55 = vld [vmem:[#allocation118_spill] sm:$0xff] }
 0x4ef   : > { %21434 = vst [vmem:[#allocation480_spill] sm:$0xff] %v16328_v58  ;;  %21436 = vst [vmem:[#allocation481_spill] sm:$0xff] %v16332_v63  ;;  %v16344_v2 = vmul.f32 %v21441_v18, %v21335_v54  ;;  %v16348_v27 = vmul.f32 %v21443_v55, %v21338_v36  ;;  %v21445_v58 = vld [vmem:[#allocation119_spill] sm:$0xff]  ;;  %v16354_v63 = vpop.permute.xlu1 %5549  ;;  %v21448_v43 = vld [vmem:[#allocation120_spill] sm:$0xff] }
 0x4f0   : > { %21438 = vst [vmem:[#allocation482_spill] sm:$0xff] %v16336_v35  ;;  %21440 = vst [vmem:[#allocation483_spill] sm:$0xff] %v16340_v29  ;;  %v16352_v20 = vmul.f32 %v21445_v58, %v21341_v40  ;;  %v16358_v35 = vmul.f32 %v21448_v43, %v21344_v9  ;;  %v21450_v60 = vld [vmem:[#allocation121_spill] sm:$0xff]  ;;  %v21452_v18 = vld [vmem:[#allocation122_spill] sm:$0xff] }
 0x4f1   : > { %21442 = vst [vmem:[#allocation484_spill] sm:$0xff] %v16344_v2  ;;  %21444 = vst [vmem:[#allocation485_spill] sm:$0xff] %v16348_v27  ;;  %v16362_v29 = vmul.f32 %v21450_v60, %v21347_v51  ;;  %v16366_v2 = vmul.f32 %v21452_v18, %v21350_v32  ;;  %v21454_v55 = vld [vmem:[#allocation123_spill] sm:$0xff]  ;;  %v21456_v58 = vld [vmem:[#allocation124_spill] sm:$0xff] }
 0x4f2   : > { %21446 = vst [vmem:[#allocation486_spill] sm:$0xff] %v16352_v20  ;;  %21447 = vst [vmem:[#allocation487_spill] sm:$0xff] %v16354_v63  ;;  %v16370_v27 = vmul.f32 %v21454_v55, %v21353_v28  ;;  %v16374_v20 = vmul.f32 %v21456_v58, %v21356_v10  ;;  %v21458_v42 = vld [vmem:[#allocation125_spill] sm:$0xff]  ;;  %v21534_v14 = vld [vmem:[#allocation220_spill] sm:$0xff] }
 0x4f3   : > { %21449 = vst [vmem:[#allocation488_spill] sm:$0xff] %v16358_v35  ;;  %21451 = vst [vmem:[#allocation489_spill] sm:$0xff] %v16362_v29  ;;  %v16378_v43 = vmul.f32 %v21458_v42, %v21359_v57  ;;  %v21460_v35 = vld [vmem:[#allocation126_spill] sm:$0xff]  ;;  %v21462_v29 = vld [vmem:[#allocation127_spill] sm:$0xff] }
 0x4f4   : > { %21453 = vst [vmem:[#allocation490_spill] sm:$0xff] %v16366_v2  ;;  %21455 = vst [vmem:[#allocation491_spill] sm:$0xff] %v16370_v27  ;;  %v16382_v60 = vmul.f32 %v21460_v35, %v21362_v22  ;;  %v16386_v18 = vmul.f32 %v21462_v29, %v21365_v12  ;;  %v21464_v2 = vld [vmem:[#allocation128_spill] sm:$0xff]  ;;  %v21466_v27 = vld [vmem:[#allocation129_spill] sm:$0xff] }
 0x4f5   : > { %21457 = vst [vmem:[#allocation492_spill] sm:$0xff] %v16374_v20  ;;  %21459 = vst [vmem:[#allocation493_spill] sm:$0xff] %v16378_v43  ;;  %v16390_v55 = vmul.f32 %v21464_v2, %v21368_v17  ;;  %v16394_v58 = vmul.f32 %v21466_v27, %v21371_v41  ;;  %v21468_v20 = vld [vmem:[#allocation130_spill] sm:$0xff]  ;;  %v21470_v43 = vld [vmem:[#allocation131_spill] sm:$0xff] }
 0x4f6   : > { %21461 = vst [vmem:[#allocation494_spill] sm:$0xff] %v16382_v60  ;;  %21463 = vst [vmem:[#allocation495_spill] sm:$0xff] %v16386_v18  ;;  %v16398_v42 = vmul.f32 %v21468_v20, %v21299_v46  ;;  %v16402_v35 = vmul.f32 %v21470_v43, %v21302_v48  ;;  %v21472_v60 = vld [vmem:[#allocation166_spill] sm:$0xff]  ;;  %v21474_v18 = vld [vmem:[#allocation167_spill] sm:$0xff] }
 0x4f7   : > { %21465 = vst [vmem:[#allocation496_spill] sm:$0xff] %v16390_v55  ;;  %21467 = vst [vmem:[#allocation497_spill] sm:$0xff] %v16394_v58  ;;  %v16406_v29 = vmul.f32 %v21472_v60, %v16008_v45  ;;  %v16410_v2 = vmul.f32 %v21474_v18, %v16000_v59  ;;  %v21476_v55 = vld [vmem:[#allocation168_spill] sm:$0xff]  ;;  %v21478_v58 = vld [vmem:[#allocation169_spill] sm:$0xff] }
 0x4f8   : > { %21469 = vst [vmem:[#allocation498_spill] sm:$0xff] %v16398_v42  ;;  %21471 = vst [vmem:[#allocation499_spill] sm:$0xff] %v16402_v35  ;;  %v16414_v27 = vmul.f32 %v21476_v55, %v15992_v5  ;;  %v16418_v20 = vmul.f32 %v21478_v58, %v15984_v52  ;;  %v21480_v42 = vld [vmem:[#allocation170_spill] sm:$0xff]  ;;  %v21482_v35 = vld [vmem:[#allocation171_spill] sm:$0xff] }
 0x4f9   : > { %21473 = vst [vmem:[#allocation500_spill] sm:$0xff] %v16406_v29  ;;  %21475 = vst [vmem:[#allocation501_spill] sm:$0xff] %v16410_v2  ;;  %v16422_v43 = vmul.f32 %v21480_v42, %v15976_v21  ;;  %v16426_v60 = vmul.f32 %v21482_v35, %v15968_v61  ;;  %v21484_v29 = vld [vmem:[#allocation172_spill] sm:$0xff]  ;;  %v21486_v2 = vld [vmem:[#allocation173_spill] sm:$0xff] }
 0x4fa   : > { %21477 = vst [vmem:[#allocation502_spill] sm:$0xff] %v16414_v27  ;;  %21479 = vst [vmem:[#allocation503_spill] sm:$0xff] %v16418_v20  ;;  %v16430_v18 = vmul.f32 %v21484_v29, %v15960_v0  ;;  %v16434_v55 = vmul.f32 %v21486_v2, %v15952_v49  ;;  %v16436_v27 = vpop.permute.xlu0 %5554  ;;  %v21489_v58 = vld [vmem:[#allocation182_spill] sm:$0xff]  ;;  %v21490_v42 = vld [vmem:[#allocation183_spill] sm:$0xff]  ;;  %v16454_v2 = vpop.permute.xlu1 %5559 }
 0x4fb   : > { %21481 = vst [vmem:[#allocation504_spill] sm:$0xff] %v16422_v43  ;;  %21483 = vst [vmem:[#allocation505_spill] sm:$0xff] %v16426_v60  ;;  %v16440_v20 = vmul.f32 %v21489_v58, %v15944_v31  ;;  %v16444_v43 = vmul.f32 %v21490_v42, %v15936_v15  ;;  %v21492_v35 = vld [vmem:[#allocation184_spill] sm:$0xff]  ;;  %v21493_v29 = vld [vmem:[#allocation185_spill] sm:$0xff] }
 0x4fc   : > { %21485 = vst [vmem:[#allocation506_spill] sm:$0xff] %v16430_v18  ;;  %21487 = vst [vmem:[#allocation507_spill] sm:$0xff] %v16434_v55  ;;  %v16448_v60 = vmul.f32 %v21492_v35, %v15928_v39  ;;  %v16452_v18 = vmul.f32 %v21493_v29, %v15920_v53  ;;  %v21496_v31 = vld [vmem:[#allocation187_spill] sm:$0xff]  ;;  %v21497_v42 = vld [vmem:[#allocation188_spill] sm:$0xff] }
 0x4fd   : > { %21488 = vst [vmem:[#allocation508_spill] sm:$0xff] %v16436_v27  ;;  %21491 = vst [vmem:[#allocation509_spill] sm:$0xff] %v16444_v43  ;;  %v21495_v27 = vld [vmem:[#allocation186_spill] sm:$0xff]  ;;  %v16462_v58 = vmul.f32 %v21496_v31, %v15904_v25  ;;  %v16466_v43 = vmul.f32 %v21497_v42, %v15896_v6  ;;  %v21498_v35 = vld [vmem:[#allocation189_spill] sm:$0xff] }
 0x4fe   : > { %21494 = vst [vmem:[#allocation510_spill] sm:$0xff] %v16454_v2  ;;  %v16458_v55 = vmul.f32 %v21495_v27, %v15912_v16  ;;  %v16470_v39 = vmul.f32 %v21498_v35, %v15888_v56  ;;  %v21499_v29 = vld [vmem:[#allocation190_spill] sm:$0xff]  ;;  %v21501_v2 = vld [vmem:[#allocation191_spill] sm:$0xff]  ;;  %v21503_v16 = vld [vmem:[#allocation192_spill] sm:$0xff] }
 0x4ff   : > { %v16474_v53 = vmul.f32 %v21499_v29, %v15880_v13  ;;  %v16478_v27 = vmul.f32 %v21501_v2, %v15872_v37  ;;  %v16482_v31 = vmul.f32 %v21503_v16, %v15864_v62  ;;  %v21505_v25 = vld [vmem:[#allocation193_spill] sm:$0xff]  ;;  %v21507_v6 = vld [vmem:[#allocation194_spill] sm:$0xff]  ;;  %v21508_v56 = vld [vmem:[#allocation195_spill] sm:$0xff] }
 0x500   : > { %v16486_v42 = vmul.f32 %v21505_v25, %v15856_v8  ;;  %v16490_v35 = vmul.f32 %v21507_v6, %v15848_v1  ;;  %v16494_v29 = vmul.f32 %v21508_v56, %v16016_v4  ;;  %v21510_v37 = vld [vmem:[#allocation196_spill] sm:$0xff]  ;;  %v21511_v16 = vld [vmem:[#allocation197_spill] sm:$0xff]  ;;  %v21512_v25 = vld [vmem:[#allocation198_spill] sm:$0xff] }
 0x501   : > { %21500 = vst [vmem:[#allocation511_spill] sm:$0xff] %v16474_v53  ;;  %21502 = vst [vmem:[#allocation512_spill] sm:$0xff] %v16478_v27  ;;  %v16500_v27 = vmul.f32 %v21510_v37, %v15813_v44  ;;  %v16504_v62 = vmul.f32 %v21511_v16, %v21311_v24  ;;  %v16508_v8 = vmul.f32 %v21512_v25, %v21314_v11  ;;  %v21513_v6 = vld [vmem:[#allocation199_spill] sm:$0xff]  ;;  %v21514_v56 = vld [vmem:[#allocation200_spill] sm:$0xff] }
 0x502   : > { %21504 = vst [vmem:[#allocation513_spill] sm:$0xff] %v16482_v31  ;;  %21506 = vst [vmem:[#allocation514_spill] sm:$0xff] %v16486_v42  ;;  %v16512_v1 = vmul.f32 %v21513_v6, %v21317_v23  ;;  %v16516_v4 = vmul.f32 %v21514_v56, %v21320_v19  ;;  %v21515_v2 = vld [vmem:[#allocation201_spill] sm:$0xff]  ;;  %v21516_v37 = vld [vmem:[#allocation202_spill] sm:$0xff]  ;;  %v16534_v6 = vpop.permute.xlu0 %5564 }
 0x503   : > { %v16520_v44 = vmul.f32 %v21515_v2, %v21323_v7  ;;  %v16524_v24 = vmul.f32 %v21516_v37, %v21326_v3  ;;  %v21517_v16 = vld [vmem:[#allocation203_spill] sm:$0xff]  ;;  %v21518_v25 = vld [vmem:[#allocation204_spill] sm:$0xff]  ;;  %21519 = vst [vmem:[#allocation515_spill] sm:$0xff] %v16534_v6  ;;  %v21522_v3 = vld [vmem:[#allocation213_spill] sm:$0xff] }
 0x504   : > { %v16528_v11 = vmul.f32 %v21517_v16, %v21329_v26  ;;  %v16532_v23 = vmul.f32 %v21518_v25, %v21332_v38  ;;  %v21520_v19 = vld [vmem:[#allocation211_spill] sm:$0xff]  ;;  %v21521_v7 = vld [vmem:[#allocation212_spill] sm:$0xff]  ;;  %v16546_v37 = vmul.f32 %v21522_v3, %v21341_v40  ;;  %v21523_v26 = vld [vmem:[#allocation214_spill] sm:$0xff]  ;;  %v16552_v38 = vpop.permute.xlu1 %5569 }
 0x505   : > { %v16538_v56 = vmul.f32 %v21520_v19, %v21335_v54  ;;  %v16542_v2 = vmul.f32 %v21521_v7, %v21338_v36  ;;  %v16550_v16 = vmul.f32 %v21523_v26, %v21344_v9  ;;  %21524 = vst [vmem:[#allocation516_spill] sm:$0xff] %v16552_v38  ;;  %v21525_v25 = vld [vmem:[#allocation215_spill] sm:$0xff]  ;;  %v21526_v54 = vld [vmem:[#allocation216_spill] sm:$0xff]  ;;  %v21528_v36 = vld [vmem:[#allocation217_spill] sm:$0xff] }
 0x506   : > { %v16556_v13 = vmul.f32 %v21525_v25, %v21347_v51  ;;  %v16560_v19 = vmul.f32 %v21526_v54, %v21350_v32  ;;  %v16564_v7 = vmul.f32 %v21528_v36, %v21353_v28  ;;  %v21530_v40 = vld [vmem:[#allocation218_spill] sm:$0xff]  ;;  %v21532_v9 = vld [vmem:[#allocation219_spill] sm:$0xff]  ;;  %v16576_v51 = vmul.f32 %v21534_v14, %v21362_v22  ;;  %v21536_v25 = vld [vmem:[#allocation221_spill] sm:$0xff] }
 0x507   : > { %v16568_v3 = vmul.f32 %v21530_v40, %v21356_v10  ;;  %v16572_v26 = vmul.f32 %v21532_v9, %v21359_v57  ;;  %v16580_v32 = vmul.f32 %v21536_v25, %v21365_v12  ;;  %v21538_v54 = vld [vmem:[#allocation222_spill] sm:$0xff]  ;;  %v21540_v36 = vld [vmem:[#allocation223_spill] sm:$0xff]  ;;  %v21541_v40 = vld [vmem:[#allocation224_spill] sm:$0xff] }
 0x508   : > { %21527 = vst [vmem:[#allocation517_spill] sm:$0xff] %v16560_v19  ;;  %21529 = vst [vmem:[#allocation518_spill] sm:$0xff] %v16564_v7  ;;  %v16584_v28 = vmul.f32 %v21538_v54, %v21368_v17  ;;  %v16588_v10 = vmul.f32 %v21540_v36, %v21371_v41  ;;  %v16592_v57 = vmul.f32 %v21541_v40, %v21299_v46  ;;  %v21543_v9 = vld [vmem:[#allocation225_spill] sm:$0xff]  ;;  %v21544_v14 = vld [vmem:[#allocation226_spill] sm:$0xff] }
 0x509   : > { %21531 = vst [vmem:[#allocation519_spill] sm:$0xff] %v16568_v3  ;;  %21533 = vst [vmem:[#allocation520_spill] sm:$0xff] %v16572_v26  ;;  %v16596_v22 = vmul.f32 %v21543_v9, %v21302_v48  ;;  %v16600_v12 = vmul.f32 %v21544_v14, %v15805_v30  ;;  %v21546_v25 = vld [vmem:[#allocation227_spill] sm:$0xff]  ;;  %v21547_v54 = vld [vmem:[#allocation272_spill] sm:$0xff] }
 0x50a   : > { %21535 = vst [vmem:[#allocation521_spill] sm:$0xff] %v16576_v51  ;;  %21537 = vst [vmem:[#allocation522_spill] sm:$0xff] %v16580_v32  ;;  %v16604_v17 = vmul.f32 %v21546_v25, %v16024_v50  ;;  %v16608_v41 = vmul.f32 %v21547_v54, %v16008_v45  ;;  %v21549_v36 = vld [vmem:[#allocation273_spill] sm:$0xff]  ;;  %v21551_v40 = vld [vmem:[#allocation274_spill] sm:$0xff] }
 0x50b   : > { %21539 = vst [vmem:[#allocation523_spill] sm:$0xff] %v16584_v28  ;;  %21542 = vst [vmem:[#allocation524_spill] sm:$0xff] %v16592_v57  ;;  %v16612_v46 = vmul.f32 %v21549_v36, %v16000_v59  ;;  %v16616_v48 = vmul.f32 %v21551_v40, %v15992_v5  ;;  %v21553_v9 = vld [vmem:[#allocation275_spill] sm:$0xff]  ;;  %v21555_v14 = vld [vmem:[#allocation276_spill] sm:$0xff]  ;;  %v16634_v36 = vpop.permute.xlu0 %5574 }
 0x50c   : > { %21545 = vst [vmem:[#allocation525_spill] sm:$0xff] %v16600_v12  ;;  %21548 = vst [vmem:[#allocation526_spill] sm:$0xff] %v16608_v41  ;;  %v16620_v30 = vmul.f32 %v21553_v9, %v15984_v52  ;;  %v16624_v50 = vmul.f32 %v21555_v14, %v15976_v21  ;;  %v21557_v25 = vld [vmem:[#allocation277_spill] sm:$0xff]  ;;  %v21562_v5 = vld [vmem:[#allocation286_spill] sm:$0xff]  ;;  %v16642_v52 = vmul.f32 %v16354_v63, %v15936_v15  ;;  %v16648_v9 = vpop.permute.xlu1 %5579 }
 0x50d   : > { %21550 = vst [vmem:[#allocation527_spill] sm:$0xff] %v16612_v46  ;;  %21552 = vst [vmem:[#allocation528_spill] sm:$0xff] %v16616_v48  ;;  %v16628_v45 = vmul.f32 %v21557_v25, %v15968_v61  ;;  %v21559_v54 = vld [vmem:[#allocation281_spill] sm:$0xff]  ;;  %v16638_v40 = vmul.f32 %v21562_v5, %v15952_v49  ;;  %v21639_v6 = vld [vmem:[#allocation495_spill] sm:$0xff] }
 0x50e   : > { %21554 = vst [vmem:[#allocation529_spill] sm:$0xff] %v16620_v30  ;;  %21556 = vst [vmem:[#allocation530_spill] sm:$0xff] %v16624_v50  ;;  %v16632_v59 = vmul.f32 %v21559_v54, %v15960_v0  ;;  %v21637_v54 = vld [vmem:[#allocation493_spill] sm:$0xff]  ;;  %v21644_v49 = vld [vmem:[#allocation500_spill] sm:$0xff] }
 0x50f   : > { %21558 = vst [vmem:[#allocation531_spill] sm:$0xff] %v16628_v45  ;;  %21561 = vst [vmem:[#allocation533_spill] sm:$0xff] %v16634_v36  ;;  %v16690_v25 = vpop.permute.xlu0 %5584  ;;  %v21641_v5 = vld [vmem:[#allocation497_spill] sm:$0xff]  ;;  %v21642_v36 = vld [vmem:[#allocation498_spill] sm:$0xff] }
 0x510   : > { %21560 = vst [vmem:[#allocation532_spill] sm:$0xff] %v16632_v59  ;;  %21563 = vst [vmem:[#allocation534_spill] sm:$0xff] %v16638_v40  ;;  %v16700_v40 = vpop.permute.xlu1 %5589  ;;  %v21645_v33 = vld [vmem:[#allocation501_spill] sm:$0xff]  ;;  %v21646_v63 = vld [vmem:[#allocation502_spill] sm:$0xff] }
 0x511   : > { %21564 = vst [vmem:[#allocation535_spill] sm:$0xff] %v16642_v52  ;;  %21567 = vst [vmem:[#allocation536_spill] sm:$0xff] %v16648_v9  ;;  %v21643_v9 = vld [vmem:[#allocation499_spill] sm:$0xff]  ;;  %v21648_v47 = vld [vmem:[#allocation504_spill] sm:$0xff] }
 0x512   : > { %21607 = vst [vmem:[#allocation537_spill] sm:$0xff] %v16690_v25  ;;  %21616 = vst [vmem:[#allocation538_spill] sm:$0xff] %v16700_v40  ;;  %v21647_v52 = vld [vmem:[#allocation503_spill] sm:$0xff]  ;;  %v21649_v50 = vld [vmem:[#allocation505_spill] sm:$0xff] }
 0x513   : > { %v21651_v14 = vld [vmem:[#allocation507_spill] sm:$0xff]  ;;  %v21652_v61 = vld [vmem:[#allocation509_spill] sm:$0xff]  ;;  %v16742_v0 = vpop.permute.xlu0 %5594  ;;  %v21654_v59 = vld [vmem:[#allocation512_spill] sm:$0xff] }
 0x514   : > { %21653 = vst [vmem:[#allocation493_spill] sm:$0xff] %v16742_v0  ;;  %v16752_v30 = vpop.permute.xlu1 %5599  ;;  %v21656_v53 = vld [vmem:[#allocation311_spill] sm:$0xff]  ;;  %v21657_v31 = vld [vmem:[#allocation445_spill] sm:$0xff]  ;;  %v21663_v32 = vld [vmem:[#allocation440_spill] sm:$0xff] }
 0x515   : > { %21655 = vst [vmem:[#allocation495_spill] sm:$0xff] %v16752_v30  ;;  %v21664_v45 = vld [vmem:[#allocation508_spill] sm:$0xff]  ;;  %v21667_v57 = vld [vmem:[#allocation439_spill] sm:$0xff]  ;;  %v21668_v34 = vld [vmem:[#allocation510_spill] sm:$0xff] }
 0x516   : > { %v16794_v28 = vmul.f32 %v21664_v45, %v21663_v32  ;;  %v16800_v12 = vmul.f32 %v21668_v34, %v21667_v57  ;;  %v21669_v38 = vld [vmem:[#allocation438_spill] sm:$0xff]  ;;  %v21670_v41 = vld [vmem:[#allocation515_spill] sm:$0xff]  ;;  %v21672_v19 = vld [vmem:[#allocation437_spill] sm:$0xff] }
 0x517   : > { %v16796_v42 = vpop.permute.xlu0 %5604  ;;  %v16804_v46 = vmul.f32 %v21670_v41, %v21669_v38  ;;  %v21673_v48 = vld [vmem:[#allocation516_spill] sm:$0xff]  ;;  %v21676_v51 = vld [vmem:[#allocation533_spill] sm:$0xff]  ;;  %v21679_v45 = vld [vmem:[#allocation435_spill] sm:$0xff] }
 0x518   : > { %21665 = vst [vmem:[#allocation497_spill] sm:$0xff] %v16794_v28  ;;  %21666 = vst [vmem:[#allocation498_spill] sm:$0xff] %v16796_v42  ;;  %v16808_v3 = vmul.f32 %v21673_v48, %v21672_v19  ;;  %v21675_v7 = vld [vmem:[#allocation436_spill] sm:$0xff]  ;;  %v16814_v32 = vpop.permute.xlu1 %5609  ;;  %v21682_v57 = vld [vmem:[#allocation434_spill] sm:$0xff] }
 0x519   : > { %21671 = vst [vmem:[#allocation499_spill] sm:$0xff] %v16804_v46  ;;  %v16812_v26 = vmul.f32 %v21676_v51, %v21675_v7  ;;  %21678 = vst [vmem:[#allocation502_spill] sm:$0xff] %v16814_v32  ;;  %v21680_v21 = vld [vmem:[#allocation536_spill] sm:$0xff]  ;;  %v16822_v34 = vmul.f32 %v16690_v25, %v21682_v57  ;;  %v21684_v38 = vld [vmem:[#allocation433_spill] sm:$0xff] }
 0x51a   : > { %21674 = vst [vmem:[#allocation500_spill] sm:$0xff] %v16808_v3  ;;  %v16818_v15 = vmul.f32 %v21680_v21, %v21679_v45  ;;  %v21685_v41 = vld [vmem:[#allocation538_spill] sm:$0xff]  ;;  %v21687_v19 = vld [vmem:[#allocation432_spill] sm:$0xff]  ;;  %v21689_v45 = vld [vmem:[#allocation431_spill] sm:$0xff] }
 0x51b   : > { %21677 = vst [vmem:[#allocation501_spill] sm:$0xff] %v16812_v26  ;;  %21683 = vst [vmem:[#allocation504_spill] sm:$0xff] %v16822_v34  ;;  %v16826_v40 = vmul.f32 %v21685_v41, %v21684_v38  ;;  %v16830_v48 = vmul.f32 %v16742_v0, %v21687_v19  ;;  %v16838_v21 = vmul.f32 %v16752_v30, %v21689_v45  ;;  %v21691_v57 = vld [vmem:[#allocation430_spill] sm:$0xff]  ;;  %v21693_v0 = vld [vmem:[#allocation441_spill] sm:$0xff]  ;;  %v16865_v34 = vpop.permute.xlu0 %5614 }
 0x51c   : > { %21681 = vst [vmem:[#allocation503_spill] sm:$0xff] %v16818_v15  ;;  %v16842_v25 = vmul.f32 %v16796_v42, %v21691_v57  ;;  %v10121_v38 = vld [vmem:[%s19809_s7 + $0x2] sm:$0x3]  ;;  %v16853_v51 = vmul.f32 %v16814_v32, %v21693_v0  ;;  %v21695_v45 = vld [vmem:[#allocation255_spill] sm:$0xff]  ;;  %v21696_v41 = vld [vmem:[#allocation333_spill] sm:$0xff] }
 0x51d   : > { %21686 = vst [vmem:[#allocation505_spill] sm:$0xff] %v16826_v40  ;;  %21688 = vst [vmem:[#allocation507_spill] sm:$0xff] %v16830_v48  ;;  %v2443_v30 = vrot.slane %v21695_v45, 1  ;;  %v21697_v46 = vld [vmem:[#allocation334_spill] sm:$0xff]  ;;  %v21702_v15 = vld [vmem:[#allocation328_spill] sm:$0xff]  ;;  %12338 = vmatprep.subr.msk.bf16.mxu0 %vm2065_vm7, %v10121_v38  ;;  %v2067_v42 = vsel %vm2065_vm7, %v10121_v38, 0 }
 0x51e   : > { %21690 = vst [vmem:[#allocation509_spill] sm:$0xff] %v16838_v21  ;;  %21692 = vst [vmem:[#allocation512_spill] sm:$0xff] %v16842_v25  ;;  %v2000_v57 = vpack.c.bf16 %v21697_v46, %v21696_v41  ;;  %v1773_v19 = vld [vmem:[%s19809_s7] sm:$0x3]  ;;  %v21703_v41 = vrot.slane %v21702_v15, 1  ;;  %v21705_v3 = vld [vmem:[#allocation164_spill] sm:$0xff]  ;;  %11046 = vmatpush3.bf16.msra.mxu0 %v2067_v42 }
 0x51f   : > { %21694 = vst [vmem:[#allocation311_spill] sm:$0xff] %v16853_v51  ;;  %21698 = vst [vmem:[#allocation445_spill] sm:$0xff] %v16865_v34  ;;  %v21699_v0 = vld [vmem:[#allocation254_spill] sm:$0xff]  ;;  %v16884_v51 = vpop.permute.xlu1 %5619  ;;  %v21709_v15 = vld [vmem:[#allocation165_spill] sm:$0xff]  ;;  %12339 = vmatprep.subr.msk.bf16.mxu0 %vm2065_vm7, %v1773_v19  ;;  %v2279_v38 = vsel %vm2065_vm7, %v1773_v19, 0 }
 0x520   : > { %v21700_v32 = vrot.slane %v21699_v0, 1  ;;  %v2504_v46 = vsel %vm2474_vm6, %v2443_v30, %v21703_v41  ;;  %v21704_v48 = vld [vmem:[#allocation70_spill] sm:$0xff]  ;;  %21707 = vst [vmem:[#allocation439_spill] sm:$0xff] %v16884_v51 }
 0x521   : > { %v16888_v40 = vmul.f32 %v21709_v15, %v2504_v46  ;;  %11048 = vmatmul.mubr.msk.bf16.vlgmr.msra.gmra.mrb[8].mxu0 %vm650_vm3, %v2000_v57  ;;  %v21719_v42 = vld [vmem:[#allocation342_spill] sm:$0xff]  ;;  %v21720_v57 = vld [vmem:[#allocation341_spill] sm:$0xff] }
 0x522   : > { %v2505_v26 = vsel %vm2474_vm6, %v21700_v32, %v2443_v30  ;;  %v21708_v32 = vld [vmem:[#allocation71_spill] sm:$0xff]  ;;  %v16891_v30 = vmul.f32 %v16884_v51, %v2504_v46  ;;  %11080 = vmatpush3.bf16.msra.mxu0 %v2279_v38  ;;  %v21721_v38 = vpack.c.bf16 %v21719_v42, %v21720_v57  ;;  %v21734_v57 = vld [vmem:[#allocation345_spill] sm:$0xff] }
 0x523   : > { %v2702_v21 = vmul.f32 %v21704_v48, %v2505_v26  ;;  %v16879_v7 = vmul.f32 %v21705_v3, %v2505_v26  ;;  %v16882_v25 = vmul.f32 %v16865_v34, %v2505_v26  ;;  %v2703_v28 = vmul.f32 %v21708_v32, %v2504_v46  ;;  %v10186_v26 = vld [vmem:[%s19809_s7 + $0x4] sm:$0x3]  ;;  %v21710_v46 = vld [vmem:[#allocation336_spill] sm:$0xff]  ;;  %v21711_v51 = vld [vmem:[#allocation335_spill] sm:$0xff] }
 0x524   : > { %v21712_v15 = vpack.c.bf16 %v21710_v46, %v21711_v51  ;;  %12340 = vmatprep.subr.msk.bf16.mxu0 %vm2065_vm7, %v10186_v26  ;;  %v21716_v3 = vld [vmem:[#allocation340_spill] sm:$0xff]  ;;  %v21717_v34 = vld [vmem:[#allocation339_spill] sm:$0xff]  ;;  %v21722_v51 = vld [vmem:[#allocation282_spill] sm:$0xff] }
 0x525   : > { %21706 = vst [vmem:[#allocation440_spill] sm:$0xff] %v16882_v25  ;;  %v2733_v41 = vpack.c.bf16 %v2703_v28, %v2702_v21  ;;  %v21713_v28 = vld [vmem:[#allocation338_spill] sm:$0xff]  ;;  %v21714_v21 = vld [vmem:[#allocation337_spill] sm:$0xff]  ;;  %v21718_v32 = vpack.c.bf16 %v21716_v3, %v21717_v34  ;;  %v21723_v46 = vld [vmem:[#allocation279_spill] sm:$0xff] }
 0x526   : > { %11051 = vmatprep.mubr.msk.bf16.mxu0 %vm650_vm3, %v21712_v15  ;;  %v21715_v19 = vpack.c.bf16 %v21713_v28, %v21714_v21  ;;  %v21724_v15 = vpack.c.bf16 %v21722_v51, %v21723_v46  ;;  %v21725_v48 = vld [vmem:[#allocation296_spill] sm:$0xff]  ;;  %v21726_v25 = vld [vmem:[#allocation295_spill] sm:$0xff] }
 0x527   : > { %v21727_v28 = vpack.c.bf16 %v21725_v48, %v21726_v25  ;;  %v21728_v21 = vld [vmem:[#allocation323_spill] sm:$0xff]  ;;  %v21740_v48 = vld [vmem:[#allocation349_spill] sm:$0xff] }
 0x528   : > { %v21731_v3 = vld [vmem:[#allocation343_spill] sm:$0xff] }
 0x529   : > { %11052 = vmatmul.mubr.msk.bf16.gmra.mrb[12].mxu0 %vm650_vm3, %v21715_v19  ;;  %v21729_v19 = vld [vmem:[#allocation318_spill] sm:$0xff]  ;;  %v21737_v46 = vld [vmem:[#allocation347_spill] sm:$0xff] }
 0x52a   : > { %11055 = vmatprep.mubr.msk.bf16.mxu0 %vm650_vm3, %v21718_v32  ;;  %v21730_v34 = vpack.c.bf16 %v21728_v21, %v21729_v19  ;;  %v21732_v32 = vld [vmem:[#allocation260_spill] sm:$0xff]  ;;  %v21743_v19 = vld [vmem:[#allocation351_spill] sm:$0xff] }
 0x52b   : > { %v21733_v42 = vpack.c.bf16 %v21731_v3, %v21732_v32  ;;  %v21746_v32 = vld [vmem:[#allocation353_spill] sm:$0xff] }
 0x531   : > { %11056 = vmatmul.mubr.msk.bf16.gmra.mrb[16].mxu0 %vm650_vm3, %v21721_v38  ;;  %v21735_v38 = vld [vmem:[#allocation344_spill] sm:$0xff] }
 0x532   : > { %11059 = vmatprep.mubr.msk.bf16.mxu0 %vm650_vm3, %v21724_v15  ;;  %v21736_v51 = vpack.c.bf16 %v21734_v57, %v21735_v38  ;;  %v21738_v15 = vld [vmem:[#allocation346_spill] sm:$0xff]  ;;  %v21749_v38 = vld [vmem:[#allocation355_spill] sm:$0xff] }
 0x533   : > { %v21739_v25 = vpack.c.bf16 %v21737_v46, %v21738_v15  ;;  %v21752_v15 = vld [vmem:[#allocation404_spill] sm:$0xff] }
 0x539   : > { %11060 = vmatmul.mubr.msk.bf16.gmra.mrb[20].mxu0 %vm650_vm3, %v21727_v28  ;;  %v21741_v28 = vld [vmem:[#allocation348_spill] sm:$0xff] }
 0x53a   : > { %11063 = vmatprep.mubr.msk.bf16.mxu0 %vm650_vm3, %v21730_v34  ;;  %v21742_v21 = vpack.c.bf16 %v21740_v48, %v21741_v28  ;;  %v21744_v34 = vld [vmem:[#allocation350_spill] sm:$0xff]  ;;  %v2799_v28 = vsel %vm2065_vm7, %v10186_v26, 0 }
 0x53b   : > { %v21745_v3 = vpack.c.bf16 %v21743_v19, %v21744_v34  ;;  %v21755_v19 = vld [vmem:[#allocation449_spill] sm:$0xff]  ;;  %v21756_v34 = vld [vmem:[#allocation448_spill] sm:$0xff] }
 0x541   : > { %11064 = vmatmul.mubr.msk.bf16.gmra.mrb[24].mxu0 %vm650_vm3, %v21733_v42  ;;  %v21747_v42 = vld [vmem:[#allocation352_spill] sm:$0xff] }
 0x542   : > { %11067 = vmatprep.mubr.msk.bf16.mxu0 %vm650_vm3, %v21736_v51  ;;  %v21748_v57 = vpack.c.bf16 %v21746_v32, %v21747_v42  ;;  %v21750_v51 = vld [vmem:[#allocation354_spill] sm:$0xff] }
 0x543   : > { %v21751_v46 = vpack.c.bf16 %v21749_v38, %v21750_v51  ;;  %v21758_v32 = vld [vmem:[#allocation426_spill] sm:$0xff]  ;;  %v21761_v38 = vld [vmem:[#allocation424_spill] sm:$0xff]  ;;  %v21762_v51 = vld [vmem:[#allocation425_spill] sm:$0xff] }
 0x544   : > { %v21759_v42 = vld [vmem:[#allocation450_spill] sm:$0xff]  ;;  %v21763_v26 = vpack.c.bf16 %v21761_v38, %v21762_v51  ;;  %v21776_v51 = vld [vmem:[#allocation332_spill] sm:$0xff] }
 0x549   : > { %11068 = vmatmul.mubr.msk.bf16.gmra.mrb[28].mxu0 %vm650_vm3, %v21739_v25  ;;  %v21753_v25 = vld [vmem:[#allocation406_spill] sm:$0xff] }
 0x54a   : > { %11071 = vmatprep.mubr.msk.bf16.mxu0 %vm650_vm3, %v21742_v21  ;;  %v21754_v48 = vpack.c.bf16 %v21752_v15, %v21753_v25  ;;  %v10235_v21 = vld [vmem:[%s19809_s7 + $0x6] sm:$0x3]  ;;  %v21765_v15 = vld [vmem:[#allocation423_spill] sm:$0xff] }
 0x551   : > { %11072 = vmatmul.mubr.msk.bf16.gmra.mrb[32].mxu0 %vm650_vm3, %v21745_v3  ;;  %v21757_v3 = vpack.c.bf16 %v21755_v19, %v21756_v34  ;;  %v21768_v19 = vld [vmem:[#allocation421_spill] sm:$0xff]  ;;  %v21770_v34 = vld [vmem:[#allocation308_spill] sm:$0xff] }
 0x552   : > { %11075 = vmatprep.mubr.msk.bf16.mxu0 %vm650_vm3, %v21748_v57  ;;  %v21760_v57 = vpack.c.bf16 %v21758_v32, %v21759_v42  ;;  %v21773_v42 = vld [vmem:[#allocation304_spill] sm:$0xff] }
 0x559   : > { %11076 = vmatmul.mubr.msk.bf16.gmra.mrb[36].mxu0 %vm650_vm3, %v21751_v46  ;;  %v21764_v46 = vld [vmem:[#allocation422_spill] sm:$0xff] }
 0x55a   : > { %11081 = vmatprep.mubr.msk.bf16.mxu0 %vm650_vm3, %v21754_v48  ;;  %v21766_v25 = vpack.c.bf16 %v21764_v46, %v21765_v15  ;;  %v21767_v48 = vld [vmem:[#allocation420_spill] sm:$0xff]  ;;  %v21779_v15 = vld [vmem:[#allocation419_spill] sm:$0xff] }
 0x561   : > { %11082 = vmatmul.mubr.msk.bf16.vlgmr.msra.gmra.mrb[8].mxu0 %vm650_vm3, %v21757_v3  ;;  %v21771_v3 = vld [vmem:[#allocation278_spill] sm:$0xff] }
 0x562   : > { %11114 = vmatpush3.bf16.msra.mxu0 %v2799_v28  ;;  %11085 = vmatprep.mubr.msk.bf16.mxu0 %vm650_vm3, %v21760_v57  ;;  %v21769_v28 = vpack.c.bf16 %v21767_v48, %v21768_v19  ;;  %v21772_v32 = vpack.c.bf16 %v21770_v34, %v21771_v3  ;;  %v21774_v57 = vld [vmem:[#allocation301_spill] sm:$0xff]  ;;  %v21785_v3 = vld [vmem:[#allocation415_spill] sm:$0xff] }
 0x563   : > { %12341 = vmatprep.subr.msk.bf16.mxu0 %vm2065_vm7, %v10235_v21  ;;  %v21775_v38 = vpack.c.bf16 %v21773_v42, %v21774_v57  ;;  %v21782_v19 = vld [vmem:[#allocation417_spill] sm:$0xff] }
 0x564   : > { %v21788_v57 = vld [vmem:[#allocation413_spill] sm:$0xff] }
 0x569   : > { %11086 = vmatmul.mubr.msk.bf16.gmra.mrb[12].mxu0 %vm650_vm3, %v21763_v26  ;;  %v21777_v26 = vld [vmem:[#allocation257_spill] sm:$0xff] }
 0x56a   : > { %11089 = vmatprep.mubr.msk.bf16.mxu0 %vm650_vm3, %v21766_v25  ;;  %v21778_v46 = vpack.c.bf16 %v21776_v51, %v21777_v26  ;;  %v21780_v25 = vld [vmem:[#allocation267_spill] sm:$0xff] }
 0x56b   : > { %v21781_v48 = vpack.c.bf16 %v21779_v15, %v21780_v25  ;;  %v21791_v26 = vld [vmem:[#allocation411_spill] sm:$0xff]  ;;  %v21794_v25 = vld [vmem:[#allocation409_spill] sm:$0xff] }
 0x571   : > { %11090 = vmatmul.mubr.msk.bf16.gmra.mrb[16].mxu0 %vm650_vm3, %v21769_v28  ;;  %v21783_v28 = vld [vmem:[#allocation418_spill] sm:$0xff] }
 0x572   : > { %11093 = vmatprep.mubr.msk.bf16.mxu0 %vm650_vm3, %v21772_v32  ;;  %v21784_v34 = vpack.c.bf16 %v21782_v19, %v21783_v28  ;;  %v21786_v32 = vld [vmem:[#allocation416_spill] sm:$0xff]  ;;  %v21797_v28 = vld [vmem:[#allocation407_spill] sm:$0xff] }
 0x573   : > { %v21787_v42 = vpack.c.bf16 %v21785_v3, %v21786_v32  ;;  %v21800_v32 = vld [vmem:[#allocation452_spill] sm:$0xff] }
 0x579   : > { %11094 = vmatmul.mubr.msk.bf16.gmra.mrb[20].mxu0 %vm650_vm3, %v21775_v38  ;;  %v21789_v38 = vld [vmem:[#allocation414_spill] sm:$0xff] }
 0x57a   : > { %11097 = vmatprep.mubr.msk.bf16.mxu0 %vm650_vm3, %v21778_v46  ;;  %v21790_v51 = vpack.c.bf16 %v21788_v57, %v21789_v38  ;;  %v21792_v46 = vld [vmem:[#allocation412_spill] sm:$0xff]  ;;  %v3286_v38 = vsel %vm2065_vm7, %v10235_v21, 0  ;;  %v21809_v21 = vld [vmem:[#allocation458_spill] sm:$0xff] }
 0x57b   : > { %v21793_v15 = vpack.c.bf16 %v21791_v26, %v21792_v46  ;;  %v21803_v26 = vld [vmem:[#allocation454_spill] sm:$0xff]  ;;  %v21804_v46 = vld [vmem:[#allocation453_spill] sm:$0xff] }
 0x581   : > { %11098 = vmatmul.mubr.msk.bf16.gmra.mrb[24].mxu0 %vm650_vm3, %v21781_v48  ;;  %v21795_v48 = vld [vmem:[#allocation410_spill] sm:$0xff] }
 0x582   : > { %11101 = vmatprep.mubr.msk.bf16.mxu0 %vm650_vm3, %v21784_v34  ;;  %v21796_v19 = vpack.c.bf16 %v21794_v25, %v21795_v48  ;;  %v21798_v34 = vld [vmem:[#allocation408_spill] sm:$0xff]  ;;  %v21807_v48 = vld [vmem:[#allocation455_spill] sm:$0xff] }
 0x583   : > { %v21799_v3 = vpack.c.bf16 %v21797_v28, %v21798_v34  ;;  %v21806_v25 = vld [vmem:[#allocation456_spill] sm:$0xff]  ;;  %v21810_v28 = vld [vmem:[#allocation457_spill] sm:$0xff] }
 0x584   : > { %v21811_v34 = vpack.c.bf16 %v21809_v21, %v21810_v28  ;;  %v21824_v21 = vld [vmem:[#allocation442_spill] sm:$0xff]  ;;  %v21825_v28 = vld [vmem:[#allocation356_spill] sm:$0xff] }
 0x589   : > { %11102 = vmatmul.mubr.msk.bf16.gmra.mrb[28].mxu0 %vm650_vm3, %v21787_v42  ;;  %v21801_v42 = vld [vmem:[#allocation451_spill] sm:$0xff] }
 0x58a   : > { %11105 = vmatprep.mubr.msk.bf16.mxu0 %vm650_vm3, %v21790_v51  ;;  %v21802_v57 = vpack.c.bf16 %v21800_v32, %v21801_v42  ;;  %v10284_v51 = vld [vmem:[%s19809_s7 + $0x8] sm:$0x3]  ;;  %v21815_v42 = vld [vmem:[#allocation293_spill] sm:$0xff] }
 0x591   : > { %11106 = vmatmul.mubr.msk.bf16.gmra.mrb[32].mxu0 %vm650_vm3, %v21793_v15  ;;  %v21805_v15 = vpack.c.bf16 %v21803_v26, %v21804_v46  ;;  %v21818_v26 = vld [vmem:[#allocation316_spill] sm:$0xff] }
 0x592   : > { %11109 = vmatprep.mubr.msk.bf16.mxu0 %vm650_vm3, %v21796_v19  ;;  %v21808_v19 = vpack.c.bf16 %v21806_v25, %v21807_v48  ;;  %v21819_v46 = vld [vmem:[#allocation312_spill] sm:$0xff]  ;;  %v21821_v25 = vld [vmem:[#allocation261_spill] sm:$0xff] }
 0x593   : > { %v21822_v48 = vld [vmem:[#allocation325_spill] sm:$0xff] }
 0x599   : > { %11110 = vmatmul.mubr.msk.bf16.gmra.mrb[36].mxu0 %vm650_vm3, %v21799_v3  ;;  %v21812_v3 = vld [vmem:[#allocation460_spill] sm:$0xff] }
 0x59a   : > { %11115 = vmatprep.mubr.msk.bf16.mxu0 %vm650_vm3, %v21802_v57  ;;  %v21816_v57 = vld [vmem:[#allocation289_spill] sm:$0xff] }
 0x5a1   : > { %11116 = vmatmul.mubr.msk.bf16.vlgmr.msra.gmra.mrb[8].mxu0 %vm650_vm3, %v2733_v41  ;;  %v21813_v41 = vld [vmem:[#allocation459_spill] sm:$0xff] }
 0x5a2   : > { %11148 = vmatpush3.bf16.msra.mxu0 %v3286_v38  ;;  %11119 = vmatprep.mubr.msk.bf16.mxu0 %vm650_vm3, %v21805_v15  ;;  %v21814_v32 = vpack.c.bf16 %v21812_v3, %v21813_v41  ;;  %v21817_v38 = vpack.c.bf16 %v21815_v42, %v21816_v57  ;;  %v21820_v15 = vpack.c.bf16 %v21818_v26, %v21819_v46  ;;  %v21827_v3 = vld [vmem:[#allocation462_spill] sm:$0xff]  ;;  %v21828_v41 = vld [vmem:[#allocation461_spill] sm:$0xff]  ;;  %v21830_v42 = vld [vmem:[#allocation464_spill] sm:$0xff] }
 0x5a3   : > { %12342 = vmatprep.subr.msk.bf16.mxu0 %vm2065_vm7, %v10284_v51  ;;  %v21831_v57 = vld [vmem:[#allocation463_spill] sm:$0xff]  ;;  %v21833_v26 = vld [vmem:[#allocation466_spill] sm:$0xff]  ;;  %v21834_v46 = vld [vmem:[#allocation465_spill] sm:$0xff] }
 0x5a9   : > { %11120 = vmatmul.mubr.msk.bf16.gmra.mrb[12].mxu0 %vm650_vm3, %v21808_v19  ;;  %v21823_v19 = vpack.c.bf16 %v21821_v25, %v21822_v48  ;;  %v21836_v25 = vld [vmem:[#allocation468_spill] sm:$0xff]  ;;  %v21837_v48 = vld [vmem:[#allocation467_spill] sm:$0xff] }
 0x5aa   : > { %11123 = vmatprep.mubr.msk.bf16.mxu0 %vm650_vm3, %v21811_v34  ;;  %v21826_v34 = vpack.c.bf16 %v21824_v21, %v21825_v28  ;;  %v21839_v21 = vld [vmem:[#allocation470_spill] sm:$0xff]  ;;  %v21840_v28 = vld [vmem:[#allocation469_spill] sm:$0xff] }
 0x5b1   : > { %11124 = vmatmul.mubr.msk.bf16.gmra.mrb[16].mxu0 %vm650_vm3, %v21814_v32  ;;  %v21829_v32 = vpack.c.bf16 %v21827_v3, %v21828_v41  ;;  %v21842_v3 = vld [vmem:[#allocation472_spill] sm:$0xff]  ;;  %v21843_v41 = vld [vmem:[#allocation471_spill] sm:$0xff] }
 0x5b2   : > { %11127 = vmatprep.mubr.msk.bf16.mxu0 %vm650_vm3, %v21817_v38  ;;  %v21832_v38 = vpack.c.bf16 %v21830_v42, %v21831_v57  ;;  %v21845_v42 = vld [vmem:[#allocation474_spill] sm:$0xff]  ;;  %v21846_v57 = vld [vmem:[#allocation473_spill] sm:$0xff] }
 0x5b9   : > { %11128 = vmatmul.mubr.msk.bf16.gmra.mrb[20].mxu0 %vm650_vm3, %v21820_v15  ;;  %v21835_v15 = vpack.c.bf16 %v21833_v26, %v21834_v46  ;;  %v3773_v26 = vsel %vm2065_vm7, %v10284_v51, 0  ;;  %v10333_v46 = vld [vmem:[%s19809_s7 + $0xa] sm:$0x3] }
 0x5ba   : > { %11131 = vmatprep.mubr.msk.bf16.mxu0 %vm650_vm3, %v21823_v19  ;;  %v21838_v19 = vpack.c.bf16 %v21836_v25, %v21837_v48  ;;  %v21849_v25 = vld [vmem:[#allocation475_spill] sm:$0xff] }
 0x5c1   : > { %11132 = vmatmul.mubr.msk.bf16.gmra.mrb[24].mxu0 %vm650_vm3, %v21826_v34  ;;  %v21841_v34 = vpack.c.bf16 %v21839_v21, %v21840_v28  ;;  %v21852_v21 = vld [vmem:[#allocation477_spill] sm:$0xff] }
 0x5c2   : > { %11135 = vmatprep.mubr.msk.bf16.mxu0 %vm650_vm3, %v21829_v32  ;;  %v21844_v32 = vpack.c.bf16 %v21842_v3, %v21843_v41  ;;  %v21855_v3 = vld [vmem:[#allocation479_spill] sm:$0xff]  ;;  %v21857_v41 = vld [vmem:[#allocation482_spill] sm:$0xff] }
 0x5c9   : > { %11136 = vmatmul.mubr.msk.bf16.gmra.mrb[28].mxu0 %vm650_vm3, %v21832_v38  ;;  %v21847_v38 = vpack.c.bf16 %v21845_v42, %v21846_v57  ;;  %v21860_v57 = vld [vmem:[#allocation309_spill] sm:$0xff] }
 0x5ca   : > { %11139 = vmatprep.mubr.msk.bf16.mxu0 %vm650_vm3, %v21835_v15  ;;  %v21848_v15 = vld [vmem:[#allocation476_spill] sm:$0xff] }
 0x5cb   : > { %v21850_v48 = vpack.c.bf16 %v21848_v15, %v21849_v25  ;;  %v21863_v15 = vld [vmem:[#allocation305_spill] sm:$0xff]  ;;  %v21864_v25 = vld [vmem:[#allocation302_spill] sm:$0xff] }
 0x5d1   : > { %11140 = vmatmul.mubr.msk.bf16.gmra.mrb[32].mxu0 %vm650_vm3, %v21838_v19  ;;  %v21851_v19 = vld [vmem:[#allocation478_spill] sm:$0xff] }
 0x5d2   : > { %11143 = vmatprep.mubr.msk.bf16.mxu0 %vm650_vm3, %v21841_v34  ;;  %v21853_v28 = vpack.c.bf16 %v21851_v19, %v21852_v21  ;;  %v21854_v34 = vld [vmem:[#allocation480_spill] sm:$0xff]  ;;  %v21866_v19 = vld [vmem:[#allocation357_spill] sm:$0xff] }
 0x5d3   : > { %v21856_v51 = vpack.c.bf16 %v21854_v34, %v21855_v3  ;;  %v21867_v21 = vld [vmem:[#allocation329_spill] sm:$0xff]  ;;  %v21869_v34 = vld [vmem:[#allocation484_spill] sm:$0xff]  ;;  %v21870_v3 = vld [vmem:[#allocation443_spill] sm:$0xff] }
 0x5d9   : > { %11144 = vmatmul.mubr.msk.bf16.gmra.mrb[36].mxu0 %vm650_vm3, %v21844_v32  ;;  %v21858_v32 = vld [vmem:[#allocation481_spill] sm:$0xff] }
 0x5da   : > { %11149 = vmatprep.mubr.msk.bf16.mxu0 %vm650_vm3, %v21847_v38  ;;  %v21859_v42 = vpack.c.bf16 %v21857_v41, %v21858_v32  ;;  %v21861_v38 = vld [vmem:[#allocation483_spill] sm:$0xff]  ;;  %v21872_v41 = vld [vmem:[#allocation486_spill] sm:$0xff]  ;;  %v21873_v32 = vld [vmem:[#allocation485_spill] sm:$0xff] }
 0x5e1   : > { %11150 = vmatmul.mubr.msk.bf16.vlgmr.msra.gmra.mrb[8].mxu0 %vm650_vm3, %v21850_v48  ;;  %v21865_v48 = vpack.c.bf16 %v21863_v15, %v21864_v25  ;;  %v21878_v15 = vld [vmem:[#allocation491_spill] sm:$0xff]  ;;  %v21879_v25 = vld [vmem:[#allocation490_spill] sm:$0xff] }
 0x5e2   : > { %11182 = vmatpush3.bf16.msra.mxu0 %v3773_v26  ;;  %11153 = vmatprep.mubr.msk.bf16.mxu0 %vm650_vm3, %v21853_v28  ;;  %v21862_v26 = vpack.c.bf16 %v21860_v57, %v21861_v38  ;;  %v21868_v28 = vpack.c.bf16 %v21866_v19, %v21867_v21  ;;  %v21875_v57 = vld [vmem:[#allocation489_spill] sm:$0xff]  ;;  %v21876_v38 = vld [vmem:[#allocation488_spill] sm:$0xff] }
 0x5e3   : > { %12343 = vmatprep.subr.msk.bf16.mxu0 %vm2065_vm7, %v10333_v46  ;;  %v21881_v19 = vld [vmem:[#allocation492_spill] sm:$0xff] }
 0x5e4   : > { %v21882_v21 = vpack.c.bf16 %v21637_v54, %v21881_v19  ;;  %v21889_v54 = vpack.c.bf16 %v21643_v9, %v21642_v36  ;;  %v21894_v19 = vld [vmem:[#allocation360_spill] sm:$0xff]  ;;  %v21896_v36 = vld [vmem:[#allocation363_spill] sm:$0xff]  ;;  %v21897_v9 = vld [vmem:[#allocation362_spill] sm:$0xff] }
 0x5e9   : > { %11154 = vmatmul.mubr.msk.bf16.gmra.mrb[12].mxu0 %vm650_vm3, %v21856_v51  ;;  %v21871_v51 = vpack.c.bf16 %v21869_v34, %v21870_v3  ;;  %v21885_v3 = vld [vmem:[#allocation496_spill] sm:$0xff] }
 0x5ea   : > { %11157 = vmatprep.mubr.msk.bf16.mxu0 %vm650_vm3, %v21859_v42  ;;  %v21874_v42 = vpack.c.bf16 %v21872_v41, %v21873_v32  ;;  %v21887_v41 = vld [vmem:[#allocation132_spill] sm:$0xff] }
 0x5eb   : > { %v3674_v32 = vmul.f32 %v21887_v41, %v21699_v0 }
 0x5f1   : > { %11158 = vmatmul.mubr.msk.bf16.gmra.mrb[16].mxu0 %vm650_vm3, %v21862_v26  ;;  %v21877_v26 = vpack.c.bf16 %v21875_v57, %v21876_v38 }
 0x5f2   : > { %11161 = vmatprep.mubr.msk.bf16.mxu0 %vm650_vm3, %v21865_v48  ;;  %v21880_v48 = vpack.c.bf16 %v21878_v15, %v21879_v25  ;;  %v21891_v15 = vld [vmem:[#allocation358_spill] sm:$0xff] }
 0x5f9   : > { %11162 = vmatmul.mubr.msk.bf16.gmra.mrb[20].mxu0 %vm650_vm3, %v21868_v28  ;;  %v21883_v28 = vld [vmem:[#allocation494_spill] sm:$0xff] }
 0x5fa   : > { %11165 = vmatprep.mubr.msk.bf16.mxu0 %vm650_vm3, %v21871_v51  ;;  %v21884_v34 = vpack.c.bf16 %v21639_v6, %v21883_v28  ;;  %v21886_v51 = vpack.c.bf16 %v21641_v5, %v21885_v3  ;;  %v4260_v6 = vsel %vm2065_vm7, %v10333_v46, 0  ;;  %v10382_v5 = vld [vmem:[%s19809_s7 + $0xc] sm:$0x3]  ;;  %v21898_v46 = vpack.c.bf16 %v21896_v36, %v21897_v9  ;;  %v21899_v28 = vld [vmem:[#allocation365_spill] sm:$0xff]  ;;  %v21914_v36 = vld [vmem:[#allocation368_spill] sm:$0xff] }
 0x5fb   : > { %v21915_v9 = vld [vmem:[#allocation367_spill] sm:$0xff] }
 0x601   : > { %11166 = vmatmul.mubr.msk.bf16.gmra.mrb[24].mxu0 %vm650_vm3, %v21874_v42  ;;  %v21888_v42 = vld [vmem:[#allocation133_spill] sm:$0xff] }
 0x602   : > { %11169 = vmatprep.mubr.msk.bf16.mxu0 %vm650_vm3, %v21877_v26  ;;  %v3675_v57 = vmul.f32 %v21888_v42, %v21695_v45  ;;  %v21890_v26 = vld [vmem:[#allocation359_spill] sm:$0xff] }
 0x603   : > { %v21892_v25 = vpack.c.bf16 %v21890_v26, %v21891_v15  ;;  %v21908_v26 = vld [vmem:[#allocation324_spill] sm:$0xff]  ;;  %v21909_v15 = vld [vmem:[#allocation319_spill] sm:$0xff] }
 0x604   : > { %v3706_v38 = vpack.c.bf16 %v3675_v57, %v3674_v32  ;;  %v21903_v32 = vld [vmem:[#allocation280_spill] sm:$0xff] }
 0x609   : > { %11170 = vmatmul.mubr.msk.bf16.gmra.mrb[28].mxu0 %vm650_vm3, %v21880_v48  ;;  %v21893_v48 = vld [vmem:[#allocation361_spill] sm:$0xff] }
 0x60a   : > { %11173 = vmatprep.mubr.msk.bf16.mxu0 %vm650_vm3, %v21882_v21  ;;  %v21895_v21 = vpack.c.bf16 %v21893_v48, %v21894_v19  ;;  %v21911_v48 = vld [vmem:[#allocation366_spill] sm:$0xff] }
 0x60b   : > { %v21912_v19 = vld [vmem:[#allocation330_spill] sm:$0xff] }
 0x611   : > { %11174 = vmatmul.mubr.msk.bf16.gmra.mrb[32].mxu0 %vm650_vm3, %v21884_v34  ;;  %v21900_v34 = vld [vmem:[#allocation364_spill] sm:$0xff] }
 0x612   : > { %11177 = vmatprep.mubr.msk.bf16.mxu0 %vm650_vm3, %v21886_v51  ;;  %v21901_v3 = vpack.c.bf16 %v21899_v28, %v21900_v34  ;;  %v21902_v51 = vld [vmem:[#allocation283_spill] sm:$0xff]  ;;  %v21917_v28 = vld [vmem:[#allocation370_spill] sm:$0xff]  ;;  %v21918_v34 = vld [vmem:[#allocation369_spill] sm:$0xff] }
 0x613   : > { %v21904_v57 = vpack.c.bf16 %v21902_v51, %v21903_v32  ;;  %v21920_v51 = vld [vmem:[#allocation372_spill] sm:$0xff]  ;;  %v21921_v32 = vld [vmem:[#allocation371_spill] sm:$0xff] }
 0x619   : > { %11178 = vmatmul.mubr.msk.bf16.gmra.mrb[36].mxu0 %vm650_vm3, %v21889_v54  ;;  %v21906_v54 = vld [vmem:[#allocation297_spill] sm:$0xff] }
 0x61a   : > { %11183 = vmatprep.mubr.msk.bf16.mxu0 %vm650_vm3, %v3706_v38  ;;  %v21905_v38 = vld [vmem:[#allocation298_spill] sm:$0xff] }
 0x621   : > { %11184 = vmatmul.mubr.msk.bf16.vlgmr.msra.gmra.mrb[8].mxu0 %vm650_vm3, %v21892_v25  ;;  %v21910_v25 = vpack.c.bf16 %v21908_v26, %v21909_v15  ;;  %v21926_v26 = vld [vmem:[#allocation376_spill] sm:$0xff]  ;;  %v21927_v15 = vld [vmem:[#allocation375_spill] sm:$0xff] }
 0x622   : > { %11216 = vmatpush3.bf16.msra.mxu0 %v4260_v6  ;;  %11187 = vmatprep.mubr.msk.bf16.mxu0 %vm650_vm3, %v21895_v21  ;;  %v21907_v6 = vpack.c.bf16 %v21905_v38, %v21906_v54  ;;  %v21913_v21 = vpack.c.bf16 %v21911_v48, %v21912_v19  ;;  %v21923_v38 = vld [vmem:[#allocation374_spill] sm:$0xff]  ;;  %v21924_v54 = vld [vmem:[#allocation373_spill] sm:$0xff] }
 0x623   : > { %12344 = vmatprep.subr.msk.bf16.mxu0 %vm2065_vm7, %v10382_v5  ;;  %v21929_v48 = vld [vmem:[#allocation378_spill] sm:$0xff]  ;;  %v21930_v19 = vld [vmem:[#allocation377_spill] sm:$0xff] }
 0x629   : > { %11188 = vmatmul.mubr.msk.bf16.gmra.mrb[12].mxu0 %vm650_vm3, %v21898_v46  ;;  %v21916_v46 = vpack.c.bf16 %v21914_v36, %v21915_v9  ;;  %v21932_v36 = vld [vmem:[#allocation380_spill] sm:$0xff]  ;;  %v21933_v9 = vld [vmem:[#allocation379_spill] sm:$0xff] }
 0x62a   : > { %11191 = vmatprep.mubr.msk.bf16.mxu0 %vm650_vm3, %v21901_v3  ;;  %v21919_v3 = vpack.c.bf16 %v21917_v28, %v21918_v34  ;;  %v21935_v28 = vpack.c.bf16 %v16888_v40, %v16879_v7  ;;  %v4747_v34 = vsel %vm2065_vm7, %v10382_v5, 0  ;;  %v21938_v40 = vpack.c.bf16 %v21649_v50, %v21648_v47  ;;  %v21939_v7 = vld [vmem:[#allocation506_spill] sm:$0xff]  ;;  %v21950_v50 = vld [vmem:[#allocation444_spill] sm:$0xff] }
 0x62b   : > { %v21940_v5 = vpack.c.bf16 %v21651_v14, %v21939_v7 }
 0x631   : > { %11192 = vmatmul.mubr.msk.bf16.gmra.mrb[16].mxu0 %vm650_vm3, %v21904_v57  ;;  %v21922_v57 = vpack.c.bf16 %v21920_v51, %v21921_v32  ;;  %v21936_v51 = vpack.c.bf16 %v21645_v33, %v21644_v49  ;;  %v21937_v32 = vpack.c.bf16 %v21647_v52, %v21646_v63  ;;  %v21941_v33 = vld [vmem:[#allocation294_spill] sm:$0xff]  ;;  %v21944_v63 = vld [vmem:[#allocation317_spill] sm:$0xff] }
 0x632   : > { %11195 = vmatprep.mubr.msk.bf16.mxu0 %vm650_vm3, %v21907_v6  ;;  %v21925_v6 = vpack.c.bf16 %v21923_v38, %v21924_v54  ;;  %v21942_v49 = vld [vmem:[#allocation290_spill] sm:$0xff]  ;;  %v21945_v52 = vld [vmem:[#allocation313_spill] sm:$0xff]  ;;  %v21947_v54 = vld [vmem:[#allocation264_spill] sm:$0xff] }
 0x633   : > { %v21946_v38 = vpack.c.bf16 %v21944_v63, %v21945_v52  ;;  %v21974_v63 = vld [vmem:[#allocation331_spill] sm:$0xff] }
 0x639   : > { %11196 = vmatmul.mubr.msk.bf16.gmra.mrb[20].mxu0 %vm650_vm3, %v21910_v25  ;;  %v21928_v25 = vpack.c.bf16 %v21926_v26, %v21927_v15  ;;  %v21951_v26 = vld [vmem:[#allocation381_spill] sm:$0xff]  ;;  %v21953_v15 = vpack.c.bf16 %v21652_v61, %v16440_v20  ;;  %v21957_v20 = vpack.c.bf16 %v16470_v39, %v16466_v43  ;;  %v21963_v39 = vpack.c.bf16 %v16494_v29, %v16490_v35 }
 0x63a   : > { %11199 = vmatprep.mubr.msk.bf16.mxu0 %vm650_vm3, %v21913_v21  ;;  %v21931_v21 = vpack.c.bf16 %v21929_v48, %v21930_v19  ;;  %v21952_v14 = vpack.c.bf16 %v21950_v50, %v21951_v26  ;;  %v5955_v48 = vld [vmem:[%s611_s3] sm:$0x1]  ;;  %v21986_v50 = vld [vmem:[#allocation521_spill] sm:$0xff] }
 0x63b   : > { %v5956_v19 = vsub.f32 0.0, %v5955_v48 }
 0x641   : > { %11200 = vmatmul.mubr.msk.bf16.gmra.mrb[24].mxu0 %vm650_vm3, %v21916_v46  ;;  %v21934_v46 = vpack.c.bf16 %v21932_v36, %v21933_v9  ;;  %v21956_v36 = vpack.c.bf16 %v16462_v58, %v16458_v55  ;;  %v21958_v9 = vld [vmem:[#allocation511_spill] sm:$0xff]  ;;  %v5963_v58 = vld [vmem:[%s19811_s9] sm:$0xff] }
 0x642   : > { %11203 = vmatprep.mubr.msk.bf16.mxu0 %vm650_vm3, %v21919_v3  ;;  %v10431_v3 = vld [vmem:[%s19809_s7 + $0xe] sm:$0x3] }
 0x643   : > { %v5964_v55 = vld [vmem:[%s19811_s9 + $0x8] sm:$0xff]  ;;  %v5234_v7 = vsel %vm2065_vm7, %v10431_v3, 0 }
 0x644   : > { %v11723_v43 = vpack.c.bf16 %v5964_v55, %v5963_v58  ;;  %v22009_v58 = vld [vmem:[#allocation300_spill] sm:$0xff]  ;;  %v22010_v55 = vld [vmem:[#allocation299_spill] sm:$0xff] }
 0x649   : > { %11204 = vmatmul.mubr.msk.bf16.gmra.mrb[28].mxu0 %vm650_vm3, %v21922_v57  ;;  %v21943_v57 = vpack.c.bf16 %v21941_v33, %v21942_v49  ;;  %v21965_v33 = vmov 0.0   ;;  %v21967_v49 = vpack.c.bf16 %v16520_v44, %v16516_v4  ;;  %v21973_v44 = vld [vmem:[#allocation382_spill] sm:$0xff] }
 0x64a   : > { %11207 = vmatprep.mubr.msk.bf16.mxu0 %vm650_vm3, %v21925_v6  ;;  %v21948_v6 = vld [vmem:[#allocation326_spill] sm:$0xff]  ;;  %v21975_v52 = vpack.c.bf16 %v21973_v44, %v21974_v63  ;;  %v22030_v63 = vld [vmem:[#allocation401_spill] sm:$0xff] }
 0x64b   : > { %v21949_v47 = vpack.c.bf16 %v21947_v54, %v21948_v6  ;;  %v21982_v6 = vld [vmem:[#allocation520_spill] sm:$0xff] }
 0x651   : > { %11208 = vmatmul.mubr.msk.bf16.gmra.mrb[32].mxu0 %vm650_vm3, %v21928_v25  ;;  %v21955_v25 = vpack.c.bf16 %v16452_v18, %v16448_v60  ;;  %v21959_v60 = vpack.c.bf16 %v21654_v59, %v21958_v9  ;;  %v21960_v18 = vld [vmem:[#allocation514_spill] sm:$0xff]  ;;  %v12691_v59 = vmov 0.0|0.0  }
 0x652   : > { %11211 = vmatprep.mubr.msk.bf16.mxu0 %vm650_vm3, %v21931_v21  ;;  %v5957_v21 = vmul.f32 1.442695, %v5956_v19  ;;  %11722 = vmatprep.subr.bf16.mxu1 %v12691_v59 }
 0x653   : > { %11724 = vmatpush3.bf16.msra.mxu1 %v11723_v43  ;;  %v22011_v43 = vpack.c.bf16 %v22009_v58, %v22010_v55  ;;  %v22065_v58 = vld [vmem:[#allocation535_spill] sm:$0xff] }
 0x654   : > { %12502 = vpow2.f32 %v5957_v21  ;;  %11725 = vmatprep.subr.bf16.mxu1 %v12691_v59  ;;  %v22013_v59 = vld [vmem:[#allocation320_spill] sm:$0xff]  ;;  %v22066_v55 = vld [vmem:[#allocation447_spill] sm:$0xff] }
 0x659   : > { %11212 = vmatmul.mubr.msk.bf16.gmra.mrb[36].mxu0 %vm650_vm3, %v21934_v46  ;;  %v21961_v46 = vld [vmem:[#allocation513_spill] sm:$0xff] }
 0x65a   : > { %11217 = vmatprep.mubr.msk.bf16.mxu0 %vm650_vm3, %v21935_v28  ;;  %v21962_v28 = vpack.c.bf16 %v21960_v18, %v21961_v46  ;;  %v22006_v46 = vld [vmem:[#allocation285_spill] sm:$0xff] }
 0x65e   : > { %v12503_v61 = vpop.eup %12502 }
 0x661   : > { %11218 = vmatmul.mubr.msk.bf16.vlgmr.msra.gmra.mrb[8].mxu0 %vm650_vm3, %v21936_v51  ;;  %v21964_v51 = vpack.c.bf16 %v16504_v62, %v16500_v27  ;;  %v10480_v62 = vld [vmem:[%s19809_s7 + $0x10] sm:$0x3]  ;;  %v21966_v27 = vpack.c.bf16 %v16512_v1, %v16508_v8  ;;  %v21969_v1 = vpack.c.bf16 %v21656_v53, %v16532_v23  ;;  %v21970_v8 = vld [vmem:[#allocation306_spill] sm:$0xff]  ;;  %v21977_v53 = vpack.c.bf16 %v16546_v37, %v16542_v2  ;;  %v21988_v37 = vld [vmem:[#allocation523_spill] sm:$0xff] }
 0x662   : > { %11250 = vmatpush3.bf16.msra.mxu0 %v4747_v34  ;;  %11221 = vmatprep.mubr.msk.bf16.mxu0 %vm650_vm3, %v21937_v32  ;;  %v5959_v34 = vadd.f32 1.0, %v12503_v61  ;;  %v5965_v32 = vld [vmem:[%s19811_s9 + $0x10] sm:$0xff]  ;;  %v21979_v23 = vld [vmem:[#allocation518_spill] sm:$0xff]  ;;  %v5721_v21 = vsel %vm2065_vm7, %v10480_v62, 0  ;;  %v22001_v61 = vld [vmem:[#allocation387_spill] sm:$0xff] }
 0x663   : > { %12345 = vmatprep.subr.msk.bf16.mxu0 %vm2065_vm7, %v10431_v3  ;;  %v21968_v3 = vpack.c.bf16 %v16528_v11, %v16524_v24  ;;  %v21976_v24 = vpack.c.bf16 %v16538_v56, %v21657_v31  ;;  %v21978_v11 = vpack.c.bf16 %v16556_v13, %v16550_v16  ;;  %v21985_v31 = vld [vmem:[#allocation522_spill] sm:$0xff]  ;;  %v21989_v13 = vpack.c.bf16 %v16588_v10, %v21988_v37  ;;  %v21990_v16 = vld [vmem:[#allocation524_spill] sm:$0xff]  ;;  %v22041_v37 = vld [vmem:[#allocation527_spill] sm:$0xff] }
 0x664   : > { %12504 = vrcp.f32 %v5959_v34  ;;  %v21987_v2 = vpack.c.bf16 %v21985_v31, %v21986_v50  ;;  %v21991_v26 = vpack.c.bf16 %v16596_v22, %v21990_v16  ;;  %v21997_v10 = vld [vmem:[#allocation386_spill] sm:$0xff]  ;;  %v22000_v22 = vld [vmem:[#allocation388_spill] sm:$0xff]  ;;  %v22040_v31 = vld [vmem:[#allocation271_spill] sm:$0xff] }
 0x665   : > { %v22002_v9 = vpack.c.bf16 %v22000_v22, %v22001_v61  ;;  %v5166_v50 = vmul.f32 %v22040_v31, %v21695_v45  ;;  %v22051_v45 = vld [vmem:[#allocation532_spill] sm:$0xff]  ;;  %v22056_v22 = vld [vmem:[#allocation315_spill] sm:$0xff]  ;;  %v22057_v61 = vld [vmem:[#allocation310_spill] sm:$0xff] }
 0x669   : > { %11222 = vmatmul.mubr.msk.bf16.gmra.mrb[12].mxu0 %vm650_vm3, %v21938_v40  ;;  %v5966_v40 = vld [vmem:[%s19811_s9 + $0x18] sm:$0xff] }
 0x66a   : > { %11225 = vmatprep.mubr.msk.bf16.mxu0 %vm650_vm3, %v21940_v5  ;;  %v11726_v29 = vpack.c.bf16 %v5966_v40, %v5965_v32  ;;  %v22015_v32 = vld [vmem:[#allocation391_spill] sm:$0xff] }
 0x66b   : > { %v22016_v40 = vld [vmem:[#allocation263_spill] sm:$0xff] }
 0x66c   : > { %11727 = vmatpush3.bf16.msra.mxu1 %v11726_v29  ;;  %v22017_v29 = vpack.c.bf16 %v22015_v32, %v22016_v40  ;;  %v22071_v32 = vld [vmem:[#allocation499_spill] sm:$0xff] }
 0x66d   : > { %11362 = vmatprep.subr.mxu1 %v21965_v33 }
 0x66e   : > { %v12505_v35 = vpop.eup %12504 }
 0x66f   : > { %v5962_v5 = vmul.f32 %v12505_v35, %v5955_v48  ;;  %v21995_v48 = vld [vmem:[#allocation383_spill] sm:$0xff]  ;;  %v22018_v35 = vld [vmem:[#allocation393_spill] sm:$0xff] }
 0x671   : > { %11226 = vmatmul.mubr.msk.bf16.gmra.mrb[16].mxu0 %vm650_vm3, %v21943_v57  ;;  %11360 = vmatmul.mubr.msk.f32.vlgmr.msra.gmra.mrb[2].mxu1 %vm5967_vm8, %v5962_v5  ;;  %v21971_v57 = vld [vmem:[#allocation303_spill] sm:$0xff] }
 0x672   : > { %11229 = vmatprep.mubr.msk.bf16.mxu0 %vm650_vm3, %v21946_v38  ;;  %11364 = vmatprep.mubr.msk.f32.mxu1 %vm12689_vm1, %v21965_v33  ;;  %v21972_v4 = vpack.c.bf16 %v21970_v8, %v21971_v57  ;;  %v21980_v38 = vld [vmem:[#allocation517_spill] sm:$0xff]  ;;  %v22027_v57 = vld [vmem:[#allocation399_spill] sm:$0xff] }
 0x673   : > { %v21981_v54 = vpack.c.bf16 %v21979_v23, %v21980_v38  ;;  %v22036_v38 = vld [vmem:[#allocation429_spill] sm:$0xff] }
 0x679   : > { %11230 = vmatmul.mubr.msk.bf16.gmra.mrb[20].mxu0 %vm650_vm3, %v21949_v47  ;;  %v21983_v47 = vld [vmem:[#allocation519_spill] sm:$0xff] }
 0x67a   : > { %11233 = vmatprep.mubr.msk.bf16.mxu0 %vm650_vm3, %v21952_v14  ;;  %v21984_v56 = vpack.c.bf16 %v21982_v6, %v21983_v47  ;;  %v21992_v14 = vld [vmem:[#allocation525_spill] sm:$0xff]  ;;  %v22039_v47 = vld [vmem:[#allocation270_spill] sm:$0xff] }
 0x681   : > { %11234 = vmatmul.mubr.msk.bf16.gmra.mrb[24].mxu0 %vm650_vm3, %v21953_v15  ;;  %v21993_v15 = vpack.c.bf16 %v16604_v17, %v21992_v14  ;;  %v22003_v17 = vld [vmem:[#allocation390_spill] sm:$0xff]  ;;  %v22045_v14 = vld [vmem:[#allocation528_spill] sm:$0xff] }
 0x682   : > { %11237 = vmatprep.mubr.msk.bf16.mxu0 %vm650_vm3, %v21955_v25  ;;  %v21994_v25 = vld [vmem:[#allocation384_spill] sm:$0xff] }
 0x683   : > { %v21996_v19 = vpack.c.bf16 %v21994_v25, %v21995_v48  ;;  %v22047_v25 = vld [vmem:[#allocation531_spill] sm:$0xff]  ;;  %v22048_v48 = vld [vmem:[#allocation530_spill] sm:$0xff] }
 0x689   : > { %11238 = vmatmul.mubr.msk.bf16.gmra.mrb[28].mxu0 %vm650_vm3, %v21956_v36  ;;  %v21998_v36 = vld [vmem:[#allocation385_spill] sm:$0xff] }
 0x68a   : > { %11241 = vmatprep.mubr.msk.bf16.mxu0 %vm650_vm3, %v21957_v20  ;;  %v21999_v20 = vpack.c.bf16 %v21997_v10, %v21998_v36  ;;  %v22053_v10 = vld [vmem:[#allocation292_spill] sm:$0xff] }
 0x68b   : > { %v22054_v36 = vld [vmem:[#allocation288_spill] sm:$0xff] }
 0x691   : > { %11242 = vmatmul.mubr.msk.bf16.gmra.mrb[32].mxu0 %vm650_vm3, %v21959_v60  ;;  %v22004_v60 = vld [vmem:[#allocation389_spill] sm:$0xff] }
 0x692   : > { %11245 = vmatprep.mubr.msk.bf16.mxu0 %vm650_vm3, %v21962_v28  ;;  %v22005_v18 = vpack.c.bf16 %v22003_v17, %v22004_v60  ;;  %v22007_v28 = vld [vmem:[#allocation284_spill] sm:$0xff]  ;;  %v22059_v17 = vld [vmem:[#allocation258_spill] sm:$0xff] }
 0x693   : > { %v22008_v34 = vpack.c.bf16 %v22006_v46, %v22007_v28  ;;  %v22060_v60 = vld [vmem:[#allocation322_spill] sm:$0xff]  ;;  %v22062_v46 = vld [vmem:[#allocation405_spill] sm:$0xff] }
 0x694   : > { %v22063_v28 = vld [vmem:[#allocation266_spill] sm:$0xff] }
 0x699   : > { %11246 = vmatmul.mubr.msk.bf16.gmra.mrb[36].mxu0 %vm650_vm3, %v21963_v39  ;;  %v22012_v39 = vld [vmem:[#allocation327_spill] sm:$0xff] }
 0x69a   : > { %11251 = vmatprep.mubr.msk.bf16.mxu0 %vm650_vm3, %v21964_v51  ;;  %v22014_v51 = vpack.c.bf16 %v22012_v39, %v22013_v59  ;;  %v22068_v39 = vld [vmem:[#allocation497_spill] sm:$0xff] }
 0x69b   : > { %v22069_v59 = vpack.c.bf16 %v16800_v12, %v22068_v39 }
 0x6a1   : > { %11252 = vmatmul.mubr.msk.bf16.vlgmr.msra.gmra.mrb[8].mxu0 %vm650_vm3, %v21966_v27  ;;  %v22022_v27 = vld [vmem:[#allocation394_spill] sm:$0xff] }
 0x6a2   : > { %11284 = vmatpush3.bf16.msra.mxu0 %v5234_v7  ;;  %11255 = vmatprep.mubr.msk.bf16.mxu0 %vm650_vm3, %v21967_v49  ;;  %v22019_v7 = vld [vmem:[#allocation392_spill] sm:$0xff] }
 0x6a3   : > { %12346 = vmatprep.subr.msk.bf16.mxu0 %vm2065_vm7, %v10480_v62  ;;  %v22020_v5 = vpack.c.bf16 %v22018_v35, %v22019_v7  ;;  %v22021_v62 = vld [vmem:[#allocation395_spill] sm:$0xff]  ;;  %v22074_v35 = vld [vmem:[#allocation501_spill] sm:$0xff] }
 0x6a4   : > { %v22023_v49 = vpack.c.bf16 %v22021_v62, %v22022_v27  ;;  %v22077_v62 = vld [vmem:[#allocation504_spill] sm:$0xff] }
 0x6a9   : > { %11256 = vmatmul.mubr.msk.bf16.gmra.mrb[12].mxu0 %vm650_vm3, %v21968_v3  ;;  %v22024_v3 = vld [vmem:[#allocation397_spill] sm:$0xff] }
 0x6aa   : > { %11259 = vmatprep.mubr.msk.bf16.mxu0 %vm650_vm3, %v21969_v1  ;;  %v22025_v1 = vld [vmem:[#allocation396_spill] sm:$0xff] }
 0x6ab   : > { %v22026_v8 = vpack.c.bf16 %v22024_v3, %v22025_v1  ;;  %v22080_v3 = vld [vmem:[#allocation507_spill] sm:$0xff] }
 0x6ac   : > { %v22082_v1 = vld [vmem:[#allocation311_spill] sm:$0xff] }
 0x6b1   : > { %11260 = vmatmul.mubr.msk.bf16.gmra.mrb[16].mxu0 %vm650_vm3, %v21972_v4  ;;  %v22028_v4 = vld [vmem:[#allocation398_spill] sm:$0xff] }
 0x6b2   : > { %11263 = vmatprep.mubr.msk.bf16.mxu0 %vm650_vm3, %v21975_v52  ;;  %v22029_v44 = vpack.c.bf16 %v22027_v57, %v22028_v4  ;;  %v22031_v52 = vld [vmem:[#allocation400_spill] sm:$0xff] }
 0x6b3   : > { %v22085_v4 = vld [vmem:[#allocation440_spill] sm:$0xff] }
 0x6b9   : > { %11264 = vmatmul.mubr.msk.bf16.gmra.mrb[20].mxu0 %vm650_vm3, %v21976_v24  ;;  %v22032_v24 = vpack.c.bf16 %v22030_v63, %v22031_v52 }
 0x6ba   : > { %11267 = vmatprep.mubr.msk.bf16.mxu0 %vm650_vm3, %v21977_v53  ;;  %v22033_v53 = vld [vmem:[#allocation427_spill] sm:$0xff] }
 0x6c1   : > { %11268 = vmatmul.mubr.msk.bf16.gmra.mrb[24].mxu0 %vm650_vm3, %v21978_v11  ;;  %v22034_v11 = vld [vmem:[#allocation402_spill] sm:$0xff] }
 0x6c2   : > { %11271 = vmatprep.mubr.msk.bf16.mxu0 %vm650_vm3, %v21981_v54  ;;  %v22035_v23 = vpack.c.bf16 %v22033_v53, %v22034_v11  ;;  %v22037_v54 = vld [vmem:[#allocation428_spill] sm:$0xff]  ;;  %v17531_v53 = vld [vmem:[%s19810_s8] ss:$0 sm:$0xff]  ;;  %v22087_v11 = vld [vmem:[#allocation65_spill] sm:$0xff] }
 0x6c3   : > { %v22038_v6 = vpack.c.bf16 %v22036_v38, %v22037_v54 }
 0x6c9   : > { %11272 = vmatmul.mubr.msk.bf16.gmra.mrb[28].mxu0 %vm650_vm3, %v21984_v56  ;;  %v5165_v56 = vmul.f32 %v22039_v47, %v21699_v0  ;;  %v22050_v0 = vld [vmem:[#allocation534_spill] sm:$0xff] }
 0x6ca   : > { %11275 = vmatprep.mubr.msk.bf16.mxu0 %vm650_vm3, %v21987_v2 }
 0x6cb   : > { %v5182_v2 = vpack.c.bf16 %v5166_v50, %v5165_v56  ;;  %v17541_v50 = vld [vmem:[%s19812_s10] ss:$0 sm:$0xff] }
 0x6d1   : > { %11276 = vmatmul.mubr.msk.bf16.gmra.mrb[32].mxu0 %vm650_vm3, %v21989_v13  ;;  %v22042_v13 = vld [vmem:[#allocation526_spill] sm:$0xff] }
 0x6d2   : > { %11279 = vmatprep.mubr.msk.bf16.mxu0 %vm650_vm3, %v21991_v26  ;;  %v22043_v16 = vpack.c.bf16 %v22041_v37, %v22042_v13  ;;  %v22044_v26 = vld [vmem:[#allocation529_spill] sm:$0xff] }
 0x6d9   : > { %11280 = vmatmul.mubr.msk.bf16.gmra.mrb[36].mxu0 %vm650_vm3, %v21993_v15  ;;  %v22046_v15 = vpack.c.bf16 %v22044_v26, %v22045_v14 }
 0x6da   : > { %11285 = vmatprep.mubr.msk.bf16.mxu0 %vm650_vm3, %v21996_v19  ;;  %v22049_v19 = vpack.c.bf16 %v22047_v25, %v22048_v48 }
 0x6e1   : > { %11286 = vmatmul.mubr.msk.bf16.vlgmr.msra.gmra.mrb[8].mxu0 %vm650_vm3, %v21999_v20  ;;  %v22055_v20 = vpack.c.bf16 %v22053_v10, %v22054_v36 }
 0x6e2   : > { %11318 = vmatpush3.bf16.msra.mxu0 %v5721_v21  ;;  %11289 = vmatprep.mubr.msk.bf16.mxu0 %vm650_vm3, %v22002_v9  ;;  %v22052_v21 = vpack.c.bf16 %v22050_v0, %v22051_v45  ;;  %v22058_v9 = vpack.c.bf16 %v22056_v22, %v22057_v61 }
 0x6e9   : > { %11290 = vmatmul.mubr.msk.bf16.gmra.mrb[12].mxu0 %vm650_vm3, %v22005_v18  ;;  %v22061_v18 = vpack.c.bf16 %v22059_v17, %v22060_v60 }
 0x6ea   : > { %11293 = vmatprep.mubr.msk.bf16.mxu0 %vm650_vm3, %v22008_v34  ;;  %v22064_v34 = vpack.c.bf16 %v22062_v46, %v22063_v28 }
 0x6f1   : > { %11294 = vmatmul.mubr.msk.bf16.gmra.mrb[16].mxu0 %vm650_vm3, %v22011_v43  ;;  %v22067_v43 = vpack.c.bf16 %v22065_v58, %v22066_v55 }
 0x6f2   : > { %11297 = vmatprep.mubr.msk.bf16.mxu0 %vm650_vm3, %v22014_v51  ;;  %v22070_v51 = vld [vmem:[#allocation500_spill] sm:$0xff] }
 0x6f3   : > { %v22072_v40 = vpack.c.bf16 %v22070_v51, %v22071_v32 }
 0x6f9   : > { %11298 = vmatmul.mubr.msk.bf16.gmra.mrb[20].mxu0 %vm650_vm3, %v22017_v29  ;;  %v22073_v29 = vld [vmem:[#allocation503_spill] sm:$0xff] }
 0x6fa   : > { %11301 = vmatprep.mubr.msk.bf16.mxu0 %vm650_vm3, %v22020_v5  ;;  %v22075_v7 = vpack.c.bf16 %v22073_v29, %v22074_v35  ;;  %v22076_v5 = vld [vmem:[#allocation505_spill] sm:$0xff] }
 0x6fb   : > { %v22078_v27 = vpack.c.bf16 %v22076_v5, %v22077_v62 }
 0x701   : > { %11302 = vmatmul.mubr.msk.bf16.gmra.mrb[24].mxu0 %vm650_vm3, %v22023_v49  ;;  %v22079_v49 = vld [vmem:[#allocation509_spill] sm:$0xff] }
 0x702   : > { %11305 = vmatprep.mubr.msk.bf16.mxu0 %vm650_vm3, %v22026_v8  ;;  %v22081_v12 = vpack.c.bf16 %v22079_v49, %v22080_v3  ;;  %v22083_v8 = vld [vmem:[#allocation512_spill] sm:$0xff] }
 0x703   : > { %v22084_v57 = vpack.c.bf16 %v22082_v1, %v22083_v8 }
 0x709   : > { %11306 = vmatmul.mubr.msk.bf16.gmra.mrb[28].mxu0 %vm650_vm3, %v22029_v44  ;;  %v22086_v44 = vpack.c.bf16 %v16891_v30, %v22085_v4 }
 0x70a   : > { %11309 = vmatprep.mubr.msk.bf16.mxu0 %vm650_vm3, %v22032_v24  ;;  %v17524_v24 = vld [vmem:[%s19813_s11] sm:$0xff] }
 0x70b   : > { %11363 = vmatpush3.msra.mxu1 %v17524_v24 }
 0x70c   : > { %11367 = vmatprep.subr.mxu1 %v21965_v33 }
 0x711   : > { %11310 = vmatmul.mubr.msk.bf16.gmra.mrb[32].mxu0 %vm650_vm3, %v22035_v23 }
 0x712   : > { %11313 = vmatprep.mubr.msk.bf16.mxu0 %vm650_vm3, %v22038_v6 }
 0x719   : > { %11314 = vmatmul.mubr.msk.bf16.gmra.mrb[36].mxu0 %vm650_vm3, %v5182_v2 }
 0x71a   : > { %11319 = vmatprep.mubr.msk.bf16.mxu0 %vm650_vm3, %v22043_v16 }
 0x721   : > { %11320 = vmatmul.mubr.msk.bf16.vlgmr.msra.gmra.mrb[8].mxu0 %vm650_vm3, %v22046_v15 }
 0x722   : > { %11323 = vmatprep.mubr.msk.bf16.mxu0 %vm650_vm3, %v22049_v19 }
 0x729   : > { %11324 = vmatmul.mubr.msk.bf16.gmra.mrb[12].mxu0 %vm650_vm3, %v22052_v21 }
 0x72a   : > { %11327 = vmatprep.mubr.msk.bf16.mxu0 %vm650_vm3, %v22055_v20 }
 0x731   : > { %11328 = vmatmul.mubr.msk.bf16.gmra.mrb[16].mxu0 %vm650_vm3, %v22058_v9 }
 0x732   : > { %11331 = vmatprep.mubr.msk.bf16.mxu0 %vm650_vm3, %v22061_v18 }
 0x739   : > { %11332 = vmatmul.mubr.msk.bf16.gmra.mrb[20].mxu0 %vm650_vm3, %v22064_v34 }
 0x73a   : > { %11335 = vmatprep.mubr.msk.bf16.mxu0 %vm650_vm3, %v22067_v43 }
 0x741   : > { %11336 = vmatmul.mubr.msk.bf16.gmra.mrb[24].mxu0 %vm650_vm3, %v22069_v59 }
 0x742   : > { %11339 = vmatprep.mubr.msk.bf16.mxu0 %vm650_vm3, %v22072_v40 }
 0x744   : > { %v6037_v63 = vpop.f32.mrb[2].mxu1 }
 0x745   : > { %v11361_v52 = vpop.f32.mrb[3].mxu1  ;;  %v17534_v30 = vrot.slane %v6037_v63, %v22087_v11 }
 0x749   : > { %11340 = vmatmul.mubr.msk.bf16.gmra.mrb[28].mxu0 %vm650_vm3, %v22075_v7 }
 0x74a   : > { %11343 = vmatprep.mubr.msk.bf16.mxu0 %vm650_vm3, %v22078_v27 }
 0x751   : > { %11344 = vmatmul.mubr.msk.bf16.gmra.mrb[32].mxu0 %vm650_vm3, %v22081_v12 }
 0x752   : > { %11347 = vmatprep.mubr.msk.bf16.mxu0 %vm650_vm3, %v22084_v57 }
 0x759   : > { %11348 = vmatmul.mubr.msk.bf16.gmra.mrb[36].mxu0 %vm650_vm3, %v22086_v44 }
 0x7f4   : > { %v11321_v23 = vpop.f32.mrb[8].mxu0 }
 0x7f5   : > { %v5925_v38 = vadd.f32 %v11321_v23, %v17531_v53  ;;  %v5757_v54 = vpop.f32.mrb[9].mxu0 }
 0x7f6   : > { %v5923_v6 = vadd.f32 %v17531_v53, %v5757_v54  ;;  %v11322_v56 = vpop.f32.mrb[10].mxu0 }
 0x7f7   : > { %v6047_v2 = vadd.f32 %v17534_v30, %v5925_v38  ;;  %v5926_v37 = vadd.f32 %v11322_v56, %v17531_v53  ;;  %v5760_v13 = vpop.f32.mrb[11].mxu0 }
 0x7f8   : > { %v6045_v16 = vadd.f32 %v17534_v30, %v5923_v6  ;;  %v5924_v26 = vadd.f32 %v17531_v53, %v5760_v13 }
 0x7f9   : > { %v6048_v14 = vadd.f32 %v17534_v30, %v5926_v37  ;;  %v17553_v48 = vadd.f32 %v17541_v50, %v6047_v2 }
 0x7fa   : > { %v17549_v15 = vadd.f32 %v17541_v50, %v6045_v16  ;;  %v6046_v25 = vadd.f32 %v17534_v30, %v5924_v26 }
 0x7fb   : > { %v17562_v36 = vadd.f32 %v17541_v50, %v6048_v14  ;;  %v6120_v46 = vsel %vm6116_vm9, %v17553_v48, 0.0 }
 0x7fc   : > { %v17556_v19 = vadd.f32 %v17541_v50, %v6046_v25  ;;  %v11325_v0 = vpop.f32.mrb[12].mxu0  ;;  %v6117_v10 = vsel %vm6116_vm9, %v17549_v15, 0.0 }
 0x7fd   : > { %v5929_v45 = vadd.f32 %v11325_v0, %v17531_v53  ;;  %v5773_v21 = vpop.f32.mrb[13].mxu0  ;;  %v6122_v43 = vsel %vm6116_vm9, %v17562_v36, 0.0 }
 0x7fe   : > { %v6118_v20 = vsel %vm6116_vm9, %v17556_v19, 0.0  ;;  %v5927_v22 = vadd.f32 %v17531_v53, %v5773_v21  ;;  %v11326_v61 = vpop.f32.mrb[14].mxu0 }
 0x7ff   : > { %v6119_v9 = vadd.f32 %v6118_v20, %v6117_v10  ;;  %v6051_v17 = vadd.f32 %v17534_v30, %v5929_v45  ;;  %v5930_v60 = vadd.f32 %v11326_v61, %v17531_v53  ;;  %v5776_v18 = vpop.f32.mrb[15].mxu0 }
 0x800   : > { %v6049_v28 = vadd.f32 %v17534_v30, %v5927_v22  ;;  %v5928_v34 = vadd.f32 %v17531_v53, %v5776_v18 }
 0x801   : > { %v6121_v58 = vadd.f32 %v6120_v46, %v6119_v9  ;;  %v6052_v55 = vadd.f32 %v17534_v30, %v5930_v60  ;;  %v17581_v32 = vadd.f32 %v17541_v50, %v6051_v17 }
 0x802   : > { %v17577_v39 = vadd.f32 %v17541_v50, %v6049_v28  ;;  %v6050_v59 = vadd.f32 %v17534_v30, %v5928_v34 }
 0x803   : > { %v6123_v51 = vadd.f32 %v6122_v43, %v6121_v58  ;;  %v17590_v27 = vadd.f32 %v17541_v50, %v6052_v55  ;;  %v6128_v44 = vsel %vm6116_vm9, %v17581_v32, 0.0 }
 0x804   : > { %v6124_v40 = vsel %vm6116_vm9, %v17577_v39, 0.0  ;;  %v17586_v29 = vadd.f32 %v17541_v50, %v6050_v59  ;;  %v11329_v35 = vpop.f32.mrb[16].mxu0 }
 0x805   : > { %v6125_v7 = vadd.f32 %v6124_v40, %v6123_v51  ;;  %v5933_v5 = vadd.f32 %v11329_v35, %v17531_v53  ;;  %v5789_v62 = vpop.f32.mrb[17].mxu0  ;;  %v6130_v54 = vsel %vm6116_vm9, %v17590_v27, 0.0 }
 0x806   : > { %v6126_v49 = vsel %vm6116_vm9, %v17586_v29, 0.0  ;;  %v5931_v3 = vadd.f32 %v17531_v53, %v5789_v62  ;;  %v11330_v12 = vpop.f32.mrb[18].mxu0 }
 0x807   : > { %v6127_v1 = vadd.f32 %v6126_v49, %v6125_v7  ;;  %v6055_v8 = vadd.f32 %v17534_v30, %v5933_v5  ;;  %v5934_v57 = vadd.f32 %v11330_v12, %v17531_v53  ;;  %v5792_v4 = vpop.f32.mrb[19].mxu0 }
 0x808   : > { %v6053_v63 = vadd.f32 %v17534_v30, %v5931_v3  ;;  %v5932_v52 = vadd.f32 %v17531_v53, %v5792_v4 }
 0x809   : > { %v6129_v23 = vadd.f32 %v6128_v44, %v6127_v1  ;;  %v6056_v38 = vadd.f32 %v17534_v30, %v5934_v57  ;;  %v17609_v37 = vadd.f32 %v17541_v50, %v6055_v8 }
 0x80a   : > { %v17605_v6 = vadd.f32 %v17541_v50, %v6053_v63  ;;  %v6054_v56 = vadd.f32 %v17534_v30, %v5932_v52 }
 0x80b   : > { %v6131_v2 = vadd.f32 %v6130_v54, %v6129_v23  ;;  %v17618_v45 = vadd.f32 %v17541_v50, %v6056_v38  ;;  %v6136_v60 = vsel %vm6116_vm9, %v17609_v37, 0.0 }
 0x80c   : > { %v6132_v13 = vsel %vm6116_vm9, %v17605_v6, 0.0  ;;  %v17614_v16 = vadd.f32 %v17541_v50, %v6054_v56  ;;  %v11333_v26 = vpop.f32.mrb[20].mxu0 }
 0x80d   : > { %v6133_v14 = vadd.f32 %v6132_v13, %v6131_v2  ;;  %v5937_v25 = vadd.f32 %v11333_v26, %v17531_v53  ;;  %v5805_v0 = vpop.f32.mrb[21].mxu0  ;;  %v6138_v58 = vsel %vm6116_vm9, %v17618_v45, 0.0 }
 0x80e   : > { %v6134_v21 = vsel %vm6116_vm9, %v17614_v16, 0.0  ;;  %v5935_v10 = vadd.f32 %v17531_v53, %v5805_v0  ;;  %v11334_v20 = vpop.f32.mrb[22].mxu0 }
 0x80f   : > { %v6135_v22 = vadd.f32 %v6134_v21, %v6133_v14  ;;  %v6059_v61 = vadd.f32 %v17534_v30, %v5937_v25  ;;  %v5938_v9 = vadd.f32 %v11334_v20, %v17531_v53  ;;  %v5808_v17 = vpop.f32.mrb[23].mxu0 }
 0x810   : > { %v6057_v18 = vadd.f32 %v17534_v30, %v5935_v10  ;;  %v5936_v46 = vadd.f32 %v17531_v53, %v5808_v17 }
 0x811   : > { %v6137_v28 = vadd.f32 %v6136_v60, %v6135_v22  ;;  %v6060_v34 = vadd.f32 %v17534_v30, %v5938_v9  ;;  %v17637_v51 = vadd.f32 %v17541_v50, %v6059_v61 }
 0x812   : > { %v17633_v55 = vadd.f32 %v17541_v50, %v6057_v18  ;;  %v6058_v43 = vadd.f32 %v17534_v30, %v5936_v46 }
 0x813   : > { %v6139_v59 = vadd.f32 %v6138_v58, %v6137_v28  ;;  %v17646_v3 = vadd.f32 %v17541_v50, %v6060_v34  ;;  %v6144_v52 = vsel %vm6116_vm9, %v17637_v51, 0.0 }
 0x814   : > { %v6140_v40 = vsel %vm6116_vm9, %v17633_v55, 0.0  ;;  %v17642_v35 = vadd.f32 %v17541_v50, %v6058_v43  ;;  %v11337_v7 = vpop.f32.mrb[24].mxu0 }
 0x815   : > { %v6141_v5 = vadd.f32 %v6140_v40, %v6139_v59  ;;  %v5941_v62 = vadd.f32 %v11337_v7, %v17531_v53  ;;  %v5821_v49 = vpop.f32.mrb[25].mxu0  ;;  %v6146_v2 = vsel %vm6116_vm9, %v17646_v3, 0.0 }
 0x816   : > { %v6142_v12 = vsel %vm6116_vm9, %v17642_v35, 0.0  ;;  %v5939_v1 = vadd.f32 %v17531_v53, %v5821_v49  ;;  %v11338_v8 = vpop.f32.mrb[26].mxu0 }
 0x817   : > { %v6143_v57 = vadd.f32 %v6142_v12, %v6141_v5  ;;  %v6063_v4 = vadd.f32 %v17534_v30, %v5941_v62  ;;  %v5942_v44 = vadd.f32 %v11338_v8, %v17531_v53  ;;  %v5824_v63 = vpop.f32.mrb[27].mxu0 }
 0x818   : > { %v6061_v23 = vadd.f32 %v17534_v30, %v5939_v1  ;;  %v5940_v38 = vadd.f32 %v17531_v53, %v5824_v63 }
 0x819   : > { %v6145_v54 = vadd.f32 %v6144_v52, %v6143_v57  ;;  %v6064_v56 = vadd.f32 %v17534_v30, %v5942_v44  ;;  %v17665_v25 = vadd.f32 %v17541_v50, %v6063_v4 }
 0x81a   : > { %v17661_v13 = vadd.f32 %v17541_v50, %v6061_v23  ;;  %v6062_v26 = vadd.f32 %v17534_v30, %v5940_v38 }
 0x81b   : > { %v6147_v14 = vadd.f32 %v6146_v2, %v6145_v54  ;;  %v17674_v9 = vadd.f32 %v17541_v50, %v6064_v56  ;;  %v6152_v43 = vsel %vm6116_vm9, %v17665_v25, 0.0 }
 0x81c   : > { %v6148_v0 = vsel %vm6116_vm9, %v17661_v13, 0.0  ;;  %v17670_v21 = vadd.f32 %v17541_v50, %v6062_v26  ;;  %v11341_v10 = vpop.f32.mrb[28].mxu0 }
 0x81d   : > { %v6149_v20 = vadd.f32 %v6148_v0, %v6147_v14  ;;  %v5945_v22 = vadd.f32 %v11341_v10, %v17531_v53  ;;  %v5837_v61 = vpop.f32.mrb[29].mxu0  ;;  %v6154_v62 = vsel %vm6116_vm9, %v17674_v9, 0.0 }
 0x81e   : > { %v6150_v17 = vsel %vm6116_vm9, %v17670_v21, 0.0  ;;  %v5943_v60 = vadd.f32 %v17531_v53, %v5837_v61  ;;  %v11342_v18 = vpop.f32.mrb[30].mxu0 }
 0x81f   : > { %v6151_v46 = vadd.f32 %v6150_v17, %v6149_v20  ;;  %v6067_v28 = vadd.f32 %v17534_v30, %v5945_v22  ;;  %v5946_v34 = vadd.f32 %v11342_v18, %v17531_v53  ;;  %v5840_v58 = vpop.f32.mrb[31].mxu0 }
 0x820   : > { %v6065_v59 = vadd.f32 %v17534_v30, %v5943_v60  ;;  %v5944_v40 = vadd.f32 %v17531_v53, %v5840_v58 }
 0x821   : > { %v6153_v7 = vadd.f32 %v6152_v43, %v6151_v46  ;;  %v6068_v5 = vadd.f32 %v17534_v30, %v5946_v34  ;;  %v17693_v8 = vadd.f32 %v17541_v50, %v6067_v28 }
 0x822   : > { %v17689_v49 = vadd.f32 %v17541_v50, %v6065_v59  ;;  %v6066_v12 = vadd.f32 %v17534_v30, %v5944_v40 }
 0x823   : > { %v6155_v1 = vadd.f32 %v6154_v62, %v6153_v7  ;;  %v17702_v38 = vadd.f32 %v17541_v50, %v6068_v5  ;;  %v6160_v20 = vsel %vm6116_vm9, %v17693_v8, 0.0 }
 0x824   : > { %v6156_v57 = vsel %vm6116_vm9, %v17689_v49, 0.0  ;;  %v17698_v4 = vadd.f32 %v17541_v50, %v6066_v12  ;;  %v11345_v44 = vpop.f32.mrb[32].mxu0 }
 0x825   : > { %v6157_v63 = vadd.f32 %v6156_v57, %v6155_v1  ;;  %v5949_v52 = vadd.f32 %v11345_v44, %v17531_v53  ;;  %v5853_v23 = vpop.f32.mrb[33].mxu0  ;;  %v6162_v18 = vsel %vm6116_vm9, %v17702_v38, 0.0 }
 0x826   : > { %v6158_v54 = vsel %vm6116_vm9, %v17698_v4, 0.0  ;;  %v5947_v56 = vadd.f32 %v17531_v53, %v5853_v23  ;;  %v11346_v2 = vpop.f32.mrb[34].mxu0 }
 0x827   : > { %v6159_v26 = vadd.f32 %v6158_v54, %v6157_v63  ;;  %v6071_v14 = vadd.f32 %v17534_v30, %v5949_v52  ;;  %v5950_v0 = vadd.f32 %v11346_v2, %v17531_v53  ;;  %v5856_v10 = vpop.f32.mrb[35].mxu0 }
 0x828   : > { %v6069_v22 = vadd.f32 %v17534_v30, %v5947_v56  ;;  %v5948_v61 = vadd.f32 %v17531_v53, %v5856_v10 }
 0x829   : > { %v6161_v17 = vadd.f32 %v6160_v20, %v6159_v26  ;;  %v6072_v60 = vadd.f32 %v17534_v30, %v5950_v0  ;;  %v17721_v58 = vadd.f32 %v17541_v50, %v6071_v14 }
 0x82a   : > { %v17717_v46 = vadd.f32 %v17541_v50, %v6069_v22  ;;  %v6070_v28 = vadd.f32 %v17534_v30, %v5948_v61 }
 0x82b   : > { %v6163_v34 = vadd.f32 %v6162_v18, %v6161_v17  ;;  %v17730_v12 = vadd.f32 %v17541_v50, %v6072_v60  ;;  %v6168_v56 = vsel %vm6116_vm9, %v17721_v58, 0.0 }
 0x82c   : > { %v6164_v43 = vsel %vm6116_vm9, %v17717_v46, 0.0  ;;  %v17726_v59 = vadd.f32 %v17541_v50, %v6070_v28  ;;  %v11349_v40 = vpop.f32.mrb[36].mxu0 }
 0x82d   : > { %v6165_v7 = vadd.f32 %v6164_v43, %v6163_v34  ;;  %v5953_v5 = vadd.f32 %v11349_v40, %v17531_v53  ;;  %v5869_v62 = vpop.f32.mrb[37].mxu0  ;;  %v6170_v10 = vsel %vm6116_vm9, %v17730_v12, 0.0 }
 0x82e   : > { %v6166_v1 = vsel %vm6116_vm9, %v17726_v59, 0.0  ;;  %v5951_v57 = vadd.f32 %v17531_v53, %v5869_v62  ;;  %v11350_v44 = vpop.f32.mrb[38].mxu0 }
 0x82f   : > { %v6167_v63 = vadd.f32 %v6166_v1, %v6165_v7  ;;  %v6075_v52 = vadd.f32 %v17534_v30, %v5953_v5  ;;  %v5954_v23 = vadd.f32 %v11350_v44, %v17531_v53  ;;  %v5872_v54 = vpop.f32.mrb[39].mxu0 }
 0x830   : > { %v6073_v2 = vadd.f32 %v17534_v30, %v5951_v57  ;;  %v5952_v26 = vadd.f32 %v17531_v53, %v5872_v54 }
 0x831   : > { %v6169_v14 = vadd.f32 %v6168_v56, %v6167_v63  ;;  %v6076_v0 = vadd.f32 %v17534_v30, %v5954_v23  ;;  %v17749_v17 = vadd.f32 %v17541_v50, %v6075_v52 }
 0x832   : > { %v17745_v20 = vadd.f32 %v17541_v50, %v6073_v2  ;;  %v6074_v22 = vadd.f32 %v17534_v30, %v5952_v26 }
 0x833   : > { %v6171_v61 = vadd.f32 %v6170_v10, %v6169_v14  ;;  %v17757_v28 = vadd.f32 %v17541_v50, %v6076_v0  ;;  %v6176_v30 = vsel %vm6116_vm9, %v17749_v17, 0.0 }
 0x834   : > { %v6172_v60 = vsel %vm6116_vm9, %v17745_v20, 0.0  ;;  %v17754_v53 = vadd.f32 %v17541_v50, %v6074_v22  ;;  %v17768_v50 = vld [vmem:[%s19814_s12] sm:$0x3] }
 0x835   : > { %v6173_v18 = vadd.f32 %v6172_v60, %v6171_v61  ;;  %v6178_v7 = vsel %vm6116_vm9, %v17757_v28, 0.0 }
 0x836   : > { %v6174_v34 = vsel %vm6116_vm9, %v17754_v53, 0.0 }
 0x837   : > { %v6175_v43 = vadd.f32 %v6174_v34, %v6173_v18 }
 0x839   : > { %v6177_v40 = vadd.f32 %v6176_v30, %v6175_v43 }
 0x83b   : > { %v6179_v5 = vadd.f32 %v6178_v7, %v6177_v40 }
 0x83d   : > { %v6180_v62 = vrot.slane %v6179_v5, 4 }
 0x83f   : > { %v6181_v1 = vadd.f32 %v6180_v62, %v6179_v5 }
 0x841   : > { %v6182_v57 = vrot.slane %v6181_v1, 2 }
 0x843   : > { %v6183_v44 = vadd.f32 %v6182_v57, %v6181_v1 }
 0x845   : > { %v6184_v63 = vrot.slane %v6183_v44, 1 }
 0x847   : > { %v6185_v52 = vadd.f32 %v6184_v63, %v6183_v44 }
 0x849   : > { %11365 = vmatmul.mubr.msk.f32.vlgmr.msra.gmra.mrb[4].mxu1 %vm6116_vm9, %v6185_v52 }
 0x84a   : > { %11368 = vmatpush3.msk.msra.mxu1 %vm2065_vm7, %v17768_v50  ;;  %11369 = vmatprep.mubr.msk.f32.mxu1 %vm12689_vm1, %v21965_v33 }
 0x84b   : > { %11372 = vmatprep.subr.mxu1 %v21965_v33 }
 0x91c   : > { %v6256_v23 = vpop.f32.mrb[4].mxu1 }
 0x91d   : > { %v6260_v54 = vmul.f32 0.0009765625, %v6256_v23  ;;  %v11366_v56 = vpop.f32.mrb[5].mxu1 }
 0x91f   : > { %11370 = vmatmul.mubr.msk.f32.vlgmr.msra.gmra.mrb[6].mxu1 %vm6262_vm10, %v6260_v54 }
 0x920   : > { %11373 = vmatpush3.msra.mxu1 %v17524_v24  ;;  %11374 = vmatprep.mubr.msk.f32.mxu1 %vm12689_vm1, %v21965_v33 }
 0x921   : > { %11377 = vmatprep.subr.mxu1 %v21965_v33 }
 0x9f2   : > { %v6335_v2 = vpop.f32.mrb[6].mxu1 }
 0x9f3   : > { %v11371_v26 = vpop.f32.mrb[7].mxu1  ;;  %v17782_v14 = vrot.slane %v6335_v2, %v22087_v11 }
 0x9f5   : > { %v17786_v0 = vsub.f32 %v17549_v15, %v17782_v14  ;;  %v17790_v10 = vsub.f32 %v17556_v19, %v17782_v14  ;;  %v17794_v24 = vsub.f32 %v17553_v48, %v17782_v14  ;;  %v17798_v22 = vsub.f32 %v17562_v36, %v17782_v14 }
 0x9f6   : > { %v17806_v15 = vsub.f32 %v17577_v39, %v17782_v14  ;;  %v17812_v48 = vsub.f32 %v17586_v29, %v17782_v14  ;;  %v17820_v30 = vsub.f32 %v17581_v32, %v17782_v14  ;;  %v17827_v29 = vsub.f32 %v17590_v27, %v17782_v14 }
 0x9f7   : > { %v6375_v61 = vmul.f32 %v17786_v0, %v17786_v0  ;;  %v6376_v60 = vmul.f32 %v17790_v10, %v17790_v10  ;;  %v6377_v19 = vmul.f32 %v17794_v24, %v17794_v24  ;;  %v6378_v36 = vmul.f32 %v17798_v22, %v17798_v22 }
 0x9f8   : > { %v6379_v39 = vmul.f32 %v17806_v15, %v17806_v15  ;;  %v6380_v5 = vmul.f32 %v17812_v48, %v17812_v48  ;;  %v17834_v32 = vsub.f32 %v17605_v6, %v17782_v14  ;;  %v6381_v57 = vmul.f32 %v17820_v30, %v17820_v30 }
 0x9f9   : > { %v6407_v18 = vsel %vm6116_vm9, %v6375_v61, 0.0  ;;  %v6408_v34 = vsel %vm6116_vm9, %v6376_v60, 0.0  ;;  %v6410_v40 = vsel %vm6116_vm9, %v6377_v19, 0.0  ;;  %v6412_v62 = vsel %vm6116_vm9, %v6378_v36, 0.0 }
 0x9fa   : > { %v6409_v43 = vadd.f32 %v6408_v34, %v6407_v18  ;;  %v6414_v44 = vsel %vm6116_vm9, %v6379_v39, 0.0  ;;  %v17841_v27 = vsub.f32 %v17614_v16, %v17782_v14  ;;  %v6382_v52 = vmul.f32 %v17827_v29, %v17827_v29 }
 0x9fb   : > { %v6416_v23 = vsel %vm6116_vm9, %v6380_v5, 0.0  ;;  %v17848_v6 = vsub.f32 %v17609_v37, %v17782_v14  ;;  %v6383_v56 = vmul.f32 %v17834_v32, %v17834_v32  ;;  %v6418_v2 = vsel %vm6116_vm9, %v6381_v57, 0.0 }
 0x9fc   : > { %v6411_v7 = vadd.f32 %v6410_v40, %v6409_v43  ;;  %v17855_v16 = vsub.f32 %v17618_v45, %v17782_v14  ;;  %v6384_v61 = vmul.f32 %v17841_v27, %v17841_v27  ;;  %v6420_v60 = vsel %vm6116_vm9, %v6382_v52, 0.0 }
 0x9fd   : > { %v17862_v37 = vsub.f32 %v17633_v55, %v17782_v14  ;;  %v6385_v36 = vmul.f32 %v17848_v6, %v17848_v6  ;;  %v6422_v18 = vsel %vm6116_vm9, %v6383_v56, 0.0  ;;  %v17869_v45 = vsub.f32 %v17642_v35, %v17782_v14 }
 0x9fe   : > { %v6413_v1 = vadd.f32 %v6412_v62, %v6411_v7  ;;  %v6386_v43 = vmul.f32 %v17855_v16, %v17855_v16  ;;  %v6424_v39 = vsel %vm6116_vm9, %v6384_v61, 0.0  ;;  %v17876_v55 = vsub.f32 %v17637_v51, %v17782_v14 }
 0x9ff   : > { %v6387_v7 = vmul.f32 %v17862_v37, %v17862_v37  ;;  %v6426_v5 = vsel %vm6116_vm9, %v6385_v36, 0.0  ;;  %v17883_v35 = vsub.f32 %v17646_v3, %v17782_v14  ;;  %v17890_v51 = vsub.f32 %v17661_v13, %v17782_v14 }
 0xa00   : > { %v6415_v63 = vadd.f32 %v6414_v44, %v6413_v1  ;;  %v6388_v1 = vmul.f32 %v17869_v45, %v17869_v45  ;;  %v6428_v57 = vsel %vm6116_vm9, %v6386_v43, 0.0  ;;  %v17897_v3 = vsub.f32 %v17670_v21, %v17782_v14 }
 0xa01   : > { %v6430_v52 = vsel %vm6116_vm9, %v6387_v7, 0.0  ;;  %v17904_v13 = vsub.f32 %v17665_v25, %v17782_v14  ;;  %v17911_v21 = vsub.f32 %v17674_v9, %v17782_v14  ;;  %v17918_v25 = vsub.f32 %v17689_v49, %v17782_v14 }
 0xa02   : > { %v6417_v54 = vadd.f32 %v6416_v23, %v6415_v63  ;;  %v6389_v63 = vmul.f32 %v17876_v55, %v17876_v55  ;;  %v6432_v56 = vsel %vm6116_vm9, %v6388_v1, 0.0  ;;  %v17925_v9 = vsub.f32 %v17698_v4, %v17782_v14 }
 0xa03   : > { %v17932_v49 = vsub.f32 %v17693_v8, %v17782_v14  ;;  %v17939_v4 = vsub.f32 %v17702_v38, %v17782_v14  ;;  %v17946_v8 = vsub.f32 %v17717_v46, %v17782_v14  ;;  %v17953_v38 = vsub.f32 %v17726_v59, %v17782_v14 }
 0xa04   : > { %v6419_v26 = vadd.f32 %v6418_v2, %v6417_v54  ;;  %v6390_v54 = vmul.f32 %v17883_v35, %v17883_v35  ;;  %v6434_v61 = vsel %vm6116_vm9, %v6389_v63, 0.0  ;;  %v17960_v46 = vsub.f32 %v17721_v58, %v17782_v14 }
 0xa05   : > { %v17967_v59 = vsub.f32 %v17730_v12, %v17782_v14  ;;  %v17974_v58 = vsub.f32 %v17745_v20, %v17782_v14  ;;  %v17981_v12 = vsub.f32 %v17754_v53, %v17782_v14  ;;  %v17988_v20 = vsub.f32 %v17749_v17, %v17782_v14 }
 0xa06   : > { %v6421_v19 = vadd.f32 %v6420_v60, %v6419_v26  ;;  %v6391_v26 = vmul.f32 %v17890_v51, %v17890_v51  ;;  %v6436_v36 = vsel %vm6116_vm9, %v6390_v54, 0.0  ;;  %v17995_v53 = vsub.f32 %v17757_v28, %v17782_v14 }
 0xa07   : > { %v6405_v17 = vmul.f32 %v17988_v20, %v17988_v20 }
 0xa08   : > { %v6423_v34 = vadd.f32 %v6422_v18, %v6421_v19  ;;  %v6392_v19 = vmul.f32 %v17897_v3, %v17897_v3  ;;  %v6438_v43 = vsel %vm6116_vm9, %v6391_v26, 0.0 }
 0xa09   : > { %v6466_v28 = vsel %vm6116_vm9, %v6405_v17, 0.0 }
 0xa0a   : > { %v6425_v40 = vadd.f32 %v6424_v39, %v6423_v34  ;;  %v6393_v34 = vmul.f32 %v17904_v13, %v17904_v13  ;;  %v6440_v7 = vsel %vm6116_vm9, %v6392_v19, 0.0 }
 0xa0c   : > { %v6427_v62 = vadd.f32 %v6426_v5, %v6425_v40  ;;  %v6394_v40 = vmul.f32 %v17911_v21, %v17911_v21  ;;  %v6442_v1 = vsel %vm6116_vm9, %v6393_v34, 0.0 }
 0xa0e   : > { %v6429_v44 = vadd.f32 %v6428_v57, %v6427_v62  ;;  %v6395_v62 = vmul.f32 %v17918_v25, %v17918_v25  ;;  %v6444_v63 = vsel %vm6116_vm9, %v6394_v40, 0.0 }
 0xa10   : > { %v6431_v23 = vadd.f32 %v6430_v52, %v6429_v44  ;;  %v6396_v44 = vmul.f32 %v17925_v9, %v17925_v9  ;;  %v6446_v54 = vsel %vm6116_vm9, %v6395_v62, 0.0 }
 0xa12   : > { %v6433_v2 = vadd.f32 %v6432_v56, %v6431_v23  ;;  %v6397_v23 = vmul.f32 %v17932_v49, %v17932_v49  ;;  %v6448_v26 = vsel %vm6116_vm9, %v6396_v44, 0.0 }
 0xa14   : > { %v6435_v60 = vadd.f32 %v6434_v61, %v6433_v2  ;;  %v6398_v2 = vmul.f32 %v17939_v4, %v17939_v4  ;;  %v6450_v19 = vsel %vm6116_vm9, %v6397_v23, 0.0 }
 0xa16   : > { %v6437_v18 = vadd.f32 %v6436_v36, %v6435_v60  ;;  %v6399_v60 = vmul.f32 %v17946_v8, %v17946_v8  ;;  %v6452_v34 = vsel %vm6116_vm9, %v6398_v2, 0.0 }
 0xa18   : > { %v6439_v39 = vadd.f32 %v6438_v43, %v6437_v18  ;;  %v6400_v18 = vmul.f32 %v17953_v38, %v17953_v38  ;;  %v6454_v40 = vsel %vm6116_vm9, %v6399_v60, 0.0 }
 0xa1a   : > { %v6441_v5 = vadd.f32 %v6440_v7, %v6439_v39  ;;  %v6401_v39 = vmul.f32 %v17960_v46, %v17960_v46  ;;  %v6456_v62 = vsel %vm6116_vm9, %v6400_v18, 0.0 }
 0xa1c   : > { %v6443_v57 = vadd.f32 %v6442_v1, %v6441_v5  ;;  %v6402_v5 = vmul.f32 %v17967_v59, %v17967_v59  ;;  %v6458_v44 = vsel %vm6116_vm9, %v6401_v39, 0.0 }
 0xa1e   : > { %v6445_v52 = vadd.f32 %v6444_v63, %v6443_v57  ;;  %v6403_v57 = vmul.f32 %v17974_v58, %v17974_v58  ;;  %v6460_v23 = vsel %vm6116_vm9, %v6402_v5, 0.0 }
 0xa20   : > { %v6447_v56 = vadd.f32 %v6446_v54, %v6445_v52  ;;  %v6404_v52 = vmul.f32 %v17981_v12, %v17981_v12 }
 0xa22   : > { %v6449_v61 = vadd.f32 %v6448_v26, %v6447_v56  ;;  %v6462_v56 = vsel %vm6116_vm9, %v6403_v57, 0.0  ;;  %v6406_v26 = vmul.f32 %v17995_v53, %v17995_v53  ;;  %v10507_v57 = vld [vmem:[%s19817_s15 + $0x4] sm:$0xf] }
 0xa23   : > { %12347 = vmatprep.subr.msk.bf16.mxu0 %vm724_vm0, %v10507_v57 }
 0xa24   : > { %v6451_v36 = vadd.f32 %v6450_v19, %v6449_v61  ;;  %v6464_v61 = vsel %vm6116_vm9, %v6404_v52, 0.0  ;;  %v6468_v19 = vsel %vm6116_vm9, %v6406_v26, 0.0  ;;  %v18035_v26 = vld [vmem:[%s19816_s14] ss:$0 sm:$0xff] }
 0xa26   : > { %v6453_v43 = vadd.f32 %v6452_v34, %v6451_v36 }
 0xa28   : > { %v6455_v7 = vadd.f32 %v6454_v40, %v6453_v43 }
 0xa2a   : > { %v6457_v1 = vadd.f32 %v6456_v62, %v6455_v7 }
 0xa2c   : > { %v6459_v63 = vadd.f32 %v6458_v44, %v6457_v1  ;;  %v7139_v44 = vsel %vm724_vm0, %v10507_v57, 0 }
 0xa2d   : > { %11383 = vmatpush3.bf16.msra.mxu0 %v7139_v44 }
 0xa2e   : > { %v6461_v54 = vadd.f32 %v6460_v23, %v6459_v63 }
 0xa30   : > { %v6463_v2 = vadd.f32 %v6462_v56, %v6461_v54  ;;  %v6550_v54 = vld [vmem:[%s19815_s13] sm:$0x1] }
 0xa32   : > { %v6465_v60 = vadd.f32 %v6464_v61, %v6463_v2 }
 0xa34   : > { %v6467_v14 = vadd.f32 %v6466_v28, %v6465_v60 }
 0xa36   : > { %v6469_v36 = vadd.f32 %v6468_v19, %v6467_v14 }
 0xa38   : > { %v6470_v18 = vrot.slane %v6469_v36, 4 }
 0xa3a   : > { %v6471_v34 = vadd.f32 %v6470_v18, %v6469_v36 }
 0xa3c   : > { %v6472_v43 = vrot.slane %v6471_v34, 2 }
 0xa3e   : > { %v6473_v39 = vadd.f32 %v6472_v43, %v6471_v34 }
 0xa40   : > { %v6474_v40 = vrot.slane %v6473_v39, 1 }
 0xa42   : > { %v6475_v7 = vadd.f32 %v6474_v40, %v6473_v39 }
 0xa44   : > { %11375 = vmatmul.mubr.msk.f32.vlgmr.msra.gmra.mrb[8].mxu1 %vm6116_vm9, %v6475_v7 }
 0xa45   : > { %11378 = vmatpush3.msk.msra.mxu1 %vm2065_vm7, %v17768_v50  ;;  %11379 = vmatprep.mubr.msk.f32.mxu1 %vm12689_vm1, %v21965_v33  ;;  %v18023_v33 = vld [vmem:[%s19817_s15] sm:$0xf] }
 0xa46   : > { %12348 = vmatprep.subr.msk.bf16.mxu1 %vm724_vm0, %v10507_v57 }
 0xb17   : > { %v6545_v5 = vpop.f32.mrb[8].mxu1 }
 0xb18   : > { %v6549_v62 = vmul.f32 0.0009765625, %v6545_v5  ;;  %v11376_v1 = vpop.f32.mrb[9].mxu1 }
 0xb1a   : > { %11380 = vmatmul.mubr.msk.f32.vlgmr.msra.gmra.mrb[10].mxu1 %vm6262_vm10, %v6549_v62 }
 0xb1b   : > { %11729 = vmatpush3.bf16.msra.mxu1 %v7139_v44 }
 0xb1c   : > { %12349 = vmatprep.subr.msk.bf16.mxu1 %vm724_vm0, %v18023_v33 }
 0xbed   : > { %v6620_v50 = vpop.f32.mrb[10].mxu1 }
 0xbee   : > { %v11381_v63 = vpop.f32.mrb[11].mxu1  ;;  %v6621_v52 = vadd.f32 1e-06, %v6620_v50 }
 0xbf0   : > { %12506 = vrsqrt.f32 %v6621_v52 }
 0xbfa   : > { %v12507_v23 = vpop.eup %12506 }
 0xbfb   : > { %v6625_v17 = vmul.f32 %v12507_v23, %v6550_v54 }
 0xbfd   : > { %v6630_v56 = vrot.slane %v6625_v17, %v22087_v11 }
 0xbff   : > { %v6632_v2 = vmul.f32 %v6630_v56, %v17786_v0  ;;  %v6633_v61 = vmul.f32 %v6630_v56, %v17790_v10  ;;  %v6634_v60 = vmul.f32 %v6630_v56, %v17794_v24  ;;  %v6635_v28 = vmul.f32 %v6630_v56, %v17798_v22 }
 0xc00   : > { %v6636_v14 = vmul.f32 %v6630_v56, %v17806_v15  ;;  %v6637_v19 = vmul.f32 %v6630_v56, %v17812_v48  ;;  %v6638_v36 = vmul.f32 %v6630_v56, %v17820_v30  ;;  %v6639_v11 = vmul.f32 %v6630_v56, %v17827_v29 }
 0xc01   : > { %v6640_v0 = vmul.f32 %v6630_v56, %v17834_v32  ;;  %v6641_v18 = vmul.f32 %v6630_v56, %v17841_v27  ;;  %v6642_v34 = vmul.f32 %v6630_v56, %v17848_v6  ;;  %v18048_v10 = vadd.f32 %v18035_v26, %v6632_v2 }
 0xc02   : > { %v6643_v24 = vmul.f32 %v6630_v56, %v17855_v16  ;;  %v6644_v22 = vmul.f32 %v6630_v56, %v17862_v37  ;;  %v6645_v15 = vmul.f32 %v6630_v56, %v17869_v45  ;;  %v18054_v48 = vadd.f32 %v18035_v26, %v6633_v61 }
 0xc03   : > { %v6646_v30 = vmul.f32 %v6630_v56, %v17876_v55  ;;  %v6647_v29 = vmul.f32 %v6630_v56, %v17883_v35  ;;  %v6648_v32 = vmul.f32 %v6630_v56, %v17890_v51  ;;  %v18060_v27 = vadd.f32 %v18035_v26, %v6634_v60 }
 0xc04   : > { %v6649_v6 = vmul.f32 %v6630_v56, %v17897_v3  ;;  %v6650_v16 = vmul.f32 %v6630_v56, %v17904_v13  ;;  %v6651_v37 = vmul.f32 %v6630_v56, %v17911_v21  ;;  %v18066_v45 = vadd.f32 %v18035_v26, %v6635_v28 }
 0xc05   : > { %v18069_v43 = vmul.f32 %v6630_v56, %v17918_v25  ;;  %v18072_v55 = vmul.f32 %v6630_v56, %v17925_v9  ;;  %v18075_v35 = vadd.f32 %v18035_v26, %v6636_v14  ;;  %v6703_v51 = vsub.f32 0.0, %v18048_v10 }
 0xc06   : > { %v18079_v3 = vmul.f32 %v6630_v56, %v17932_v49  ;;  %v18082_v13 = vmul.f32 %v6630_v56, %v17939_v4  ;;  %v18085_v21 = vadd.f32 %v18035_v26, %v6637_v19  ;;  %v6704_v25 = vsub.f32 0.0, %v18054_v48 }
 0xc07   : > { %v18089_v39 = vmul.f32 %v6630_v56, %v17946_v8  ;;  %v18092_v9 = vmul.f32 %v6630_v56, %v17953_v38  ;;  %v18095_v40 = vadd.f32 %v18035_v26, %v6638_v36  ;;  %v6705_v49 = vsub.f32 0.0, %v18060_v27 }
 0xc08   : > { %v18099_v7 = vmul.f32 %v6630_v56, %v17960_v46  ;;  %v18102_v4 = vmul.f32 %v6630_v56, %v17967_v59  ;;  %v18105_v5 = vadd.f32 %v18035_v26, %v6639_v11  ;;  %v6706_v8 = vsub.f32 0.0, %v18066_v45 }
 0xc09   : > { %v18109_v62 = vmul.f32 %v6630_v56, %v17974_v58  ;;  %v18112_v38 = vadd.f32 %v18035_v26, %v6640_v0  ;;  %v6707_v1 = vsub.f32 0.0, %v18075_v35  ;;  %v6735_v57 = vmul.f32 1.442695, %v6703_v51 }
 0xc0a   : > { %v18116_v46 = vmul.f32 %v6630_v56, %v17981_v12  ;;  %v18119_v59 = vadd.f32 %v18035_v26, %v6641_v18  ;;  %v6708_v44 = vsub.f32 0.0, %v18085_v21  ;;  %v6737_v50 = vmul.f32 1.442695, %v6704_v25 }
 0xc0b   : > { %v18123_v63 = vmul.f32 %v6630_v56, %v17988_v20  ;;  %v18126_v58 = vadd.f32 %v18035_v26, %v6642_v34  ;;  %v6709_v52 = vsub.f32 0.0, %v18095_v40  ;;  %v6739_v23 = vmul.f32 1.442695, %v6705_v49 }
 0xc0c   : > { %v18130_v54 = vmul.f32 %v6630_v56, %v17995_v53  ;;  %v18133_v12 = vadd.f32 %v18035_v26, %v6643_v24  ;;  %v6710_v17 = vsub.f32 0.0, %v18105_v5  ;;  %v6741_v2 = vmul.f32 1.442695, %v6706_v8 }
 0xc0d   : > { %v18137_v61 = vadd.f32 %v18035_v26, %v6644_v22  ;;  %v6711_v20 = vsub.f32 0.0, %v18112_v38  ;;  %12508 = vpow2.f32 %v6735_v57  ;;  %v6743_v60 = vmul.f32 1.442695, %v6707_v1 }
 0xc0e   : > { %v18141_v28 = vadd.f32 %v18035_v26, %v6645_v15  ;;  %v6712_v14 = vsub.f32 0.0, %v18119_v59  ;;  %12510 = vpow2.f32 %v6737_v50  ;;  %v6745_v53 = vmul.f32 1.442695, %v6708_v44 }
 0xc0f   : > { %v18145_v56 = vadd.f32 %v18035_v26, %v6646_v30  ;;  %v6713_v19 = vsub.f32 0.0, %v18126_v58  ;;  %12512 = vpow2.f32 %v6739_v23  ;;  %v6747_v36 = vmul.f32 1.442695, %v6709_v52 }
 0xc10   : > { %22088 = vst [vmem:[#allocation438_spill] sm:$0xff] %v18141_v28  ;;  %v18149_v11 = vadd.f32 %v18035_v26, %v6647_v29  ;;  %v6714_v0 = vsub.f32 0.0, %v18133_v12  ;;  %12514 = vpow2.f32 %v6741_v2  ;;  %v6749_v18 = vmul.f32 1.442695, %v6710_v17 }
 0xc11   : > { %22089 = vst [vmem:[#allocation437_spill] sm:$0xff] %v18145_v56  ;;  %v18153_v34 = vadd.f32 %v18035_v26, %v6648_v32  ;;  %v6715_v24 = vsub.f32 0.0, %v18137_v61  ;;  %12516 = vpow2.f32 %v6743_v60  ;;  %v6751_v22 = vmul.f32 1.442695, %v6711_v20 }
 0xc12   : > { %22090 = vst [vmem:[#allocation436_spill] sm:$0xff] %v18149_v11  ;;  %v18157_v15 = vadd.f32 %v18035_v26, %v6649_v6  ;;  %v6716_v30 = vsub.f32 0.0, %v18141_v28  ;;  %12518 = vpow2.f32 %v6745_v53  ;;  %v6753_v51 = vmul.f32 1.442695, %v6712_v14 }
 0xc13   : > { %22091 = vst [vmem:[#allocation435_spill] sm:$0xff] %v18153_v34  ;;  %v18161_v29 = vadd.f32 %v18035_v26, %v6650_v16  ;;  %v6717_v25 = vsub.f32 0.0, %v18145_v56  ;;  %12520 = vpow2.f32 %v6747_v36  ;;  %v6755_v49 = vmul.f32 1.442695, %v6713_v19 }
 0xc14   : > { %22092 = vst [vmem:[#allocation434_spill] sm:$0xff] %v18157_v15  ;;  %v18165_v32 = vadd.f32 %v18035_v26, %v6651_v37  ;;  %v6718_v8 = vsub.f32 0.0, %v18149_v11  ;;  %12522 = vpow2.f32 %v6749_v18  ;;  %v6757_v1 = vmul.f32 1.442695, %v6714_v0 }
 0xc15   : > { %v18170_v6 = vadd.f32 %v18035_v26, %v18069_v43  ;;  %v6719_v57 = vsub.f32 0.0, %v18153_v34  ;;  %12524 = vpow2.f32 %v6751_v22  ;;  %v6759_v16 = vmul.f32 1.442695, %v6715_v24 }
 0xc16   : > { %v18175_v44 = vadd.f32 %v18035_v26, %v18072_v55  ;;  %v6720_v50 = vsub.f32 0.0, %v18157_v15  ;;  %12526 = vpow2.f32 %v6753_v51  ;;  %v6761_v37 = vmul.f32 1.442695, %v6716_v30 }
 0xc17   : > { %v18178_v52 = vpop.eup %12508  ;;  %v18182_v23 = vadd.f32 %v18035_v26, %v18079_v3  ;;  %v6721_v43 = vsub.f32 0.0, %v18161_v29  ;;  %12528 = vpow2.f32 %v6755_v49  ;;  %v6763_v17 = vmul.f32 1.442695, %v6717_v25 }
 0xc18   : > { %v18185_v2 = vpop.eup %12510  ;;  %v18189_v55 = vadd.f32 %v18035_v26, %v18082_v13  ;;  %v6722_v20 = vsub.f32 0.0, %v18165_v32  ;;  %12530 = vpow2.f32 %v6757_v1  ;;  %v6765_v60 = vmul.f32 1.442695, %v6718_v8 }
 0xc19   : > { %v18192_v14 = vpop.eup %12512  ;;  %v18196_v3 = vadd.f32 %v18035_v26, %v18089_v39  ;;  %v6723_v53 = vsub.f32 0.0, %v18170_v6  ;;  %12532 = vpow2.f32 %v6759_v16  ;;  %v6767_v19 = vmul.f32 1.442695, %v6719_v57 }
 0xc1a   : > { %v18199_v36 = vpop.eup %12514  ;;  %v18203_v13 = vadd.f32 %v18035_v26, %v18092_v9  ;;  %v6724_v0 = vsub.f32 0.0, %v18175_v44  ;;  %12534 = vpow2.f32 %v6761_v37  ;;  %v6769_v18 = vmul.f32 1.442695, %v6720_v50 }
 0xc1b   : > { %v18206_v24 = vpop.eup %12516  ;;  %v18210_v39 = vadd.f32 %v18035_v26, %v18099_v7  ;;  %v6725_v22 = vsub.f32 0.0, %v18182_v23  ;;  %12536 = vpow2.f32 %v6763_v17  ;;  %v6771_v30 = vmul.f32 1.442695, %v6721_v43 }
 0xc1c   : > { %v18213_v51 = vpop.eup %12518  ;;  %v18217_v9 = vadd.f32 %v18035_v26, %v18102_v4  ;;  %v6726_v25 = vsub.f32 0.0, %v18189_v55  ;;  %12538 = vpow2.f32 %v6765_v60  ;;  %v6773_v49 = vmul.f32 1.442695, %v6722_v20 }
 0xc1d   : > { %v18220_v8 = vpop.eup %12520  ;;  %v18224_v7 = vadd.f32 %v18035_v26, %v18109_v62  ;;  %v6727_v1 = vsub.f32 0.0, %v18196_v3  ;;  %12540 = vpow2.f32 %v6767_v19  ;;  %v6775_v57 = vmul.f32 1.442695, %v6723_v53 }
 0xc1e   : > { %v18227_v16 = vpop.eup %12522  ;;  %v18231_v4 = vadd.f32 %v18035_v26, %v18116_v46  ;;  %v6728_v50 = vsub.f32 0.0, %v18203_v13  ;;  %12542 = vpow2.f32 %v6769_v18  ;;  %v6777_v37 = vmul.f32 1.442695, %v6724_v0 }
 0xc1f   : > { %v18234_v43 = vpop.eup %12524  ;;  %v18238_v62 = vadd.f32 %v18035_v26, %v18123_v63  ;;  %v6729_v17 = vsub.f32 0.0, %v18210_v39  ;;  %12544 = vpow2.f32 %v6771_v30  ;;  %v6779_v20 = vmul.f32 1.442695, %v6725_v22 }
 0xc20   : > { %v18241_v60 = vpop.eup %12526  ;;  %v18245_v46 = vadd.f32 %v18035_v26, %v18130_v54  ;;  %v6730_v53 = vsub.f32 0.0, %v18217_v9  ;;  %12546 = vpow2.f32 %v6773_v49  ;;  %v6781_v19 = vmul.f32 1.442695, %v6726_v25 }
 0xc21   : > { %v18248_v0 = vpop.eup %12528  ;;  %v6731_v18 = vsub.f32 0.0, %v18224_v7  ;;  %12548 = vpow2.f32 %v6775_v57  ;;  %v6783_v63 = vmul.f32 1.442695, %v6727_v1  ;;  %v6732_v22 = vsub.f32 0.0, %v18231_v4 }
 0xc22   : > { %v18251_v31 = vpop.eup %12530  ;;  %12550 = vpow2.f32 %v6777_v37  ;;  %v6785_v30 = vmul.f32 1.442695, %v6728_v50  ;;  %v6733_v26 = vsub.f32 0.0, %v18238_v62  ;;  %v6787_v54 = vmul.f32 1.442695, %v6729_v17 }
 0xc23   : > { %v18254_v47 = vpop.eup %12532  ;;  %12552 = vpow2.f32 %v6779_v20  ;;  %v6734_v25 = vsub.f32 0.0, %v18245_v46  ;;  %v6789_v42 = vmul.f32 1.442695, %v6730_v53  ;;  %v6791_v1 = vmul.f32 1.442695, %v6731_v18 }
 0xc24   : > { %v18257_v49 = vpop.eup %12534  ;;  %12554 = vpow2.f32 %v6781_v19  ;;  %v6793_v50 = vmul.f32 1.442695, %v6732_v22  ;;  %v6795_v15 = vmul.f32 1.442695, %v6733_v26  ;;  %v6799_v53 = vadd.f32 1.0, %v18178_v52 }
 0xc25   : > { %v18260_v57 = vpop.eup %12536  ;;  %12556 = vpow2.f32 %v6783_v63  ;;  %v6797_v17 = vmul.f32 1.442695, %v6734_v25  ;;  %v6800_v18 = vadd.f32 1.0, %v18185_v2  ;;  %v6801_v22 = vadd.f32 1.0, %v18192_v14 }
 0xc26   : > { %v18262_v41 = vpop.eup %12538  ;;  %12558 = vpow2.f32 %v6785_v30  ;;  %v6802_v26 = vadd.f32 1.0, %v18199_v36 }
 0xc27   : > { %v18264_v37 = vpop.eup %12540  ;;  %12560 = vpow2.f32 %v6787_v54 }
 0xc28   : > { %v18266_v20 = vpop.eup %12542  ;;  %12562 = vpow2.f32 %v6789_v42  ;;  %v6803_v42 = vadd.f32 1.0, %v18206_v24 }
 0xc29   : > { %v12545_v34 = vpop.eup %12544  ;;  %12564 = vpow2.f32 %v6791_v1  ;;  %v6804_v1 = vadd.f32 1.0, %v18213_v51 }
 0xc2a   : > { %v12547_v19 = vpop.eup %12546  ;;  %12566 = vpow2.f32 %v6793_v50  ;;  %v6817_v50 = vadd.f32 1.0, %v12545_v34 }
 0xc2b   : > { %v12549_v63 = vpop.eup %12548  ;;  %12568 = vpow2.f32 %v6795_v15  ;;  %v6818_v11 = vadd.f32 1.0, %v12547_v19 }
 0xc2c   : > { %v12551_v30 = vpop.eup %12550  ;;  %12570 = vpow2.f32 %v6797_v17  ;;  %v6819_v14 = vadd.f32 1.0, %v12549_v63 }
 0xc2d   : > { %v12553_v54 = vpop.eup %12552  ;;  %12572 = vrcp.f32 %v6799_v53  ;;  %v6820_v56 = vadd.f32 1.0, %v12551_v30 }
 0xc2e   : > { %v12555_v25 = vpop.eup %12554  ;;  %12574 = vrcp.f32 %v6800_v18  ;;  %v6821_v28 = vadd.f32 1.0, %v12553_v54 }
 0xc2f   : > { %v12557_v52 = vpop.eup %12556  ;;  %12576 = vrcp.f32 %v6801_v22  ;;  %v6822_v53 = vadd.f32 1.0, %v12555_v25 }
 0xc30   : > { %v12559_v2 = vpop.eup %12558  ;;  %12578 = vrcp.f32 %v6802_v26  ;;  %v6823_v18 = vadd.f32 1.0, %v12557_v52 }
 0xc31   : > { %v12561_v15 = vpop.eup %12560  ;;  %12580 = vrcp.f32 %v6803_v42  ;;  %v6824_v22 = vadd.f32 1.0, %v12559_v2  ;;  %v6805_v2 = vadd.f32 1.0, %v18220_v8 }
 0xc32   : > { %v12563_v17 = vpop.eup %12562  ;;  %12582 = vrcp.f32 %v6804_v1  ;;  %v6825_v26 = vadd.f32 1.0, %v12561_v15 }
 0xc33   : > { %v12565_v36 = vpop.eup %12564  ;;  %12584 = vrcp.f32 %v6817_v50  ;;  %v6826_v42 = vadd.f32 1.0, %v12563_v17  ;;  %v6807_v17 = vadd.f32 1.0, %v18234_v43 }
 0xc34   : > { %v12567_v24 = vpop.eup %12566  ;;  %12586 = vrcp.f32 %v6818_v11  ;;  %v6827_v1 = vadd.f32 1.0, %v12565_v36  ;;  %v6808_v36 = vadd.f32 1.0, %v18241_v60 }
 0xc35   : > { %v12569_v51 = vpop.eup %12568  ;;  %12588 = vrcp.f32 %v6819_v14  ;;  %v6828_v50 = vadd.f32 1.0, %v12567_v24  ;;  %v6806_v14 = vadd.f32 1.0, %v18227_v16 }
 0xc36   : > { %v12571_v34 = vpop.eup %12570  ;;  %12590 = vrcp.f32 %v6820_v56  ;;  %v6829_v25 = vadd.f32 1.0, %v12569_v51  ;;  %v18286_v51 = vadd.f32 1.0, %v18251_v31 }
 0xc37   : > { %v12573_v19 = vpop.eup %12572  ;;  %12592 = vrcp.f32 %v6821_v28  ;;  %v6830_v56 = vadd.f32 1.0, %v12571_v34  ;;  %v18279_v28 = vsel %vm724_vm0, %v18023_v33, 0 }
 0xc38   : > { %v12575_v63 = vpop.eup %12574  ;;  %12594 = vrcp.f32 %v6822_v53  ;;  %v6809_v53 = vadd.f32 1.0, %v18248_v0 }
 0xc39   : > { %v18274_v30 = vpop.eup %12576  ;;  %12596 = vrcp.f32 %v6823_v18  ;;  %v18292_v18 = vadd.f32 1.0, %v18254_v47 }
 0xc3a   : > { %v12579_v54 = vpop.eup %12578  ;;  %12598 = vrcp.f32 %v6824_v22 }
 0xc3b   : > { %v12581_v11 = vpop.eup %12580  ;;  %12600 = vrcp.f32 %v6825_v26  ;;  %v18295_v16 = vmul.f32 %v12579_v54, %v18066_v45 }
 0xc3c   : > { %v12583_v52 = vpop.eup %12582  ;;  %12602 = vrcp.f32 %v6826_v42  ;;  %v18301_v31 = vmul.f32 %v12581_v11, %v18075_v35  ;;  %v18317_v35 = vmul.f32 %v12573_v19, %v18048_v10  ;;  %v22098_v11 = vld [vmem:[#allocation25_spill] sm:$0xff]  ;;  %v18331_v10 = vmul.f32 %v12575_v63, %v18054_v48  ;;  %v22100_v19 = vld [vmem:[#allocation26_spill] sm:$0xff] }
 0xc3d   : > { %v12585_v15 = vpop.eup %12584  ;;  %12604 = vrcp.f32 %v6827_v1  ;;  %v18309_v22 = vmul.f32 %v12583_v52, %v18085_v21  ;;  %v22097_v1 = vld [vmem:[#allocation24_spill] sm:$0xff]  ;;  %v6930_v52 = vrot.slane %v18295_v16, 7 }
 0xc3e   : > { %v12587_v24 = vpop.eup %12586  ;;  %12606 = vrcp.f32 %v6828_v50  ;;  %v18289_v8 = vmul.f32 %v12585_v15, %v18161_v29  ;;  %v22093_v29 = vld [vmem:[#allocation22_spill] sm:$0xff]  ;;  %22096 = vst [vmem:[#allocation432_spill] sm:$0xff] %v18317_v35  ;;  %22099 = vst [vmem:[#allocation431_spill] sm:$0xff] %v18331_v10  ;;  %v6931_v15 = vrot.slane %v18301_v31, 7 }
 0xc3f   : > { %v12589_v33 = vpop.eup %12588  ;;  %12608 = vrcp.f32 %v6829_v25  ;;  %v18298_v43 = vmul.f32 %v12587_v24, %v18165_v32  ;;  %22094 = vst [vmem:[#allocation433_spill] sm:$0xff] %v18309_v22  ;;  %v22095_v32 = vld [vmem:[#allocation23_spill] sm:$0xff]  ;;  %v20428_v48 = vrot.slane %v18309_v22, 7 }
 0xc40   : > { %v12591_v60 = vpop.eup %12590  ;;  %12610 = vrcp.f32 %v6830_v56  ;;  %v18304_v0 = vmul.f32 %v12589_v33, %v18170_v6  ;;  %v7060_v34 = vmul.f32 %v18289_v8, %v22093_v29  ;;  %v22101_v33 = vld [vmem:[#allocation27_spill] sm:$0xff]  ;;  %v6813_v29 = vadd.f32 1.0, %v18260_v57 }
 0xc41   : > { %v12593_v47 = vpop.eup %12592  ;;  %12612 = vrcp.f32 %v6805_v2  ;;  %v18312_v45 = vmul.f32 %v12591_v60, %v18175_v44  ;;  %v7061_v26 = vmul.f32 %v18298_v43, %v22095_v32  ;;  %v18358_v32 = vmul.f32 %v18274_v30, %v18060_v27 }
 0xc42   : > { %v12595_v42 = vpop.eup %12594  ;;  %12614 = vrcp.f32 %v6806_v14  ;;  %v18320_v6 = vmul.f32 %v12593_v47, %v18182_v23  ;;  %v7062_v54 = vmul.f32 %v18304_v0, %v22097_v1  ;;  %v18368_v57 = vsel %vm1500_vm5, %v6930_v52, %v6931_v15 }
 0xc43   : > { %v12597_v50 = vpop.eup %12596  ;;  %v18325_v21 = vmul.f32 %v12595_v42, %v18189_v55  ;;  %v7082_v44 = vpack.c.bf16 %v7061_v26, %v7060_v34  ;;  %v7063_v25 = vmul.f32 %v18312_v45, %v22098_v11  ;;  %12616 = vrcp.f32 %v6807_v17  ;;  %22102 = vst [vmem:[#allocation430_spill] sm:$0xff] %v18358_v32  ;;  %v22105_v42 = vld [vmem:[#allocation3_spill] sm:$0xff]  ;;  %v22109_v11 = vld [vmem:[#allocation29_spill] sm:$0xff] }
 0xc44   : > { %v12599_v2 = vpop.eup %12598  ;;  %v18334_v23 = vmul.f32 %v12597_v50, %v18196_v3  ;;  %v7064_v56 = vmul.f32 %v18320_v6, %v22100_v19  ;;  %v6812_v3 = vadd.f32 1.0, %v18257_v49  ;;  %12618 = vrcp.f32 %v6808_v36  ;;  %v22112_v19 = vld [vmem:[#allocation31_spill] sm:$0xff] }
 0xc45   : > { %v12601_v55 = vpop.eup %12600  ;;  %v18340_v14 = vmul.f32 %v12599_v2, %v18203_v13  ;;  %11404 = vmatprep.mubr.msk.bf16.mxu1 %vm6116_vm9, %v7082_v44  ;;  %v7083_v24 = vpack.c.bf16 %v7063_v25, %v7062_v54  ;;  %v7065_v60 = vmul.f32 %v18325_v21, %v22101_v33  ;;  %v18354_v13 = vld [vmem:[%s19817_s15 + $0x8] sm:$0xf]  ;;  %v7042_v1 = vmul.f32 %v18317_v35, %v22105_v42  ;;  %v22106_v54 = vld [vmem:[#allocation5_spill] sm:$0xff] }
 0xc46   : > { %v12603_v63 = vpop.eup %12602  ;;  %v18349_v34 = vmul.f32 %v12601_v55, %v18210_v39  ;;  %v7043_v27 = vmul.f32 %v18331_v10, %v22106_v54  ;;  %12620 = vrcp.f32 %v6809_v53  ;;  %v22113_v55 = vld [vmem:[#allocation198_spill] sm:$0xff]  ;;  %v22118_v54 = vld [vmem:[#allocation7_spill] sm:$0xff] }
 0xc47   : > { %v12605_v47 = vpop.eup %12604  ;;  %v18361_v26 = vmul.f32 %v12603_v63, %v18217_v9  ;;  %11405 = vmatmul.mubr.msk.bf16.vlgmr.msra.gmra.mrb[12].mxu1 %vm6116_vm9, %v7083_v24  ;;  %v7084_v49 = vpack.c.bf16 %v7065_v60, %v7064_v56  ;;  %v22107_v9 = vld [vmem:[#allocation28_spill] sm:$0xff]  ;;  %v7067_v36 = vmul.f32 %v18340_v14, %v22109_v11  ;;  %v18400_v24 = vmul.f32 %v18368_v57, %v22113_v55  ;;  %v22116_v60 = vld [vmem:[#allocation6_spill] sm:$0xff]  ;;  %v22119_v11 = vld [vmem:[#allocation199_spill] sm:$0xff] }
 0xc48   : > { %v12607_v17 = vpop.eup %12606  ;;  %11417 = vmatpush3.bf16.msra.mxu1 %v18279_v28  ;;  %v7066_v30 = vmul.f32 %v18334_v23, %v22107_v9  ;;  %v18389_v28 = vsel %vm1500_vm5, %v6931_v15, %v20428_v48  ;;  %12622 = vrcp.f32 %v18286_v51  ;;  %v7045_v9 = vmul.f32 %v18295_v16, %v22118_v54  ;;  %v22148_v54 = vld [vmem:[#allocation40_spill] sm:$0xff] }
 0xc49   : > { %22103 = vst [vmem:[#allocation441_spill] sm:$0xff] %v18361_v26  ;;  %v12609_v50 = vpop.eup %12608  ;;  %v18378_v44 = vmul.f32 %v12607_v17, %v18231_v4  ;;  %11408 = vmatprep.mubr.msk.bf16.mxu1 %vm6116_vm9, %v7084_v49  ;;  %12350 = vmatprep.subr.msk.bf16.mxu1 %vm724_vm0, %v18354_v13  ;;  %v22111_v4 = vld [vmem:[#allocation30_spill] sm:$0xff]  ;;  %v7069_v56 = vmul.f32 %v18361_v26, %v22112_v19  ;;  %22114 = vst [vmem:[#allocation334_spill] sm:$0xff] %v18400_v24  ;;  %12624 = vrcp.f32 %v18292_v18 }
 0xc4a   : > { %v12611_v25 = vpop.eup %12610  ;;  %v18392_v53 = vmul.f32 %v12609_v50, %v18238_v62  ;;  %v7068_v2 = vmul.f32 %v18349_v34, %v22111_v4  ;;  %v7044_v62 = vmul.f32 %v18358_v32, %v22116_v60  ;;  %v22117_v17 = vld [vmem:[#allocation2_spill] sm:$0xff]  ;;  %v18416_v51 = vmul.f32 %v18389_v28, %v22119_v11 }
 0xc4b   : > { %22108 = vst [vmem:[#allocation255_spill] sm:$0xff] %v18378_v44  ;;  %v12613_v33 = vpop.eup %12612  ;;  %v18404_v15 = vmul.f32 %v12611_v25, %v18245_v46  ;;  %v20429_v63 = vrot.slane %v18378_v44, 7  ;;  %v18419_v46 = vmul.f32 %v12605_v47, %v18224_v7  ;;  %v22122_v25 = vld [vmem:[#allocation4_spill] sm:$0xff]  ;;  %v7085_v19 = vpack.c.bf16 %v7067_v36, %v7066_v30 }
 0xc4c   : > { %22110 = vst [vmem:[#allocation333_spill] sm:$0xff] %v18392_v53  ;;  %v12615_v49 = vpop.eup %12614  ;;  %v7040_v42 = vmul.f32 %v18392_v53, %v22117_v17  ;;  %v6957_v50 = vrot.slane %v18392_v53, 7  ;;  %22120 = vst [vmem:[#allocation328_spill] sm:$0xff] %v18416_v51  ;;  %v6814_v60 = vadd.f32 1.0, %v18262_v41  ;;  %v7073_v17 = vpack.c.bf16 %v7043_v27, %v7042_v1  ;;  %v22125_v36 = vld [vmem:[#allocation32_spill] sm:$0xff] }
 0xc4d   : > { %22115 = vst [vmem:[#allocation254_spill] sm:$0xff] %v18404_v15  ;;  %22121 = vst [vmem:[#allocation336_spill] sm:$0xff] %v18419_v46  ;;  %v7041_v4 = vmul.f32 %v18404_v15, %v22122_v25  ;;  %v6958_v55 = vrot.slane %v18404_v15, 7  ;;  %v7086_v48 = vpack.c.bf16 %v7069_v56, %v7068_v2  ;;  %v12617_v41 = vpop.eup %12616  ;;  %12626 = vrcp.f32 %v6812_v3  ;;  %v22126_v56 = vld [vmem:[#allocation33_spill] sm:$0xff] }
 0xc4e   : > { %v18437_v47 = vsel %vm1500_vm5, %v20429_v63, %v6957_v50  ;;  %v18440_v1 = vmul.f32 %v12613_v33, %v18095_v40  ;;  %v6927_v18 = vrot.slane %v18317_v35, 7  ;;  %v18445_v27 = vmul.f32 %v12615_v49, %v18105_v5  ;;  %v12619_v3 = vpop.eup %12618  ;;  %v22127_v33 = vld [vmem:[#allocation34_spill] sm:$0xff]  ;;  %v22128_v5 = vld [vmem:[#allocation35_spill] sm:$0xff] }
 0xc4f   : > { %v7072_v11 = vpack.c.bf16 %v7041_v4, %v7040_v42  ;;  %11409 = vmatmul.mubr.msk.bf16.gmra.mrb[16].mxu1 %vm6116_vm9, %v7085_v19  ;;  %v18431_v7 = vsel %vm1500_vm5, %v6957_v50, %v6958_v55  ;;  %22124 = vst [vmem:[#allocation338_spill] sm:$0xff] %v18437_v47  ;;  %v7074_v30 = vpack.c.bf16 %v7045_v9, %v7044_v62  ;;  %12628 = vrcp.f32 %v6813_v29  ;;  %v22129_v9 = vld [vmem:[#allocation8_spill] sm:$0xff]  ;;  %v22130_v29 = vld [vmem:[#allocation9_spill] sm:$0xff] }
 0xc50   : > { %22123 = vst [vmem:[#allocation335_spill] sm:$0xff] %v18431_v7  ;;  %11412 = vmatprep.mubr.msk.bf16.mxu1 %vm6116_vm9, %v7086_v48  ;;  %v7070_v2 = vmul.f32 %v18419_v46, %v22125_v36  ;;  %v7071_v42 = vmul.f32 %v18378_v44, %v22126_v56  ;;  %v6928_v40 = vrot.slane %v18331_v10, 7  ;;  %v6991_v48 = vmul.f32 %v18437_v47, %v22127_v33  ;;  %v12621_v50 = vpop.eup %12620  ;;  %v22132_v56 = vld [vmem:[#allocation11_spill] sm:$0xff] }
 0xc51   : > { %11384 = vmatprep.mubr.msk.bf16.mxu0 %vm6116_vm9, %v7072_v11  ;;  %v6992_v49 = vmul.f32 %v18431_v7, %v22128_v5  ;;  %12630 = vrcp.f32 %v6814_v60  ;;  %v6929_v62 = vrot.slane %v18358_v32, 7  ;;  %v7046_v25 = vmul.f32 %v18301_v31, %v22129_v9  ;;  %v22131_v11 = vld [vmem:[#allocation10_spill] sm:$0xff] }
 0xc52   : > { %11385 = vmatmul.mubr.msk.bf16.vlgmr.msra.gmra.mrb[40].mxu0 %vm6116_vm9, %v7073_v17  ;;  %v7047_v4 = vmul.f32 %v18309_v22, %v22130_v29  ;;  %v12623_v19 = vpop.eup %12622  ;;  %v6815_v17 = vadd.f32 1.0, %v18264_v37  ;;  %v7048_v36 = vmul.f32 %v18440_v1, %v22131_v11  ;;  %v7049_v33 = vmul.f32 %v18445_v27, %v22132_v56 }
 0xc53   : > { %11388 = vmatprep.mubr.msk.bf16.mxu0 %vm6116_vm9, %v7074_v30  ;;  %v7087_v60 = vpack.c.bf16 %v7071_v42, %v7070_v2  ;;  %v6816_v30 = vadd.f32 1.0, %v18266_v20  ;;  %v18472_v5 = vsel %vm1500_vm5, %v6958_v55, %v6927_v18  ;;  %v7023_v9 = vpack.c.bf16 %v6992_v49, %v6991_v48  ;;  %v22135_v42 = vld [vmem:[#allocation36_spill] sm:$0xff] }
 0xc54   : > { %22133 = vst [vmem:[#allocation337_spill] sm:$0xff] %v18472_v5  ;;  %v18476_v29 = vsel %vm1500_vm5, %v6927_v18, %v6928_v40  ;;  %v18479_v37 = vmul.f32 %v12617_v41, %v18112_v38  ;;  %v18482_v11 = vmul.f32 %v12619_v3, %v18119_v59  ;;  %v18489_v20 = vsel %vm1500_vm5, %v6929_v62, %v6930_v52  ;;  %v12625_v41 = vpop.eup %12624  ;;  %v22136_v3 = vld [vmem:[#allocation37_spill] sm:$0xff] }
 0xc55   : > { %22134 = vst [vmem:[#allocation340_spill] sm:$0xff] %v18476_v29  ;;  %v18493_v55 = vsel %vm1500_vm5, %v6928_v40, %v6929_v62  ;;  %v18496_v18 = vmul.f32 %v12621_v50, %v18126_v58  ;;  %v18499_v38 = vmul.f32 %v12623_v19, %v18133_v12  ;;  %v7075_v59 = vpack.c.bf16 %v7047_v4, %v7046_v25  ;;  %v22137_v58 = vld [vmem:[#allocation38_spill] sm:$0xff]  ;;  %v22138_v12 = vld [vmem:[#allocation39_spill] sm:$0xff]  ;;  %v22139_v4 = vld [vmem:[#allocation12_spill] sm:$0xff] }
 0xc56   : > { %12632 = vrcp.f32 %v6815_v17  ;;  %v7076_v2 = vpack.c.bf16 %v7049_v33, %v7048_v36  ;;  %v6993_v52 = vmul.f32 %v18472_v5, %v22135_v42  ;;  %v6994_v48 = vmul.f32 %v18476_v29, %v22136_v3  ;;  %v22140_v17 = vld [vmem:[#allocation13_spill] sm:$0xff]  ;;  %v22141_v33 = vld [vmem:[#allocation14_spill] sm:$0xff] }
 0xc57   : > { %11413 = vmatmul.mubr.msk.bf16.gmra.mrb[20].mxu1 %vm6116_vm9, %v7087_v60  ;;  %v12627_v40 = vpop.eup %12626  ;;  %v6995_v49 = vmul.f32 %v18493_v55, %v22137_v58  ;;  %v6996_v50 = vmul.f32 %v18489_v20, %v22138_v12  ;;  %v6933_v62 = vrot.slane %v18440_v1, 7  ;;  %v6934_v25 = vrot.slane %v18445_v27, 7 }
 0xc58   : > { %11418 = vmatprep.mubr.msk.bf16.mxu1 %vm6116_vm9, %v7023_v9  ;;  %12634 = vrcp.f32 %v6816_v30  ;;  %v7050_v19 = vmul.f32 %v18479_v37, %v22139_v4  ;;  %v7051_v36 = vmul.f32 %v18482_v11, %v22140_v17  ;;  %v7052_v60 = vmul.f32 %v18496_v18, %v22141_v33  ;;  %v22142_v9 = vld [vmem:[#allocation15_spill] sm:$0xff] }
 0xc59   : > { %v12629_v56 = vpop.eup %12628  ;;  %v7024_v3 = vpack.c.bf16 %v6994_v48, %v6993_v52  ;;  %v7677_v30 = vsel %vm724_vm0, %v18354_v13, 0  ;;  %v7025_v58 = vpack.c.bf16 %v6996_v50, %v6995_v49  ;;  %v22144_v12 = vrot.slane %v18309_v22, 7  ;;  %v18537_v17 = vld [vmem:[%s19817_s15 + $0xc] sm:$0xf]  ;;  %v22145_v13 = vld [vmem:[#allocation438_spill] sm:$0xff]  ;;  %v22146_v50 = vld [vmem:[#allocation437_spill] sm:$0xff] }
 0xc5a   : > { %11389 = vmatmul.mubr.msk.bf16.gmra.mrb[44].mxu0 %vm6116_vm9, %v7075_v59  ;;  %v7053_v59 = vmul.f32 %v18499_v38, %v22142_v9  ;;  %v18540_v52 = vmul.f32 %v12625_v41, %v18137_v61  ;;  %v18543_v48 = vmul.f32 %v12627_v40, %v22145_v13  ;;  %v7077_v49 = vpack.c.bf16 %v7051_v36, %v7050_v19  ;;  %v22147_v9 = vld [vmem:[#allocation436_spill] sm:$0xff]  ;;  %v22149_v41 = vld [vmem:[#allocation41_spill] sm:$0xff]  ;;  %v22150_v13 = vld [vmem:[#allocation42_spill] sm:$0xff] }
 0xc5b   : > { %11392 = vmatprep.mubr.msk.bf16.mxu0 %vm6116_vm9, %v7076_v2  ;;  %v12631_v42 = vpop.eup %12630  ;;  %v18526_v2 = vsel %vm1500_vm5, %v6933_v62, %v6934_v25  ;;  %v18532_v4 = vsel %vm1500_vm5, %v22144_v12, %v6933_v62  ;;  %v18547_v33 = vmul.f32 %v12629_v56, %v22146_v50  ;;  %v6997_v61 = vmul.f32 %v18368_v57, %v22148_v54  ;;  %v22151_v36 = vld [vmem:[#allocation43_spill] sm:$0xff]  ;;  %v22153_v50 = vld [vmem:[#allocation17_spill] sm:$0xff] }
 0xc5c   : > { %22143 = vst [vmem:[#allocation339_spill] sm:$0xff] %v18526_v2  ;;  %v18550_v62 = vmul.f32 %v12631_v42, %v22147_v9  ;;  %v7078_v12 = vpack.c.bf16 %v7053_v59, %v7052_v60  ;;  %v6998_v40 = vmul.f32 %v18389_v28, %v22149_v41  ;;  %v6999_v19 = vmul.f32 %v18532_v4, %v22150_v13  ;;  %v22154_v41 = vld [vmem:[#allocation18_spill] sm:$0xff]  ;;  %v22155_v13 = vld [vmem:[#allocation19_spill] sm:$0xff] }
 0xc5d   : > { %v7000_v56 = vmul.f32 %v18526_v2, %v22151_v36  ;;  %v6935_v60 = vrot.slane %v18479_v37, 7  ;;  %v6936_v59 = vrot.slane %v18482_v11, 7  ;;  %v6937_v54 = vrot.slane %v18496_v18, 7 }
 0xc5e   : > { %v6938_v42 = vrot.slane %v18499_v38, 7  ;;  %v7055_v9 = vmul.f32 %v18543_v48, %v22153_v50  ;;  %v7057_v36 = vmul.f32 %v18550_v62, %v22155_v13  ;;  %v7026_v24 = vpack.c.bf16 %v6998_v40, %v6997_v61 }
 0xc5f   : > { %11419 = vmatmul.mubr.msk.bf16.vlgmr.msra.gmra.mrb[24].mxu1 %vm6116_vm9, %v7024_v3  ;;  %v7027_v51 = vpack.c.bf16 %v7000_v56, %v6999_v19  ;;  %v18579_v7 = vsel %vm1500_vm5, %v6935_v60, %v6936_v59  ;;  %v18592_v50 = vsel %vm1500_vm5, %v6936_v59, %v6937_v54  ;;  %v7519_v40 = vrot.slane %v18309_v22, 1  ;;  %v22160_v56 = vld [vmem:[#allocation435_spill] sm:$0xff] }
 0xc60   : > { %11451 = vmatpush3.bf16.msra.mxu1 %v7677_v30  ;;  %11422 = vmatprep.mubr.msk.bf16.mxu1 %vm6116_vm9, %v7025_v58  ;;  %v12633_v3 = vpop.eup %12632  ;;  %v22152_v30 = vld [vmem:[#allocation16_spill] sm:$0xff]  ;;  %22156 = vst [vmem:[#allocation342_spill] sm:$0xff] %v18579_v7  ;;  %22159 = vst [vmem:[#allocation279_spill] sm:$0xff] %v18592_v50  ;;  %v20438_v19 = vrot.slane %v18440_v1, 1 }
 0xc61   : > { %12351 = vmatprep.subr.msk.bf16.mxu1 %vm724_vm0, %v18537_v17  ;;  %v7054_v58 = vmul.f32 %v18540_v52, %v22152_v30  ;;  %v18587_v30 = vsel %vm1500_vm5, %v6937_v54, %v6938_v42  ;;  %v22163_v54 = vld [vmem:[#allocation45_spill] sm:$0xff] }
 0xc62   : > { %11393 = vmatmul.mubr.msk.bf16.gmra.mrb[48].mxu0 %vm6116_vm9, %v7077_v49  ;;  %v7056_v49 = vmul.f32 %v18547_v33, %v22154_v41  ;;  %v12635_v63 = vpop.eup %12634  ;;  %22158 = vst [vmem:[#allocation282_spill] sm:$0xff] %v18587_v30  ;;  %v18598_v41 = vmul.f32 %v12633_v3, %v22160_v56  ;;  %v7002_v61 = vmul.f32 %v18579_v7, %v22163_v54  ;;  %v22164_v3 = vrot.slane %v18301_v31, 1 }
 0xc63   : > { %11396 = vmatprep.mubr.msk.bf16.mxu0 %vm6116_vm9, %v7078_v12  ;;  %v18583_v12 = vsel %vm1500_vm5, %v6934_v25, %v6935_v60  ;;  %v22161_v25 = vld [vmem:[#allocation434_spill] sm:$0xff]  ;;  %v7079_v13 = vpack.c.bf16 %v7055_v9, %v7054_v58  ;;  %v18612_v22 = vsel %vm2474_vm6, %v7519_v40, %v20438_v19  ;;  %v22166_v9 = vld [vmem:[#allocation47_spill] sm:$0xff]  ;;  %v6940_v56 = vrot.slane %v18543_v48, 7  ;;  %v22172_v19 = vld [vmem:[#allocation21_spill] sm:$0xff] }
 0xc64   : > { %22157 = vst [vmem:[#allocation341_spill] sm:$0xff] %v18583_v12  ;;  %v18601_v60 = vmul.f32 %v12635_v63, %v22161_v25  ;;  %v7080_v47 = vpack.c.bf16 %v7057_v36, %v7056_v49  ;;  %v18618_v63 = vsel %vm2474_vm6, %v22164_v3, %v7519_v40  ;;  %v7004_v49 = vmul.f32 %v18587_v30, %v22166_v9  ;;  %v22167_v40 = vld [vmem:[#allocation274_spill] sm:$0xff] }
 0xc65   : > { %v6939_v36 = vrot.slane %v18540_v52, 7  ;;  %v6941_v25 = vrot.slane %v18547_v33, 7  ;;  %v18632_v54 = vmul.f32 %v18618_v63, %v22167_v40 }
 0xc66   : > { %v7059_v30 = vmul.f32 %v18601_v60, %v22172_v19 }
 0xc67   : > { %11423 = vmatmul.mubr.msk.bf16.gmra.mrb[28].mxu1 %vm6116_vm9, %v7026_v24  ;;  %v22162_v24 = vld [vmem:[#allocation44_spill] sm:$0xff]  ;;  %22168 = vst [vmem:[#allocation296_spill] sm:$0xff] %v18632_v54  ;;  %v18650_v40 = vsel %vm1500_vm5, %v6938_v42, %v6939_v36 }
 0xc68   : > { %11426 = vmatprep.mubr.msk.bf16.mxu1 %vm6116_vm9, %v7027_v51  ;;  %v7001_v59 = vmul.f32 %v18583_v12, %v22162_v24  ;;  %v22165_v51 = vld [vmem:[#allocation46_spill] sm:$0xff]  ;;  %v6942_v24 = vrot.slane %v18550_v62, 7  ;;  %v18646_v12 = vsel %vm1500_vm5, %v6939_v36, %v6940_v56  ;;  %22174 = vst [vmem:[#allocation318_spill] sm:$0xff] %v18650_v40 }
 0xc69   : > { %v7003_v58 = vmul.f32 %v18592_v50, %v22165_v51  ;;  %v22171_v51 = vld [vmem:[#allocation20_spill] sm:$0xff]  ;;  %22173 = vst [vmem:[#allocation323_spill] sm:$0xff] %v18646_v12 }
 0xc6a   : > { %11397 = vmatmul.mubr.msk.bf16.gmra.mrb[52].mxu0 %vm6116_vm9, %v7079_v13  ;;  %v22169_v13 = vld [vmem:[#allocation275_spill] sm:$0xff]  ;;  %v7058_v9 = vmul.f32 %v18598_v41, %v22171_v51  ;;  %v7028_v50 = vpack.c.bf16 %v7002_v61, %v7001_v59  ;;  %v18659_v61 = vsel %vm1500_vm5, %v6940_v56, %v6941_v25  ;;  %v22177_v59 = vld [vmem:[#allocation48_spill] sm:$0xff]  ;;  %v6943_v56 = vrot.slane %v18598_v41, 7 }
 0xc6b   : > { %11400 = vmatprep.mubr.msk.bf16.mxu0 %vm6116_vm9, %v7080_v47  ;;  %v18636_v3 = vmul.f32 %v18612_v22, %v22169_v13  ;;  %v7029_v7 = vpack.c.bf16 %v7004_v49, %v7003_v58  ;;  %v18655_v13 = vsel %vm1500_vm5, %v6941_v25, %v6942_v24  ;;  %22176 = vst [vmem:[#allocation260_spill] sm:$0xff] %v18659_v61  ;;  %v22178_v49 = vld [vmem:[#allocation49_spill] sm:$0xff]  ;;  %v22180_v51 = vld [vmem:[#allocation51_spill] sm:$0xff]  ;;  %v6946_v25 = vrot.slane %v18298_v43, 7 }
 0xc6c   : > { %22175 = vst [vmem:[#allocation343_spill] sm:$0xff] %v18655_v13  ;;  %v7081_v19 = vpack.c.bf16 %v7059_v30, %v7058_v9  ;;  %v7005_v58 = vmul.f32 %v18650_v40, %v22177_v59  ;;  %v7006_v42 = vmul.f32 %v18646_v12, %v22178_v49  ;;  %v7008_v47 = vmul.f32 %v18655_v13, %v22180_v51 }
 0xc6d   : > { %22170 = vst [vmem:[#allocation295_spill] sm:$0xff] %v18636_v3  ;;  %v6944_v30 = vrot.slane %v18601_v60, 7  ;;  %v6947_v3 = vrot.slane %v18304_v0, 7  ;;  %v6948_v13 = vrot.slane %v18312_v45, 7 }
 0xc6e   : > { %v7030_v9 = vpack.c.bf16 %v7006_v42, %v7005_v58  ;;  %v22186_v42 = vld [vmem:[#allocation53_spill] sm:$0xff] }
 0xc6f   : > { %11427 = vmatmul.mubr.msk.bf16.gmra.mrb[32].mxu1 %vm6116_vm9, %v7028_v50  ;;  %v22179_v50 = vld [vmem:[#allocation50_spill] sm:$0xff]  ;;  %v18677_v49 = vsel %vm1500_vm5, %v6943_v56, %v6944_v30 }
 0xc70   : > { %11430 = vmatprep.mubr.msk.bf16.mxu1 %vm6116_vm9, %v7029_v7  ;;  %v7007_v36 = vmul.f32 %v18659_v61, %v22179_v50  ;;  %v6945_v7 = vrot.slane %v18289_v8, 7  ;;  %22181 = vst [vmem:[#allocation345_spill] sm:$0xff] %v18677_v49 }
 0xc72   : > { %11401 = vmatmul.mubr.msk.bf16.gmra.mrb[56].mxu0 %vm6116_vm9, %v7081_v19  ;;  %v7031_v59 = vpack.c.bf16 %v7008_v47, %v7007_v36  ;;  %v18681_v19 = vsel %vm1500_vm5, %v6942_v24, %v6943_v56  ;;  %v18686_v50 = vsel %vm1500_vm5, %v6945_v7, %v6946_v25  ;;  %v18690_v51 = vsel %vm1500_vm5, %v6944_v30, %v6945_v7  ;;  %v22185_v47 = vld [vmem:[#allocation52_spill] sm:$0xff]  ;;  %v22187_v24 = vld [vmem:[#allocation54_spill] sm:$0xff] }
 0xc73   : > { %22182 = vst [vmem:[#allocation344_spill] sm:$0xff] %v18681_v19  ;;  %22183 = vst [vmem:[#allocation347_spill] sm:$0xff] %v18686_v50  ;;  %v7009_v58 = vmul.f32 %v18681_v19, %v22185_v47  ;;  %v7010_v36 = vmul.f32 %v18677_v49, %v22186_v42  ;;  %v7011_v56 = vmul.f32 %v18690_v51, %v22187_v24  ;;  %v6949_v30 = vrot.slane %v18320_v6, 7  ;;  %v22197_v49 = vld [vmem:[#allocation59_spill] sm:$0xff] }
 0xc74   : > { %22184 = vst [vmem:[#allocation346_spill] sm:$0xff] %v18690_v51  ;;  %v6950_v7 = vrot.slane %v18325_v21, 7  ;;  %v18707_v47 = vsel %vm1500_vm5, %v6947_v3, %v6948_v13  ;;  %v18711_v42 = vsel %vm1500_vm5, %v6946_v25, %v6947_v3  ;;  %v6951_v3 = vrot.slane %v18334_v23, 7  ;;  %v22195_v25 = vld [vmem:[#allocation104_spill] sm:$0xff] }
 0xc75   : > { %22189 = vst [vmem:[#allocation349_spill] sm:$0xff] %v18707_v47  ;;  %22190 = vst [vmem:[#allocation348_spill] sm:$0xff] %v18711_v42 }
 0xc76   : > { %v18716_v24 = vsel %vm1500_vm5, %v6949_v30, %v6950_v7 }
 0xc77   : > { %11431 = vmatmul.mubr.msk.bf16.gmra.mrb[36].mxu1 %vm6116_vm9, %v7030_v9  ;;  %v22188_v9 = vld [vmem:[#allocation55_spill] sm:$0xff]  ;;  %22191 = vst [vmem:[#allocation351_spill] sm:$0xff] %v18716_v24 }
 0xc78   : > { %11434 = vmatprep.mubr.msk.bf16.mxu1 %vm6116_vm9, %v7031_v59  ;;  %v7012_v54 = vmul.f32 %v18686_v50, %v22188_v9  ;;  %v7032_v59 = vpack.c.bf16 %v7010_v36, %v7009_v58  ;;  %v18720_v9 = vsel %vm1500_vm5, %v6948_v13, %v6949_v30  ;;  %v22194_v36 = vld [vmem:[#allocation57_spill] sm:$0xff]  ;;  %v22196_v50 = vld [vmem:[#allocation58_spill] sm:$0xff]  ;;  %v7016_v13 = vmul.f32 %v18716_v24, %v22197_v49 }
 0xc79   : > { %22192 = vst [vmem:[#allocation350_spill] sm:$0xff] %v18720_v9  ;;  %v7015_v51 = vmul.f32 %v18720_v9, %v22196_v50  ;;  %v22198_v30 = vld [vmem:[#allocation105_spill] sm:$0xff]  ;;  %v18751_v49 = vsel %vm1500_vm5, %v6950_v7, %v6951_v3  ;;  %v22204_v7 = vld [vmem:[#allocation63_spill] sm:$0xff]  ;;  %v6955_v24 = vrot.slane %v18419_v46, 7  ;;  %v7514_v9 = vrot.slane %v18317_v35, 1 }
 0xc7a   : > { %v7033_v61 = vpack.c.bf16 %v7012_v54, %v7011_v56  ;;  %v22193_v54 = vld [vmem:[#allocation56_spill] sm:$0xff]  ;;  %v7014_v56 = vmul.f32 %v18707_v47, %v22194_v36  ;;  %v6953_v36 = vrot.slane %v18349_v34, 7  ;;  %v6954_v47 = vrot.slane %v18361_v26, 7  ;;  %22199 = vst [vmem:[#allocation353_spill] sm:$0xff] %v18751_v49 }
 0xc7b   : > { %v7013_v58 = vmul.f32 %v18711_v42, %v22193_v54  ;;  %v18739_v54 = vmul.f32 %v18389_v28, %v22198_v30  ;;  %v7035_v42 = vpack.c.bf16 %v7016_v13, %v7015_v51  ;;  %v22202_v51 = vld [vmem:[#allocation60_spill] sm:$0xff] }
 0xc7c   : > { %v18756_v28 = vsel %vm1500_vm5, %v6953_v36, %v6954_v47 }
 0xc7d   : > { %22200 = vst [vmem:[#allocation352_spill] sm:$0xff] %v18756_v28 }
 0xc7f   : > { %11435 = vmatmul.mubr.msk.bf16.gmra.mrb[40].mxu1 %vm6116_vm9, %v7032_v59  ;;  %v18730_v59 = vmul.f32 %v18368_v57, %v22195_v25  ;;  %v7034_v25 = vpack.c.bf16 %v7014_v56, %v7013_v58  ;;  %v7017_v58 = vmul.f32 %v18751_v49, %v22202_v51  ;;  %v22203_v56 = vld [vmem:[#allocation61_spill] sm:$0xff]  ;;  %v22206_v51 = vrot.slane %v18378_v44, 7 }
 0xc80   : > { %11438 = vmatprep.mubr.msk.bf16.mxu1 %vm6116_vm9, %v7033_v61  ;;  %v6952_v61 = vrot.slane %v18340_v14, 7 }
 0xc82   : > { %v18747_v50 = vsel %vm1500_vm5, %v6951_v3, %v6952_v61  ;;  %v18760_v30 = vsel %vm1500_vm5, %v6952_v61, %v6953_v36  ;;  %v20469_v61 = vrot.slane %v18392_v53, 1 }
 0xc83   : > { %22201 = vst [vmem:[#allocation355_spill] sm:$0xff] %v18760_v30  ;;  %v7018_v13 = vmul.f32 %v18747_v50, %v22203_v56  ;;  %v7019_v3 = vmul.f32 %v18760_v30, %v22204_v7  ;;  %v18779_v56 = vsel %vm1500_vm5, %v6955_v24, %v22206_v51  ;;  %v18783_v7 = vsel %vm1500_vm5, %v6954_v47, %v6955_v24  ;;  %v22212_v51 = vld [vmem:[#allocation68_spill] sm:$0xff] }
 0xc84   : > { %22207 = vst [vmem:[#allocation354_spill] sm:$0xff] %v18783_v7  ;;  %v7515_v24 = vrot.slane %v18331_v10, 1 }
 0xc85   : > { %v7036_v36 = vpack.c.bf16 %v7018_v13, %v7017_v58  ;;  %v22210_v58 = vld [vmem:[#allocation66_spill] sm:$0xff] }
 0xc86   : > { %v7021_v13 = vmul.f32 %v18783_v7, %v22210_v58 }
 0xc87   : > { %11439 = vmatmul.mubr.msk.bf16.gmra.mrb[12].mxu1 %vm6116_vm9, %v7034_v25  ;;  %v22205_v25 = vld [vmem:[#allocation64_spill] sm:$0xff] }
 0xc88   : > { %11442 = vmatprep.mubr.msk.bf16.mxu1 %vm6116_vm9, %v7035_v42  ;;  %v7020_v57 = vmul.f32 %v18756_v28, %v22205_v25  ;;  %v7545_v42 = vrot.slane %v18404_v15, 1  ;;  %v22213_v15 = vld [vmem:[#allocation69_spill] sm:$0xff] }
 0xc8a   : > { %v7037_v19 = vpack.c.bf16 %v7020_v57, %v7019_v3  ;;  %v18790_v25 = vsel %vm2474_vm6, %v20469_v61, %v7545_v42  ;;  %v18794_v57 = vsel %vm2474_vm6, %v7545_v42, %v7514_v9  ;;  %v22211_v3 = vld [vmem:[#allocation67_spill] sm:$0xff]  ;;  %v7517_v42 = vrot.slane %v18295_v16, 1 }
 0xc8b   : > { %22208 = vst [vmem:[#allocation404_spill] sm:$0xff] %v18790_v25  ;;  %22209 = vst [vmem:[#allocation406_spill] sm:$0xff] %v18794_v57  ;;  %v7022_v47 = vmul.f32 %v18779_v56, %v22211_v3  ;;  %v7578_v61 = vmul.f32 %v18790_v25, %v22212_v51  ;;  %v7579_v35 = vmul.f32 %v18794_v57, %v22213_v15  ;;  %v22225_v57 = vld [vmem:[#allocation72_spill] sm:$0xff]  ;;  %v7521_v25 = vrot.slane %v18445_v27, 1 }
 0xc8d   : > { %v7038_v28 = vpack.c.bf16 %v7022_v47, %v7021_v13  ;;  %v7610_v58 = vpack.c.bf16 %v7579_v35, %v7578_v61  ;;  %v22221_v61 = vld [vmem:[#allocation70_spill] sm:$0xff] }
 0xc8f   : > { %11443 = vmatmul.mubr.msk.bf16.gmra.mrb[16].mxu1 %vm6116_vm9, %v7036_v36  ;;  %v7516_v36 = vrot.slane %v18358_v32, 1  ;;  %v22216_v32 = vrot.slane %v18301_v31, 1 }
 0xc90   : > { %11446 = vmatprep.mubr.msk.bf16.mxu1 %vm6116_vm9, %v7037_v19  ;;  %v18810_v19 = vsel %vm2474_vm6, %v7514_v9, %v7515_v24  ;;  %v22219_v9 = vld [vmem:[#allocation168_spill] sm:$0xff] }
 0xc91   : > { %22214 = vst [vmem:[#allocation449_spill] sm:$0xff] %v18810_v19  ;;  %v18814_v3 = vsel %vm2474_vm6, %v7515_v24, %v7516_v36  ;;  %v18821_v51 = vsel %vm2474_vm6, %v7517_v42, %v22216_v32  ;;  %v18825_v15 = vsel %vm2474_vm6, %v7516_v36, %v7517_v42  ;;  %v18830_v35 = vmul.f32 %v18618_v63, %v22219_v9  ;;  %v22223_v24 = vld [vmem:[#allocation169_spill] sm:$0xff] }
 0xc92   : > { %22215 = vst [vmem:[#allocation448_spill] sm:$0xff] %v18814_v3  ;;  %22217 = vst [vmem:[#allocation426_spill] sm:$0xff] %v18821_v51  ;;  %v7580_v13 = vmul.f32 %v18810_v19, %v22221_v61  ;;  %v18838_v32 = vmul.f32 %v18612_v22, %v22223_v24  ;;  %v7582_v36 = vmul.f32 %v18825_v15, %v22225_v57  ;;  %v22226_v42 = vld [vmem:[#allocation73_spill] sm:$0xff]  ;;  %v7522_v9 = vrot.slane %v18479_v37, 1  ;;  %v18853_v24 = vld [vmem:[%s19817_s15 + $0x10] sm:$0xf] }
 0xc93   : > { %22218 = vst [vmem:[#allocation450_spill] sm:$0xff] %v18825_v15  ;;  %22220 = vst [vmem:[#allocation424_spill] sm:$0xff] %v18830_v35  ;;  %v22233_v35 = vld [vmem:[#allocation77_spill] sm:$0xff] }
 0xc94   : > { %22224 = vst [vmem:[#allocation425_spill] sm:$0xff] %v18838_v32  ;;  %v18858_v57 = vsel %vm2474_vm6, %v7521_v25, %v7522_v9 }
 0xc95   : > { %22227 = vst [vmem:[#allocation422_spill] sm:$0xff] %v18858_v57  ;;  %v7587_v32 = vmul.f32 %v18858_v57, %v22233_v35 }
 0xc97   : > { %11447 = vmatmul.mubr.msk.bf16.gmra.mrb[20].mxu1 %vm6116_vm9, %v7038_v28  ;;  %v22222_v28 = vld [vmem:[#allocation71_spill] sm:$0xff] }
 0xc98   : > { %11452 = vmatprep.mubr.msk.bf16.mxu1 %vm6116_vm9, %v7610_v58  ;;  %v7581_v47 = vmul.f32 %v18814_v3, %v22222_v28  ;;  %v7583_v58 = vmul.f32 %v18821_v51, %v22226_v42  ;;  %v7971_v28 = vsel %vm724_vm0, %v18537_v17, 0  ;;  %v22228_v42 = vrot.slane %v18440_v1, 1  ;;  %v22230_v17 = vld [vmem:[#allocation74_spill] sm:$0xff] }
 0xc99   : > { %v7528_v51 = vrot.slane %v18547_v33, 1 }
 0xc9a   : > { %v7611_v19 = vpack.c.bf16 %v7581_v47, %v7580_v13  ;;  %v7612_v3 = vpack.c.bf16 %v7583_v58, %v7582_v36  ;;  %v18864_v13 = vsel %vm2474_vm6, %v22228_v42, %v7521_v25  ;;  %v7584_v47 = vmul.f32 %v18618_v63, %v22230_v17  ;;  %v22231_v36 = vld [vmem:[#allocation75_spill] sm:$0xff] }
 0xc9b   : > { %22229 = vst [vmem:[#allocation423_spill] sm:$0xff] %v18864_v13  ;;  %v7585_v58 = vmul.f32 %v18612_v22, %v22231_v36  ;;  %v7523_v25 = vrot.slane %v18482_v11, 1  ;;  %v7526_v63 = vrot.slane %v18540_v52, 1 }
 0xc9d   : > { %v7613_v42 = vpack.c.bf16 %v7585_v58, %v7584_v47  ;;  %v18887_v36 = vsel %vm2474_vm6, %v7522_v9, %v7523_v25  ;;  %v22239_v47 = vld [vmem:[#allocation79_spill] sm:$0xff]  ;;  %v22240_v9 = vld [vmem:[#allocation80_spill] sm:$0xff] }
 0xc9e   : > { %22235 = vst [vmem:[#allocation421_spill] sm:$0xff] %v18887_v36 }
 0xc9f   : > { %11453 = vmatmul.mubr.msk.bf16.vlgmr.msra.gmra.mrb[24].mxu1 %vm6116_vm9, %v7611_v19  ;;  %v22232_v19 = vld [vmem:[#allocation76_spill] sm:$0xff] }
 0xca0   : > { %11485 = vmatpush3.bf16.msra.mxu1 %v7971_v28  ;;  %11456 = vmatprep.mubr.msk.bf16.mxu1 %vm6116_vm9, %v7612_v3  ;;  %v7586_v61 = vmul.f32 %v18864_v13, %v22232_v19  ;;  %v7524_v28 = vrot.slane %v18496_v18, 1  ;;  %v7525_v3 = vrot.slane %v18499_v38, 1  ;;  %v7527_v13 = vrot.slane %v18543_v48, 1 }
 0xca1   : > { %12352 = vmatprep.subr.msk.bf16.mxu1 %vm724_vm0, %v18853_v24 }
 0xca2   : > { %v7614_v17 = vpack.c.bf16 %v7587_v32, %v7586_v61  ;;  %v18883_v22 = vsel %vm2474_vm6, %v7523_v25, %v7524_v28  ;;  %v18892_v35 = vsel %vm2474_vm6, %v7525_v3, %v7526_v63  ;;  %v18896_v19 = vsel %vm2474_vm6, %v7524_v28, %v7525_v3  ;;  %v22238_v32 = vld [vmem:[#allocation78_spill] sm:$0xff] }
 0xca3   : > { %22234 = vst [vmem:[#allocation420_spill] sm:$0xff] %v18883_v22  ;;  %22236 = vst [vmem:[#allocation308_spill] sm:$0xff] %v18892_v35  ;;  %v7588_v61 = vmul.f32 %v18887_v36, %v22238_v32  ;;  %v7589_v58 = vmul.f32 %v18883_v22, %v22239_v47  ;;  %v7590_v25 = vmul.f32 %v18896_v19, %v22240_v9  ;;  %v7529_v28 = vrot.slane %v18550_v62, 1 }
 0xca4   : > { %22237 = vst [vmem:[#allocation278_spill] sm:$0xff] %v18896_v19  ;;  %v7530_v3 = vrot.slane %v18598_v41, 1  ;;  %v18913_v32 = vsel %vm2474_vm6, %v7527_v13, %v7528_v51  ;;  %v18917_v47 = vsel %vm2474_vm6, %v7526_v63, %v7527_v13  ;;  %v22248_v13 = vld [vmem:[#allocation84_spill] sm:$0xff]  ;;  %v7531_v19 = vrot.slane %v18601_v60, 1 }
 0xca5   : > { %22242 = vst [vmem:[#allocation304_spill] sm:$0xff] %v18913_v32  ;;  %22243 = vst [vmem:[#allocation301_spill] sm:$0xff] %v18917_v47  ;;  %v7532_v22 = vrot.slane %v18289_v8, 1 }
 0xca6   : > { %v18922_v9 = vsel %vm2474_vm6, %v7529_v28, %v7530_v3 }
 0xca7   : > { %11457 = vmatmul.mubr.msk.bf16.gmra.mrb[28].mxu1 %vm6116_vm9, %v7613_v42  ;;  %v22241_v42 = vld [vmem:[#allocation81_spill] sm:$0xff]  ;;  %22244 = vst [vmem:[#allocation332_spill] sm:$0xff] %v18922_v9 }
 0xca8   : > { %11460 = vmatprep.mubr.msk.bf16.mxu1 %vm6116_vm9, %v7614_v17  ;;  %v7591_v57 = vmul.f32 %v18892_v35, %v22241_v42  ;;  %v7615_v17 = vpack.c.bf16 %v7589_v58, %v7588_v61  ;;  %v18926_v42 = vsel %vm2474_vm6, %v7528_v51, %v7529_v28  ;;  %v22247_v58 = vld [vmem:[#allocation83_spill] sm:$0xff]  ;;  %v7533_v51 = vrot.slane %v18298_v43, 1 }
 0xca9   : > { %22245 = vst [vmem:[#allocation257_spill] sm:$0xff] %v18926_v42  ;;  %v7594_v63 = vmul.f32 %v18926_v42, %v22248_v13  ;;  %v7535_v42 = vrot.slane %v18312_v45, 1 }
 0xcaa   : > { %v7616_v15 = vpack.c.bf16 %v7591_v57, %v7590_v25  ;;  %v22246_v57 = vld [vmem:[#allocation82_spill] sm:$0xff]  ;;  %v7593_v25 = vmul.f32 %v18913_v32, %v22247_v58  ;;  %v18947_v58 = vsel %vm2474_vm6, %v7530_v3, %v7531_v19  ;;  %v7536_v32 = vrot.slane %v18320_v6, 1 }
 0xcab   : > { %v7592_v61 = vmul.f32 %v18917_v47, %v22246_v57  ;;  %v18943_v57 = vsel %vm2474_vm6, %v7531_v19, %v7532_v22  ;;  %22251 = vst [vmem:[#allocation267_spill] sm:$0xff] %v18947_v58  ;;  %v22256_v19 = vld [vmem:[#allocation88_spill] sm:$0xff] }
 0xcac   : > { %22250 = vst [vmem:[#allocation419_spill] sm:$0xff] %v18943_v57 }
 0xcad   : > { %v7617_v28 = vpack.c.bf16 %v7593_v25, %v7592_v61  ;;  %v22255_v25 = vld [vmem:[#allocation87_spill] sm:$0xff] }
 0xcaf   : > { %11461 = vmatmul.mubr.msk.bf16.gmra.mrb[32].mxu1 %vm6116_vm9, %v7615_v17  ;;  %v22249_v17 = vld [vmem:[#allocation85_spill] sm:$0xff] }
 0xcb0   : > { %11464 = vmatprep.mubr.msk.bf16.mxu1 %vm6116_vm9, %v7616_v15  ;;  %v7595_v35 = vmul.f32 %v18922_v9, %v22249_v17  ;;  %v7534_v15 = vrot.slane %v18304_v0, 1  ;;  %v18956_v17 = vsel %vm2474_vm6, %v7532_v22, %v7533_v51  ;;  %v7537_v22 = vrot.slane %v18325_v21, 1 }
 0xcb1   : > { %22253 = vst [vmem:[#allocation418_spill] sm:$0xff] %v18956_v17  ;;  %v7598_v3 = vmul.f32 %v18956_v17, %v22256_v19  ;;  %v7539_v17 = vrot.slane %v18340_v14, 1 }
 0xcb2   : > { %v7618_v36 = vpack.c.bf16 %v7595_v35, %v7594_v63  ;;  %v18952_v13 = vsel %vm2474_vm6, %v7533_v51, %v7534_v15  ;;  %v22254_v35 = vld [vmem:[#allocation86_spill] sm:$0xff]  ;;  %v7597_v63 = vmul.f32 %v18943_v57, %v22255_v25  ;;  %v18977_v25 = vsel %vm2474_vm6, %v7534_v15, %v7535_v42 }
 0xcb3   : > { %22252 = vst [vmem:[#allocation417_spill] sm:$0xff] %v18952_v13  ;;  %v7596_v61 = vmul.f32 %v18947_v58, %v22254_v35  ;;  %v18973_v35 = vsel %vm2474_vm6, %v7535_v42, %v7536_v32  ;;  %22259 = vst [vmem:[#allocation416_spill] sm:$0xff] %v18977_v25  ;;  %v22264_v42 = vld [vmem:[#allocation92_spill] sm:$0xff]  ;;  %v7540_v57 = vrot.slane %v18349_v34, 1 }
 0xcb4   : > { %22258 = vst [vmem:[#allocation415_spill] sm:$0xff] %v18973_v35 }
 0xcb5   : > { %v7619_v51 = vpack.c.bf16 %v7597_v63, %v7596_v61  ;;  %v22263_v63 = vld [vmem:[#allocation91_spill] sm:$0xff] }
 0xcb7   : > { %11465 = vmatmul.mubr.msk.bf16.gmra.mrb[36].mxu1 %vm6116_vm9, %v7617_v28  ;;  %v22257_v28 = vld [vmem:[#allocation89_spill] sm:$0xff] }
 0xcb8   : > { %11468 = vmatprep.mubr.msk.bf16.mxu1 %vm6116_vm9, %v7618_v36  ;;  %v7599_v9 = vmul.f32 %v18952_v13, %v22257_v28  ;;  %v7538_v36 = vrot.slane %v18334_v23, 1  ;;  %v18986_v28 = vsel %vm2474_vm6, %v7536_v32, %v7537_v22  ;;  %v7541_v32 = vrot.slane %v18361_v26, 1 }
 0xcb9   : > { %22261 = vst [vmem:[#allocation414_spill] sm:$0xff] %v18986_v28  ;;  %v7602_v15 = vmul.f32 %v18986_v28, %v22264_v42  ;;  %v7543_v28 = vrot.slane %v18378_v44, 1 }
 0xcba   : > { %v7620_v47 = vpack.c.bf16 %v7599_v9, %v7598_v3  ;;  %v18982_v19 = vsel %vm2474_vm6, %v7537_v22, %v7538_v36  ;;  %v22262_v9 = vld [vmem:[#allocation90_spill] sm:$0xff]  ;;  %v7601_v3 = vmul.f32 %v18973_v35, %v22263_v63  ;;  %v19007_v63 = vsel %vm2474_vm6, %v7538_v36, %v7539_v17 }
 0xcbb   : > { %22260 = vst [vmem:[#allocation413_spill] sm:$0xff] %v18982_v19  ;;  %v7600_v61 = vmul.f32 %v18977_v25, %v22262_v9  ;;  %v19003_v9 = vsel %vm2474_vm6, %v7539_v17, %v7540_v57  ;;  %v22269_v17 = vld [vmem:[#allocation96_spill] sm:$0xff] }
 0xcbd   : > { %v7621_v22 = vpack.c.bf16 %v7601_v3, %v7600_v61  ;;  %v22268_v3 = vld [vmem:[#allocation95_spill] sm:$0xff] }
 0xcbf   : > { %11469 = vmatmul.mubr.msk.bf16.gmra.mrb[40].mxu1 %vm6116_vm9, %v7619_v51  ;;  %v22265_v51 = vld [vmem:[#allocation93_spill] sm:$0xff] }
 0xcc0   : > { %11472 = vmatprep.mubr.msk.bf16.mxu1 %vm6116_vm9, %v7620_v47  ;;  %v7603_v13 = vmul.f32 %v18982_v19, %v22265_v51  ;;  %v7542_v47 = vrot.slane %v18419_v46, 1  ;;  %v19016_v51 = vsel %vm2474_vm6, %v7540_v57, %v7541_v32  ;;  %v22271_v57 = vrot.slane %v18392_v53, 1 }
 0xcc1   : > { %v7606_v36 = vmul.f32 %v19016_v51, %v22269_v17  ;;  %v22274_v17 = vld [vmem:[#allocation99_spill] sm:$0xff] }
 0xcc2   : > { %v7622_v58 = vpack.c.bf16 %v7603_v13, %v7602_v15  ;;  %v19012_v42 = vsel %vm2474_vm6, %v7541_v32, %v7542_v47  ;;  %v22267_v13 = vld [vmem:[#allocation94_spill] sm:$0xff]  ;;  %v7605_v15 = vmul.f32 %v19003_v9, %v22268_v3  ;;  %v19036_v32 = vsel %vm2474_vm6, %v7542_v47, %v7543_v28 }
 0xcc3   : > { %22266 = vst [vmem:[#allocation411_spill] sm:$0xff] %v19012_v42  ;;  %v7604_v61 = vmul.f32 %v19007_v63, %v22267_v13  ;;  %22272 = vst [vmem:[#allocation412_spill] sm:$0xff] %v19036_v32  ;;  %v22273_v13 = vld [vmem:[#allocation98_spill] sm:$0xff] }
 0xcc4   : > { %v7608_v3 = vmul.f32 %v19036_v32, %v22273_v13 }
 0xcc5   : > { %v7623_v35 = vpack.c.bf16 %v7605_v15, %v7604_v61  ;;  %v22275_v61 = vld [vmem:[#allocation100_spill] sm:$0xff] }
 0xcc6   : > { %v7872_v15 = vmul.f32 %v18472_v5, %v22275_v61  ;;  %v19059_v61 = vld [vmem:[%s19817_s15 + $0x14] sm:$0xf] }
 0xcc7   : > { %11473 = vmatmul.mubr.msk.bf16.gmra.mrb[12].mxu1 %vm6116_vm9, %v7621_v22  ;;  %v22270_v22 = vld [vmem:[#allocation97_spill] sm:$0xff] }
 0xcc8   : > { %11476 = vmatprep.mubr.msk.bf16.mxu1 %vm6116_vm9, %v7622_v58  ;;  %v7607_v19 = vmul.f32 %v19012_v42, %v22270_v22  ;;  %v19032_v58 = vsel %vm2474_vm6, %v7543_v28, %v22271_v57  ;;  %v22278_v28 = vld [vmem:[#allocation103_spill] sm:$0xff] }
 0xcc9   : > { %v7875_v47 = vmul.f32 %v18489_v20, %v22278_v28 }
 0xcca   : > { %v7624_v25 = vpack.c.bf16 %v7607_v19, %v7606_v36  ;;  %v7609_v19 = vmul.f32 %v19032_v58, %v22274_v17  ;;  %v22276_v36 = vld [vmem:[#allocation101_spill] sm:$0xff]  ;;  %v8265_v17 = vsel %vm724_vm0, %v18853_v24, 0  ;;  %v22282_v24 = vld [vmem:[#allocation108_spill] sm:$0xff] }
 0xccb   : > { %v7873_v22 = vmul.f32 %v18476_v29, %v22276_v36  ;;  %v22281_v36 = vld [vmem:[#allocation107_spill] sm:$0xff]  ;;  %v22290_v29 = vld [vmem:[#allocation112_spill] sm:$0xff] }
 0xccc   : > { %v7625_v57 = vpack.c.bf16 %v7609_v19, %v7608_v3  ;;  %v22279_v3 = vpack.c.bf16 %v18739_v54, %v18730_v59  ;;  %v22280_v19 = vld [vmem:[#allocation106_spill] sm:$0xff]  ;;  %v22287_v54 = vld [vmem:[#allocation279_spill] sm:$0xff]  ;;  %v7884_v5 = vmul.f32 %v18650_v40, %v22290_v29  ;;  %v22299_v29 = vld [vmem:[#allocation345_spill] sm:$0xff] }
 0xccd   : > { %v7904_v39 = vpack.c.bf16 %v7873_v22, %v7872_v15  ;;  %v7878_v15 = vmul.f32 %v18532_v4, %v22280_v19  ;;  %v7879_v22 = vmul.f32 %v18526_v2, %v22281_v36  ;;  %v22286_v59 = vld [vmem:[#allocation110_spill] sm:$0xff]  ;;  %v22291_v2 = vld [vmem:[#allocation113_spill] sm:$0xff] }
 0xcce   : > { %v22289_v19 = vld [vmem:[#allocation282_spill] sm:$0xff] }
 0xccf   : > { %11477 = vmatmul.mubr.msk.bf16.gmra.mrb[16].mxu1 %vm6116_vm9, %v7623_v35  ;;  %v22277_v35 = vld [vmem:[#allocation102_spill] sm:$0xff] }
 0xcd0   : > { %11480 = vmatprep.mubr.msk.bf16.mxu1 %vm6116_vm9, %v7624_v25  ;;  %v7874_v25 = vmul.f32 %v18493_v55, %v22277_v35  ;;  %v22284_v35 = vld [vmem:[#allocation109_spill] sm:$0xff] }
 0xcd2   : > { %v7905_v13 = vpack.c.bf16 %v7875_v47, %v7874_v25  ;;  %v22285_v25 = vld [vmem:[#allocation342_spill] sm:$0xff]  ;;  %v7907_v47 = vpack.c.bf16 %v7879_v22, %v7878_v15  ;;  %v22293_v22 = vld [vmem:[#allocation260_spill] sm:$0xff] }
 0xcd3   : > { %v7881_v28 = vmul.f32 %v22285_v25, %v22284_v35  ;;  %v22292_v15 = vld [vmem:[#allocation114_spill] sm:$0xff] }
 0xcd7   : > { %11481 = vmatmul.mubr.msk.bf16.gmra.mrb[20].mxu1 %vm6116_vm9, %v7625_v57  ;;  %v22283_v57 = vld [vmem:[#allocation341_spill] sm:$0xff] }
 0xcd8   : > { %11486 = vmatprep.mubr.msk.bf16.mxu1 %vm6116_vm9, %v7904_v39  ;;  %v7880_v39 = vmul.f32 %v22283_v57, %v22282_v24  ;;  %v7885_v24 = vmul.f32 %v18646_v12, %v22291_v2 }
 0xcda   : > { %v7910_v35 = vpack.c.bf16 %v7885_v24, %v7884_v5  ;;  %v22300_v5 = vld [vmem:[#allocation118_spill] sm:$0xff]  ;;  %v22303_v24 = vld [vmem:[#allocation347_spill] sm:$0xff] }
 0xcdf   : > { %11487 = vmatmul.mubr.msk.bf16.vlgmr.msra.gmra.mrb[24].mxu1 %vm6116_vm9, %v7905_v13  ;;  %v7908_v13 = vpack.c.bf16 %v7881_v28, %v7880_v39  ;;  %v7886_v39 = vmul.f32 %v22293_v22, %v22292_v15  ;;  %v22294_v28 = vld [vmem:[#allocation115_spill] sm:$0xff]  ;;  %v22304_v15 = vld [vmem:[#allocation120_spill] sm:$0xff]  ;;  %v22306_v22 = vld [vmem:[#allocation121_spill] sm:$0xff] }
 0xce0   : > { %11519 = vmatpush3.bf16.msra.mxu1 %v8265_v17  ;;  %11490 = vmatprep.mubr.msk.bf16.mxu1 %vm6116_vm9, %v22279_v3  ;;  %v7882_v17 = vmul.f32 %v22287_v54, %v22286_v59  ;;  %v22288_v3 = vld [vmem:[#allocation111_spill] sm:$0xff]  ;;  %v22296_v59 = vld [vmem:[#allocation116_spill] sm:$0xff]  ;;  %v22298_v54 = vld [vmem:[#allocation117_spill] sm:$0xff] }
 0xce1   : > { %12353 = vmatprep.subr.msk.bf16.mxu1 %vm724_vm0, %v19059_v61  ;;  %v7883_v36 = vmul.f32 %v22289_v19, %v22288_v3  ;;  %v22297_v3 = vld [vmem:[#allocation344_spill] sm:$0xff]  ;;  %v7889_v40 = vmul.f32 %v22299_v29, %v22298_v54 }
 0xce2   : > { %v7888_v19 = vmul.f32 %v22297_v3, %v22296_v59  ;;  %v22307_v59 = vld [vmem:[#allocation349_spill] sm:$0xff] }
 0xce3   : > { %v7909_v57 = vpack.c.bf16 %v7883_v36, %v7882_v17  ;;  %v22302_v36 = vld [vmem:[#allocation119_spill] sm:$0xff]  ;;  %v7893_v3 = vmul.f32 %v22307_v59, %v22306_v22 }
 0xce4   : > { %v7912_v2 = vpack.c.bf16 %v7889_v40, %v7888_v19  ;;  %v22308_v40 = vld [vmem:[#allocation122_spill] sm:$0xff] }
 0xce7   : > { %11491 = vmatmul.mubr.msk.bf16.gmra.mrb[28].mxu1 %vm6116_vm9, %v7907_v47  ;;  %v22295_v47 = vld [vmem:[#allocation343_spill] sm:$0xff] }
 0xce8   : > { %11494 = vmatprep.mubr.msk.bf16.mxu1 %vm6116_vm9, %v7908_v13  ;;  %v7887_v13 = vmul.f32 %v22295_v47, %v22294_v28  ;;  %v22305_v28 = vld [vmem:[#allocation348_spill] sm:$0xff] }
 0xce9   : > { %v7892_v47 = vmul.f32 %v22305_v28, %v22304_v15 }
 0xcea   : > { %v7911_v25 = vpack.c.bf16 %v7887_v13, %v7886_v39  ;;  %v22310_v39 = vld [vmem:[#allocation123_spill] sm:$0xff] }
 0xceb   : > { %v7914_v54 = vpack.c.bf16 %v7893_v3, %v7892_v47  ;;  %v22311_v13 = vld [vmem:[#allocation351_spill] sm:$0xff] }
 0xcec   : > { %v22315_v3 = vld [vmem:[#allocation127_spill] sm:$0xff] }
 0xcef   : > { %11495 = vmatmul.mubr.msk.bf16.gmra.mrb[32].mxu1 %vm6116_vm9, %v7909_v57  ;;  %v22301_v57 = vld [vmem:[#allocation346_spill] sm:$0xff] }
 0xcf0   : > { %11498 = vmatprep.mubr.msk.bf16.mxu1 %vm6116_vm9, %v7910_v35  ;;  %v7890_v17 = vmul.f32 %v22301_v57, %v22300_v5  ;;  %v7891_v35 = vmul.f32 %v22303_v24, %v22302_v36  ;;  %v22312_v5 = vld [vmem:[#allocation124_spill] sm:$0xff]  ;;  %v22313_v24 = vld [vmem:[#allocation125_spill] sm:$0xff] }
 0xcf1   : > { %v7896_v36 = vmul.f32 %v18751_v49, %v22312_v5  ;;  %v7897_v15 = vmul.f32 %v18747_v50, %v22313_v24 }
 0xcf2   : > { %v7913_v12 = vpack.c.bf16 %v7891_v35, %v7890_v17  ;;  %v22316_v17 = vld [vmem:[#allocation352_spill] sm:$0xff] }
 0xcf3   : > { %v7916_v22 = vpack.c.bf16 %v7897_v15, %v7896_v36  ;;  %v7899_v35 = vmul.f32 %v22316_v17, %v22315_v3  ;;  %v22321_v36 = vld [vmem:[#allocation131_spill] sm:$0xff]  ;;  %v22324_v3 = vld [vmem:[#allocation432_spill] sm:$0xff] }
 0xcf4   : > { %v22322_v15 = vld [vmem:[#allocation335_spill] sm:$0xff] }
 0xcf7   : > { %11499 = vmatmul.mubr.msk.bf16.gmra.mrb[36].mxu1 %vm6116_vm9, %v7911_v25  ;;  %v22309_v25 = vld [vmem:[#allocation350_spill] sm:$0xff] }
 0xcf8   : > { %11502 = vmatprep.mubr.msk.bf16.mxu1 %vm6116_vm9, %v7912_v2  ;;  %v7894_v19 = vmul.f32 %v22309_v25, %v22308_v40  ;;  %v7895_v2 = vmul.f32 %v22311_v13, %v22310_v39  ;;  %v22318_v39 = vld [vmem:[#allocation129_spill] sm:$0xff] }
 0xcf9   : > { %v7901_v5 = vmul.f32 %v18779_v56, %v22318_v39 }
 0xcfa   : > { %v7915_v28 = vpack.c.bf16 %v7895_v2, %v7894_v19  ;;  %v22320_v19 = vld [vmem:[#allocation338_spill] sm:$0xff] }
 0xcff   : > { %11503 = vmatmul.mubr.msk.bf16.gmra.mrb[40].mxu1 %vm6116_vm9, %v7913_v12  ;;  %v22314_v12 = vld [vmem:[#allocation126_spill] sm:$0xff] }
 0xd00   : > { %11506 = vmatprep.mubr.msk.bf16.mxu1 %vm6116_vm9, %v7914_v54  ;;  %v7898_v47 = vmul.f32 %v18760_v30, %v22314_v12  ;;  %v22317_v54 = vld [vmem:[#allocation128_spill] sm:$0xff]  ;;  %v22325_v30 = vld [vmem:[#allocation133_spill] sm:$0xff] }
 0xd01   : > { %v7900_v40 = vmul.f32 %v18783_v7, %v22317_v54  ;;  %v22323_v12 = vld [vmem:[#allocation132_spill] sm:$0xff]  ;;  %v8167_v54 = vmul.f32 %v18331_v10, %v22325_v30  ;;  %v8559_v30 = vsel %vm724_vm0, %v19059_v61, 0  ;;  %v22381_v10 = vld [vmem:[#allocation165_spill] sm:$0xff] }
 0xd02   : > { %v7917_v49 = vpack.c.bf16 %v7899_v35, %v7898_v47  ;;  %v8166_v17 = vmul.f32 %v22324_v3, %v22323_v12  ;;  %v22327_v47 = vld [vmem:[#allocation430_spill] sm:$0xff]  ;;  %v22331_v12 = vld [vmem:[#allocation433_spill] sm:$0xff]  ;;  %v22334_v61 = vld [vmem:[#allocation140_spill] sm:$0xff] }
 0xd03   : > { %v7918_v24 = vpack.c.bf16 %v7901_v5, %v7900_v40  ;;  %v22328_v40 = vld [vmem:[#allocation135_spill] sm:$0xff] }
 0xd04   : > { %v8198_v39 = vpack.c.bf16 %v8167_v54, %v8166_v17  ;;  %v8169_v5 = vmul.f32 %v18295_v16, %v22328_v40  ;;  %v22333_v54 = vld [vmem:[#allocation139_spill] sm:$0xff] }
 0xd07   : > { %11507 = vmatmul.mubr.msk.bf16.gmra.mrb[12].mxu1 %vm6116_vm9, %v7915_v28  ;;  %v22319_v28 = vld [vmem:[#allocation130_spill] sm:$0xff] }
 0xd08   : > { %11510 = vmatprep.mubr.msk.bf16.mxu1 %vm6116_vm9, %v7916_v22  ;;  %v7902_v2 = vmul.f32 %v22320_v19, %v22319_v28  ;;  %v7903_v22 = vmul.f32 %v22322_v15, %v22321_v36  ;;  %v22330_v36 = vld [vmem:[#allocation137_spill] sm:$0xff] }
 0xd09   : > { %v8171_v3 = vmul.f32 %v22331_v12, %v22330_v36 }
 0xd0a   : > { %v7919_v7 = vpack.c.bf16 %v7903_v22, %v7902_v2  ;;  %v22332_v2 = vld [vmem:[#allocation138_spill] sm:$0xff] }
 0xd0b   : > { %v8172_v22 = vmul.f32 %v18440_v1, %v22332_v2  ;;  %v22341_v2 = vld [vmem:[#allocation143_spill] sm:$0xff] }
 0xd0f   : > { %11511 = vmatmul.mubr.msk.bf16.gmra.mrb[16].mxu1 %vm6116_vm9, %v7917_v49  ;;  %v22326_v49 = vld [vmem:[#allocation134_spill] sm:$0xff] }
 0xd10   : > { %11514 = vmatprep.mubr.msk.bf16.mxu1 %vm6116_vm9, %v7918_v24  ;;  %v8168_v35 = vmul.f32 %v22327_v47, %v22326_v49  ;;  %v22329_v24 = vld [vmem:[#allocation136_spill] sm:$0xff]  ;;  %v22335_v49 = vld [vmem:[#allocation141_spill] sm:$0xff] }
 0xd11   : > { %v8170_v28 = vmul.f32 %v18301_v31, %v22329_v24 }
 0xd12   : > { %v8199_v15 = vpack.c.bf16 %v8169_v5, %v8168_v35  ;;  %v8175_v35 = vmul.f32 %v18482_v11, %v22335_v49 }
 0xd13   : > { %v8200_v17 = vpack.c.bf16 %v8171_v3, %v8170_v28  ;;  %v8174_v3 = vmul.f32 %v18479_v37, %v22334_v61  ;;  %v22342_v61 = vld [vmem:[#allocation144_spill] sm:$0xff] }
 0xd15   : > { %v8202_v24 = vpack.c.bf16 %v8175_v35, %v8174_v3 }
 0xd17   : > { %11515 = vmatmul.mubr.msk.bf16.gmra.mrb[20].mxu1 %vm6116_vm9, %v7919_v7  ;;  %v19151_v7 = vld [vmem:[%s19817_s15 + $0x18] sm:$0xf] }
 0xd18   : > { %11520 = vmatprep.mubr.msk.bf16.mxu1 %vm6116_vm9, %v8198_v39  ;;  %v8173_v39 = vmul.f32 %v18445_v27, %v22333_v54  ;;  %v8177_v54 = vmul.f32 %v18499_v38, %v22341_v2 }
 0xd1f   : > { %11521 = vmatmul.mubr.msk.bf16.vlgmr.msra.gmra.mrb[24].mxu1 %vm6116_vm9, %v8199_v15  ;;  %v8201_v15 = vpack.c.bf16 %v8173_v39, %v8172_v22  ;;  %v8178_v22 = vmul.f32 %v18540_v52, %v22342_v61  ;;  %v22343_v39 = vld [vmem:[#allocation145_spill] sm:$0xff]  ;;  %v22349_v61 = vld [vmem:[#allocation147_spill] sm:$0xff] }
 0xd20   : > { %11553 = vmatpush3.bf16.msra.mxu1 %v8559_v30  ;;  %11524 = vmatprep.mubr.msk.bf16.mxu1 %vm6116_vm9, %v8200_v17  ;;  %v22340_v30 = vld [vmem:[#allocation142_spill] sm:$0xff]  ;;  %v8179_v3 = vmul.f32 %v18543_v48, %v22343_v39  ;;  %v8181_v39 = vmul.f32 %v18550_v62, %v22349_v61  ;;  %v22357_v61 = vld [vmem:[#allocation151_spill] sm:$0xff] }
 0xd21   : > { %12354 = vmatprep.subr.msk.bf16.mxu1 %vm724_vm0, %v19151_v7  ;;  %v8176_v17 = vmul.f32 %v18496_v18, %v22340_v30  ;;  %v22348_v30 = vld [vmem:[#allocation146_spill] sm:$0xff] }
 0xd22   : > { %v8180_v2 = vmul.f32 %v18547_v33, %v22348_v30  ;;  %v22356_v30 = vld [vmem:[#allocation150_spill] sm:$0xff] }
 0xd23   : > { %v8203_v35 = vpack.c.bf16 %v8177_v54, %v8176_v17  ;;  %v22351_v54 = vld [vmem:[#allocation149_spill] sm:$0xff] }
 0xd25   : > { %v19165_v40 = vpop.f32.mrb[40].mxu0 }
 0xd26   : > { %22336 = vst [vmem:[#allocation409_spill] sm:$0xff] %v19165_v40  ;;  %v19167_v5 = vpop.f32.mrb[41].mxu0 }
 0xd27   : > { %22337 = vst [vmem:[#allocation410_spill] sm:$0xff] %v19167_v5  ;;  %v19169_v28 = vpop.f32.mrb[42].mxu0  ;;  %11525 = vmatmul.mubr.msk.bf16.gmra.mrb[28].mxu1 %vm6116_vm9, %v8201_v15  ;;  %v8204_v5 = vpack.c.bf16 %v8179_v3, %v8178_v22  ;;  %v8183_v22 = vmul.f32 %v18601_v60, %v22351_v54  ;;  %v8185_v54 = vmul.f32 %v18298_v43, %v22357_v61  ;;  %v22365_v61 = vld [vmem:[#allocation155_spill] sm:$0xff] }
 0xd28   : > { %22338 = vst [vmem:[#allocation407_spill] sm:$0xff] %v19169_v28  ;;  %v19172_v36 = vpop.f32.mrb[43].mxu0  ;;  %11528 = vmatprep.mubr.msk.bf16.mxu1 %vm6116_vm9, %v8202_v24 }
 0xd29   : > { %22339 = vst [vmem:[#allocation408_spill] sm:$0xff] %v19172_v36  ;;  %v22350_v36 = vld [vmem:[#allocation148_spill] sm:$0xff] }
 0xd2a   : > { %v8182_v17 = vmul.f32 %v18598_v41, %v22350_v36  ;;  %v8184_v36 = vmul.f32 %v18289_v8, %v22356_v30  ;;  %v22364_v30 = vld [vmem:[#allocation154_spill] sm:$0xff] }
 0xd2d   : > { %v19183_v49 = vpop.f32.mrb[44].mxu0 }
 0xd2e   : > { %22344 = vst [vmem:[#allocation452_spill] sm:$0xff] %v19183_v49  ;;  %v19185_v15 = vpop.f32.mrb[45].mxu0  ;;  %v22358_v49 = vld [vmem:[#allocation152_spill] sm:$0xff] }
 0xd2f   : > { %22345 = vst [vmem:[#allocation451_spill] sm:$0xff] %v19185_v15  ;;  %v19187_v40 = vpop.f32.mrb[46].mxu0  ;;  %11529 = vmatmul.mubr.msk.bf16.gmra.mrb[32].mxu1 %vm6116_vm9, %v8203_v35 }
 0xd30   : > { %22346 = vst [vmem:[#allocation454_spill] sm:$0xff] %v19187_v40  ;;  %v19190_v24 = vpop.f32.mrb[47].mxu0  ;;  %11532 = vmatprep.mubr.msk.bf16.mxu1 %vm6116_vm9, %v8204_v5  ;;  %v8205_v40 = vpack.c.bf16 %v8181_v39, %v8180_v2  ;;  %v8186_v2 = vmul.f32 %v18304_v0, %v22358_v49  ;;  %v22359_v39 = vld [vmem:[#allocation153_spill] sm:$0xff]  ;;  %v8188_v49 = vmul.f32 %v18320_v6, %v22364_v30  ;;  %v22372_v30 = vld [vmem:[#allocation158_spill] sm:$0xff] }
 0xd31   : > { %22347 = vst [vmem:[#allocation453_spill] sm:$0xff] %v19190_v24  ;;  %v8206_v24 = vpack.c.bf16 %v8183_v22, %v8182_v17  ;;  %v8187_v17 = vmul.f32 %v18312_v45, %v22359_v39  ;;  %v8189_v39 = vmul.f32 %v18325_v21, %v22365_v61  ;;  %v22373_v61 = vld [vmem:[#allocation159_spill] sm:$0xff] }
 0xd35   : > { %v19201_v3 = vpop.f32.mrb[48].mxu0 }
 0xd36   : > { %22352 = vst [vmem:[#allocation456_spill] sm:$0xff] %v19201_v3  ;;  %v19203_v35 = vpop.f32.mrb[49].mxu0  ;;  %v22366_v3 = vld [vmem:[#allocation156_spill] sm:$0xff] }
 0xd37   : > { %22353 = vst [vmem:[#allocation455_spill] sm:$0xff] %v19203_v35  ;;  %v19205_v15 = vpop.f32.mrb[50].mxu0  ;;  %11533 = vmatmul.mubr.msk.bf16.gmra.mrb[36].mxu1 %vm6116_vm9, %v8205_v40 }
 0xd38   : > { %22354 = vst [vmem:[#allocation458_spill] sm:$0xff] %v19205_v15  ;;  %v19208_v5 = vpop.f32.mrb[51].mxu0  ;;  %11536 = vmatprep.mubr.msk.bf16.mxu1 %vm6116_vm9, %v8206_v24  ;;  %v8207_v15 = vpack.c.bf16 %v8185_v54, %v8184_v36  ;;  %v8190_v36 = vmul.f32 %v18334_v23, %v22366_v3  ;;  %v22367_v54 = vld [vmem:[#allocation157_spill] sm:$0xff]  ;;  %v8192_v3 = vmul.f32 %v18349_v34, %v22372_v30  ;;  %v22378_v30 = vld [vmem:[#allocation254_spill] sm:$0xff] }
 0xd39   : > { %22355 = vst [vmem:[#allocation457_spill] sm:$0xff] %v19208_v5  ;;  %v8208_v5 = vpack.c.bf16 %v8187_v17, %v8186_v2  ;;  %v8191_v2 = vmul.f32 %v18340_v14, %v22367_v54  ;;  %v8193_v54 = vmul.f32 %v18361_v26, %v22373_v61  ;;  %v22380_v61 = vld [vmem:[#allocation449_spill] sm:$0xff] }
 0xd3d   : > { %v19219_v22 = vpop.f32.mrb[52].mxu0 }
 0xd3e   : > { %22360 = vst [vmem:[#allocation460_spill] sm:$0xff] %v19219_v22  ;;  %v19221_v40 = vpop.f32.mrb[53].mxu0  ;;  %v22374_v22 = vld [vmem:[#allocation160_spill] sm:$0xff] }
 0xd3f   : > { %22361 = vst [vmem:[#allocation459_spill] sm:$0xff] %v19221_v40  ;;  %v19223_v35 = vpop.f32.mrb[54].mxu0  ;;  %11537 = vmatmul.mubr.msk.bf16.gmra.mrb[40].mxu1 %vm6116_vm9, %v8207_v15 }
 0xd40   : > { %22362 = vst [vmem:[#allocation293_spill] sm:$0xff] %v19223_v35  ;;  %v19226_v24 = vpop.f32.mrb[55].mxu0  ;;  %11540 = vmatprep.mubr.msk.bf16.mxu1 %vm6116_vm9, %v8208_v5  ;;  %v8209_v35 = vpack.c.bf16 %v8189_v39, %v8188_v49  ;;  %v8194_v49 = vmul.f32 %v18419_v46, %v22374_v22  ;;  %v22375_v39 = vld [vmem:[#allocation161_spill] sm:$0xff]  ;;  %v22382_v22 = vld [vmem:[#allocation448_spill] sm:$0xff] }
 0xd41   : > { %22363 = vst [vmem:[#allocation289_spill] sm:$0xff] %v19226_v24  ;;  %v8210_v24 = vpack.c.bf16 %v8191_v2, %v8190_v36  ;;  %v8195_v36 = vmul.f32 %v18378_v44, %v22375_v39  ;;  %v8211_v2 = vpack.c.bf16 %v8193_v54, %v8192_v3  ;;  %v8461_v46 = vmul.f32 %v22382_v22, %v22381_v10  ;;  %v22383_v3 = vld [vmem:[#allocation166_spill] sm:$0xff]  ;;  %v19276_v10 = vld [vmem:[%s19817_s15 + $0x1c] sm:$0xf] }
 0xd42   : > { %v22396_v22 = vld [vmem:[#allocation173_spill] sm:$0xff] }
 0xd45   : > { %v19237_v17 = vpop.f32.mrb[56].mxu0 }
 0xd46   : > { %22368 = vst [vmem:[#allocation316_spill] sm:$0xff] %v19237_v17  ;;  %v19239_v15 = vpop.f32.mrb[57].mxu0  ;;  %v22379_v17 = vld [vmem:[#allocation164_spill] sm:$0xff] }
 0xd47   : > { %22369 = vst [vmem:[#allocation312_spill] sm:$0xff] %v19239_v15  ;;  %v19241_v40 = vpop.f32.mrb[58].mxu0  ;;  %11541 = vmatmul.mubr.msk.bf16.gmra.mrb[12].mxu1 %vm6116_vm9, %v8209_v35  ;;  %v22376_v35 = vld [vmem:[#allocation162_spill] sm:$0xff]  ;;  %v8460_v28 = vmul.f32 %v22380_v61, %v22379_v17 }
 0xd48   : > { %22370 = vst [vmem:[#allocation261_spill] sm:$0xff] %v19241_v40  ;;  %v19244_v5 = vpop.f32.mrb[59].mxu0  ;;  %11544 = vmatprep.mubr.msk.bf16.mxu1 %vm6116_vm9, %v8210_v24  ;;  %v8212_v40 = vpack.c.bf16 %v8195_v36, %v8194_v49  ;;  %v8196_v24 = vmul.f32 %v18392_v53, %v22376_v35  ;;  %v22385_v49 = vld [vmem:[#allocation167_spill] sm:$0xff]  ;;  %v22386_v36 = vld [vmem:[#allocation426_spill] sm:$0xff]  ;;  %v22404_v53 = vld [vmem:[#allocation177_spill] sm:$0xff] }
 0xd49   : > { %22371 = vst [vmem:[#allocation325_spill] sm:$0xff] %v19244_v5  ;;  %v22377_v5 = vld [vmem:[#allocation163_spill] sm:$0xff]  ;;  %v8492_v39 = vpack.c.bf16 %v8461_v46, %v8460_v28  ;;  %v22388_v46 = vld [vmem:[#allocation424_spill] sm:$0xff]  ;;  %v22390_v17 = vld [vmem:[#allocation170_spill] sm:$0xff] }
 0xd4a   : > { %v8197_v15 = vmul.f32 %v22378_v30, %v22377_v5  ;;  %v8853_v5 = vsel %vm724_vm0, %v19151_v7, 0  ;;  %v22394_v7 = vld [vmem:[#allocation172_spill] sm:$0xff] }
 0xd4c   : > { %v8213_v26 = vpack.c.bf16 %v8197_v15, %v8196_v24  ;;  %v22391_v15 = vld [vmem:[#allocation423_spill] sm:$0xff] }
 0xd4d   : > { %v8466_v24 = vmul.f32 %v22391_v15, %v22390_v17  ;;  %v22400_v17 = vld [vmem:[#allocation175_spill] sm:$0xff]  ;;  %v22402_v15 = vld [vmem:[#allocation176_spill] sm:$0xff] }
 0xd4f   : > { %11545 = vmatmul.mubr.msk.bf16.gmra.mrb[16].mxu1 %vm6116_vm9, %v8211_v2  ;;  %v8463_v2 = vmul.f32 %v22386_v36, %v22385_v49  ;;  %v22395_v49 = vld [vmem:[#allocation421_spill] sm:$0xff] }
 0xd50   : > { %11548 = vmatprep.mubr.msk.bf16.mxu1 %vm6116_vm9, %v8212_v40  ;;  %v22384_v40 = vld [vmem:[#allocation450_spill] sm:$0xff] }
 0xd51   : > { %v8462_v54 = vmul.f32 %v22384_v40, %v22383_v3  ;;  %v22393_v3 = vld [vmem:[#allocation422_spill] sm:$0xff]  ;;  %v22403_v40 = vld [vmem:[#allocation301_spill] sm:$0xff] }
 0xd52   : > { %v8472_v30 = vmul.f32 %v22403_v40, %v22402_v15  ;;  %v22413_v15 = vld [vmem:[#allocation419_spill] sm:$0xff] }
 0xd53   : > { %v8493_v35 = vpack.c.bf16 %v8463_v2, %v8462_v54  ;;  %v8468_v2 = vmul.f32 %v22395_v49, %v22394_v7  ;;  %v22405_v7 = vld [vmem:[#allocation304_spill] sm:$0xff] }
 0xd54   : > { %v8473_v49 = vmul.f32 %v22405_v7, %v22404_v53 }
 0xd57   : > { %11549 = vmatmul.mubr.msk.bf16.gmra.mrb[20].mxu1 %vm6116_vm9, %v8213_v26  ;;  %v22387_v26 = vld [vmem:[#allocation425_spill] sm:$0xff] }
 0xd58   : > { %11554 = vmatprep.mubr.msk.bf16.mxu1 %vm6116_vm9, %v8492_v39  ;;  %v22389_v28 = vpack.c.bf16 %v22387_v26, %v22388_v46  ;;  %v22392_v39 = vld [vmem:[#allocation171_spill] sm:$0xff]  ;;  %v22398_v26 = vld [vmem:[#allocation174_spill] sm:$0xff] }
 0xd59   : > { %v8467_v54 = vmul.f32 %v22393_v3, %v22392_v39  ;;  %v22399_v46 = vld [vmem:[#allocation278_spill] sm:$0xff]  ;;  %v22401_v39 = vld [vmem:[#allocation308_spill] sm:$0xff] }
 0xd5a   : > { %v8471_v3 = vmul.f32 %v22401_v39, %v22400_v17  ;;  %v22411_v17 = vld [vmem:[#allocation267_spill] sm:$0xff] }
 0xd5b   : > { %v8495_v61 = vpack.c.bf16 %v8467_v54, %v8466_v24  ;;  %v22408_v54 = vld [vmem:[#allocation179_spill] sm:$0xff] }
 0xd5f   : > { %11555 = vmatmul.mubr.msk.bf16.vlgmr.msra.gmra.mrb[24].mxu1 %vm6116_vm9, %v8493_v35  ;;  %v22397_v35 = vld [vmem:[#allocation420_spill] sm:$0xff] }
 0xd60   : > { %11587 = vmatpush3.bf16.msra.mxu1 %v8853_v5  ;;  %11558 = vmatprep.mubr.msk.bf16.mxu1 %vm6116_vm9, %v22389_v28  ;;  %v8469_v5 = vmul.f32 %v22397_v35, %v22396_v22  ;;  %v8470_v28 = vmul.f32 %v22399_v46, %v22398_v26  ;;  %v8498_v22 = vpack.c.bf16 %v8473_v49, %v8472_v30  ;;  %v22410_v26 = vld [vmem:[#allocation180_spill] sm:$0xff]  ;;  %v22412_v46 = vld [vmem:[#allocation181_spill] sm:$0xff]  ;;  %v22415_v30 = vld [vmem:[#allocation418_spill] sm:$0xff] }
 0xd61   : > { %12355 = vmatprep.subr.msk.bf16.mxu1 %vm724_vm0, %v19276_v10  ;;  %v8476_v39 = vmul.f32 %v22411_v17, %v22410_v26  ;;  %v8477_v40 = vmul.f32 %v22413_v15, %v22412_v46  ;;  %v22416_v49 = vld [vmem:[#allocation183_spill] sm:$0xff] }
 0xd62   : > { %v8496_v36 = vpack.c.bf16 %v8469_v5, %v8468_v2  ;;  %v8497_v44 = vpack.c.bf16 %v8471_v3, %v8470_v28  ;;  %v22409_v2 = vld [vmem:[#allocation332_spill] sm:$0xff]  ;;  %v22417_v28 = vld [vmem:[#allocation417_spill] sm:$0xff]  ;;  %v22421_v26 = vld [vmem:[#allocation415_spill] sm:$0xff] }
 0xd63   : > { %v8475_v5 = vmul.f32 %v22409_v2, %v22408_v54  ;;  %v8500_v53 = vpack.c.bf16 %v8477_v40, %v8476_v39  ;;  %v22419_v54 = vld [vmem:[#allocation416_spill] sm:$0xff]  ;;  %v22422_v40 = vld [vmem:[#allocation186_spill] sm:$0xff] }
 0xd67   : > { %11559 = vmatmul.mubr.msk.bf16.gmra.mrb[28].mxu1 %vm6116_vm9, %v8495_v61  ;;  %v22406_v61 = vld [vmem:[#allocation178_spill] sm:$0xff] }
 0xd68   : > { %11562 = vmatprep.mubr.msk.bf16.mxu1 %vm6116_vm9, %v8496_v36  ;;  %v22407_v36 = vld [vmem:[#allocation257_spill] sm:$0xff] }
 0xd69   : > { %v8474_v24 = vmul.f32 %v22407_v36, %v22406_v61  ;;  %v22418_v61 = vld [vmem:[#allocation184_spill] sm:$0xff]  ;;  %v22420_v36 = vld [vmem:[#allocation185_spill] sm:$0xff] }
 0xd6a   : > { %v8480_v2 = vmul.f32 %v22419_v54, %v22418_v61  ;;  %v8481_v17 = vmul.f32 %v22421_v26, %v22420_v36 }
 0xd6b   : > { %v8499_v35 = vpack.c.bf16 %v8475_v5, %v8474_v24  ;;  %v22424_v24 = vld [vmem:[#allocation187_spill] sm:$0xff]  ;;  %v22425_v5 = vld [vmem:[#allocation413_spill] sm:$0xff] }
 0xd6c   : > { %v8502_v46 = vpack.c.bf16 %v8481_v17, %v8480_v2  ;;  %v22429_v17 = vld [vmem:[#allocation191_spill] sm:$0xff] }
 0xd6f   : > { %11563 = vmatmul.mubr.msk.bf16.gmra.mrb[32].mxu1 %vm6116_vm9, %v8497_v44  ;;  %v22414_v44 = vld [vmem:[#allocation182_spill] sm:$0xff] }
 0xd70   : > { %11566 = vmatprep.mubr.msk.bf16.mxu1 %vm6116_vm9, %v8498_v22  ;;  %v8478_v3 = vmul.f32 %v22415_v30, %v22414_v44  ;;  %v8479_v22 = vmul.f32 %v22417_v28, %v22416_v49  ;;  %v22426_v44 = vld [vmem:[#allocation188_spill] sm:$0xff]  ;;  %v22427_v28 = vld [vmem:[#allocation189_spill] sm:$0xff] }
 0xd71   : > { %v8484_v49 = vmul.f32 %v19007_v63, %v22426_v44  ;;  %v8485_v61 = vmul.f32 %v19003_v9, %v22427_v28 }
 0xd72   : > { %v8501_v7 = vpack.c.bf16 %v8479_v22, %v8478_v3  ;;  %v8487_v3 = vmul.f32 %v19012_v42, %v22429_v17  ;;  %v22430_v22 = vld [vmem:[#allocation192_spill] sm:$0xff]  ;;  %v22437_v42 = vld [vmem:[#allocation197_spill] sm:$0xff] }
 0xd73   : > { %v8504_v36 = vpack.c.bf16 %v8485_v61, %v8484_v49  ;;  %v22434_v49 = vld [vmem:[#allocation195_spill] sm:$0xff]  ;;  %v22435_v61 = vld [vmem:[#allocation406_spill] sm:$0xff] }
 0xd77   : > { %11567 = vmatmul.mubr.msk.bf16.gmra.mrb[36].mxu1 %vm6116_vm9, %v8499_v35  ;;  %v22423_v35 = vld [vmem:[#allocation414_spill] sm:$0xff] }
 0xd78   : > { %11570 = vmatprep.mubr.msk.bf16.mxu1 %vm6116_vm9, %v8500_v53  ;;  %v8482_v39 = vmul.f32 %v22423_v35, %v22422_v40  ;;  %v8483_v53 = vmul.f32 %v22425_v5, %v22424_v24  ;;  %v22431_v40 = vld [vmem:[#allocation193_spill] sm:$0xff] }
 0xd79   : > { %v8489_v24 = vmul.f32 %v19032_v58, %v22431_v40 }
 0xd7a   : > { %v8503_v54 = vpack.c.bf16 %v8483_v53, %v8482_v39  ;;  %v22433_v39 = vld [vmem:[#allocation404_spill] sm:$0xff] }
 0xd7f   : > { %11571 = vmatmul.mubr.msk.bf16.gmra.mrb[40].mxu1 %vm6116_vm9, %v8501_v7  ;;  %v22428_v7 = vld [vmem:[#allocation190_spill] sm:$0xff] }
 0xd80   : > { %11574 = vmatprep.mubr.msk.bf16.mxu1 %vm6116_vm9, %v8502_v46  ;;  %v8486_v2 = vmul.f32 %v19016_v51, %v22428_v7  ;;  %v8488_v46 = vmul.f32 %v19036_v32, %v22430_v22  ;;  %v22436_v7 = vld [vmem:[#allocation196_spill] sm:$0xff]  ;;  %v8755_v22 = vmul.f32 %v18489_v20, %v22437_v42  ;;  %v19364_v20 = vld [vmem:[%s19817_s15 + $0x20] sm:$0xf] }
 0xd81   : > { %v8754_v17 = vmul.f32 %v18493_v55, %v22436_v7  ;;  %v22441_v55 = vld [vmem:[#allocation328_spill] sm:$0xff]  ;;  %v22442_v42 = vld [vmem:[#allocation334_spill] sm:$0xff] }
 0xd82   : > { %v8505_v44 = vpack.c.bf16 %v8487_v3, %v8486_v2  ;;  %v8506_v28 = vpack.c.bf16 %v8489_v24, %v8488_v46  ;;  %v22438_v2 = vld [vmem:[#allocation200_spill] sm:$0xff]  ;;  %v22439_v46 = vld [vmem:[#allocation201_spill] sm:$0xff]  ;;  %v22440_v24 = vld [vmem:[#allocation339_spill] sm:$0xff] }
 0xd83   : > { %v8786_v40 = vpack.c.bf16 %v8755_v22, %v8754_v17  ;;  %v8758_v3 = vmul.f32 %v18532_v4, %v22438_v2  ;;  %v22444_v4 = vld [vmem:[#allocation202_spill] sm:$0xff]  ;;  %v22448_v17 = vld [vmem:[#allocation204_spill] sm:$0xff]  ;;  %v22449_v22 = vld [vmem:[#allocation279_spill] sm:$0xff] }
 0xd84   : > { %v22447_v7 = vld [vmem:[#allocation342_spill] sm:$0xff]  ;;  %v22450_v2 = vld [vmem:[#allocation205_spill] sm:$0xff] }
 0xd87   : > { %11575 = vmatmul.mubr.msk.bf16.gmra.mrb[12].mxu1 %vm6116_vm9, %v8503_v54  ;;  %v22432_v54 = vld [vmem:[#allocation194_spill] sm:$0xff] }
 0xd88   : > { %11578 = vmatprep.mubr.msk.bf16.mxu1 %vm6116_vm9, %v8504_v36  ;;  %v8490_v53 = vmul.f32 %v22433_v39, %v22432_v54  ;;  %v8491_v36 = vmul.f32 %v22435_v61, %v22434_v49  ;;  %v22458_v61 = vld [vmem:[#allocation209_spill] sm:$0xff] }
 0xd8a   : > { %v8507_v32 = vpack.c.bf16 %v8491_v36, %v8490_v53  ;;  %v22445_v53 = vld [vmem:[#allocation341_spill] sm:$0xff]  ;;  %v22446_v36 = vld [vmem:[#allocation203_spill] sm:$0xff] }
 0xd8b   : > { %v8760_v49 = vmul.f32 %v22445_v53, %v22444_v4  ;;  %v22456_v53 = vld [vmem:[#allocation208_spill] sm:$0xff] }
 0xd8f   : > { %11579 = vmatmul.mubr.msk.bf16.gmra.mrb[16].mxu1 %vm6116_vm9, %v8505_v44  ;;  %v8759_v44 = vmul.f32 %v22440_v24, %v22439_v46 }
 0xd90   : > { %11582 = vmatprep.mubr.msk.bf16.mxu1 %vm6116_vm9, %v8506_v28  ;;  %v9147_v28 = vsel %vm724_vm0, %v19276_v10, 0  ;;  %v8761_v10 = vmul.f32 %v22447_v7, %v22446_v36  ;;  %v22457_v36 = vld [vmem:[#allocation260_spill] sm:$0xff] }
 0xd91   : > { %v8788_v54 = vpack.c.bf16 %v8759_v44, %v8758_v3  ;;  %v22451_v3 = vld [vmem:[#allocation282_spill] sm:$0xff]  ;;  %v8766_v7 = vmul.f32 %v22457_v36, %v22456_v53  ;;  %v22468_v53 = vld [vmem:[#allocation215_spill] sm:$0xff] }
 0xd92   : > { %v8763_v46 = vmul.f32 %v22451_v3, %v22450_v2  ;;  %v8789_v24 = vpack.c.bf16 %v8761_v10, %v8760_v49  ;;  %v22460_v49 = vld [vmem:[#allocation210_spill] sm:$0xff]  ;;  %v22461_v10 = vld [vmem:[#allocation344_spill] sm:$0xff]  ;;  %v22462_v3 = vld [vmem:[#allocation211_spill] sm:$0xff]  ;;  %v8773_v36 = vmul.f32 %v22307_v59, %v22468_v53 }
 0xd93   : > { %v22475_v59 = vld [vmem:[#allocation355_spill] sm:$0xff]  ;;  %v22481_v53 = vld [vmem:[#allocation224_spill] sm:$0xff] }
 0xd97   : > { %11583 = vmatmul.mubr.msk.bf16.gmra.mrb[20].mxu1 %vm6116_vm9, %v8507_v32  ;;  %v22443_v32 = vpack.c.bf16 %v22441_v55, %v22442_v42  ;;  %v22454_v42 = vld [vmem:[#allocation207_spill] sm:$0xff] }
 0xd98   : > { %11588 = vmatprep.mubr.msk.bf16.mxu1 %vm6116_vm9, %v8786_v40  ;;  %v8762_v40 = vmul.f32 %v22449_v22, %v22448_v17  ;;  %v22459_v17 = vld [vmem:[#allocation343_spill] sm:$0xff] }
 0xd99   : > { %v8767_v22 = vmul.f32 %v22459_v17, %v22458_v61  ;;  %v22470_v17 = vld [vmem:[#allocation217_spill] sm:$0xff] }
 0xd9a   : > { %v8790_v44 = vpack.c.bf16 %v8763_v46, %v8762_v40  ;;  %v8768_v40 = vmul.f32 %v22461_v10, %v22460_v49  ;;  %v8769_v46 = vmul.f32 %v22299_v29, %v22462_v3  ;;  %v22471_v49 = vld [vmem:[#allocation218_spill] sm:$0xff]  ;;  %v22472_v10 = vld [vmem:[#allocation353_spill] sm:$0xff]  ;;  %v22473_v3 = vld [vmem:[#allocation219_spill] sm:$0xff] }
 0xd9b   : > { %v8792_v2 = vpack.c.bf16 %v8767_v22, %v8766_v7  ;;  %v22469_v7 = vld [vmem:[#allocation216_spill] sm:$0xff] }
 0xd9c   : > { %v8774_v29 = vmul.f32 %v22309_v25, %v22469_v7  ;;  %v22477_v25 = vld [vmem:[#allocation352_spill] sm:$0xff]  ;;  %v22483_v7 = vld [vmem:[#allocation335_spill] sm:$0xff] }
 0xd9f   : > { %11589 = vmatmul.mubr.msk.bf16.vlgmr.msra.gmra.mrb[24].mxu1 %vm6116_vm9, %v22443_v32  ;;  %v22455_v32 = vld [vmem:[#allocation323_spill] sm:$0xff] }
 0xda0   : > { %11621 = vmatpush3.bf16.msra.mxu1 %v9147_v28  ;;  %11592 = vmatprep.mubr.msk.bf16.mxu1 %vm6116_vm9, %v8788_v54  ;;  %v22452_v28 = vld [vmem:[#allocation206_spill] sm:$0xff]  ;;  %v8765_v4 = vmul.f32 %v22455_v32, %v22454_v42  ;;  %v8793_v32 = vpack.c.bf16 %v8769_v46, %v8768_v40  ;;  %v8776_v40 = vmul.f32 %v22472_v10, %v22471_v49  ;;  %v22486_v10 = vld [vmem:[#allocation227_spill] sm:$0xff] }
 0xda1   : > { %12356 = vmatprep.subr.msk.bf16.mxu1 %vm724_vm0, %v19364_v20  ;;  %v22453_v54 = vld [vmem:[#allocation318_spill] sm:$0xff]  ;;  %v8777_v46 = vmul.f32 %v18747_v50, %v22473_v3  ;;  %v8782_v50 = vmul.f32 %v22320_v19, %v22481_v53 }
 0xda2   : > { %v8764_v55 = vmul.f32 %v22453_v54, %v22452_v28  ;;  %v22464_v28 = vld [vmem:[#allocation213_spill] sm:$0xff]  ;;  %v22465_v54 = vld [vmem:[#allocation347_spill] sm:$0xff] }
 0xda3   : > { %v8771_v42 = vmul.f32 %v22465_v54, %v22464_v28  ;;  %v22476_v28 = vld [vmem:[#allocation221_spill] sm:$0xff] }
 0xda4   : > { %v8791_v39 = vpack.c.bf16 %v8765_v4, %v8764_v55  ;;  %v22467_v55 = vld [vmem:[#allocation348_spill] sm:$0xff]  ;;  %v8779_v54 = vmul.f32 %v22477_v25, %v22476_v28  ;;  %v22490_v28 = vld [vmem:[#allocation230_spill] sm:$0xff] }
 0xda5   : > { %v9050_v25 = vmul.f32 %v18301_v31, %v22490_v28  ;;  %v22494_v31 = vld [vmem:[#allocation234_spill] sm:$0xff]  ;;  %v22507_v28 = vld [vmem:[#allocation247_spill] sm:$0xff] }
 0xda7   : > { %11593 = vmatmul.mubr.msk.bf16.gmra.mrb[28].mxu1 %vm6116_vm9, %v8789_v24  ;;  %v22463_v24 = vld [vmem:[#allocation212_spill] sm:$0xff] }
 0xda8   : > { %11596 = vmatprep.mubr.msk.bf16.mxu1 %vm6116_vm9, %v8790_v44  ;;  %v8770_v44 = vmul.f32 %v22301_v57, %v22463_v24  ;;  %v8775_v57 = vmul.f32 %v22311_v13, %v22470_v17  ;;  %v22474_v24 = vld [vmem:[#allocation220_spill] sm:$0xff] }
 0xdaa   : > { %v8794_v61 = vpack.c.bf16 %v8771_v42, %v8770_v44  ;;  %v8778_v44 = vmul.f32 %v22475_v59, %v22474_v24  ;;  %v8797_v42 = vpack.c.bf16 %v8777_v46, %v8776_v40  ;;  %v22487_v40 = vld [vmem:[#allocation340_spill] sm:$0xff]  ;;  %v22489_v24 = vld [vmem:[#allocation229_spill] sm:$0xff] }
 0xdab   : > { %v8785_v3 = vmul.f32 %v22487_v40, %v22486_v10  ;;  %v22488_v46 = vld [vmem:[#allocation228_spill] sm:$0xff]  ;;  %v9049_v19 = vmul.f32 %v18295_v16, %v22489_v24  ;;  %v9441_v16 = vsel %vm724_vm0, %v19364_v20, 0  ;;  %v22502_v40 = vld [vmem:[#allocation242_spill] sm:$0xff]  ;;  %v22505_v24 = vld [vmem:[#allocation245_spill] sm:$0xff] }
 0xdac   : > { %v8798_v13 = vpack.c.bf16 %v8779_v54, %v8778_v44  ;;  %v22491_v54 = vld [vmem:[#allocation231_spill] sm:$0xff]  ;;  %v22496_v20 = vld [vmem:[#allocation236_spill] sm:$0xff] }
 0xdad   : > { %v9056_v53 = vmul.f32 %v18496_v18, %v22496_v20 }
 0xdaf   : > { %11597 = vmatmul.mubr.msk.bf16.gmra.mrb[32].mxu1 %vm6116_vm9, %v8791_v39  ;;  %v22466_v39 = vld [vmem:[#allocation214_spill] sm:$0xff] }
 0xdb0   : > { %11600 = vmatprep.mubr.msk.bf16.mxu1 %vm6116_vm9, %v8792_v2  ;;  %v8772_v4 = vmul.f32 %v22467_v55, %v22466_v39  ;;  %v8796_v2 = vpack.c.bf16 %v8775_v57, %v8774_v29  ;;  %v22480_v55 = vld [vmem:[#allocation223_spill] sm:$0xff] }
 0xdb2   : > { %v8795_v22 = vpack.c.bf16 %v8773_v36, %v8772_v4  ;;  %v8781_v4 = vmul.f32 %v18779_v56, %v22480_v55  ;;  %v22482_v36 = vld [vmem:[#allocation225_spill] sm:$0xff]  ;;  %v9048_v56 = vmul.f32 %v22327_v47, %v22488_v46  ;;  %v22503_v46 = vld [vmem:[#allocation243_spill] sm:$0xff] }
 0xdb3   : > { %v8783_v29 = vmul.f32 %v22483_v7, %v22482_v36 }
 0xdb4   : > { %v9080_v44 = vpack.c.bf16 %v9049_v19, %v9048_v56  ;;  %v22504_v56 = vld [vmem:[#allocation244_spill] sm:$0xff] }
 0xdb5   : > { %v8800_v57 = vpack.c.bf16 %v8783_v29, %v8782_v50  ;;  %v22497_v50 = vld [vmem:[#allocation237_spill] sm:$0xff] }
 0xdb6   : > { %v9057_v36 = vmul.f32 %v18499_v38, %v22497_v50 }
 0xdb7   : > { %11601 = vmatmul.mubr.msk.bf16.gmra.mrb[36].mxu1 %vm6116_vm9, %v8793_v32  ;;  %v22478_v32 = vld [vmem:[#allocation222_spill] sm:$0xff] }
 0xdb8   : > { %11604 = vmatprep.mubr.msk.bf16.mxu1 %vm6116_vm9, %v8794_v61  ;;  %v22479_v61 = vld [vmem:[#allocation354_spill] sm:$0xff]  ;;  %v9084_v29 = vpack.c.bf16 %v9057_v36, %v9056_v53  ;;  %v22519_v53 = vld [vmem:[#allocation268_spill] sm:$0xff]  ;;  %v22521_v36 = vld [vmem:[#allocation269_spill] sm:$0xff] }
 0xdb9   : > { %v8780_v39 = vmul.f32 %v22479_v61, %v22478_v32  ;;  %v22493_v61 = vld [vmem:[#allocation233_spill] sm:$0xff] }
 0xdba   : > { %v9053_v47 = vmul.f32 %v18445_v27, %v22493_v61  ;;  %v22511_v61 = vld [vmem:[#allocation251_spill] sm:$0xff] }
 0xdbb   : > { %v8799_v17 = vpack.c.bf16 %v8781_v4, %v8780_v39  ;;  %v19456_v4 = vld [vmem:[%s19819_s17] sm:$0x3] }
 0xdbf   : > { %11605 = vmatmul.mubr.msk.bf16.gmra.mrb[40].mxu1 %vm6116_vm9, %v8795_v22  ;;  %v22484_v22 = vld [vmem:[#allocation226_spill] sm:$0xff] }
 0xdc0   : > { %11608 = vmatprep.mubr.msk.bf16.mxu1 %vm6116_vm9, %v8796_v2  ;;  %v22485_v2 = vld [vmem:[#allocation337_spill] sm:$0xff] }
 0xdc1   : > { %v8784_v49 = vmul.f32 %v22485_v2, %v22484_v22  ;;  %v22500_v22 = vld [vmem:[#allocation240_spill] sm:$0xff] }
 0xdc2   : > { %v9060_v2 = vmul.f32 %v18547_v33, %v22500_v22  ;;  %v9065_v33 = vmul.f32 %v18298_v43, %v22505_v24  ;;  %v22525_v22 = vld [vmem:[#allocation271_spill] sm:$0xff] }
 0xdc3   : > { %v8801_v59 = vpack.c.bf16 %v8785_v3, %v8784_v49  ;;  %v22501_v49 = vld [vmem:[#allocation241_spill] sm:$0xff]  ;;  %v9062_v3 = vmul.f32 %v18598_v41, %v22502_v40  ;;  %v9067_v41 = vmul.f32 %v18312_v45, %v22507_v28  ;;  %v22532_v24 = vld [vmem:[#allocation423_spill] sm:$0xff] }
 0xdc4   : > { %v9061_v18 = vmul.f32 %v18550_v62, %v22501_v49  ;;  %v22529_v40 = vld [vmem:[#allocation273_spill] sm:$0xff] }
 0xdc6   : > { %v9086_v38 = vpack.c.bf16 %v9061_v18, %v9060_v2  ;;  %v22526_v2 = vld [vmem:[#allocation431_spill] sm:$0xff]  ;;  %v22527_v18 = vld [vmem:[#allocation272_spill] sm:$0xff] }
 0xdc7   : > { %11609 = vmatmul.mubr.msk.bf16.gmra.mrb[12].mxu1 %vm6116_vm9, %v8797_v42  ;;  %v9051_v42 = vmul.f32 %v22331_v12, %v22491_v54  ;;  %v22495_v12 = vld [vmem:[#allocation235_spill] sm:$0xff]  ;;  %v22509_v54 = vld [vmem:[#allocation249_spill] sm:$0xff]  ;;  %v9079_v49 = vmul.f32 %v22526_v2, %v22525_v22  ;;  %v22557_v22 = vld [vmem:[#allocation446_spill] sm:$0xff] }
 0xdc8   : > { %11612 = vmatprep.mubr.msk.bf16.mxu1 %vm6116_vm9, %v8798_v13  ;;  %v22492_v13 = vld [vmem:[#allocation232_spill] sm:$0xff]  ;;  %v9055_v27 = vmul.f32 %v18482_v11, %v22495_v12  ;;  %v9358_v2 = vmul.f32 %v22415_v30, %v22557_v22 }
 0xdc9   : > { %v9052_v32 = vmul.f32 %v18440_v1, %v22492_v13  ;;  %v9081_v39 = vpack.c.bf16 %v9051_v42, %v9050_v25  ;;  %v9054_v1 = vmul.f32 %v18479_v37, %v22494_v31  ;;  %v22508_v25 = vld [vmem:[#allocation248_spill] sm:$0xff]  ;;  %v22510_v13 = vld [vmem:[#allocation250_spill] sm:$0xff]  ;;  %v22515_v31 = vld [vmem:[#allocation259_spill] sm:$0xff] }
 0xdca   : > { %v12658_v22 = vld [vmem:[%s12829_s26 + $0x50] sm:$0xff] }
 0xdcb   : > { %v9082_v55 = vpack.c.bf16 %v9053_v47, %v9052_v32  ;;  %v9083_v7 = vpack.c.bf16 %v9055_v27, %v9054_v1  ;;  %v9070_v32 = vmul.f32 %v18334_v23, %v22510_v13  ;;  %v22512_v47 = vld [vmem:[#allocation252_spill] sm:$0xff]  ;;  %v22517_v27 = vld [vmem:[#allocation262_spill] sm:$0xff]  ;;  %v22518_v23 = vld [vmem:[#allocation255_spill] sm:$0xff] }
 0xdcc   : > { %v9072_v45 = vmul.f32 %v18349_v34, %v22512_v47  ;;  %v22516_v1 = vld [vmem:[#allocation336_spill] sm:$0xff]  ;;  %v9075_v20 = vmul.f32 %v22518_v23, %v22517_v27  ;;  %v22522_v34 = vld [vmem:[#allocation254_spill] sm:$0xff]  ;;  %v22550_v23 = vld [vmem:[#allocation321_spill] sm:$0xff] }
 0xdcd   : > { %v9074_v12 = vmul.f32 %v22516_v1, %v22515_v31  ;;  %v22541_v13 = vld [vmem:[#allocation420_spill] sm:$0xff]  ;;  %v22548_v1 = vld [vmem:[#allocation314_spill] sm:$0xff] }
 0xdcf   : > { %11613 = vmatmul.mubr.msk.bf16.gmra.mrb[16].mxu1 %vm6116_vm9, %v8799_v17  ;;  %v22498_v17 = vld [vmem:[#allocation238_spill] sm:$0xff] }
 0xdd0   : > { %11616 = vmatprep.mubr.msk.bf16.mxu1 %vm6116_vm9, %v8800_v57  ;;  %v9058_v37 = vmul.f32 %v18540_v52, %v22498_v17  ;;  %v22499_v57 = vld [vmem:[#allocation239_spill] sm:$0xff]  ;;  %v9063_v52 = vmul.f32 %v18601_v60, %v22503_v46  ;;  %v9068_v60 = vmul.f32 %v18320_v6, %v22508_v25  ;;  %v22514_v6 = vld [vmem:[#allocation441_spill] sm:$0xff]  ;;  %v22536_v25 = vld [vmem:[#allocation296_spill] sm:$0xff] }
 0xdd1   : > { %v9059_v11 = vmul.f32 %v18543_v48, %v22499_v57  ;;  %v9064_v48 = vmul.f32 %v18289_v8, %v22504_v56  ;;  %v9069_v8 = vmul.f32 %v18325_v21, %v22509_v54  ;;  %v22524_v57 = vld [vmem:[#allocation432_spill] sm:$0xff]  ;;  %v22538_v54 = vld [vmem:[#allocation281_spill] sm:$0xff] }
 0xdd2   : > { %v9087_v19 = vpack.c.bf16 %v9063_v52, %v9062_v3  ;;  %v22530_v3 = vld [vmem:[#allocation426_spill] sm:$0xff] }
 0xdd3   : > { %v9085_v10 = vpack.c.bf16 %v9059_v11, %v9058_v37  ;;  %v9088_v62 = vpack.c.bf16 %v9065_v33, %v9064_v48  ;;  %v9090_v43 = vpack.c.bf16 %v9069_v8, %v9068_v60  ;;  %v22523_v37 = vld [vmem:[#allocation270_spill] sm:$0xff]  ;;  %v9343_v46 = vmul.f32 %v22530_v3, %v22529_v40  ;;  %v22531_v48 = vld [vmem:[#allocation276_spill] sm:$0xff]  ;;  %v22539_v8 = vld [vmem:[#allocation421_spill] sm:$0xff] }
 0xdd4   : > { %v9078_v11 = vmul.f32 %v22524_v57, %v22523_v37  ;;  %v9346_v33 = vmul.f32 %v22532_v24, %v22531_v48  ;;  %v22556_v57 = vld [vmem:[#allocation403_spill] sm:$0xff]  ;;  %v22560_v3 = vld [vmem:[#allocation508_spill] sm:$0xff] }
 0xdd5   : > { %v22563_v24 = vld [vmem:[#allocation515_spill] sm:$0xff] }
 0xdd6   : > { %v9095_v52 = vpack.c.bf16 %v9079_v49, %v9078_v11  ;;  %v9357_v11 = vmul.f32 %v22413_v15, %v22556_v57  ;;  %v22558_v49 = vld [vmem:[#allocation487_spill] sm:$0xff]  ;;  %v9362_v15 = vmul.f32 %v22423_v35, %v22563_v24  ;;  %v12666_v24 = vld [vmem:[%s12829_s26 + $0x90] sm:$0xff] }
 0xdd7   : > { %11617 = vmatmul.mubr.msk.bf16.gmra.mrb[20].mxu1 %vm6116_vm9, %v8801_v59  ;;  %v22506_v59 = vld [vmem:[#allocation246_spill] sm:$0xff]  ;;  %v22569_v35 = vld [vmem:[#allocation411_spill] sm:$0xff] }
 0xdd8   : > { %11622 = vmatprep.mubr.msk.bf16.mxu1 %vm6116_vm9, %v9080_v44  ;;  %v9066_v44 = vmul.f32 %v18304_v0, %v22506_v59  ;;  %v9071_v0 = vmul.f32 %v18340_v14, %v22511_v61  ;;  %v22520_v14 = vld [vmem:[#allocation333_spill] sm:$0xff]  ;;  %v22542_v61 = vld [vmem:[#allocation287_spill] sm:$0xff] }
 0xdd9   : > { %v9076_v50 = vmul.f32 %v22520_v14, %v22519_v53  ;;  %v22552_v14 = vld [vmem:[#allocation256_spill] sm:$0xff]  ;;  %v12657_v57 = vld [vmem:[%s12829_s26 + $0x48] sm:$0xff] }
 0xdda   : > { %v9089_v42 = vpack.c.bf16 %v9067_v41, %v9066_v44  ;;  %v9748_v44 = vsel %vm2065_vm7, %v19456_v4, 0  ;;  %v22535_v41 = vld [vmem:[#allocation295_spill] sm:$0xff] }
 0xddb   : > { %v22537_v60 = vpack.c.bf16 %v22535_v41, %v22536_v25  ;;  %v22567_v25 = vld [vmem:[#allocation537_spill] sm:$0xff] }
 0xddf   : > { %11623 = vmatmul.mubr.msk.bf16.vlgmr.msra.gmra.mrb[24].mxu1 %vm6116_vm9, %v9081_v39  ;;  %v22513_v39 = vld [vmem:[#allocation253_spill] sm:$0xff] }
 0xde0   : > { %11655 = vmatpush3.bf16.msra.mxu1 %v9441_v16  ;;  %11626 = vmatprep.mubr.msk.bf16.mxu1 %vm6116_vm9, %v9082_v55  ;;  %v9073_v16 = vmul.f32 %v22514_v6, %v22513_v39  ;;  %v9091_v55 = vpack.c.bf16 %v9071_v0, %v9070_v32  ;;  %v22543_v0 = vld [vmem:[#allocation278_spill] sm:$0xff] }
 0xde1   : > { %12357 = vmatprep.subr.msk.bf16.mxu1 %vm2065_vm7, %v19456_v4  ;;  %v9350_v47 = vmul.f32 %v22543_v0, %v22542_v61  ;;  %v22545_v4 = vld [vmem:[#allocation308_spill] sm:$0xff]  ;;  %v22575_v0 = vld [vmem:[#allocation502_spill] sm:$0xff] }
 0xde2   : > { %v9092_v21 = vpack.c.bf16 %v9073_v16, %v9072_v45  ;;  %v22544_v45 = vld [vmem:[#allocation291_spill] sm:$0xff] }
 0xde3   : > { %v9351_v39 = vmul.f32 %v22545_v4, %v22544_v45 }
 0xde5   : > { %v9378_v16 = vpack.c.bf16 %v9351_v39, %v9350_v47  ;;  %v22576_v47 = vld [vmem:[#allocation406_spill] sm:$0xff] }
 0xde6   : > { %v9371_v45 = vmul.f32 %v22576_v47, %v22575_v0  ;;  %v19668_v47 = vld [vmem:[%s19820_s18] ss:$0 sm:$0xff] }
 0xde7   : > { %11627 = vmatmul.mubr.msk.bf16.gmra.mrb[28].mxu1 %vm6116_vm9, %v9083_v7  ;;  %v9077_v7 = vmul.f32 %v22522_v34, %v22521_v36 }
 0xde8   : > { %11630 = vmatprep.mubr.msk.bf16.mxu1 %vm6116_vm9, %v9084_v29  ;;  %v9093_v29 = vpack.c.bf16 %v9075_v20, %v9074_v12  ;;  %v22549_v12 = vld [vmem:[#allocation304_spill] sm:$0xff]  ;;  %v22551_v20 = vld [vmem:[#allocation257_spill] sm:$0xff] }
 0xde9   : > { %v9094_v17 = vpack.c.bf16 %v9077_v7, %v9076_v50  ;;  %v9353_v27 = vmul.f32 %v22549_v12, %v22548_v1  ;;  %v9354_v53 = vmul.f32 %v22551_v20, %v22550_v23  ;;  %v22553_v50 = vld [vmem:[#allocation332_spill] sm:$0xff]  ;;  %v12648_v1 = vld [vmem:[%s12829_s26] sm:$0xff]  ;;  %v12649_v12 = vld [vmem:[%s12829_s26 + $0x8] sm:$0xff] }
 0xdea   : > { %v9355_v36 = vmul.f32 %v22553_v50, %v22552_v14  ;;  %v12650_v20 = vld [vmem:[%s12829_s26 + $0x10] sm:$0xff]  ;;  %v12652_v50 = vld [vmem:[%s12829_s26 + $0x20] sm:$0xff] }
 0xdec   : > { %v9380_v7 = vpack.c.bf16 %v9355_v36, %v9354_v53  ;;  %v12651_v53 = vld [vmem:[%s12829_s26 + $0x18] sm:$0xff]  ;;  %v12653_v36 = vld [vmem:[%s12829_s26 + $0x28] sm:$0xff] }
 0xded   : > { %v9676_v14 = vpack.c.bf16 %v12651_v53, %v12650_v20 }
 0xdef   : > { %11631 = vmatmul.mubr.msk.bf16.gmra.mrb[32].mxu1 %vm6116_vm9, %v9085_v10  ;;  %v22528_v10 = vld [vmem:[#allocation450_spill] sm:$0xff] }
 0xdf0   : > { %11634 = vmatprep.mubr.msk.bf16.mxu1 %vm6116_vm9, %v9086_v38  ;;  %v9342_v38 = vmul.f32 %v22528_v10, %v22527_v18  ;;  %v22559_v18 = vld [vmem:[#allocation417_spill] sm:$0xff] }
 0xdf1   : > { %v9359_v10 = vmul.f32 %v22559_v18, %v22558_v49  ;;  %v12660_v18 = vld [vmem:[%s12829_s26 + $0x60] sm:$0xff] }
 0xdf2   : > { %v9374_v56 = vpack.c.bf16 %v9343_v46, %v9342_v38  ;;  %v22561_v46 = vld [vmem:[#allocation416_spill] sm:$0xff] }
 0xdf3   : > { %v9382_v40 = vpack.c.bf16 %v9359_v10, %v9358_v2  ;;  %v12659_v2 = vld [vmem:[%s12829_s26 + $0x58] sm:$0xff]  ;;  %v12661_v10 = vld [vmem:[%s12829_s26 + $0x68] sm:$0xff] }
 0xdf4   : > { %v9680_v49 = vpack.c.bf16 %v12659_v2, %v12658_v22 }
 0xdf7   : > { %11635 = vmatmul.mubr.msk.bf16.gmra.mrb[36].mxu1 %vm6116_vm9, %v9087_v19  ;;  %v22533_v19 = vld [vmem:[#allocation277_spill] sm:$0xff] }
 0xdf8   : > { %11638 = vmatprep.mubr.msk.bf16.mxu1 %vm6116_vm9, %v9088_v62  ;;  %v22534_v62 = vld [vmem:[#allocation422_spill] sm:$0xff] }
 0xdf9   : > { %v9347_v59 = vmul.f32 %v22534_v62, %v22533_v19 }
 0xdfb   : > { %v9376_v28 = vpack.c.bf16 %v9347_v59, %v9346_v33  ;;  %v22564_v33 = vld [vmem:[#allocation516_spill] sm:$0xff]  ;;  %v22565_v59 = vld [vmem:[#allocation533_spill] sm:$0xff] }
 0xdfc   : > { %v9363_v30 = vmul.f32 %v22425_v5, %v22564_v33 }
 0xdfe   : > { %v9384_v62 = vpack.c.bf16 %v9363_v30, %v9362_v15  ;;  %v12667_v15 = vld [vmem:[%s12829_s26 + $0x98] sm:$0xff]  ;;  %v12668_v30 = vld [vmem:[%s12829_s26 + $0xa0] sm:$0xff] }
 0xdff   : > { %11639 = vmatmul.mubr.msk.bf16.gmra.mrb[40].mxu1 %vm6116_vm9, %v9089_v42  ;;  %v9348_v42 = vmul.f32 %v22539_v8, %v22538_v54  ;;  %v9684_v33 = vpack.c.bf16 %v12667_v15, %v12666_v24  ;;  %v22589_v24 = vld [vmem:[#allocation456_spill] sm:$0xff] }
 0xe00   : > { %11642 = vmatprep.mubr.msk.bf16.mxu1 %vm6116_vm9, %v9090_v43  ;;  %v22540_v43 = vld [vmem:[#allocation286_spill] sm:$0xff] }
 0xe01   : > { %v9349_v32 = vmul.f32 %v22541_v13, %v22540_v43  ;;  %v22571_v43 = vld [vmem:[#allocation412_spill] sm:$0xff]  ;;  %v22572_v13 = vld [vmem:[#allocation495_spill] sm:$0xff] }
 0xe03   : > { %v9377_v6 = vpack.c.bf16 %v9349_v32, %v9348_v42  ;;  %v22570_v42 = vld [vmem:[#allocation493_spill] sm:$0xff]  ;;  %v22573_v32 = vld [vmem:[#allocation498_spill] sm:$0xff] }
 0xe07   : > { %11643 = vmatmul.mubr.msk.bf16.gmra.mrb[12].mxu1 %vm6116_vm9, %v9091_v55  ;;  %v22546_v55 = vld [vmem:[#allocation307_spill] sm:$0xff] }
 0xe08   : > { %11646 = vmatprep.mubr.msk.bf16.mxu1 %vm6116_vm9, %v9092_v21  ;;  %v22547_v21 = vld [vmem:[#allocation301_spill] sm:$0xff] }
 0xe09   : > { %v9352_v31 = vmul.f32 %v22547_v21, %v22546_v55  ;;  %v22579_v21 = vld [vmem:[#allocation439_spill] sm:$0xff] }
 0xe0b   : > { %v9379_v34 = vpack.c.bf16 %v9353_v27, %v9352_v31  ;;  %v9675_v27 = vpack.c.bf16 %v12649_v12, %v12648_v1 }
 0xe0f   : > { %11647 = vmatmul.mubr.msk.bf16.gmra.mrb[16].mxu1 %vm6116_vm9, %v9093_v29  ;;  %v22554_v29 = vld [vmem:[#allocation265_spill] sm:$0xff] }
 0xe10   : > { %11650 = vmatprep.mubr.msk.bf16.mxu1 %vm6116_vm9, %v9094_v17  ;;  %v22555_v17 = vld [vmem:[#allocation267_spill] sm:$0xff] }
 0xe11   : > { %v9356_v37 = vmul.f32 %v22555_v17, %v22554_v29  ;;  %v12655_v29 = vld [vmem:[%s12829_s26 + $0x38] sm:$0xff] }
 0xe13   : > { %v9381_v38 = vpack.c.bf16 %v9357_v11, %v9356_v37  ;;  %v12656_v37 = vld [vmem:[%s12829_s26 + $0x40] sm:$0xff] }
 0xe14   : > { %v9679_v11 = vpack.c.bf16 %v12657_v57, %v12656_v37 }
 0xe17   : > { %11651 = vmatmul.mubr.msk.bf16.gmra.mrb[20].mxu1 %vm6116_vm9, %v9095_v52  ;;  %v9360_v52 = vmul.f32 %v22561_v46, %v22560_v3  ;;  %v12663_v3 = vld [vmem:[%s12829_s26 + $0x78] sm:$0xff] }
 0xe18   : > { %11656 = vmatprep.mubr.msk.bf16.mxu1 %vm6116_vm9, %v9374_v56  ;;  %v22562_v56 = vld [vmem:[#allocation510_spill] sm:$0xff] }
 0xe19   : > { %v9361_v48 = vmul.f32 %v22421_v26, %v22562_v56  ;;  %v9366_v26 = vmul.f32 %v19016_v51, %v22567_v25  ;;  %v22574_v51 = vld [vmem:[#allocation404_spill] sm:$0xff]  ;;  %v12665_v56 = vld [vmem:[%s12829_s26 + $0x88] sm:$0xff] }
 0xe1a   : > { %v9370_v61 = vmul.f32 %v22574_v51, %v22573_v32  ;;  %v12673_v25 = vld [vmem:[%s12829_s26 + $0xc8] sm:$0xff] }
 0xe1b   : > { %v9383_v19 = vpack.c.bf16 %v9361_v48, %v9360_v52  ;;  %v12664_v52 = vld [vmem:[%s12829_s26 + $0x80] sm:$0xff]  ;;  %v22581_v32 = vld [vmem:[#allocation407_spill] sm:$0xff] }
 0xe1c   : > { %v9388_v39 = vpack.c.bf16 %v9371_v45, %v9370_v61  ;;  %v9683_v48 = vpack.c.bf16 %v12665_v56, %v12664_v52  ;;  %v22582_v61 = vld [vmem:[#allocation408_spill] sm:$0xff]  ;;  %v22583_v45 = vld [vmem:[#allocation409_spill] sm:$0xff] }
 0xe1f   : > { %11657 = vmatmul.mubr.msk.bf16.vlgmr.msra.gmra.mrb[24].mxu1 %vm6116_vm9, %v22537_v60  ;;  %v22568_v60 = vld [vmem:[#allocation538_spill] sm:$0xff] }
 0xe20   : > { %11689 = vmatpush3.bf16.msra.mxu1 %v9748_v44  ;;  %11660 = vmatprep.mubr.msk.bf16.mxu1 %vm6116_vm9, %v9376_v28  ;;  %v9364_v44 = vmul.f32 %v19007_v63, %v22565_v59  ;;  %v22566_v28 = vld [vmem:[#allocation536_spill] sm:$0xff]  ;;  %v9367_v54 = vmul.f32 %v22569_v35, %v22568_v60  ;;  %v9368_v63 = vmul.f32 %v22571_v43, %v22570_v42  ;;  %v12675_v35 = vld [vmem:[%s12829_s26 + $0xd8] sm:$0xff] }
 0xe21   : > { %v9365_v41 = vmul.f32 %v19003_v9, %v22566_v28  ;;  %v9369_v9 = vmul.f32 %v19032_v58, %v22572_v13  ;;  %v22580_v58 = vld [vmem:[#allocation448_spill] sm:$0xff] }
 0xe22   : > { %v9386_v8 = vpack.c.bf16 %v9367_v54, %v9366_v26  ;;  %v9373_v31 = vmul.f32 %v22580_v58, %v22579_v21  ;;  %v12670_v59 = vld [vmem:[%s12829_s26 + $0xb0] sm:$0xff] }
 0xe23   : > { %v9385_v5 = vpack.c.bf16 %v9365_v41, %v9364_v44  ;;  %v9387_v4 = vpack.c.bf16 %v9369_v9, %v9368_v63  ;;  %v12671_v44 = vld [vmem:[%s12829_s26 + $0xb8] sm:$0xff]  ;;  %v12672_v41 = vld [vmem:[%s12829_s26 + $0xc0] sm:$0xff]  ;;  %v12674_v60 = vld [vmem:[%s12829_s26 + $0xd0] sm:$0xff] }
 0xe24   : > { %v9686_v28 = vpack.c.bf16 %v12671_v44, %v12670_v59  ;;  %v9687_v26 = vpack.c.bf16 %v12673_v25, %v12672_v41  ;;  %v9688_v54 = vpack.c.bf16 %v12675_v35, %v12674_v60  ;;  %v12678_v43 = vld [vmem:[%s12829_s26 + $0xf0] sm:$0xff]  ;;  %v12679_v63 = vld [vmem:[%s12829_s26 + $0xf8] sm:$0xff]  ;;  %v19659_v9 = vld [vmem:[%s19818_s16] ss:$0 sm:$0xff] }
 0xe25   : > { %v9690_v13 = vpack.c.bf16 %v12679_v63, %v12678_v43  ;;  %v11736_v51 = vadd.f32 %v22581_v32, %v19659_v9  ;;  %v11739_v0 = vadd.f32 %v19659_v9, %v22582_v61  ;;  %v11754_v15 = vadd.f32 %v22589_v24, %v19659_v9  ;;  %v22591_v41 = vld [vmem:[#allocation458_spill] sm:$0xff]  ;;  %v22592_v60 = vld [vmem:[#allocation457_spill] sm:$0xff] }
 0xe26   : > { %v11760_v25 = vadd.f32 %v22591_v41, %v19659_v9  ;;  %v11763_v35 = vadd.f32 %v19659_v9, %v22592_v60 }
 0xe27   : > { %11661 = vmatmul.mubr.msk.bf16.gmra.mrb[28].mxu1 %vm6116_vm9, %v9377_v6  ;;  %v22577_v6 = vld [vmem:[#allocation445_spill] sm:$0xff]  ;;  %v11737_v58 = vadd.f32 %v11736_v51, %v19668_v47  ;;  %v11740_v12 = vadd.f32 %v11739_v0, %v19668_v47  ;;  %v22593_v0 = vld [vmem:[#allocation460_spill] sm:$0xff] }
 0xe28   : > { %11664 = vmatprep.mubr.msk.bf16.mxu1 %vm6116_vm9, %v9378_v16  ;;  %v22578_v16 = vld [vmem:[#allocation449_spill] sm:$0xff]  ;;  %v11764_v61 = vadd.f32 %v11763_v35, %v19668_v47 }
 0xe29   : > { %v9372_v55 = vmul.f32 %v22578_v16, %v22577_v6 }
 0xe2b   : > { %v9389_v23 = vpack.c.bf16 %v9373_v31, %v9372_v55 }
 0xe2f   : > { %11665 = vmatmul.mubr.msk.bf16.gmra.mrb[32].mxu1 %vm6116_vm9, %v9379_v34  ;;  %v9677_v34 = vpack.c.bf16 %v12653_v36, %v12652_v50  ;;  %v22586_v50 = vld [vmem:[#allocation451_spill] sm:$0xff] }
 0xe30   : > { %11668 = vmatprep.mubr.msk.bf16.mxu1 %vm6116_vm9, %v9380_v7  ;;  %v12654_v7 = vld [vmem:[%s12829_s26 + $0x30] sm:$0xff]  ;;  %v11745_v36 = vadd.f32 %v19659_v9, %v22586_v50 }
 0xe31   : > { %v9678_v17 = vpack.c.bf16 %v12655_v29, %v12654_v7  ;;  %v22587_v29 = vld [vmem:[#allocation454_spill] sm:$0xff] }
 0xe37   : > { %11669 = vmatmul.mubr.msk.bf16.gmra.mrb[36].mxu1 %vm6116_vm9, %v9381_v38  ;;  %v9681_v38 = vpack.c.bf16 %v12661_v10, %v12660_v18 }
 0xe38   : > { %11672 = vmatprep.mubr.msk.bf16.mxu1 %vm6116_vm9, %v9382_v40  ;;  %v12662_v40 = vld [vmem:[%s12829_s26 + $0x70] sm:$0xff] }
 0xe39   : > { %v9682_v46 = vpack.c.bf16 %v12663_v3, %v12662_v40 }
 0xe3f   : > { %11673 = vmatmul.mubr.msk.bf16.gmra.mrb[40].mxu1 %vm6116_vm9, %v9383_v19  ;;  %v12669_v19 = vld [vmem:[%s12829_s26 + $0xa8] sm:$0xff] }
 0xe40   : > { %11676 = vmatprep.mubr.msk.bf16.mxu1 %vm6116_vm9, %v9384_v62  ;;  %v9685_v62 = vpack.c.bf16 %v12669_v19, %v12668_v30 }
 0xe47   : > { %11677 = vmatmul.mubr.msk.bf16.gmra.mrb[12].mxu1 %vm6116_vm9, %v9385_v5  ;;  %v12676_v5 = vld [vmem:[%s12829_s26 + $0xe0] sm:$0xff] }
 0xe48   : > { %11680 = vmatprep.mubr.msk.bf16.mxu1 %vm6116_vm9, %v9386_v8  ;;  %v12677_v8 = vld [vmem:[%s12829_s26 + $0xe8] sm:$0xff] }
 0xe49   : > { %v9689_v42 = vpack.c.bf16 %v12677_v8, %v12676_v5  ;;  %v11755_v5 = vadd.f32 %v11754_v15, %v19668_v47 }
 0xe4f   : > { %11681 = vmatmul.mubr.msk.bf16.gmra.mrb[16].mxu1 %vm6116_vm9, %v9387_v4  ;;  %v11730_v4 = vadd.f32 %v22583_v45, %v19659_v9  ;;  %v11766_v45 = vadd.f32 %v22593_v0, %v19659_v9 }
 0xe50   : > { %11684 = vmatprep.mubr.msk.bf16.mxu1 %vm6116_vm9, %v9388_v39  ;;  %v22584_v39 = vld [vmem:[#allocation410_spill] sm:$0xff] }
 0xe51   : > { %v11733_v6 = vadd.f32 %v19659_v9, %v22584_v39 }
 0xe57   : > { %11685 = vmatmul.mubr.msk.bf16.gmra.mrb[20].mxu1 %vm6116_vm9, %v9389_v23 }
 0xe58   : > { %11690 = vmatprep.mubr.msk.bf16.mxu1 %vm650_vm3, %v9675_v27  ;;  %v22585_v27 = vld [vmem:[#allocation452_spill] sm:$0xff] }
 0xe59   : > { %v11742_v23 = vadd.f32 %v22585_v27, %v19659_v9  ;;  %v22596_v27 = vld [vmem:[#allocation289_spill] sm:$0xff] }
 0xe5b   : > { %v11743_v18 = vadd.f32 %v11742_v23, %v19668_v47  ;;  %v11775_v23 = vadd.f32 %v19659_v9, %v22596_v27 }
 0xe5f   : > { %11691 = vmatmul.mubr.msk.bf16.vlgmr.msra.gmra.mrb[24].mxu1 %vm650_vm3, %v9676_v14 }
 0xe60   : > { %11694 = vmatprep.mubr.msk.bf16.mxu1 %vm650_vm3, %v9677_v34 }
 0xe67   : > { %11695 = vmatmul.mubr.msk.bf16.gmra.mrb[28].mxu1 %vm650_vm3, %v9678_v17  ;;  %v11748_v17 = vadd.f32 %v22587_v29, %v19659_v9 }
 0xe68   : > { %11698 = vmatprep.mubr.msk.bf16.mxu1 %vm650_vm3, %v9679_v11  ;;  %v22588_v11 = vld [vmem:[#allocation453_spill] sm:$0xff] }
 0xe69   : > { %v11751_v22 = vadd.f32 %v19659_v9, %v22588_v11 }
 0xe6f   : > { %11699 = vmatmul.mubr.msk.bf16.gmra.mrb[32].mxu1 %vm650_vm3, %v9680_v49 }
 0xe70   : > { %11702 = vmatprep.mubr.msk.bf16.mxu1 %vm650_vm3, %v9681_v38  ;;  %v11746_v38 = vadd.f32 %v11745_v36, %v19668_v47 }
 0xe77   : > { %11703 = vmatmul.mubr.msk.bf16.gmra.mrb[36].mxu1 %vm650_vm3, %v9682_v46  ;;  %v11749_v46 = vadd.f32 %v11748_v17, %v19668_v47 }
 0xe78   : > { %11706 = vmatprep.mubr.msk.bf16.mxu1 %vm650_vm3, %v9683_v48  ;;  %v11752_v48 = vadd.f32 %v11751_v22, %v19668_v47 }
 0xe7f   : > { %11707 = vmatmul.mubr.msk.bf16.gmra.mrb[40].mxu1 %vm650_vm3, %v9684_v33 }
 0xe80   : > { %11710 = vmatprep.mubr.msk.bf16.mxu1 %vm650_vm3, %v9685_v62  ;;  %v22590_v62 = vld [vmem:[#allocation455_spill] sm:$0xff] }
 0xe81   : > { %v11757_v59 = vadd.f32 %v19659_v9, %v22590_v62 }
 0xe87   : > { %11711 = vmatmul.mubr.msk.bf16.gmra.mrb[12].mxu1 %vm650_vm3, %v9686_v28 }
 0xe88   : > { %11714 = vmatprep.mubr.msk.bf16.mxu1 %vm650_vm3, %v9687_v26 }
 0xe8f   : > { %11715 = vmatmul.mubr.msk.bf16.gmra.mrb[16].mxu1 %vm650_vm3, %v9688_v54 }
 0xe90   : > { %11718 = vmatprep.mubr.msk.bf16.mxu1 %vm650_vm3, %v9689_v42  ;;  %v11758_v42 = vadd.f32 %v11757_v59, %v19668_v47 }
 0xe97   : > { %11719 = vmatmul.mubr.msk.bf16.gmra.mrb[20].mxu1 %vm650_vm3, %v9690_v13  ;;  %v11761_v13 = vadd.f32 %v11760_v25, %v19668_v47 }
 0xf32   : > { %v11692_v16 = vpop.f32.mrb[24].mxu1 }
 0xf33   : > { %v11731_v55 = vadd.f32 %v11730_v4, %v11692_v16  ;;  %v9784_v21 = vpop.f32.mrb[25].mxu1  ;;  %v22594_v16 = vld [vmem:[#allocation459_spill] sm:$0xff] }
 0xf34   : > { %v11734_v31 = vadd.f32 %v11733_v6, %v9784_v21  ;;  %v11693_v1 = vpop.f32.mrb[26].mxu1 }
 0xf35   : > { %v11732_v20 = vadd.f32 %v11731_v55, %v19668_v47  ;;  %v11738_v53 = vadd.f32 %v11737_v58, %v11693_v1  ;;  %v9787_v14 = vpop.f32.mrb[27].mxu1  ;;  %v11769_v55 = vadd.f32 %v19659_v9, %v22594_v16 }
 0xf36   : > { %v11735_v34 = vadd.f32 %v11734_v31, %v19668_v47  ;;  %v11741_v7 = vadd.f32 %v11740_v12, %v9787_v14  ;;  %v22595_v31 = vld [vmem:[#allocation293_spill] sm:$0xff] }
 0xf37   : > { %v9945_v37 = vmul.f32 0.70710677, %v11732_v20  ;;  %v9946_v57 = vmul.f32 0.70710677, %v11738_v53  ;;  %v11772_v1 = vadd.f32 %v22595_v31, %v19659_v9  ;;  %v11767_v53 = vadd.f32 %v11766_v45, %v19668_v47 }
 0xf38   : > { %v9943_v2 = vmul.f32 0.70710677, %v11735_v34  ;;  %v9944_v49 = vmul.f32 0.70710677, %v11741_v7  ;;  %v11770_v50 = vadd.f32 %v11769_v55, %v19668_v47 }
 0xf39   : > { %9977 = vst.msk [vmem:[%s19686_s24 + $0x10] sm:$0xff] %vm6116_vm9, %v9945_v37  ;;  %9978 = vst.msk [vmem:[%s19686_s24 + $0x18] sm:$0xff] %vm6116_vm9, %v9946_v57  ;;  %v11773_v7 = vadd.f32 %v11772_v1, %v19668_v47  ;;  %v11776_v37 = vadd.f32 %v11775_v23, %v19668_v47  ;;  %v22597_v57 = vld [vmem:[#allocation316_spill] sm:$0xff] }
 0xf3a   : > { %9975 = vst.msk [vmem:[%s19686_s24] sm:$0xff] %vm6116_vm9, %v9943_v2  ;;  %9976 = vst.msk [vmem:[%s19686_s24 + $0x8] sm:$0xff] %vm6116_vm9, %v9944_v49  ;;  %v11696_v10 = vpop.f32.mrb[28].mxu1  ;;  %v11778_v11 = vadd.f32 %v22597_v57, %v19659_v9 }
 0xf3b   : > { %v11744_v40 = vadd.f32 %v11743_v18, %v11696_v10  ;;  %v9800_v3 = vpop.f32.mrb[29].mxu1  ;;  %v22598_v18 = vld [vmem:[#allocation312_spill] sm:$0xff] }
 0xf3c   : > { %v11747_v52 = vadd.f32 %v11746_v38, %v9800_v3  ;;  %v11697_v56 = vpop.f32.mrb[30].mxu1  ;;  %v11781_v10 = vadd.f32 %v19659_v9, %v22598_v18  ;;  %v22599_v3 = vld [vmem:[#allocation261_spill] sm:$0xff]  ;;  %v11779_v15 = vadd.f32 %v11778_v11, %v19668_v47 }
 0xf3d   : > { %v9949_v33 = vmul.f32 0.70710677, %v11744_v40  ;;  %v11750_v30 = vadd.f32 %v11749_v46, %v11697_v56  ;;  %v9803_v19 = vpop.f32.mrb[31].mxu1  ;;  %v11784_v46 = vadd.f32 %v22599_v3, %v19659_v9  ;;  %v22600_v56 = vld [vmem:[#allocation325_spill] sm:$0xff] }
 0xf3e   : > { %v9947_v44 = vmul.f32 0.70710677, %v11747_v52  ;;  %v11753_v28 = vadd.f32 %v11752_v48, %v9803_v19  ;;  %v11787_v48 = vadd.f32 %v19659_v9, %v22600_v56 }
 0xf3f   : > { %9981 = vst.msk [vmem:[%s19686_s24 + $0x30] sm:$0xff] %vm6116_vm9, %v9949_v33  ;;  %v9950_v26 = vmul.f32 0.70710677, %v11750_v30  ;;  %v11782_v30 = vadd.f32 %v11781_v10, %v19668_v47  ;;  %v11785_v59 = vadd.f32 %v11784_v46, %v19668_v47 }
 0xf40   : > { %9979 = vst.msk [vmem:[%s19686_s24 + $0x20] sm:$0xff] %vm6116_vm9, %v9947_v44  ;;  %v9948_v54 = vmul.f32 0.70710677, %v11753_v28  ;;  %v11788_v41 = vadd.f32 %v11787_v48, %v19668_v47 }
 0xf41   : > { %9982 = vst.msk [vmem:[%s19686_s24 + $0x38] sm:$0xff] %vm6116_vm9, %v9950_v26 }
 0xf42   : > { %9980 = vst.msk [vmem:[%s19686_s24 + $0x28] sm:$0xff] %vm6116_vm9, %v9948_v54  ;;  %v11700_v8 = vpop.f32.mrb[32].mxu1 }
 0xf43   : > { %v11756_v43 = vadd.f32 %v11755_v5, %v11700_v8  ;;  %v9816_v63 = vpop.f32.mrb[33].mxu1  ;;  %v11792_v8 = vadd.f32 %v19668_v47, %v19659_v9 }
 0xf44   : > { %v11759_v32 = vadd.f32 %v11758_v42, %v9816_v63  ;;  %v11701_v51 = vpop.f32.mrb[34].mxu1 }
 0xf45   : > { %v9953_v4 = vmul.f32 0.70710677, %v11756_v43  ;;  %v11762_v39 = vadd.f32 %v11761_v13, %v11701_v51  ;;  %v9819_v6 = vpop.f32.mrb[35].mxu1 }
 0xf46   : > { %v9951_v21 = vmul.f32 0.70710677, %v11759_v32  ;;  %v11765_v58 = vadd.f32 %v11764_v61, %v9819_v6 }
 0xf47   : > { %9985 = vst.msk [vmem:[%s19686_s24 + $0x50] sm:$0xff] %vm6116_vm9, %v9953_v4  ;;  %v9954_v12 = vmul.f32 0.70710677, %v11762_v39 }
 0xf48   : > { %9983 = vst.msk [vmem:[%s19686_s24 + $0x40] sm:$0xff] %vm6116_vm9, %v9951_v21  ;;  %v9952_v20 = vmul.f32 0.70710677, %v11765_v58 }
 0xf49   : > { %9986 = vst.msk [vmem:[%s19686_s24 + $0x58] sm:$0xff] %vm6116_vm9, %v9954_v12 }
 0xf4a   : > { %9984 = vst.msk [vmem:[%s19686_s24 + $0x48] sm:$0xff] %vm6116_vm9, %v9952_v20  ;;  %v11704_v14 = vpop.f32.mrb[36].mxu1 }
 0xf4b   : > { %v11768_v36 = vadd.f32 %v11767_v53, %v11704_v14  ;;  %v9832_v34 = vpop.f32.mrb[37].mxu1 }
 0xf4c   : > { %v11771_v29 = vadd.f32 %v11770_v50, %v9832_v34  ;;  %v11705_v17 = vpop.f32.mrb[38].mxu1 }
 0xf4d   : > { %v9957_v22 = vmul.f32 0.70710677, %v11768_v36  ;;  %v11774_v2 = vadd.f32 %v11773_v7, %v11705_v17  ;;  %v9835_v49 = vpop.f32.mrb[39].mxu1 }
 0xf4e   : > { %v9955_v38 = vmul.f32 0.70710677, %v11771_v29  ;;  %v11777_v40 = vadd.f32 %v11776_v37, %v9835_v49 }
 0xf4f   : > { %9989 = vst.msk [vmem:[%s19686_s24 + $0x70] sm:$0xff] %vm6116_vm9, %v9957_v22  ;;  %v9958_v52 = vmul.f32 0.70710677, %v11774_v2 }
 0xf50   : > { %9987 = vst.msk [vmem:[%s19686_s24 + $0x60] sm:$0xff] %vm6116_vm9, %v9955_v38  ;;  %v9956_v24 = vmul.f32 0.70710677, %v11777_v40 }
 0xf51   : > { %9990 = vst.msk [vmem:[%s19686_s24 + $0x78] sm:$0xff] %vm6116_vm9, %v9958_v52 }
 0xf52   : > { %9988 = vst.msk [vmem:[%s19686_s24 + $0x68] sm:$0xff] %vm6116_vm9, %v9956_v24  ;;  %v11708_v33 = vpop.f32.mrb[40].mxu1 }
 0xf53   : > { %v11780_v19 = vadd.f32 %v11779_v15, %v11708_v33  ;;  %v9848_v62 = vpop.f32.mrb[41].mxu1 }
 0xf54   : > { %v11783_v44 = vadd.f32 %v11782_v30, %v9848_v62  ;;  %v11709_v28 = vpop.f32.mrb[42].mxu1 }
 0xf55   : > { %v9961_v25 = vmul.f32 0.70710677, %v11780_v19  ;;  %v11786_v26 = vadd.f32 %v11785_v59, %v11709_v28  ;;  %v9851_v60 = vpop.f32.mrb[43].mxu1 }
 0xf56   : > { %v9959_v35 = vmul.f32 0.70710677, %v11783_v44  ;;  %v11789_v54 = vadd.f32 %v11788_v41, %v9851_v60 }
 0xf57   : > { %9993 = vst.msk [vmem:[%s19686_s24 + $0x90] sm:$0xff] %vm6116_vm9, %v9961_v25  ;;  %v9962_v5 = vmul.f32 0.70710677, %v11786_v26 }
 0xf58   : > { %9991 = vst.msk [vmem:[%s19686_s24 + $0x80] sm:$0xff] %vm6116_vm9, %v9959_v35  ;;  %v9960_v42 = vmul.f32 0.70710677, %v11789_v54 }
 0xf59   : > { %9994 = vst.msk [vmem:[%s19686_s24 + $0x98] sm:$0xff] %vm6116_vm9, %v9962_v5 }
 0xf5a   : > { %9992 = vst.msk [vmem:[%s19686_s24 + $0x88] sm:$0xff] %vm6116_vm9, %v9960_v42  ;;  %v11712_v43 = vpop.f32.mrb[12].mxu1 }
 0xf5b   : > { %v11791_v63 = vadd.f32 %v11792_v8, %v11712_v43  ;;  %v9864_v13 = vpop.f32.mrb[13].mxu1 }
 0xf5c   : > { %v11793_v32 = vadd.f32 %v11792_v8, %v9864_v13  ;;  %v11713_v51 = vpop.f32.mrb[14].mxu1 }
 0xf5d   : > { %v9965_v61 = vmul.f32 0.70710677, %v11791_v63  ;;  %v11795_v0 = vadd.f32 %v11792_v8, %v11713_v51  ;;  %v9867_v45 = vpop.f32.mrb[15].mxu1 }
 0xf5e   : > { %v9963_v4 = vmul.f32 0.70710677, %v11793_v32  ;;  %v11797_v9 = vadd.f32 %v11792_v8, %v9867_v45 }
 0xf5f   : > { %9997 = vst.msk [vmem:[%s19686_s24 + $0xb0] sm:$0xff] %vm6116_vm9, %v9965_v61  ;;  %v9966_v47 = vmul.f32 0.70710677, %v11795_v0 }
 0xf60   : > { %9995 = vst.msk [vmem:[%s19686_s24 + $0xa0] sm:$0xff] %vm6116_vm9, %v9963_v4  ;;  %v9964_v39 = vmul.f32 0.70710677, %v11797_v9 }
 0xf61   : > { %9998 = vst.msk [vmem:[%s19686_s24 + $0xb8] sm:$0xff] %vm6116_vm9, %v9966_v47 }
 0xf62   : > { %9996 = vst.msk [vmem:[%s19686_s24 + $0xa8] sm:$0xff] %vm6116_vm9, %v9964_v39  ;;  %v11716_v6 = vpop.f32.mrb[16].mxu1 }
 0xf63   : > { %v11799_v16 = vadd.f32 %v11792_v8, %v11716_v6  ;;  %v9880_v55 = vpop.f32.mrb[17].mxu1 }
 0xf64   : > { %v11801_v21 = vadd.f32 %v11792_v8, %v9880_v55  ;;  %v11717_v58 = vpop.f32.mrb[18].mxu1 }
 0xf65   : > { %v9969_v31 = vmul.f32 0.70710677, %v11799_v16  ;;  %v11803_v1 = vadd.f32 %v11792_v8, %v11717_v58  ;;  %v9883_v12 = vpop.f32.mrb[19].mxu1 }
 0xf66   : > { %v9967_v27 = vmul.f32 0.70710677, %v11801_v21  ;;  %v11805_v23 = vadd.f32 %v11792_v8, %v9883_v12 }
 0xf67   : > { %10001 = vst.msk [vmem:[%s19686_s24 + $0xd0] sm:$0xff] %vm6116_vm9, %v9969_v31  ;;  %v9970_v20 = vmul.f32 0.70710677, %v11803_v1 }
 0xf68   : > { %9999 = vst.msk [vmem:[%s19686_s24 + $0xc0] sm:$0xff] %vm6116_vm9, %v9967_v27  ;;  %v9968_v53 = vmul.f32 0.70710677, %v11805_v23 }
 0xf69   : > { %10002 = vst.msk [vmem:[%s19686_s24 + $0xd8] sm:$0xff] %vm6116_vm9, %v9970_v20 }
 0xf6a   : > { %10000 = vst.msk [vmem:[%s19686_s24 + $0xc8] sm:$0xff] %vm6116_vm9, %v9968_v53  ;;  %v11720_v14 = vpop.f32.mrb[20].mxu1 }
 0xf6b   : > { %v11807_v50 = vadd.f32 %v11792_v8, %v11720_v14  ;;  %v9896_v36 = vpop.f32.mrb[21].mxu1 }
 0xf6c   : > { %v11809_v34 = vadd.f32 %v11792_v8, %v9896_v36  ;;  %v11721_v7 = vpop.f32.mrb[22].mxu1 }
 0xf6d   : > { %v9973_v29 = vmul.f32 0.70710677, %v11807_v50  ;;  %v11811_v17 = vadd.f32 %v11792_v8, %v11721_v7  ;;  %v9899_v37 = vpop.f32.mrb[23].mxu1 }
 0xf6e   : > { %v9971_v57 = vmul.f32 0.70710677, %v11809_v34  ;;  %v11813_v11 = vadd.f32 %v11792_v8, %v9899_v37 }
 0xf6f   : > { %10005 = vst.msk [vmem:[%s19686_s24 + $0xf0] sm:$0xff] %vm6116_vm9, %v9973_v29  ;;  %v9974_v22 = vmul.f32 0.70710677, %v11811_v17 }
 0xf70   : > { %10003 = vst.msk [vmem:[%s19686_s24 + $0xe0] sm:$0xff] %vm6116_vm9, %v9971_v57  ;;  %v9972_v2 = vmul.f32 0.70710677, %v11813_v11 }
 0xf71   : > { %10006 = vst.msk [vmem:[%s19686_s24 + $0xf8] sm:$0xff] %vm6116_vm9, %v9974_v22 }
 0xf72   : > { %10004 = vst.msk [vmem:[%s19686_s24 + $0xe8] sm:$0xff] %vm6116_vm9, %v9972_v2 }
 0xf73 PF: > { %s29_s0 = sadd.s32 1, %s12686_s0  }
 0xf74   : > { %p26_p4 = scmp.ge.s32.totalorder %s29_s0, 4  }
 0xf76   :  { %28 = sbr.rel (!%p26_p4) target bundleno = 5 (0x5), region = 153 }

</bundles_post_ra>
